<compile_context>
chip_gen: v7x
topology: tpu7x:2x2x1
jax: 0.10.0
libtpu: 0.0.40
codegen_flags: <defaults>
</compile_context>

<pallas_src>
import functools

import jax
import jax.numpy as jnp
from jax import lax
from jax.experimental import pallas as pl
from jax.experimental.pallas import tpu as pltpu

LANE = 128


def _round_up(x, m):
    return ((x + m - 1) // m) * m


def _conv_out_rows(H, W):
    # conv output rows: flattened (H, W+2) plane, rounded to 8 sublanes.
    return _round_up(H * (W + 2), 8)


def _conv_in_rows(H, W):
    # rows a conv-input buffer needs so every tap window (max row offset
    # 2*(W+2)+2) of every output row stays in bounds.
    return _round_up(2 * (W + 2) + 2 + _conv_out_rows(H, W), 8)


def _tap_offsets(Wp, group):
    offs = [ki * Wp + kj for ki in range(3) for kj in range(3)]
    if group == 1:
        return tuple((o,) for o in offs)
    assert group == 2
    offs = offs + [offs[-1]]              # 10th slot pairs with a zero weight tap
    return tuple((offs[2 * i], offs[2 * i + 1]) for i in range(5))


def _use_k256_tap_pairs():
    """K=256 tap packing only pays on the 256-deep MXUs (v6e / v7x)."""
    try:
        kind = jax.devices()[0].device_kind.lower()
    except Exception:
        return True
    return not any(tag in kind for tag in ("v2", "v3", "v4", "v5"))


# ----------------------------------------------------------------------------
# Fused Conv3x3 'same' (+folded BN bias) + ReLU  [+ MaxPool2d(2) + re-pad].
# ----------------------------------------------------------------------------
def _conv_block_kernel(x_ref, w_ref, b_ref, o_ref, *scratch,
                       tap_offsets, rows, pool, H, W):
    # --- conv: sum of shifted-window MXU dots (bf16 operands, f32 acc) ---
    acc = None
    for t, offs in enumerate(tap_offsets):
        if len(offs) == 1:
            lhs = x_ref[pl.ds(offs[0], rows), :].astype(jnp.bfloat16)
        else:   # K=256 pairing: two shifted windows concatenated along lanes
            lhs = jnp.concatenate(
                [x_ref[pl.ds(o, rows), :].astype(jnp.bfloat16) for o in offs],
                axis=-1)
        part = jnp.dot(lhs, w_ref[t], preferred_element_type=jnp.float32)
        acc = part if acc is None else acc + part
    y = jnp.maximum(acc + b_ref[...], 0.0)          # f32 epilogue (bias + ReLU)

    if not pool:
        o_ref[...] = y.astype(o_ref.dtype)
        return

    # --- fused MaxPool2d(2) + re-pad: conv output never leaves VMEM ---
    y_ref, = scratch
    y_ref[...] = y
    Wp = W + 2
    Ho, Wo = H // 2, W // 2
    Wpn = Wo + 2
    o_ref[...] = jnp.zeros_like(o_ref)              # zero ring + tail margin
    for ho in range(Ho):                            # <= 14 rows; each iteration
        base = 2 * ho * Wp                          # stores immediately -> short lives
        r00 = y_ref[pl.ds(base, Wo, stride=2), :]
        r01 = y_ref[pl.ds(base + 1, Wo, stride=2), :]
        r10 = y_ref[pl.ds(base + Wp, Wo, stride=2), :]
        r11 = y_ref[pl.ds(base + Wp + 1, Wo, stride=2), :]
        m = jnp.maximum(jnp.maximum(r00, r01), jnp.maximum(r10, r11))
        o_ref[pl.ds((ho + 1) * Wpn + 1, Wo), :] = m


def conv_block(x, w, b, H, W, *, pool, out_dtype=jnp.float32):
    """x: (N, R_in, 128) flattened padded plane (or conv1 im2col).
    Returns (N, R_out, Cout_p): pooled + re-padded next-conv input if `pool`,
    else the raw conv output plane."""
    N, R_in, Cin_p = x.shape
    T, K, Cout_p = w.shape
    rows = _conv_out_rows(H, W)
    if T == 1:                          # conv1: pre-im2col'd -> single dot
        taps = ((0,),)
    else:
        taps = _tap_offsets(W + 2, K // Cin_p)
    if pool:
        R_out = _conv_in_rows(H // 2, W // 2)
        scratch = [pltpu.VMEM((rows, Cout_p), jnp.float32)]
    else:
        R_out = rows
        scratch = []
    kernel = functools.partial(_conv_block_kernel, tap_offsets=taps,
                               rows=rows, pool=pool, H=H, W=W)
    return pl.pallas_call(
        kernel,
        out_shape=jax.ShapeDtypeStruct((N, R_out, Cout_p), out_dtype),
        grid=(N,),
        in_specs=[
            pl.BlockSpec((None, R_in, Cin_p), lambda n: (n, 0, 0)),
            pl.BlockSpec((T, K, Cout_p), lambda n: (0, 0, 0)),
            pl.BlockSpec((1, Cout_p), lambda n: (0, 0)),
        ],
        out_specs=pl.BlockSpec((None, R_out, Cout_p), lambda n: (n, 0, 0)),
        scratch_shapes=scratch,
        compiler_params=pltpu.CompilerParams(
            dimension_semantics=("parallel",)),   # batch >= 2 fills both v7x TCs
    )(x, w, b)


# ----------------------------------------------------------------------------
# Fused FC head: logits = tanh(x @ W1 + b1) @ W2 + b2   (single kernel).
# ----------------------------------------------------------------------------
def _fc_head_kernel(x_ref, w1_ref, b1_ref, w2_ref, b2_ref, o_ref):
    h = jnp.dot(x_ref[...], w1_ref[...], preferred_element_type=jnp.float32)
    h = jnp.tanh(h + b1_ref[...]).astype(jnp.bfloat16)
    y = jnp.dot(h, w2_ref[...], preferred_element_type=jnp.float32)
    o_ref[...] = y + b2_ref[...]


def fc_head(x_flat, w1, b1, w2, b2):
    M, K = x_flat.shape
    Hd = w1.shape[1]
    Np = w2.shape[1]
    return pl.pallas_call(
        _fc_head_kernel,
        out_shape=jax.ShapeDtypeStruct((M, Np), jnp.float32),
        grid=(1,),
        in_specs=[
            pl.BlockSpec((M, K), lambda i: (0, 0)),       # full-extent, no batch pad
            pl.BlockSpec((K, Hd), lambda i: (0, 0)),
            pl.BlockSpec((1, Hd), lambda i: (0, 0)),
            pl.BlockSpec((w2.shape[0], Np), lambda i: (0, 0)),
            pl.BlockSpec((1, Np), lambda i: (0, 0)),
        ],
        out_specs=pl.BlockSpec((M, Np), lambda i: (0, 0)),
        compiler_params=pltpu.CompilerParams(
            dimension_semantics=("arbitrary",),
            vmem_limit_bytes=32 * 1024 * 1024),
    )(x_flat, w1, b1, w2, b2)


# ----------------------------------------------------------------------------
# Parameters: PyTorch-style synthetic init + one-time folding / packing.
# ----------------------------------------------------------------------------
def init_raw_params(key, num_classes=10):
    conv_defs = [(1, 32), (32, 64), (64, 128)]
    raw = {}
    for idx, (cin, cout) in enumerate(conv_defs, start=1):
        key, kw, kb, kg, kbt, km, kv = jax.random.split(key, 7)
        raw[f"conv{idx}_w"] = jax.random.normal(kw, (cout, cin, 3, 3), jnp.float32) * 0.1
        raw[f"conv{idx}_b"] = jax.random.normal(kb, (cout,), jnp.float32) * 0.05
        raw[f"bn{idx}_gamma"] = jax.random.uniform(kg, (cout,), jnp.float32, 0.5, 1.5)
        raw[f"bn{idx}_beta"] = jax.random.normal(kbt, (cout,), jnp.float32) * 0.1
        raw[f"bn{idx}_mean"] = jax.random.normal(km, (cout,), jnp.float32) * 0.1
        raw[f"bn{idx}_var"] = jax.random.uniform(kv, (cout,), jnp.float32, 0.5, 1.5)
    key, k1, k2, k3, k4 = jax.random.split(key, 5)
    raw["fc1_w"] = jax.random.normal(k1, (256, 7 * 7 * 128), jnp.float32) * 0.01
    raw["fc1_b"] = jax.random.normal(k2, (256,), jnp.float32) * 0.01
    raw["fc2_w"] = jax.random.normal(k3, (num_classes, 256), jnp.float32) * 0.02
    raw["fc2_b"] = jax.random.normal(k4, (num_classes,), jnp.float32) * 0.02
    return raw


def prepare_params(raw, num_classes=10, eps=1e-5, pair_taps=True):
    """One-time: fold inference BN + conv bias, transpose/pad/pack weights, bf16."""
    p = {}
    conv_cins = [1, 32, 64]
    for idx, cin in enumerate(conv_cins, start=1):
        w = raw[f"conv{idx}_w"]                                   # (cout, cin, 3, 3)
        cout = w.shape[0]
        scale = raw[f"bn{idx}_gamma"] / jnp.sqrt(raw[f"bn{idx}_var"] + eps)
        bias = (raw[f"conv{idx}_b"] - raw[f"bn{idx}_mean"]) * scale + raw[f"bn{idx}_beta"]
        w = w * scale[:, None, None, None]                        # fold BN scale
        w9 = jnp.transpose(w, (2, 3, 1, 0)).reshape(9, cin, cout)  # (tap, cin, cout)
        cout_p = _round_up(cout, LANE)
        if idx == 1:
            # conv1 (cin=1): taps live in the im2col lanes -> one (128,128) matrix
            wmat = jnp.zeros((1, LANE, cout_p), jnp.float32)
            wmat = wmat.at[0, :9, :cout].set(w9[:, 0, :])
            p["conv1_w"] = wmat.astype(jnp.bfloat16)
        else:
            cin_p = _round_up(cin, LANE)
            w9p = jnp.pad(w9, ((0, 0), (0, cin_p - cin), (0, cout_p - cout)))
            if pair_taps:  # K=256 packing for v6e/v7x: taps (2p, 2p+1) stacked along K
                w10 = jnp.concatenate(
                    [w9p, jnp.zeros((1, cin_p, cout_p), w9p.dtype)], axis=0)
                w9p = jnp.concatenate([w10[0::2], w10[1::2]], axis=1)  # (5, 2*cin_p, cout_p)
            p[f"conv{idx}_w"] = w9p.astype(jnp.bfloat16)
        p[f"conv{idx}_b"] = (jnp.pad(bias, (0, cout_p - cout))
                             .reshape(1, cout_p).astype(jnp.float32))

    # fc1: permute PyTorch (out, c*49 + h*7 + w) columns into the flattened
    # conv3-output order (h, w_padded(9), c(128)); junk / pad positions -> zero rows.
    rows3 = _conv_out_rows(7, 7)                                  # 64
    w1 = raw["fc1_w"].reshape(256, 128, 7, 7)                     # (out, c, h, w)
    w1 = jnp.transpose(w1, (2, 3, 1, 0))                          # (h, w, c, out)
    w1 = jnp.pad(w1, ((0, 0), (0, 2), (0, 0), (0, 0)))            # w -> 9 (junk cols = 0)
    w1 = w1.reshape(7 * 9 * 128, 256)
    w1 = jnp.pad(w1, ((0, rows3 * 128 - 7 * 9 * 128), (0, 0)))
    p["fc1_w"] = w1.astype(jnp.bfloat16)
    p["fc1_b"] = raw["fc1_b"].reshape(1, 256).astype(jnp.float32)

    ncp = _round_up(num_classes, LANE)
    p["fc2_w"] = jnp.pad(raw["fc2_w"].T, ((0, 0), (0, ncp - num_classes))).astype(jnp.bfloat16)
    p["fc2_b"] = jnp.pad(raw["fc2_b"], (0, ncp - num_classes)).reshape(1, ncp).astype(jnp.float32)
    return p


# ----------------------------------------------------------------------------
# Forward pass.
# ----------------------------------------------------------------------------
def _prep_input_im2col(x_nchw):
    """NCHW (Cin=1) -> (N, H*(W+2), 128) bf16: the 9 conv1 taps of every output
    pixel packed into lanes (one-time XLA prep; conv1 becomes a single MXU dot)."""
    N, C, H, W = x_nchw.shape
    Wp = W + 2
    rows = H * Wp
    rows_p = _round_up(rows, 8)
    xpad = jnp.pad(x_nchw[:, 0], ((0, 0), (1, 1), (1, 1)))        # zero ring ('same')
    flat = xpad.reshape(N, (H + 2) * Wp)
    need = 2 * Wp + 2 + rows
    if need > flat.shape[1]:
        flat = jnp.pad(flat, ((0, 0), (0, need - flat.shape[1])))
    taps = [flat[:, ki * Wp + kj: ki * Wp + kj + rows]
            for ki in range(3) for kj in range(3)]
    im = jnp.stack(taps, axis=-1)                                  # (N, rows, 9)
    im = jnp.pad(im, ((0, 0), (0, rows_p - rows), (0, LANE - 9)))
    return im.astype(jnp.bfloat16)


@functools.partial(jax.jit, static_argnames=("num_classes",))
def cnn4_forward(x_nchw, params, num_classes=10):
    N, _, H, W = x_nchw.shape                                      # (N, 1, 28, 28)

    x = _prep_input_im2col(x_nchw)                                 # (N, 840, 128) bf16
    x = conv_block(x, params["conv1_w"], params["conv1_b"], H, W, pool=True)
    H, W = H // 2, W // 2                                          # 14; x: (N, 264, 128)
    x = conv_block(x, params["conv2_w"], params["conv2_b"], H, W, pool=True)
    H, W = H // 2, W // 2                                          # 7;  x: (N, 88, 128)
    x = conv_block(x, params["conv3_w"], params["conv3_b"], H, W, pool=False,
                   out_dtype=jnp.bfloat16)                         # (N, 64, 128) bf16
    # TODO(synk): dropout1/2/3 are inference-mode identities (no RNG masking).

    flat = x.reshape(N, x.shape[1] * x.shape[2])                   # (N, 8192), free
    logits = fc_head(flat, params["fc1_w"], params["fc1_b"],
                     params["fc2_w"], params["fc2_b"])
    return logits[:, :num_classes]


# ----------------------------------------------------------------------------
# Pure-JAX f32 reference (PyTorch eval() semantics) for a loose-tolerance check.
# ----------------------------------------------------------------------------
def cnn4_reference(x, raw, num_classes, eps=1e-5):
    def conv_bn_relu(x, i):
        y = lax.conv_general_dilated(
            x, raw[f"conv{i}_w"], (1, 1), "SAME",
            dimension_numbers=("NCHW", "OIHW", "NCHW"),
            precision=lax.Precision.HIGHEST)
        y = y + raw[f"conv{i}_b"][None, :, None, None]
        y = ((y - raw[f"bn{i}_mean"][None, :, None, None])
             / jnp.sqrt(raw[f"bn{i}_var"] + eps)[None, :, None, None]
             * raw[f"bn{i}_gamma"][None, :, None, None]
             + raw[f"bn{i}_beta"][None, :, None, None])
        return jnp.maximum(y, 0.0)

    def pool2(x):
        N, C, H, W = x.shape
        return jnp.max(x.reshape(N, C, H // 2, 2, W // 2, 2), axis=(3, 5))

    x = pool2(conv_bn_relu(x, 1))
    x = pool2(conv_bn_relu(x, 2))
    x = conv_bn_relu(x, 3)
    x = x.reshape(x.shape[0], -1)                                  # C,H,W flatten order
    x = jnp.tanh(x @ raw["fc1_w"].T + raw["fc1_b"])
    return x @ raw["fc2_w"].T + raw["fc2_b"]


if __name__ == "__main__":
    num_classes = 10
    key = jax.random.PRNGKey(0)
    key, xkey = jax.random.split(key)
    # 28x28 single-channel input (the module's fc1 fixes the spatial size).
    x = jax.random.normal(xkey, (2, 1, 28, 28), jnp.float32)
    raw = init_raw_params(key, num_classes=num_classes)
    params = prepare_params(raw, num_classes=num_classes,
                            pair_taps=_use_k256_tap_pairs())

    logits = cnn4_forward(x, params, num_classes=num_classes)
    logits = jax.block_until_ready(logits)
    assert logits.shape == (2, num_classes), logits.shape
    assert bool(jnp.all(jnp.isfinite(logits)))

    # Loose tolerance: kernels use bf16 MXU operands with f32 accumulation.
    ref = cnn4_reference(x, raw, num_classes)
    err = float(jnp.max(jnp.abs(logits - ref)))
    assert err < 3e-2, f"max abs error vs reference: {err}"
    print("KERNEL_OK")
</pallas_src>

<mosaic_0001>
module attributes {stable_mosaic.version = 11 : i64} {
  func.func @_conv_block_kernel(%arg0: i32, %arg1: memref<1x264x128xf32, #tpu.memory_space<vmem>>, %arg2: memref<5x256x128xbf16, #tpu.memory_space<vmem>>, %arg3: memref<1x128xf32, #tpu.memory_space<vmem>>, %arg4: memref<1x88x128xf32, #tpu.memory_space<vmem>>, %arg5: memref<224x128xf32, #tpu.memory_space<vmem>>) attributes {dimension_semantics = [#tpu.dimension_semantics<parallel>], iteration_bounds = array<i64: 2>, scalar_prefetch = 0 : i64, scratch_operands = 1 : i64, tpu.core_type = #tpu.core_type<tc>, window_params = [{transform_indices = @transform_0, window_bounds = array<i64: 1, 264, 128>}, {pipeline_mode = #tpu.pipeline_mode<synchronous>, transform_indices = @transform_1, window_bounds = array<i64: 5, 256, 128>}, {pipeline_mode = #tpu.pipeline_mode<synchronous>, transform_indices = @transform_2, window_bounds = array<i64: 1, 128>}, {transform_indices = @transform_3, window_bounds = array<i64: 1, 88, 128>}]} {
    %c0 = arith.constant 0 : index
    %c0_0 = arith.constant 0 : index
    %c0_1 = arith.constant 0 : index
    %0 = vector.load %arg1[%c0, %c0_0, %c0_1] : memref<1x264x128xf32, #tpu.memory_space<vmem>>, vector<1x224x128xf32>
    %1 = vector.shape_cast %0 : vector<1x224x128xf32> to vector<224x128xf32>
    %2 = arith.truncf %1 : vector<224x128xf32> to vector<224x128xbf16>
    %c0_2 = arith.constant 0 : index
    %c1 = arith.constant 1 : index
    %c0_3 = arith.constant 0 : index
    %3 = vector.load %arg1[%c0_2, %c1, %c0_3] : memref<1x264x128xf32, #tpu.memory_space<vmem>>, vector<1x224x128xf32>
    %4 = vector.shape_cast %3 : vector<1x224x128xf32> to vector<224x128xf32>
    %5 = arith.truncf %4 : vector<224x128xf32> to vector<224x128xbf16>
    %6 = tpu.concatenate %2, %5 in 1 : vector<224x128xbf16>, vector<224x128xbf16> -> vector<224x256xbf16>
    %c0_4 = arith.constant 0 : index
    %c0_5 = arith.constant 0 : index
    %c0_6 = arith.constant 0 : index
    %7 = vector.load %arg2[%c0_4, %c0_5, %c0_6] : memref<5x256x128xbf16, #tpu.memory_space<vmem>>, vector<1x256x128xbf16>
    %8 = vector.shape_cast %7 : vector<1x256x128xbf16> to vector<256x128xbf16>
    %cst = arith.constant dense<0.000000e+00> : vector<224x128xf32>
    %9 = tpu.matmul %6, %8, %cst {dimension_numbers = #tpu.dot_dimension_numbers<[1], [0], [0], [1], [0, 0, 1, 1], [], []>} : vector<224x256xbf16>, vector<256x128xbf16>, vector<224x128xf32> -> vector<224x128xf32>
    %c0_7 = arith.constant 0 : index
    %c2 = arith.constant 2 : index
    %c0_8 = arith.constant 0 : index
    %10 = vector.load %arg1[%c0_7, %c2, %c0_8] : memref<1x264x128xf32, #tpu.memory_space<vmem>>, vector<1x224x128xf32>
    %11 = vector.shape_cast %10 : vector<1x224x128xf32> to vector<224x128xf32>
    %12 = arith.truncf %11 : vector<224x128xf32> to vector<224x128xbf16>
    %c0_9 = arith.constant 0 : index
    %c16 = arith.constant 16 : index
    %c0_10 = arith.constant 0 : index
    %13 = vector.load %arg1[%c0_9, %c16, %c0_10] : memref<1x264x128xf32, #tpu.memory_space<vmem>>, vector<1x224x128xf32>
    %14 = vector.shape_cast %13 : vector<1x224x128xf32> to vector<224x128xf32>
    %15 = arith.truncf %14 : vector<224x128xf32> to vector<224x128xbf16>
    %16 = tpu.concatenate %12, %15 in 1 : vector<224x128xbf16>, vector<224x128xbf16> -> vector<224x256xbf16>
    %c1_11 = arith.constant 1 : index
    %c0_12 = arith.constant 0 : index
    %c0_13 = arith.constant 0 : index
    %17 = vector.load %arg2[%c1_11, %c0_12, %c0_13] : memref<5x256x128xbf16, #tpu.memory_space<vmem>>, vector<1x256x128xbf16>
    %18 = vector.shape_cast %17 : vector<1x256x128xbf16> to vector<256x128xbf16>
    %cst_14 = arith.constant dense<0.000000e+00> : vector<224x128xf32>
    %19 = tpu.matmul %16, %18, %cst_14 {dimension_numbers = #tpu.dot_dimension_numbers<[1], [0], [0], [1], [0, 0, 1, 1], [], []>} : vector<224x256xbf16>, vector<256x128xbf16>, vector<224x128xf32> -> vector<224x128xf32>
    %20 = arith.addf %9, %19 : vector<224x128xf32>
    %c0_15 = arith.constant 0 : index
    %c17 = arith.constant 17 : index
    %c0_16 = arith.constant 0 : index
    %21 = vector.load %arg1[%c0_15, %c17, %c0_16] : memref<1x264x128xf32, #tpu.memory_space<vmem>>, vector<1x224x128xf32>
    %22 = vector.shape_cast %21 : vector<1x224x128xf32> to vector<224x128xf32>
    %23 = arith.truncf %22 : vector<224x128xf32> to vector<224x128xbf16>
    %c0_17 = arith.constant 0 : index
    %c18 = arith.constant 18 : index
    %c0_18 = arith.constant 0 : index
    %24 = vector.load %arg1[%c0_17, %c18, %c0_18] : memref<1x264x128xf32, #tpu.memory_space<vmem>>, vector<1x224x128xf32>
    %25 = vector.shape_cast %24 : vector<1x224x128xf32> to vector<224x128xf32>
    %26 = arith.truncf %25 : vector<224x128xf32> to vector<224x128xbf16>
    %27 = tpu.concatenate %23, %26 in 1 : vector<224x128xbf16>, vector<224x128xbf16> -> vector<224x256xbf16>
    %c2_19 = arith.constant 2 : index
    %c0_20 = arith.constant 0 : index
    %c0_21 = arith.constant 0 : index
    %28 = vector.load %arg2[%c2_19, %c0_20, %c0_21] : memref<5x256x128xbf16, #tpu.memory_space<vmem>>, vector<1x256x128xbf16>
    %29 = vector.shape_cast %28 : vector<1x256x128xbf16> to vector<256x128xbf16>
    %cst_22 = arith.constant dense<0.000000e+00> : vector<224x128xf32>
    %30 = tpu.matmul %27, %29, %cst_22 {dimension_numbers = #tpu.dot_dimension_numbers<[1], [0], [0], [1], [0, 0, 1, 1], [], []>} : vector<224x256xbf16>, vector<256x128xbf16>, vector<224x128xf32> -> vector<224x128xf32>
    %31 = arith.addf %20, %30 : vector<224x128xf32>
    %c0_23 = arith.constant 0 : index
    %c32 = arith.constant 32 : index
    %c0_24 = arith.constant 0 : index
    %32 = vector.load %arg1[%c0_23, %c32, %c0_24] : memref<1x264x128xf32, #tpu.memory_space<vmem>>, vector<1x224x128xf32>
    %33 = vector.shape_cast %32 : vector<1x224x128xf32> to vector<224x128xf32>
    %34 = arith.truncf %33 : vector<224x128xf32> to vector<224x128xbf16>
    %c0_25 = arith.constant 0 : index
    %c33 = arith.constant 33 : index
    %c0_26 = arith.constant 0 : index
    %35 = vector.load %arg1[%c0_25, %c33, %c0_26] : memref<1x264x128xf32, #tpu.memory_space<vmem>>, vector<1x224x128xf32>
    %36 = vector.shape_cast %35 : vector<1x224x128xf32> to vector<224x128xf32>
    %37 = arith.truncf %36 : vector<224x128xf32> to vector<224x128xbf16>
    %38 = tpu.concatenate %34, %37 in 1 : vector<224x128xbf16>, vector<224x128xbf16> -> vector<224x256xbf16>
    %c3 = arith.constant 3 : index
    %c0_27 = arith.constant 0 : index
    %c0_28 = arith.constant 0 : index
    %39 = vector.load %arg2[%c3, %c0_27, %c0_28] : memref<5x256x128xbf16, #tpu.memory_space<vmem>>, vector<1x256x128xbf16>
    %40 = vector.shape_cast %39 : vector<1x256x128xbf16> to vector<256x128xbf16>
    %cst_29 = arith.constant dense<0.000000e+00> : vector<224x128xf32>
    %41 = tpu.matmul %38, %40, %cst_29 {dimension_numbers = #tpu.dot_dimension_numbers<[1], [0], [0], [1], [0, 0, 1, 1], [], []>} : vector<224x256xbf16>, vector<256x128xbf16>, vector<224x128xf32> -> vector<224x128xf32>
    %42 = arith.addf %31, %41 : vector<224x128xf32>
    %c0_30 = arith.constant 0 : index
    %c34 = arith.constant 34 : index
    %c0_31 = arith.constant 0 : index
    %43 = vector.load %arg1[%c0_30, %c34, %c0_31] : memref<1x264x128xf32, #tpu.memory_space<vmem>>, vector<1x224x128xf32>
    %44 = vector.shape_cast %43 : vector<1x224x128xf32> to vector<224x128xf32>
    %45 = arith.truncf %44 : vector<224x128xf32> to vector<224x128xbf16>
    %c0_32 = arith.constant 0 : index
    %c34_33 = arith.constant 34 : index
    %c0_34 = arith.constant 0 : index
    %46 = vector.load %arg1[%c0_32, %c34_33, %c0_34] : memref<1x264x128xf32, #tpu.memory_space<vmem>>, vector<1x224x128xf32>
    %47 = vector.shape_cast %46 : vector<1x224x128xf32> to vector<224x128xf32>
    %48 = arith.truncf %47 : vector<224x128xf32> to vector<224x128xbf16>
    %49 = tpu.concatenate %45, %48 in 1 : vector<224x128xbf16>, vector<224x128xbf16> -> vector<224x256xbf16>
    %c4 = arith.constant 4 : index
    %c0_35 = arith.constant 0 : index
    %c0_36 = arith.constant 0 : index
    %50 = vector.load %arg2[%c4, %c0_35, %c0_36] : memref<5x256x128xbf16, #tpu.memory_space<vmem>>, vector<1x256x128xbf16>
    %51 = vector.shape_cast %50 : vector<1x256x128xbf16> to vector<256x128xbf16>
    %cst_37 = arith.constant dense<0.000000e+00> : vector<224x128xf32>
    %52 = tpu.matmul %49, %51, %cst_37 {dimension_numbers = #tpu.dot_dimension_numbers<[1], [0], [0], [1], [0, 0, 1, 1], [], []>} : vector<224x256xbf16>, vector<256x128xbf16>, vector<224x128xf32> -> vector<224x128xf32>
    %53 = arith.addf %42, %52 : vector<224x128xf32>
    %c0_38 = arith.constant 0 : index
    %c0_39 = arith.constant 0 : index
    %54 = vector.load %arg3[%c0_38, %c0_39] : memref<1x128xf32, #tpu.memory_space<vmem>>, vector<1x128xf32>
    %55 = vector.broadcast %54 : vector<1x128xf32> to vector<224x128xf32>
    %56 = arith.addf %53, %55 : vector<224x128xf32>
    %cst_40 = arith.constant 0.000000e+00 : f32
    %57 = vector.broadcast %cst_40 : f32 to vector<224x128xf32>
    %58 = arith.maximumf %56, %57 : vector<224x128xf32>
    %c0_41 = arith.constant 0 : index
    %c0_42 = arith.constant 0 : index
    %59 = vector.load %arg5[%c0_41, %c0_42] : memref<224x128xf32, #tpu.memory_space<vmem>>, vector<224x128xf32>
    tpu.vector_store %arg5[%c0_41, %c0_42], %58 {strides = array<i32>} : memref<224x128xf32, #tpu.memory_space<vmem>>, vector<224x128xf32>,
    %cst_43 = arith.constant 0.000000e+00 : f32
    %60 = vector.broadcast %cst_43 : f32 to vector<88x128xf32>
    %c0_44 = arith.constant 0 : index
    %c0_45 = arith.constant 0 : index
    %c0_46 = arith.constant 0 : index
    %61 = vector.load %arg4[%c0_44, %c0_45, %c0_46] : memref<1x88x128xf32, #tpu.memory_space<vmem>>, vector<1x88x128xf32>
    %62 = vector.shape_cast %61 : vector<1x88x128xf32> to vector<88x128xf32>
    %63 = vector.shape_cast %60 : vector<88x128xf32> to vector<1x88x128xf32>
    tpu.vector_store %arg4[%c0_44, %c0_45, %c0_46], %63 {strides = array<i32>} : memref<1x88x128xf32, #tpu.memory_space<vmem>>, vector<1x88x128xf32>,
    %c0_47 = arith.constant 0 : index
    %c0_48 = arith.constant 0 : index
    %64 = tpu.strided_load %arg5[%c0_47, %c0_48] {strides = array<i32: 2, 1>} : memref<224x128xf32, #tpu.memory_space<vmem>>, vector<7x128xf32>
    %c1_49 = arith.constant 1 : index
    %c0_50 = arith.constant 0 : index
    %65 = tpu.strided_load %arg5[%c1_49, %c0_50] {strides = array<i32: 2, 1>} : memref<224x128xf32, #tpu.memory_space<vmem>>, vector<7x128xf32>
    %c16_51 = arith.constant 16 : index
    %c0_52 = arith.constant 0 : index
    %66 = tpu.strided_load %arg5[%c16_51, %c0_52] {strides = array<i32: 2, 1>} : memref<224x128xf32, #tpu.memory_space<vmem>>, vector<7x128xf32>
    %c17_53 = arith.constant 17 : index
    %c0_54 = arith.constant 0 : index
    %67 = tpu.strided_load %arg5[%c17_53, %c0_54] {strides = array<i32: 2, 1>} : memref<224x128xf32, #tpu.memory_space<vmem>>, vector<7x128xf32>
    %68 = arith.maximumf %64, %65 : vector<7x128xf32>
    %69 = arith.maximumf %66, %67 : vector<7x128xf32>
    %70 = arith.maximumf %68, %69 : vector<7x128xf32>
    %c0_55 = arith.constant 0 : index
    %c10 = arith.constant 10 : index
    %c0_56 = arith.constant 0 : index
    %71 = vector.load %arg4[%c0_55, %c10, %c0_56] : memref<1x88x128xf32, #tpu.memory_space<vmem>>, vector<1x7x128xf32>
    %72 = vector.shape_cast %71 : vector<1x7x128xf32> to vector<7x128xf32>
    %73 = vector.shape_cast %70 : vector<7x128xf32> to vector<1x7x128xf32>
    tpu.vector_store %arg4[%c0_55, %c10, %c0_56], %73 {strides = array<i32>} : memref<1x88x128xf32, #tpu.memory_space<vmem>>, vector<1x7x128xf32>,
    %c32_57 = arith.constant 32 : index
    %c0_58 = arith.constant 0 : index
    %74 = tpu.strided_load %arg5[%c32_57, %c0_58] {strides = array<i32: 2, 1>} : memref<224x128xf32, #tpu.memory_space<vmem>>, vector<7x128xf32>
    %c33_59 = arith.constant 33 : index
    %c0_60 = arith.constant 0 : index
    %75 = tpu.strided_load %arg5[%c33_59, %c0_60] {strides = array<i32: 2, 1>} : memref<224x128xf32, #tpu.memory_space<vmem>>, vector<7x128xf32>
    %c48 = arith.constant 48 : index
    %c0_61 = arith.constant 0 : index
    %76 = tpu.strided_load %arg5[%c48, %c0_61] {strides = array<i32: 2, 1>} : memref<224x128xf32, #tpu.memory_space<vmem>>, vector<7x128xf32>
    %c49 = arith.constant 49 : index
    %c0_62 = arith.constant 0 : index
    %77 = tpu.strided_load %arg5[%c49, %c0_62] {strides = array<i32: 2, 1>} : memref<224x128xf32, #tpu.memory_space<vmem>>, vector<7x128xf32>
    %78 = arith.maximumf %74, %75 : vector<7x128xf32>
    %79 = arith.maximumf %76, %77 : vector<7x128xf32>
    %80 = arith.maximumf %78, %79 : vector<7x128xf32>
    %c0_63 = arith.constant 0 : index
    %c19 = arith.constant 19 : index
    %c0_64 = arith.constant 0 : index
    %81 = vector.load %arg4[%c0_63, %c19, %c0_64] : memref<1x88x128xf32, #tpu.memory_space<vmem>>, vector<1x7x128xf32>
    %82 = vector.shape_cast %81 : vector<1x7x128xf32> to vector<7x128xf32>
    %83 = vector.shape_cast %80 : vector<7x128xf32> to vector<1x7x128xf32>
    tpu.vector_store %arg4[%c0_63, %c19, %c0_64], %83 {strides = array<i32>} : memref<1x88x128xf32, #tpu.memory_space<vmem>>, vector<1x7x128xf32>,
    %c64 = arith.constant 64 : index
    %c0_65 = arith.constant 0 : index
    %84 = tpu.strided_load %arg5[%c64, %c0_65] {strides = array<i32: 2, 1>} : memref<224x128xf32, #tpu.memory_space<vmem>>, vector<7x128xf32>
    %c65 = arith.constant 65 : index
    %c0_66 = arith.constant 0 : index
    %85 = tpu.strided_load %arg5[%c65, %c0_66] {strides = array<i32: 2, 1>} : memref<224x128xf32, #tpu.memory_space<vmem>>, vector<7x128xf32>
    %c80 = arith.constant 80 : index
    %c0_67 = arith.constant 0 : index
    %86 = tpu.strided_load %arg5[%c80, %c0_67] {strides = array<i32: 2, 1>} : memref<224x128xf32, #tpu.memory_space<vmem>>, vector<7x128xf32>
    %c81 = arith.constant 81 : index
    %c0_68 = arith.constant 0 : index
    %87 = tpu.strided_load %arg5[%c81, %c0_68] {strides = array<i32: 2, 1>} : memref<224x128xf32, #tpu.memory_space<vmem>>, vector<7x128xf32>
    %88 = arith.maximumf %84, %85 : vector<7x128xf32>
    %89 = arith.maximumf %86, %87 : vector<7x128xf32>
    %90 = arith.maximumf %88, %89 : vector<7x128xf32>
    %c0_69 = arith.constant 0 : index
    %c28 = arith.constant 28 : index
    %c0_70 = arith.constant 0 : index
    %91 = vector.load %arg4[%c0_69, %c28, %c0_70] : memref<1x88x128xf32, #tpu.memory_space<vmem>>, vector<1x7x128xf32>
    %92 = vector.shape_cast %91 : vector<1x7x128xf32> to vector<7x128xf32>
    %93 = vector.shape_cast %90 : vector<7x128xf32> to vector<1x7x128xf32>
    tpu.vector_store %arg4[%c0_69, %c28, %c0_70], %93 {strides = array<i32>} : memref<1x88x128xf32, #tpu.memory_space<vmem>>, vector<1x7x128xf32>,
    %c96 = arith.constant 96 : index
    %c0_71 = arith.constant 0 : index
    %94 = tpu.strided_load %arg5[%c96, %c0_71] {strides = array<i32: 2, 1>} : memref<224x128xf32, #tpu.memory_space<vmem>>, vector<7x128xf32>
    %c97 = arith.constant 97 : index
    %c0_72 = arith.constant 0 : index
    %95 = tpu.strided_load %arg5[%c97, %c0_72] {strides = array<i32: 2, 1>} : memref<224x128xf32, #tpu.memory_space<vmem>>, vector<7x128xf32>
    %c112 = arith.constant 112 : index
    %c0_73 = arith.constant 0 : index
    %96 = tpu.strided_load %arg5[%c112, %c0_73] {strides = array<i32: 2, 1>} : memref<224x128xf32, #tpu.memory_space<vmem>>, vector<7x128xf32>
    %c113 = arith.constant 113 : index
    %c0_74 = arith.constant 0 : index
    %97 = tpu.strided_load %arg5[%c113, %c0_74] {strides = array<i32: 2, 1>} : memref<224x128xf32, #tpu.memory_space<vmem>>, vector<7x128xf32>
    %98 = arith.maximumf %94, %95 : vector<7x128xf32>
    %99 = arith.maximumf %96, %97 : vector<7x128xf32>
    %100 = arith.maximumf %98, %99 : vector<7x128xf32>
    %c0_75 = arith.constant 0 : index
    %c37 = arith.constant 37 : index
    %c0_76 = arith.constant 0 : index
    %101 = vector.load %arg4[%c0_75, %c37, %c0_76] : memref<1x88x128xf32, #tpu.memory_space<vmem>>, vector<1x7x128xf32>
    %102 = vector.shape_cast %101 : vector<1x7x128xf32> to vector<7x128xf32>
    %103 = vector.shape_cast %100 : vector<7x128xf32> to vector<1x7x128xf32>
    tpu.vector_store %arg4[%c0_75, %c37, %c0_76], %103 {strides = array<i32>} : memref<1x88x128xf32, #tpu.memory_space<vmem>>, vector<1x7x128xf32>,
    %c128 = arith.constant 128 : index
    %c0_77 = arith.constant 0 : index
    %104 = tpu.strided_load %arg5[%c128, %c0_77] {strides = array<i32: 2, 1>} : memref<224x128xf32, #tpu.memory_space<vmem>>, vector<7x128xf32>
    %c129 = arith.constant 129 : index
    %c0_78 = arith.constant 0 : index
    %105 = tpu.strided_load %arg5[%c129, %c0_78] {strides = array<i32: 2, 1>} : memref<224x128xf32, #tpu.memory_space<vmem>>, vector<7x128xf32>
    %c144 = arith.constant 144 : index
    %c0_79 = arith.constant 0 : index
    %106 = tpu.strided_load %arg5[%c144, %c0_79] {strides = array<i32: 2, 1>} : memref<224x128xf32, #tpu.memory_space<vmem>>, vector<7x128xf32>
    %c145 = arith.constant 145 : index
    %c0_80 = arith.constant 0 : index
    %107 = tpu.strided_load %arg5[%c145, %c0_80] {strides = array<i32: 2, 1>} : memref<224x128xf32, #tpu.memory_space<vmem>>, vector<7x128xf32>
    %108 = arith.maximumf %104, %105 : vector<7x128xf32>
    %109 = arith.maximumf %106, %107 : vector<7x128xf32>
    %110 = arith.maximumf %108, %109 : vector<7x128xf32>
    %c0_81 = arith.constant 0 : index
    %c46 = arith.constant 46 : index
    %c0_82 = arith.constant 0 : index
    %111 = vector.load %arg4[%c0_81, %c46, %c0_82] : memref<1x88x128xf32, #tpu.memory_space<vmem>>, vector<1x7x128xf32>
    %112 = vector.shape_cast %111 : vector<1x7x128xf32> to vector<7x128xf32>
    %113 = vector.shape_cast %110 : vector<7x128xf32> to vector<1x7x128xf32>
    tpu.vector_store %arg4[%c0_81, %c46, %c0_82], %113 {strides = array<i32>} : memref<1x88x128xf32, #tpu.memory_space<vmem>>, vector<1x7x128xf32>,
    %c160 = arith.constant 160 : index
    %c0_83 = arith.constant 0 : index
    %114 = tpu.strided_load %arg5[%c160, %c0_83] {strides = array<i32: 2, 1>} : memref<224x128xf32, #tpu.memory_space<vmem>>, vector<7x128xf32>
    %c161 = arith.constant 161 : index
    %c0_84 = arith.constant 0 : index
    %115 = tpu.strided_load %arg5[%c161, %c0_84] {strides = array<i32: 2, 1>} : memref<224x128xf32, #tpu.memory_space<vmem>>, vector<7x128xf32>
    %c176 = arith.constant 176 : index
    %c0_85 = arith.constant 0 : index
    %116 = tpu.strided_load %arg5[%c176, %c0_85] {strides = array<i32: 2, 1>} : memref<224x128xf32, #tpu.memory_space<vmem>>, vector<7x128xf32>
    %c177 = arith.constant 177 : index
    %c0_86 = arith.constant 0 : index
    %117 = tpu.strided_load %arg5[%c177, %c0_86] {strides = array<i32: 2, 1>} : memref<224x128xf32, #tpu.memory_space<vmem>>, vector<7x128xf32>
    %118 = arith.maximumf %114, %115 : vector<7x128xf32>
    %119 = arith.maximumf %116, %117 : vector<7x128xf32>
    %120 = arith.maximumf %118, %119 : vector<7x128xf32>
    %c0_87 = arith.constant 0 : index
    %c55 = arith.constant 55 : index
    %c0_88 = arith.constant 0 : index
    %121 = vector.load %arg4[%c0_87, %c55, %c0_88] : memref<1x88x128xf32, #tpu.memory_space<vmem>>, vector<1x7x128xf32>
    %122 = vector.shape_cast %121 : vector<1x7x128xf32> to vector<7x128xf32>
    %123 = vector.shape_cast %120 : vector<7x128xf32> to vector<1x7x128xf32>
    tpu.vector_store %arg4[%c0_87, %c55, %c0_88], %123 {strides = array<i32>} : memref<1x88x128xf32, #tpu.memory_space<vmem>>, vector<1x7x128xf32>,
    %c192 = arith.constant 192 : index
    %c0_89 = arith.constant 0 : index
    %124 = tpu.strided_load %arg5[%c192, %c0_89] {strides = array<i32: 2, 1>} : memref<224x128xf32, #tpu.memory_space<vmem>>, vector<7x128xf32>
    %c193 = arith.constant 193 : index
    %c0_90 = arith.constant 0 : index
    %125 = tpu.strided_load %arg5[%c193, %c0_90] {strides = array<i32: 2, 1>} : memref<224x128xf32, #tpu.memory_space<vmem>>, vector<7x128xf32>
    %c208 = arith.constant 208 : index
    %c0_91 = arith.constant 0 : index
    %126 = tpu.strided_load %arg5[%c208, %c0_91] {strides = array<i32: 2, 1>} : memref<224x128xf32, #tpu.memory_space<vmem>>, vector<7x128xf32>
    %c209 = arith.constant 209 : index
    %c0_92 = arith.constant 0 : index
    %127 = tpu.strided_load %arg5[%c209, %c0_92] {strides = array<i32: 2, 1>} : memref<224x128xf32, #tpu.memory_space<vmem>>, vector<7x128xf32>
    %128 = arith.maximumf %124, %125 : vector<7x128xf32>
    %129 = arith.maximumf %126, %127 : vector<7x128xf32>
    %130 = arith.maximumf %128, %129 : vector<7x128xf32>
    %c0_93 = arith.constant 0 : index
    %c64_94 = arith.constant 64 : index
    %c0_95 = arith.constant 0 : index
    %131 = vector.load %arg4[%c0_93, %c64_94, %c0_95] : memref<1x88x128xf32, #tpu.memory_space<vmem>>, vector<1x7x128xf32>
    %132 = vector.shape_cast %131 : vector<1x7x128xf32> to vector<7x128xf32>
    %133 = vector.shape_cast %130 : vector<7x128xf32> to vector<1x7x128xf32>
    tpu.vector_store %arg4[%c0_93, %c64_94, %c0_95], %133 {strides = array<i32>} : memref<1x88x128xf32, #tpu.memory_space<vmem>>, vector<1x7x128xf32>,
    return
  }
  func.func @transform_0(%arg0: i32) -> (i32, i32, i32) {
    %c0_i32 = arith.constant 0 : i32
    %c0_i32_0 = arith.constant 0 : i32
    %c0_i32_1 = arith.constant 0 : i32
    return %arg0, %c0_i32, %c0_i32_0 : i32, i32, i32
  }
  func.func @transform_1(%arg0: i32) -> (i32, i32, i32) {
    %c0_i32 = arith.constant 0 : i32
    %c0_i32_0 = arith.constant 0 : i32
    %c0_i32_1 = arith.constant 0 : i32
    %c0_i32_2 = arith.constant 0 : i32
    return %c0_i32, %c0_i32_0, %c0_i32_1 : i32, i32, i32
  }
  func.func @transform_2(%arg0: i32) -> (i32, i32) {
    %c0_i32 = arith.constant 0 : i32
    %c0_i32_0 = arith.constant 0 : i32
    %c0_i32_1 = arith.constant 0 : i32
    return %c0_i32, %c0_i32_0 : i32, i32
  }
  func.func @transform_3(%arg0: i32) -> (i32, i32, i32) {
    %c0_i32 = arith.constant 0 : i32
    %c0_i32_0 = arith.constant 0 : i32
    %c0_i32_1 = arith.constant 0 : i32
    return %arg0, %c0_i32, %c0_i32_0 : i32, i32, i32
  }
}

module attributes {stable_mosaic.version = 11 : i64} {
  func.func @_conv_block_kernel(%arg0: i32, %arg1: memref<1x840x128xbf16, #tpu.memory_space<vmem>>, %arg2: memref<1x128x128xbf16, #tpu.memory_space<vmem>>, %arg3: memref<1x128xf32, #tpu.memory_space<vmem>>, %arg4: memref<1x264x128xf32, #tpu.memory_space<vmem>>, %arg5: memref<840x128xf32, #tpu.memory_space<vmem>>) attributes {dimension_semantics = [#tpu.dimension_semantics<parallel>], iteration_bounds = array<i64: 2>, scalar_prefetch = 0 : i64, scratch_operands = 1 : i64, tpu.core_type = #tpu.core_type<tc>, window_params = [{transform_indices = @transform_0, window_bounds = array<i64: 1, 840, 128>}, {pipeline_mode = #tpu.pipeline_mode<synchronous>, transform_indices = @transform_1, window_bounds = array<i64: 1, 128, 128>}, {pipeline_mode = #tpu.pipeline_mode<synchronous>, transform_indices = @transform_2, window_bounds = array<i64: 1, 128>}, {transform_indices = @transform_3, window_bounds = array<i64: 1, 264, 128>}]} {
    %c0 = arith.constant 0 : index
    %c0_0 = arith.constant 0 : index
    %c0_1 = arith.constant 0 : index
    %0 = vector.load %arg1[%c0, %c0_0, %c0_1] : memref<1x840x128xbf16, #tpu.memory_space<vmem>>, vector<1x840x128xbf16>
    %1 = vector.shape_cast %0 : vector<1x840x128xbf16> to vector<840x128xbf16>
    %c0_2 = arith.constant 0 : index
    %c0_3 = arith.constant 0 : index
    %c0_4 = arith.constant 0 : index
    %2 = vector.load %arg2[%c0_2, %c0_3, %c0_4] : memref<1x128x128xbf16, #tpu.memory_space<vmem>>, vector<1x128x128xbf16>
    %3 = vector.shape_cast %2 : vector<1x128x128xbf16> to vector<128x128xbf16>
    %cst = arith.constant dense<0.000000e+00> : vector<840x128xf32>
    %4 = tpu.matmul %1, %3, %cst {dimension_numbers = #tpu.dot_dimension_numbers<[1], [0], [0], [1], [0, 0, 1, 1], [], []>} : vector<840x128xbf16>, vector<128x128xbf16>, vector<840x128xf32> -> vector<840x128xf32>
    %c0_5 = arith.constant 0 : index
    %c0_6 = arith.constant 0 : index
    %5 = vector.load %arg3[%c0_5, %c0_6] : memref<1x128xf32, #tpu.memory_space<vmem>>, vector<1x128xf32>
    %6 = vector.broadcast %5 : vector<1x128xf32> to vector<840x128xf32>
    %7 = arith.addf %4, %6 : vector<840x128xf32>
    %cst_7 = arith.constant 0.000000e+00 : f32
    %8 = vector.broadcast %cst_7 : f32 to vector<840x128xf32>
    %9 = arith.maximumf %7, %8 : vector<840x128xf32>
    %c0_8 = arith.constant 0 : index
    %c0_9 = arith.constant 0 : index
    %10 = vector.load %arg5[%c0_8, %c0_9] : memref<840x128xf32, #tpu.memory_space<vmem>>, vector<840x128xf32>
    tpu.vector_store %arg5[%c0_8, %c0_9], %9 {strides = array<i32>} : memref<840x128xf32, #tpu.memory_space<vmem>>, vector<840x128xf32>,
    %cst_10 = arith.constant 0.000000e+00 : f32
    %11 = vector.broadcast %cst_10 : f32 to vector<264x128xf32>
    %c0_11 = arith.constant 0 : index
    %c0_12 = arith.constant 0 : index
    %c0_13 = arith.constant 0 : index
    %12 = vector.load %arg4[%c0_11, %c0_12, %c0_13] : memref<1x264x128xf32, #tpu.memory_space<vmem>>, vector<1x264x128xf32>
    %13 = vector.shape_cast %12 : vector<1x264x128xf32> to vector<264x128xf32>
    %14 = vector.shape_cast %11 : vector<264x128xf32> to vector<1x264x128xf32>
    tpu.vector_store %arg4[%c0_11, %c0_12, %c0_13], %14 {strides = array<i32>} : memref<1x264x128xf32, #tpu.memory_space<vmem>>, vector<1x264x128xf32>,
    %c0_14 = arith.constant 0 : index
    %c0_15 = arith.constant 0 : index
    %15 = tpu.strided_load %arg5[%c0_14, %c0_15] {strides = array<i32: 2, 1>} : memref<840x128xf32, #tpu.memory_space<vmem>>, vector<14x128xf32>
    %c1 = arith.constant 1 : index
    %c0_16 = arith.constant 0 : index
    %16 = tpu.strided_load %arg5[%c1, %c0_16] {strides = array<i32: 2, 1>} : memref<840x128xf32, #tpu.memory_space<vmem>>, vector<14x128xf32>
    %c30 = arith.constant 30 : index
    %c0_17 = arith.constant 0 : index
    %17 = tpu.strided_load %arg5[%c30, %c0_17] {strides = array<i32: 2, 1>} : memref<840x128xf32, #tpu.memory_space<vmem>>, vector<14x128xf32>
    %c31 = arith.constant 31 : index
    %c0_18 = arith.constant 0 : index
    %18 = tpu.strided_load %arg5[%c31, %c0_18] {strides = array<i32: 2, 1>} : memref<840x128xf32, #tpu.memory_space<vmem>>, vector<14x128xf32>
    %19 = arith.maximumf %15, %16 : vector<14x128xf32>
    %20 = arith.maximumf %17, %18 : vector<14x128xf32>
    %21 = arith.maximumf %19, %20 : vector<14x128xf32>
    %c0_19 = arith.constant 0 : index
    %c17 = arith.constant 17 : index
    %c0_20 = arith.constant 0 : index
    %22 = vector.load %arg4[%c0_19, %c17, %c0_20] : memref<1x264x128xf32, #tpu.memory_space<vmem>>, vector<1x14x128xf32>
    %23 = vector.shape_cast %22 : vector<1x14x128xf32> to vector<14x128xf32>
    %24 = vector.shape_cast %21 : vector<14x128xf32> to vector<1x14x128xf32>
    tpu.vector_store %arg4[%c0_19, %c17, %c0_20], %24 {strides = array<i32>} : memref<1x264x128xf32, #tpu.memory_space<vmem>>, vector<1x14x128xf32>,
    %c60 = arith.constant 60 : index
    %c0_21 = arith.constant 0 : index
    %25 = tpu.strided_load %arg5[%c60, %c0_21] {strides = array<i32: 2, 1>} : memref<840x128xf32, #tpu.memory_space<vmem>>, vector<14x128xf32>
    %c61 = arith.constant 61 : index
    %c0_22 = arith.constant 0 : index
    %26 = tpu.strided_load %arg5[%c61, %c0_22] {strides = array<i32: 2, 1>} : memref<840x128xf32, #tpu.memory_space<vmem>>, vector<14x128xf32>
    %c90 = arith.constant 90 : index
    %c0_23 = arith.constant 0 : index
    %27 = tpu.strided_load %arg5[%c90, %c0_23] {strides = array<i32: 2, 1>} : memref<840x128xf32, #tpu.memory_space<vmem>>, vector<14x128xf32>
    %c91 = arith.constant 91 : index
    %c0_24 = arith.constant 0 : index
    %28 = tpu.strided_load %arg5[%c91, %c0_24] {strides = array<i32: 2, 1>} : memref<840x128xf32, #tpu.memory_space<vmem>>, vector<14x128xf32>
    %29 = arith.maximumf %25, %26 : vector<14x128xf32>
    %30 = arith.maximumf %27, %28 : vector<14x128xf32>
    %31 = arith.maximumf %29, %30 : vector<14x128xf32>
    %c0_25 = arith.constant 0 : index
    %c33 = arith.constant 33 : index
    %c0_26 = arith.constant 0 : index
    %32 = vector.load %arg4[%c0_25, %c33, %c0_26] : memref<1x264x128xf32, #tpu.memory_space<vmem>>, vector<1x14x128xf32>
    %33 = vector.shape_cast %32 : vector<1x14x128xf32> to vector<14x128xf32>
    %34 = vector.shape_cast %31 : vector<14x128xf32> to vector<1x14x128xf32>
    tpu.vector_store %arg4[%c0_25, %c33, %c0_26], %34 {strides = array<i32>} : memref<1x264x128xf32, #tpu.memory_space<vmem>>, vector<1x14x128xf32>,
    %c120 = arith.constant 120 : index
    %c0_27 = arith.constant 0 : index
    %35 = tpu.strided_load %arg5[%c120, %c0_27] {strides = array<i32: 2, 1>} : memref<840x128xf32, #tpu.memory_space<vmem>>, vector<14x128xf32>
    %c121 = arith.constant 121 : index
    %c0_28 = arith.constant 0 : index
    %36 = tpu.strided_load %arg5[%c121, %c0_28] {strides = array<i32: 2, 1>} : memref<840x128xf32, #tpu.memory_space<vmem>>, vector<14x128xf32>
    %c150 = arith.constant 150 : index
    %c0_29 = arith.constant 0 : index
    %37 = tpu.strided_load %arg5[%c150, %c0_29] {strides = array<i32: 2, 1>} : memref<840x128xf32, #tpu.memory_space<vmem>>, vector<14x128xf32>
    %c151 = arith.constant 151 : index
    %c0_30 = arith.constant 0 : index
    %38 = tpu.strided_load %arg5[%c151, %c0_30] {strides = array<i32: 2, 1>} : memref<840x128xf32, #tpu.memory_space<vmem>>, vector<14x128xf32>
    %39 = arith.maximumf %35, %36 : vector<14x128xf32>
    %40 = arith.maximumf %37, %38 : vector<14x128xf32>
    %41 = arith.maximumf %39, %40 : vector<14x128xf32>
    %c0_31 = arith.constant 0 : index
    %c49 = arith.constant 49 : index
    %c0_32 = arith.constant 0 : index
    %42 = vector.load %arg4[%c0_31, %c49, %c0_32] : memref<1x264x128xf32, #tpu.memory_space<vmem>>, vector<1x14x128xf32>
    %43 = vector.shape_cast %42 : vector<1x14x128xf32> to vector<14x128xf32>
    %44 = vector.shape_cast %41 : vector<14x128xf32> to vector<1x14x128xf32>
    tpu.vector_store %arg4[%c0_31, %c49, %c0_32], %44 {strides = array<i32>} : memref<1x264x128xf32, #tpu.memory_space<vmem>>, vector<1x14x128xf32>,
    %c180 = arith.constant 180 : index
    %c0_33 = arith.constant 0 : index
    %45 = tpu.strided_load %arg5[%c180, %c0_33] {strides = array<i32: 2, 1>} : memref<840x128xf32, #tpu.memory_space<vmem>>, vector<14x128xf32>
    %c181 = arith.constant 181 : index
    %c0_34 = arith.constant 0 : index
    %46 = tpu.strided_load %arg5[%c181, %c0_34] {strides = array<i32: 2, 1>} : memref<840x128xf32, #tpu.memory_space<vmem>>, vector<14x128xf32>
    %c210 = arith.constant 210 : index
    %c0_35 = arith.constant 0 : index
    %47 = tpu.strided_load %arg5[%c210, %c0_35] {strides = array<i32: 2, 1>} : memref<840x128xf32, #tpu.memory_space<vmem>>, vector<14x128xf32>
    %c211 = arith.constant 211 : index
    %c0_36 = arith.constant 0 : index
    %48 = tpu.strided_load %arg5[%c211, %c0_36] {strides = array<i32: 2, 1>} : memref<840x128xf32, #tpu.memory_space<vmem>>, vector<14x128xf32>
    %49 = arith.maximumf %45, %46 : vector<14x128xf32>
    %50 = arith.maximumf %47, %48 : vector<14x128xf32>
    %51 = arith.maximumf %49, %50 : vector<14x128xf32>
    %c0_37 = arith.constant 0 : index
    %c65 = arith.constant 65 : index
    %c0_38 = arith.constant 0 : index
    %52 = vector.load %arg4[%c0_37, %c65, %c0_38] : memref<1x264x128xf32, #tpu.memory_space<vmem>>, vector<1x14x128xf32>
    %53 = vector.shape_cast %52 : vector<1x14x128xf32> to vector<14x128xf32>
    %54 = vector.shape_cast %51 : vector<14x128xf32> to vector<1x14x128xf32>
    tpu.vector_store %arg4[%c0_37, %c65, %c0_38], %54 {strides = array<i32>} : memref<1x264x128xf32, #tpu.memory_space<vmem>>, vector<1x14x128xf32>,
    %c240 = arith.constant 240 : index
    %c0_39 = arith.constant 0 : index
    %55 = tpu.strided_load %arg5[%c240, %c0_39] {strides = array<i32: 2, 1>} : memref<840x128xf32, #tpu.memory_space<vmem>>, vector<14x128xf32>
    %c241 = arith.constant 241 : index
    %c0_40 = arith.constant 0 : index
    %56 = tpu.strided_load %arg5[%c241, %c0_40] {strides = array<i32: 2, 1>} : memref<840x128xf32, #tpu.memory_space<vmem>>, vector<14x128xf32>
    %c270 = arith.constant 270 : index
    %c0_41 = arith.constant 0 : index
    %57 = tpu.strided_load %arg5[%c270, %c0_41] {strides = array<i32: 2, 1>} : memref<840x128xf32, #tpu.memory_space<vmem>>, vector<14x128xf32>
    %c271 = arith.constant 271 : index
    %c0_42 = arith.constant 0 : index
    %58 = tpu.strided_load %arg5[%c271, %c0_42] {strides = array<i32: 2, 1>} : memref<840x128xf32, #tpu.memory_space<vmem>>, vector<14x128xf32>
    %59 = arith.maximumf %55, %56 : vector<14x128xf32>
    %60 = arith.maximumf %57, %58 : vector<14x128xf32>
    %61 = arith.maximumf %59, %60 : vector<14x128xf32>
    %c0_43 = arith.constant 0 : index
    %c81 = arith.constant 81 : index
    %c0_44 = arith.constant 0 : index
    %62 = vector.load %arg4[%c0_43, %c81, %c0_44] : memref<1x264x128xf32, #tpu.memory_space<vmem>>, vector<1x14x128xf32>
    %63 = vector.shape_cast %62 : vector<1x14x128xf32> to vector<14x128xf32>
    %64 = vector.shape_cast %61 : vector<14x128xf32> to vector<1x14x128xf32>
    tpu.vector_store %arg4[%c0_43, %c81, %c0_44], %64 {strides = array<i32>} : memref<1x264x128xf32, #tpu.memory_space<vmem>>, vector<1x14x128xf32>,
    %c300 = arith.constant 300 : index
    %c0_45 = arith.constant 0 : index
    %65 = tpu.strided_load %arg5[%c300, %c0_45] {strides = array<i32: 2, 1>} : memref<840x128xf32, #tpu.memory_space<vmem>>, vector<14x128xf32>
    %c301 = arith.constant 301 : index
    %c0_46 = arith.constant 0 : index
    %66 = tpu.strided_load %arg5[%c301, %c0_46] {strides = array<i32: 2, 1>} : memref<840x128xf32, #tpu.memory_space<vmem>>, vector<14x128xf32>
    %c330 = arith.constant 330 : index
    %c0_47 = arith.constant 0 : index
    %67 = tpu.strided_load %arg5[%c330, %c0_47] {strides = array<i32: 2, 1>} : memref<840x128xf32, #tpu.memory_space<vmem>>, vector<14x128xf32>
    %c331 = arith.constant 331 : index
    %c0_48 = arith.constant 0 : index
    %68 = tpu.strided_load %arg5[%c331, %c0_48] {strides = array<i32: 2, 1>} : memref<840x128xf32, #tpu.memory_space<vmem>>, vector<14x128xf32>
    %69 = arith.maximumf %65, %66 : vector<14x128xf32>
    %70 = arith.maximumf %67, %68 : vector<14x128xf32>
    %71 = arith.maximumf %69, %70 : vector<14x128xf32>
    %c0_49 = arith.constant 0 : index
    %c97 = arith.constant 97 : index
    %c0_50 = arith.constant 0 : index
    %72 = vector.load %arg4[%c0_49, %c97, %c0_50] : memref<1x264x128xf32, #tpu.memory_space<vmem>>, vector<1x14x128xf32>
    %73 = vector.shape_cast %72 : vector<1x14x128xf32> to vector<14x128xf32>
    %74 = vector.shape_cast %71 : vector<14x128xf32> to vector<1x14x128xf32>
    tpu.vector_store %arg4[%c0_49, %c97, %c0_50], %74 {strides = array<i32>} : memref<1x264x128xf32, #tpu.memory_space<vmem>>, vector<1x14x128xf32>,
    %c360 = arith.constant 360 : index
    %c0_51 = arith.constant 0 : index
    %75 = tpu.strided_load %arg5[%c360, %c0_51] {strides = array<i32: 2, 1>} : memref<840x128xf32, #tpu.memory_space<vmem>>, vector<14x128xf32>
    %c361 = arith.constant 361 : index
    %c0_52 = arith.constant 0 : index
    %76 = tpu.strided_load %arg5[%c361, %c0_52] {strides = array<i32: 2, 1>} : memref<840x128xf32, #tpu.memory_space<vmem>>, vector<14x128xf32>
    %c390 = arith.constant 390 : index
    %c0_53 = arith.constant 0 : index
    %77 = tpu.strided_load %arg5[%c390, %c0_53] {strides = array<i32: 2, 1>} : memref<840x128xf32, #tpu.memory_space<vmem>>, vector<14x128xf32>
    %c391 = arith.constant 391 : index
    %c0_54 = arith.constant 0 : index
    %78 = tpu.strided_load %arg5[%c391, %c0_54] {strides = array<i32: 2, 1>} : memref<840x128xf32, #tpu.memory_space<vmem>>, vector<14x128xf32>
    %79 = arith.maximumf %75, %76 : vector<14x128xf32>
    %80 = arith.maximumf %77, %78 : vector<14x128xf32>
    %81 = arith.maximumf %79, %80 : vector<14x128xf32>
    %c0_55 = arith.constant 0 : index
    %c113 = arith.constant 113 : index
    %c0_56 = arith.constant 0 : index
    %82 = vector.load %arg4[%c0_55, %c113, %c0_56] : memref<1x264x128xf32, #tpu.memory_space<vmem>>, vector<1x14x128xf32>
    %83 = vector.shape_cast %82 : vector<1x14x128xf32> to vector<14x128xf32>
    %84 = vector.shape_cast %81 : vector<14x128xf32> to vector<1x14x128xf32>
    tpu.vector_store %arg4[%c0_55, %c113, %c0_56], %84 {strides = array<i32>} : memref<1x264x128xf32, #tpu.memory_space<vmem>>, vector<1x14x128xf32>,
    %c420 = arith.constant 420 : index
    %c0_57 = arith.constant 0 : index
    %85 = tpu.strided_load %arg5[%c420, %c0_57] {strides = array<i32: 2, 1>} : memref<840x128xf32, #tpu.memory_space<vmem>>, vector<14x128xf32>
    %c421 = arith.constant 421 : index
    %c0_58 = arith.constant 0 : index
    %86 = tpu.strided_load %arg5[%c421, %c0_58] {strides = array<i32: 2, 1>} : memref<840x128xf32, #tpu.memory_space<vmem>>, vector<14x128xf32>
    %c450 = arith.constant 450 : index
    %c0_59 = arith.constant 0 : index
    %87 = tpu.strided_load %arg5[%c450, %c0_59] {strides = array<i32: 2, 1>} : memref<840x128xf32, #tpu.memory_space<vmem>>, vector<14x128xf32>
    %c451 = arith.constant 451 : index
    %c0_60 = arith.constant 0 : index
    %88 = tpu.strided_load %arg5[%c451, %c0_60] {strides = array<i32: 2, 1>} : memref<840x128xf32, #tpu.memory_space<vmem>>, vector<14x128xf32>
    %89 = arith.maximumf %85, %86 : vector<14x128xf32>
    %90 = arith.maximumf %87, %88 : vector<14x128xf32>
    %91 = arith.maximumf %89, %90 : vector<14x128xf32>
    %c0_61 = arith.constant 0 : index
    %c129 = arith.constant 129 : index
    %c0_62 = arith.constant 0 : index
    %92 = vector.load %arg4[%c0_61, %c129, %c0_62] : memref<1x264x128xf32, #tpu.memory_space<vmem>>, vector<1x14x128xf32>
    %93 = vector.shape_cast %92 : vector<1x14x128xf32> to vector<14x128xf32>
    %94 = vector.shape_cast %91 : vector<14x128xf32> to vector<1x14x128xf32>
    tpu.vector_store %arg4[%c0_61, %c129, %c0_62], %94 {strides = array<i32>} : memref<1x264x128xf32, #tpu.memory_space<vmem>>, vector<1x14x128xf32>,
    %c480 = arith.constant 480 : index
    %c0_63 = arith.constant 0 : index
    %95 = tpu.strided_load %arg5[%c480, %c0_63] {strides = array<i32: 2, 1>} : memref<840x128xf32, #tpu.memory_space<vmem>>, vector<14x128xf32>
    %c481 = arith.constant 481 : index
    %c0_64 = arith.constant 0 : index
    %96 = tpu.strided_load %arg5[%c481, %c0_64] {strides = array<i32: 2, 1>} : memref<840x128xf32, #tpu.memory_space<vmem>>, vector<14x128xf32>
    %c510 = arith.constant 510 : index
    %c0_65 = arith.constant 0 : index
    %97 = tpu.strided_load %arg5[%c510, %c0_65] {strides = array<i32: 2, 1>} : memref<840x128xf32, #tpu.memory_space<vmem>>, vector<14x128xf32>
    %c511 = arith.constant 511 : index
    %c0_66 = arith.constant 0 : index
    %98 = tpu.strided_load %arg5[%c511, %c0_66] {strides = array<i32: 2, 1>} : memref<840x128xf32, #tpu.memory_space<vmem>>, vector<14x128xf32>
    %99 = arith.maximumf %95, %96 : vector<14x128xf32>
    %100 = arith.maximumf %97, %98 : vector<14x128xf32>
    %101 = arith.maximumf %99, %100 : vector<14x128xf32>
    %c0_67 = arith.constant 0 : index
    %c145 = arith.constant 145 : index
    %c0_68 = arith.constant 0 : index
    %102 = vector.load %arg4[%c0_67, %c145, %c0_68] : memref<1x264x128xf32, #tpu.memory_space<vmem>>, vector<1x14x128xf32>
    %103 = vector.shape_cast %102 : vector<1x14x128xf32> to vector<14x128xf32>
    %104 = vector.shape_cast %101 : vector<14x128xf32> to vector<1x14x128xf32>
    tpu.vector_store %arg4[%c0_67, %c145, %c0_68], %104 {strides = array<i32>} : memref<1x264x128xf32, #tpu.memory_space<vmem>>, vector<1x14x128xf32>,
    %c540 = arith.constant 540 : index
    %c0_69 = arith.constant 0 : index
    %105 = tpu.strided_load %arg5[%c540, %c0_69] {strides = array<i32: 2, 1>} : memref<840x128xf32, #tpu.memory_space<vmem>>, vector<14x128xf32>
    %c541 = arith.constant 541 : index
    %c0_70 = arith.constant 0 : index
    %106 = tpu.strided_load %arg5[%c541, %c0_70] {strides = array<i32: 2, 1>} : memref<840x128xf32, #tpu.memory_space<vmem>>, vector<14x128xf32>
    %c570 = arith.constant 570 : index
    %c0_71 = arith.constant 0 : index
    %107 = tpu.strided_load %arg5[%c570, %c0_71] {strides = array<i32: 2, 1>} : memref<840x128xf32, #tpu.memory_space<vmem>>, vector<14x128xf32>
    %c571 = arith.constant 571 : index
    %c0_72 = arith.constant 0 : index
    %108 = tpu.strided_load %arg5[%c571, %c0_72] {strides = array<i32: 2, 1>} : memref<840x128xf32, #tpu.memory_space<vmem>>, vector<14x128xf32>
    %109 = arith.maximumf %105, %106 : vector<14x128xf32>
    %110 = arith.maximumf %107, %108 : vector<14x128xf32>
    %111 = arith.maximumf %109, %110 : vector<14x128xf32>
    %c0_73 = arith.constant 0 : index
    %c161 = arith.constant 161 : index
    %c0_74 = arith.constant 0 : index
    %112 = vector.load %arg4[%c0_73, %c161, %c0_74] : memref<1x264x128xf32, #tpu.memory_space<vmem>>, vector<1x14x128xf32>
    %113 = vector.shape_cast %112 : vector<1x14x128xf32> to vector<14x128xf32>
    %114 = vector.shape_cast %111 : vector<14x128xf32> to vector<1x14x128xf32>
    tpu.vector_store %arg4[%c0_73, %c161, %c0_74], %114 {strides = array<i32>} : memref<1x264x128xf32, #tpu.memory_space<vmem>>, vector<1x14x128xf32>,
    %c600 = arith.constant 600 : index
    %c0_75 = arith.constant 0 : index
    %115 = tpu.strided_load %arg5[%c600, %c0_75] {strides = array<i32: 2, 1>} : memref<840x128xf32, #tpu.memory_space<vmem>>, vector<14x128xf32>
    %c601 = arith.constant 601 : index
    %c0_76 = arith.constant 0 : index
    %116 = tpu.strided_load %arg5[%c601, %c0_76] {strides = array<i32: 2, 1>} : memref<840x128xf32, #tpu.memory_space<vmem>>, vector<14x128xf32>
    %c630 = arith.constant 630 : index
    %c0_77 = arith.constant 0 : index
    %117 = tpu.strided_load %arg5[%c630, %c0_77] {strides = array<i32: 2, 1>} : memref<840x128xf32, #tpu.memory_space<vmem>>, vector<14x128xf32>
    %c631 = arith.constant 631 : index
    %c0_78 = arith.constant 0 : index
    %118 = tpu.strided_load %arg5[%c631, %c0_78] {strides = array<i32: 2, 1>} : memref<840x128xf32, #tpu.memory_space<vmem>>, vector<14x128xf32>
    %119 = arith.maximumf %115, %116 : vector<14x128xf32>
    %120 = arith.maximumf %117, %118 : vector<14x128xf32>
    %121 = arith.maximumf %119, %120 : vector<14x128xf32>
    %c0_79 = arith.constant 0 : index
    %c177 = arith.constant 177 : index
    %c0_80 = arith.constant 0 : index
    %122 = vector.load %arg4[%c0_79, %c177, %c0_80] : memref<1x264x128xf32, #tpu.memory_space<vmem>>, vector<1x14x128xf32>
    %123 = vector.shape_cast %122 : vector<1x14x128xf32> to vector<14x128xf32>
    %124 = vector.shape_cast %121 : vector<14x128xf32> to vector<1x14x128xf32>
    tpu.vector_store %arg4[%c0_79, %c177, %c0_80], %124 {strides = array<i32>} : memref<1x264x128xf32, #tpu.memory_space<vmem>>, vector<1x14x128xf32>,
    %c660 = arith.constant 660 : index
    %c0_81 = arith.constant 0 : index
    %125 = tpu.strided_load %arg5[%c660, %c0_81] {strides = array<i32: 2, 1>} : memref<840x128xf32, #tpu.memory_space<vmem>>, vector<14x128xf32>
    %c661 = arith.constant 661 : index
    %c0_82 = arith.constant 0 : index
    %126 = tpu.strided_load %arg5[%c661, %c0_82] {strides = array<i32: 2, 1>} : memref<840x128xf32, #tpu.memory_space<vmem>>, vector<14x128xf32>
    %c690 = arith.constant 690 : index
    %c0_83 = arith.constant 0 : index
    %127 = tpu.strided_load %arg5[%c690, %c0_83] {strides = array<i32: 2, 1>} : memref<840x128xf32, #tpu.memory_space<vmem>>, vector<14x128xf32>
    %c691 = arith.constant 691 : index
    %c0_84 = arith.constant 0 : index
    %128 = tpu.strided_load %arg5[%c691, %c0_84] {strides = array<i32: 2, 1>} : memref<840x128xf32, #tpu.memory_space<vmem>>, vector<14x128xf32>
    %129 = arith.maximumf %125, %126 : vector<14x128xf32>
    %130 = arith.maximumf %127, %128 : vector<14x128xf32>
    %131 = arith.maximumf %129, %130 : vector<14x128xf32>
    %c0_85 = arith.constant 0 : index
    %c193 = arith.constant 193 : index
    %c0_86 = arith.constant 0 : index
    %132 = vector.load %arg4[%c0_85, %c193, %c0_86] : memref<1x264x128xf32, #tpu.memory_space<vmem>>, vector<1x14x128xf32>
    %133 = vector.shape_cast %132 : vector<1x14x128xf32> to vector<14x128xf32>
    %134 = vector.shape_cast %131 : vector<14x128xf32> to vector<1x14x128xf32>
    tpu.vector_store %arg4[%c0_85, %c193, %c0_86], %134 {strides = array<i32>} : memref<1x264x128xf32, #tpu.memory_space<vmem>>, vector<1x14x128xf32>,
    %c720 = arith.constant 720 : index
    %c0_87 = arith.constant 0 : index
    %135 = tpu.strided_load %arg5[%c720, %c0_87] {strides = array<i32: 2, 1>} : memref<840x128xf32, #tpu.memory_space<vmem>>, vector<14x128xf32>
    %c721 = arith.constant 721 : index
    %c0_88 = arith.constant 0 : index
    %136 = tpu.strided_load %arg5[%c721, %c0_88] {strides = array<i32: 2, 1>} : memref<840x128xf32, #tpu.memory_space<vmem>>, vector<14x128xf32>
    %c750 = arith.constant 750 : index
    %c0_89 = arith.constant 0 : index
    %137 = tpu.strided_load %arg5[%c750, %c0_89] {strides = array<i32: 2, 1>} : memref<840x128xf32, #tpu.memory_space<vmem>>, vector<14x128xf32>
    %c751 = arith.constant 751 : index
    %c0_90 = arith.constant 0 : index
    %138 = tpu.strided_load %arg5[%c751, %c0_90] {strides = array<i32: 2, 1>} : memref<840x128xf32, #tpu.memory_space<vmem>>, vector<14x128xf32>
    %139 = arith.maximumf %135, %136 : vector<14x128xf32>
    %140 = arith.maximumf %137, %138 : vector<14x128xf32>
    %141 = arith.maximumf %139, %140 : vector<14x128xf32>
    %c0_91 = arith.constant 0 : index
    %c209 = arith.constant 209 : index
    %c0_92 = arith.constant 0 : index
    %142 = vector.load %arg4[%c0_91, %c209, %c0_92] : memref<1x264x128xf32, #tpu.memory_space<vmem>>, vector<1x14x128xf32>
    %143 = vector.shape_cast %142 : vector<1x14x128xf32> to vector<14x128xf32>
    %144 = vector.shape_cast %141 : vector<14x128xf32> to vector<1x14x128xf32>
    tpu.vector_store %arg4[%c0_91, %c209, %c0_92], %144 {strides = array<i32>} : memref<1x264x128xf32, #tpu.memory_space<vmem>>, vector<1x14x128xf32>,
    %c780 = arith.constant 780 : index
    %c0_93 = arith.constant 0 : index
    %145 = tpu.strided_load %arg5[%c780, %c0_93] {strides = array<i32: 2, 1>} : memref<840x128xf32, #tpu.memory_space<vmem>>, vector<14x128xf32>
    %c781 = arith.constant 781 : index
    %c0_94 = arith.constant 0 : index
    %146 = tpu.strided_load %arg5[%c781, %c0_94] {strides = array<i32: 2, 1>} : memref<840x128xf32, #tpu.memory_space<vmem>>, vector<14x128xf32>
    %c810 = arith.constant 810 : index
    %c0_95 = arith.constant 0 : index
    %147 = tpu.strided_load %arg5[%c810, %c0_95] {strides = array<i32: 2, 1>} : memref<840x128xf32, #tpu.memory_space<vmem>>, vector<14x128xf32>
    %c811 = arith.constant 811 : index
    %c0_96 = arith.constant 0 : index
    %148 = tpu.strided_load %arg5[%c811, %c0_96] {strides = array<i32: 2, 1>} : memref<840x128xf32, #tpu.memory_space<vmem>>, vector<14x128xf32>
    %149 = arith.maximumf %145, %146 : vector<14x128xf32>
    %150 = arith.maximumf %147, %148 : vector<14x128xf32>
    %151 = arith.maximumf %149, %150 : vector<14x128xf32>
    %c0_97 = arith.constant 0 : index
    %c225 = arith.constant 225 : index
    %c0_98 = arith.constant 0 : index
    %152 = vector.load %arg4[%c0_97, %c225, %c0_98] : memref<1x264x128xf32, #tpu.memory_space<vmem>>, vector<1x14x128xf32>
    %153 = vector.shape_cast %152 : vector<1x14x128xf32> to vector<14x128xf32>
    %154 = vector.shape_cast %151 : vector<14x128xf32> to vector<1x14x128xf32>
    tpu.vector_store %arg4[%c0_97, %c225, %c0_98], %154 {strides = array<i32>} : memref<1x264x128xf32, #tpu.memory_space<vmem>>, vector<1x14x128xf32>,
    return
  }
  func.func @transform_0(%arg0: i32) -> (i32, i32, i32) {
    %c0_i32 = arith.constant 0 : i32
    %c0_i32_0 = arith.constant 0 : i32
    %c0_i32_1 = arith.constant 0 : i32
    return %arg0, %c0_i32, %c0_i32_0 : i32, i32, i32
  }
  func.func @transform_1(%arg0: i32) -> (i32, i32, i32) {
    %c0_i32 = arith.constant 0 : i32
    %c0_i32_0 = arith.constant 0 : i32
    %c0_i32_1 = arith.constant 0 : i32
    %c0_i32_2 = arith.constant 0 : i32
    return %c0_i32, %c0_i32_0, %c0_i32_1 : i32, i32, i32
  }
  func.func @transform_2(%arg0: i32) -> (i32, i32) {
    %c0_i32 = arith.constant 0 : i32
    %c0_i32_0 = arith.constant 0 : i32
    %c0_i32_1 = arith.constant 0 : i32
    return %c0_i32, %c0_i32_0 : i32, i32
  }
  func.func @transform_3(%arg0: i32) -> (i32, i32, i32) {
    %c0_i32 = arith.constant 0 : i32
    %c0_i32_0 = arith.constant 0 : i32
    %c0_i32_1 = arith.constant 0 : i32
    return %arg0, %c0_i32, %c0_i32_0 : i32, i32, i32
  }
}

module attributes {stable_mosaic.version = 11 : i64} {
  func.func @_conv_block_kernel(%arg0: i32, %arg1: memref<1x88x128xf32, #tpu.memory_space<vmem>>, %arg2: memref<5x256x128xbf16, #tpu.memory_space<vmem>>, %arg3: memref<1x128xf32, #tpu.memory_space<vmem>>, %arg4: memref<1x64x128xbf16, #tpu.memory_space<vmem>>) attributes {dimension_semantics = [#tpu.dimension_semantics<parallel>], iteration_bounds = array<i64: 2>, scalar_prefetch = 0 : i64, scratch_operands = 0 : i64, tpu.core_type = #tpu.core_type<tc>, window_params = [{transform_indices = @transform_0, window_bounds = array<i64: 1, 88, 128>}, {pipeline_mode = #tpu.pipeline_mode<synchronous>, transform_indices = @transform_1, window_bounds = array<i64: 5, 256, 128>}, {pipeline_mode = #tpu.pipeline_mode<synchronous>, transform_indices = @transform_2, window_bounds = array<i64: 1, 128>}, {transform_indices = @transform_3, window_bounds = array<i64: 1, 64, 128>}]} {
    %c0 = arith.constant 0 : index
    %c0_0 = arith.constant 0 : index
    %c0_1 = arith.constant 0 : index
    %0 = vector.load %arg1[%c0, %c0_0, %c0_1] : memref<1x88x128xf32, #tpu.memory_space<vmem>>, vector<1x64x128xf32>
    %1 = vector.shape_cast %0 : vector<1x64x128xf32> to vector<64x128xf32>
    %2 = arith.truncf %1 : vector<64x128xf32> to vector<64x128xbf16>
    %c0_2 = arith.constant 0 : index
    %c1 = arith.constant 1 : index
    %c0_3 = arith.constant 0 : index
    %3 = vector.load %arg1[%c0_2, %c1, %c0_3] : memref<1x88x128xf32, #tpu.memory_space<vmem>>, vector<1x64x128xf32>
    %4 = vector.shape_cast %3 : vector<1x64x128xf32> to vector<64x128xf32>
    %5 = arith.truncf %4 : vector<64x128xf32> to vector<64x128xbf16>
    %6 = tpu.concatenate %2, %5 in 1 : vector<64x128xbf16>, vector<64x128xbf16> -> vector<64x256xbf16>
    %c0_4 = arith.constant 0 : index
    %c0_5 = arith.constant 0 : index
    %c0_6 = arith.constant 0 : index
    %7 = vector.load %arg2[%c0_4, %c0_5, %c0_6] : memref<5x256x128xbf16, #tpu.memory_space<vmem>>, vector<1x256x128xbf16>
    %8 = vector.shape_cast %7 : vector<1x256x128xbf16> to vector<256x128xbf16>
    %cst = arith.constant dense<0.000000e+00> : vector<64x128xf32>
    %9 = tpu.matmul %6, %8, %cst {dimension_numbers = #tpu.dot_dimension_numbers<[1], [0], [0], [1], [0, 0, 1, 1], [], []>} : vector<64x256xbf16>, vector<256x128xbf16>, vector<64x128xf32> -> vector<64x128xf32>
    %c0_7 = arith.constant 0 : index
    %c2 = arith.constant 2 : index
    %c0_8 = arith.constant 0 : index
    %10 = vector.load %arg1[%c0_7, %c2, %c0_8] : memref<1x88x128xf32, #tpu.memory_space<vmem>>, vector<1x64x128xf32>
    %11 = vector.shape_cast %10 : vector<1x64x128xf32> to vector<64x128xf32>
    %12 = arith.truncf %11 : vector<64x128xf32> to vector<64x128xbf16>
    %c0_9 = arith.constant 0 : index
    %c9 = arith.constant 9 : index
    %c0_10 = arith.constant 0 : index
    %13 = vector.load %arg1[%c0_9, %c9, %c0_10] : memref<1x88x128xf32, #tpu.memory_space<vmem>>, vector<1x64x128xf32>
    %14 = vector.shape_cast %13 : vector<1x64x128xf32> to vector<64x128xf32>
    %15 = arith.truncf %14 : vector<64x128xf32> to vector<64x128xbf16>
    %16 = tpu.concatenate %12, %15 in 1 : vector<64x128xbf16>, vector<64x128xbf16> -> vector<64x256xbf16>
    %c1_11 = arith.constant 1 : index
    %c0_12 = arith.constant 0 : index
    %c0_13 = arith.constant 0 : index
    %17 = vector.load %arg2[%c1_11, %c0_12, %c0_13] : memref<5x256x128xbf16, #tpu.memory_space<vmem>>, vector<1x256x128xbf16>
    %18 = vector.shape_cast %17 : vector<1x256x128xbf16> to vector<256x128xbf16>
    %cst_14 = arith.constant dense<0.000000e+00> : vector<64x128xf32>
    %19 = tpu.matmul %16, %18, %cst_14 {dimension_numbers = #tpu.dot_dimension_numbers<[1], [0], [0], [1], [0, 0, 1, 1], [], []>} : vector<64x256xbf16>, vector<256x128xbf16>, vector<64x128xf32> -> vector<64x128xf32>
    %20 = arith.addf %9, %19 : vector<64x128xf32>
    %c0_15 = arith.constant 0 : index
    %c10 = arith.constant 10 : index
    %c0_16 = arith.constant 0 : index
    %21 = vector.load %arg1[%c0_15, %c10, %c0_16] : memref<1x88x128xf32, #tpu.memory_space<vmem>>, vector<1x64x128xf32>
    %22 = vector.shape_cast %21 : vector<1x64x128xf32> to vector<64x128xf32>
    %23 = arith.truncf %22 : vector<64x128xf32> to vector<64x128xbf16>
    %c0_17 = arith.constant 0 : index
    %c11 = arith.constant 11 : index
    %c0_18 = arith.constant 0 : index
    %24 = vector.load %arg1[%c0_17, %c11, %c0_18] : memref<1x88x128xf32, #tpu.memory_space<vmem>>, vector<1x64x128xf32>
    %25 = vector.shape_cast %24 : vector<1x64x128xf32> to vector<64x128xf32>
    %26 = arith.truncf %25 : vector<64x128xf32> to vector<64x128xbf16>
    %27 = tpu.concatenate %23, %26 in 1 : vector<64x128xbf16>, vector<64x128xbf16> -> vector<64x256xbf16>
    %c2_19 = arith.constant 2 : index
    %c0_20 = arith.constant 0 : index
    %c0_21 = arith.constant 0 : index
    %28 = vector.load %arg2[%c2_19, %c0_20, %c0_21] : memref<5x256x128xbf16, #tpu.memory_space<vmem>>, vector<1x256x128xbf16>
    %29 = vector.shape_cast %28 : vector<1x256x128xbf16> to vector<256x128xbf16>
    %cst_22 = arith.constant dense<0.000000e+00> : vector<64x128xf32>
    %30 = tpu.matmul %27, %29, %cst_22 {dimension_numbers = #tpu.dot_dimension_numbers<[1], [0], [0], [1], [0, 0, 1, 1], [], []>} : vector<64x256xbf16>, vector<256x128xbf16>, vector<64x128xf32> -> vector<64x128xf32>
    %31 = arith.addf %20, %30 : vector<64x128xf32>
    %c0_23 = arith.constant 0 : index
    %c18 = arith.constant 18 : index
    %c0_24 = arith.constant 0 : index
    %32 = vector.load %arg1[%c0_23, %c18, %c0_24] : memref<1x88x128xf32, #tpu.memory_space<vmem>>, vector<1x64x128xf32>
    %33 = vector.shape_cast %32 : vector<1x64x128xf32> to vector<64x128xf32>
    %34 = arith.truncf %33 : vector<64x128xf32> to vector<64x128xbf16>
    %c0_25 = arith.constant 0 : index
    %c19 = arith.constant 19 : index
    %c0_26 = arith.constant 0 : index
    %35 = vector.load %arg1[%c0_25, %c19, %c0_26] : memref<1x88x128xf32, #tpu.memory_space<vmem>>, vector<1x64x128xf32>
    %36 = vector.shape_cast %35 : vector<1x64x128xf32> to vector<64x128xf32>
    %37 = arith.truncf %36 : vector<64x128xf32> to vector<64x128xbf16>
    %38 = tpu.concatenate %34, %37 in 1 : vector<64x128xbf16>, vector<64x128xbf16> -> vector<64x256xbf16>
    %c3 = arith.constant 3 : index
    %c0_27 = arith.constant 0 : index
    %c0_28 = arith.constant 0 : index
    %39 = vector.load %arg2[%c3, %c0_27, %c0_28] : memref<5x256x128xbf16, #tpu.memory_space<vmem>>, vector<1x256x128xbf16>
    %40 = vector.shape_cast %39 : vector<1x256x128xbf16> to vector<256x128xbf16>
    %cst_29 = arith.constant dense<0.000000e+00> : vector<64x128xf32>
    %41 = tpu.matmul %38, %40, %cst_29 {dimension_numbers = #tpu.dot_dimension_numbers<[1], [0], [0], [1], [0, 0, 1, 1], [], []>} : vector<64x256xbf16>, vector<256x128xbf16>, vector<64x128xf32> -> vector<64x128xf32>
    %42 = arith.addf %31, %41 : vector<64x128xf32>
    %c0_30 = arith.constant 0 : index
    %c20 = arith.constant 20 : index
    %c0_31 = arith.constant 0 : index
    %43 = vector.load %arg1[%c0_30, %c20, %c0_31] : memref<1x88x128xf32, #tpu.memory_space<vmem>>, vector<1x64x128xf32>
    %44 = vector.shape_cast %43 : vector<1x64x128xf32> to vector<64x128xf32>
    %45 = arith.truncf %44 : vector<64x128xf32> to vector<64x128xbf16>
    %c0_32 = arith.constant 0 : index
    %c20_33 = arith.constant 20 : index
    %c0_34 = arith.constant 0 : index
    %46 = vector.load %arg1[%c0_32, %c20_33, %c0_34] : memref<1x88x128xf32, #tpu.memory_space<vmem>>, vector<1x64x128xf32>
    %47 = vector.shape_cast %46 : vector<1x64x128xf32> to vector<64x128xf32>
    %48 = arith.truncf %47 : vector<64x128xf32> to vector<64x128xbf16>
    %49 = tpu.concatenate %45, %48 in 1 : vector<64x128xbf16>, vector<64x128xbf16> -> vector<64x256xbf16>
    %c4 = arith.constant 4 : index
    %c0_35 = arith.constant 0 : index
    %c0_36 = arith.constant 0 : index
    %50 = vector.load %arg2[%c4, %c0_35, %c0_36] : memref<5x256x128xbf16, #tpu.memory_space<vmem>>, vector<1x256x128xbf16>
    %51 = vector.shape_cast %50 : vector<1x256x128xbf16> to vector<256x128xbf16>
    %cst_37 = arith.constant dense<0.000000e+00> : vector<64x128xf32>
    %52 = tpu.matmul %49, %51, %cst_37 {dimension_numbers = #tpu.dot_dimension_numbers<[1], [0], [0], [1], [0, 0, 1, 1], [], []>} : vector<64x256xbf16>, vector<256x128xbf16>, vector<64x128xf32> -> vector<64x128xf32>
    %53 = arith.addf %42, %52 : vector<64x128xf32>
    %c0_38 = arith.constant 0 : index
    %c0_39 = arith.constant 0 : index
    %54 = vector.load %arg3[%c0_38, %c0_39] : memref<1x128xf32, #tpu.memory_space<vmem>>, vector<1x128xf32>
    %55 = vector.broadcast %54 : vector<1x128xf32> to vector<64x128xf32>
    %56 = arith.addf %53, %55 : vector<64x128xf32>
    %cst_40 = arith.constant 0.000000e+00 : f32
    %57 = vector.broadcast %cst_40 : f32 to vector<64x128xf32>
    %58 = arith.maximumf %56, %57 : vector<64x128xf32>
    %59 = arith.truncf %58 : vector<64x128xf32> to vector<64x128xbf16>
    %c0_41 = arith.constant 0 : index
    %c0_42 = arith.constant 0 : index
    %c0_43 = arith.constant 0 : index
    %60 = vector.load %arg4[%c0_41, %c0_42, %c0_43] : memref<1x64x128xbf16, #tpu.memory_space<vmem>>, vector<1x64x128xbf16>
    %61 = vector.shape_cast %60 : vector<1x64x128xbf16> to vector<64x128xbf16>
    %62 = vector.shape_cast %59 : vector<64x128xbf16> to vector<1x64x128xbf16>
    tpu.vector_store %arg4[%c0_41, %c0_42, %c0_43], %62 {strides = array<i32>} : memref<1x64x128xbf16, #tpu.memory_space<vmem>>, vector<1x64x128xbf16>,
    return
  }
  func.func @transform_0(%arg0: i32) -> (i32, i32, i32) {
    %c0_i32 = arith.constant 0 : i32
    %c0_i32_0 = arith.constant 0 : i32
    %c0_i32_1 = arith.constant 0 : i32
    return %arg0, %c0_i32, %c0_i32_0 : i32, i32, i32
  }
  func.func @transform_1(%arg0: i32) -> (i32, i32, i32) {
    %c0_i32 = arith.constant 0 : i32
    %c0_i32_0 = arith.constant 0 : i32
    %c0_i32_1 = arith.constant 0 : i32
    %c0_i32_2 = arith.constant 0 : i32
    return %c0_i32, %c0_i32_0, %c0_i32_1 : i32, i32, i32
  }
  func.func @transform_2(%arg0: i32) -> (i32, i32) {
    %c0_i32 = arith.constant 0 : i32
    %c0_i32_0 = arith.constant 0 : i32
    %c0_i32_1 = arith.constant 0 : i32
    return %c0_i32, %c0_i32_0 : i32, i32
  }
  func.func @transform_3(%arg0: i32) -> (i32, i32, i32) {
    %c0_i32 = arith.constant 0 : i32
    %c0_i32_0 = arith.constant 0 : i32
    %c0_i32_1 = arith.constant 0 : i32
    return %arg0, %c0_i32, %c0_i32_0 : i32, i32, i32
  }
}

module attributes {stable_mosaic.version = 11 : i64} {
  func.func @_fc_head_kernel(%arg0: i32, %arg1: memref<2x8192xbf16, #tpu.memory_space<vmem>>, %arg2: memref<8192x256xbf16, #tpu.memory_space<vmem>>, %arg3: memref<1x256xf32, #tpu.memory_space<vmem>>, %arg4: memref<256x128xbf16, #tpu.memory_space<vmem>>, %arg5: memref<1x128xf32, #tpu.memory_space<vmem>>, %arg6: memref<2x128xf32, #tpu.memory_space<vmem>>) attributes {dimension_semantics = [#tpu.dimension_semantics<arbitrary>], iteration_bounds = array<i64: 1>, scalar_prefetch = 0 : i64, scratch_operands = 0 : i64, tpu.core_type = #tpu.core_type<tc>, window_params = [{pipeline_mode = #tpu.pipeline_mode<synchronous>, transform_indices = @transform_0, window_bounds = array<i64: 2, 8192>}, {pipeline_mode = #tpu.pipeline_mode<synchronous>, transform_indices = @transform_1, window_bounds = array<i64: 8192, 256>}, {pipeline_mode = #tpu.pipeline_mode<synchronous>, transform_indices = @transform_2, window_bounds = array<i64: 1, 256>}, {pipeline_mode = #tpu.pipeline_mode<synchronous>, transform_indices = @transform_3, window_bounds = array<i64: 256, 128>}, {pipeline_mode = #tpu.pipeline_mode<synchronous>, transform_indices = @transform_4, window_bounds = array<i64: 1, 128>}, {pipeline_mode = #tpu.pipeline_mode<synchronous>, transform_indices = @transform_5, window_bounds = array<i64: 2, 128>}]} {
    %c0 = arith.constant 0 : index
    %c0_0 = arith.constant 0 : index
    %0 = vector.load %arg1[%c0, %c0_0] : memref<2x8192xbf16, #tpu.memory_space<vmem>>, vector<2x8192xbf16>
    %c0_1 = arith.constant 0 : index
    %c0_2 = arith.constant 0 : index
    %1 = vector.load %arg2[%c0_1, %c0_2] : memref<8192x256xbf16, #tpu.memory_space<vmem>>, vector<8192x256xbf16>
    %cst = arith.constant dense<0.000000e+00> : vector<2x256xf32>
    %2 = tpu.matmul %0, %1, %cst {dimension_numbers = #tpu.dot_dimension_numbers<[1], [0], [0], [1], [0, 0, 1, 1], [], []>} : vector<2x8192xbf16>, vector<8192x256xbf16>, vector<2x256xf32> -> vector<2x256xf32>
    %c0_3 = arith.constant 0 : index
    %c0_4 = arith.constant 0 : index
    %3 = vector.load %arg3[%c0_3, %c0_4] : memref<1x256xf32, #tpu.memory_space<vmem>>, vector<1x256xf32>
    %4 = vector.broadcast %3 : vector<1x256xf32> to vector<2x256xf32>
    %5 = arith.addf %2, %4 : vector<2x256xf32>
    %6 = math.tanh %5 : vector<2x256xf32>
    %7 = arith.truncf %6 : vector<2x256xf32> to vector<2x256xbf16>
    %c0_5 = arith.constant 0 : index
    %c0_6 = arith.constant 0 : index
    %8 = vector.load %arg4[%c0_5, %c0_6] : memref<256x128xbf16, #tpu.memory_space<vmem>>, vector<256x128xbf16>
    %cst_7 = arith.constant dense<0.000000e+00> : vector<2x128xf32>
    %9 = tpu.matmul %7, %8, %cst_7 {dimension_numbers = #tpu.dot_dimension_numbers<[1], [0], [0], [1], [0, 0, 1, 1], [], []>} : vector<2x256xbf16>, vector<256x128xbf16>, vector<2x128xf32> -> vector<2x128xf32>
    %c0_8 = arith.constant 0 : index
    %c0_9 = arith.constant 0 : index
    %10 = vector.load %arg5[%c0_8, %c0_9] : memref<1x128xf32, #tpu.memory_space<vmem>>, vector<1x128xf32>
    %11 = vector.broadcast %10 : vector<1x128xf32> to vector<2x128xf32>
    %12 = arith.addf %9, %11 : vector<2x128xf32>
    %c0_10 = arith.constant 0 : index
    %c0_11 = arith.constant 0 : index
    %13 = vector.load %arg6[%c0_10, %c0_11] : memref<2x128xf32, #tpu.memory_space<vmem>>, vector<2x128xf32>
    tpu.vector_store %arg6[%c0_10, %c0_11], %12 {strides = array<i32>} : memref<2x128xf32, #tpu.memory_space<vmem>>, vector<2x128xf32>,
    return
  }
  func.func @transform_0(%arg0: i32) -> (i32, i32) {
    %c0_i32 = arith.constant 0 : i32
    %c0_i32_0 = arith.constant 0 : i32
    %c0_i32_1 = arith.constant 0 : i32
    return %c0_i32, %c0_i32_0 : i32, i32
  }
  func.func @transform_1(%arg0: i32) -> (i32, i32) {
    %c0_i32 = arith.constant 0 : i32
    %c0_i32_0 = arith.constant 0 : i32
    %c0_i32_1 = arith.constant 0 : i32
    return %c0_i32, %c0_i32_0 : i32, i32
  }
  func.func @transform_2(%arg0: i32) -> (i32, i32) {
    %c0_i32 = arith.constant 0 : i32
    %c0_i32_0 = arith.constant 0 : i32
    %c0_i32_1 = arith.constant 0 : i32
    return %c0_i32, %c0_i32_0 : i32, i32
  }
  func.func @transform_3(%arg0: i32) -> (i32, i32) {
    %c0_i32 = arith.constant 0 : i32
    %c0_i32_0 = arith.constant 0 : i32
    %c0_i32_1 = arith.constant 0 : i32
    return %c0_i32, %c0_i32_0 : i32, i32
  }
  func.func @transform_4(%arg0: i32) -> (i32, i32) {
    %c0_i32 = arith.constant 0 : i32
    %c0_i32_0 = arith.constant 0 : i32
    %c0_i32_1 = arith.constant 0 : i32
    return %c0_i32, %c0_i32_0 : i32, i32
  }
  func.func @transform_5(%arg0: i32) -> (i32, i32) {
    %c0_i32 = arith.constant 0 : i32
    %c0_i32_0 = arith.constant 0 : i32
    %c0_i32_1 = arith.constant 0 : i32
    return %c0_i32, %c0_i32_0 : i32, i32
  }
}

</mosaic_0001>

<bundles_post_ra>
// kernel: cnn4_forward.6
= control target key start
LH: loop header
LB: loop body
LE: loop exit
PB: predicated region body
PF: predicated region fallthrough
CT: control target
= control target key end

     0   :  { %8 = vsyncpa [#allocation3], 0  ;;  %s2189_s0 = inlined_call_operand.vmem [shape: f32[2,88,128], index: 0, kind: input, shape index: {}]   ;;  %s2190_s1 = inlined_call_operand.hbm [shape: bf16[5,256,128], index: 1, kind: input, shape index: {}]   ;;  %s2191_s2 = inlined_call_operand.hbm [shape: f32[1,128], index: 2, kind: input, shape index: {}]   ;;  %s2192_s3 = inlined_call_operand.vmem [shape: bf16[2,64,128], index: 3, kind: output, shape index: {}]  }
   0x1   :  { %9 = vsyncpa [#allocation5], 0  ;;  %s1993_s12 = smov 0  }
   0x2 LB: > { %s1999_s13 = sadd.s32 4294967295, %s1967_s12   ;;  %p1436_p0 = scmp.ge.s32.totalorder %s1967_s12, 1  ;;  %s1967_s12 = sphi %s1993_s12, %s15_s12  }
   0x3   : > { %p114_p1 = scmp.lt.s32.totalorder %s1967_s12, 3  ;;  %s1969_s14 = smov [#allocation2]  }
   0x4   : > { %s126_s15 = sshll.u32 %s1969_s14, 4  ;;  %p2193_p3 = scmp.eq.s32.totalorder %s1999_s13, 0  ;;  %s127_s15 = int_to_ptr.vmem [resolvable:$true] %s126_s15 }
   0x5   : > { %p2003_p2 = pnand %p1436_p0, %p114_p1  ;;  %s1970_s17 = smov [#allocation4]  }
   0x6   : > { %s140_s18 = sshll.u32 %s1970_s17, 4  ;;  %s1897_s22 = scalar_lea.hbm %s2190_s1, 10240  ;;  %s2016_s18 = int_to_ptr.vmem [resolvable:$true] %s140_s18 }
   0x7   : > { %s2195_s16 = scalar_select %p2003_p2, 1, 0 }
   0x8   : > { %p1794_p4 = pneg %p2003_p2  ;;  %p1898_p6 = scmp.ne.s32.totalorder %s2190_s1, %s1897_s22 }
   0x9   : > { %p1904_p10 = scmp.lt.u32.totalorder %s1897_s22, %s2190_s1 }
   0xa   : > { %p2012_p5 = pnand %p2193_p3, %p1794_p4 }
   0xc   : > { %p1899_p7 = pneg %p2012_p5 }
   0xe   : > { %p1900_p8 = pnand %p1899_p7, %p1898_p6 }
  0x10   : > { %p1901_p9 = pneg %p1900_p8 }
  0x12   : > { %p1906_p11 = pnand %p1904_p10, %p1901_p9 }
  0x14   : > { %1909 = shalt.err (!%p1906_p11)
}
  0x15   : > { %s1910_s27 = scalar_lea.vmem %s127_s15, 10240  ;;  %p1918_p1 = scmp.lt.s32.totalorder %s127_s15, %s127_s15 }
  0x16   : > { %p1911_p12 = scmp.ne.s32.totalorder %s127_s15, %s1910_s27  ;;  %p1919_p4 = scmp.lt.s32.totalorder %s1910_s27, %s1910_s27 }
  0x18   : > { %p1913_p13 = pnand %p1911_p12, %p1899_p7  ;;  %p1920_p3 = por %p1919_p4, %p1918_p1 }
  0x1a   : > { %p1914_p0 = pneg %p1913_p13 }
  0x1c   : > { %p1921_p2 = pnand %p1920_p3, %p1914_p0 }
  0x1e   : > { %1924 = shalt.err (!%p1921_p2)
}
  0x1f   : > { %s1971_s28 = smov 64   ;;  %s1972_s29 = smov 4  }
  0x20   : > { %1797 = dma.hbm_to_vmem [thread:$0]  (!%p2012_p5), %s2190_s1, 10240, %s127_s15, [#allocation3], %s1971_s28, %s1971_s28, %s1972_s29  }
  0x21   : > { %s1925_s7 = scalar_lea.hbm %s2191_s2, 16 }
  0x22   : > { %p1926_p6 = scmp.ne.s32.totalorder %s2191_s2, %s1925_s7  ;;  %p1932_p8 = scmp.lt.u32.totalorder %s1925_s7, %s2191_s2 }
  0x24   : > { %p1928_p2 = pnand %p1926_p6, %p1899_p7 }
  0x26   : > { %p1929_p3 = pneg %p1928_p2 }
  0x28   : > { %p1934_p9 = pnand %p1932_p8, %p1929_p3 }
  0x2a   : > { %1937 = shalt.err (!%p1934_p9)
}
  0x2b   : > { %s1938_s14 = scalar_lea.vmem %s2016_s18, 16  ;;  %s1945_s15 = scalar_lea.vmem %s2016_s18, 32 }
  0x2c   : > { %p1939_p10 = scmp.ne.s32.totalorder %s2016_s18, %s1938_s14  ;;  %p1946_p13 = scmp.lt.s32.totalorder %s2016_s18, %s2016_s18 }
  0x2d   : > { %p1947_p0 = scmp.lt.s32.totalorder %s1945_s15, %s1938_s14 }
  0x2e   : > { %p1941_p11 = pnand %p1939_p10, %p1899_p7 }
  0x2f   : > { %p1948_p1 = por %p1947_p0, %p1946_p13 }
  0x30   : > { %p1942_p12 = pneg %p1941_p11 }
  0x32   : > { %p1949_p4 = pnand %p1948_p1, %p1942_p12 }
  0x34   : > { %1952 = shalt.err (!%p1949_p4)
}
  0x35   : > { %1800 = dma.hbm_to_vmem [thread:$0]  (!%p2012_p5), %s2191_s2, 16, %s2016_s18, [#allocation5]  }
  0x36   : > { %p2197_p6 = scmp.ne.s32.totalorder %s2195_s16, 0 }
  0x37   : > { %p2198_p7 = scmp.eq.s32.totalorder (!%p2197_p6), %s1999_s13, 0 }
  0x38   : > { %161 = sbr.rel (%p2197_p6) target bundleno = 402 (0x192), region = 32 }
  0x3f   : > { %1958 = dma.done.wait (%p2198_p7), [#allocation3], 10240   ;;  %p2199_p2 = pmov %p2198_p7 }
  0x41   : > { %1960 = vsyncadd (%p2199_p2), [#allocation3], 4294957056  ;;  %p2200_p3 = pmov %p2199_p2 }
  0x42   : > { %p2201_p8 = pmov %p2199_p2 }
  0x43   : > { %1962 = dma.done.wait (%p2200_p3), [#allocation5], 16  }
  0x44   : > { %1964 = vsyncadd (%p2201_p8), [#allocation5], 4294967280  ;;  %v1817_v0 = vld [vmem:[#allocation2 + $0xc0] sm:$0xff]   ;;  %v1821_v4 = vld [vmem:[#allocation2 + $0xc8] sm:$0xff]   ;;  %p189_p5 = scmp.lt.s32.totalorder %s1999_s13, 1 }
  0x45   : > { %v1818_v1 = vld [vmem:[#allocation2 + $0x40] sm:$0xff]   ;;  %1569 = vmatprep.subr.bf16.mxu0 %v1817_v0  ;;  %v1822_v5 = vld [vmem:[#allocation2 + $0x48] sm:$0xff]   ;;  %v1825_v8 = vld [vmem:[#allocation2 + $0xd0] sm:$0xff]  }
  0x46   : > { %v1819_v2 = vld [vmem:[#allocation2 + $0x80] sm:$0xff]   ;;  %1609 = vmatprep.subr.bf16.mxu1 %v1818_v1  ;;  %v1823_v6 = vld [vmem:[#allocation2 + $0x88] sm:$0xff]   ;;  %v1826_v9 = vld [vmem:[#allocation2 + $0x50] sm:$0xff]   ;;  %s2203_s13 = smov (!%p189_p5, %s1999_s13), 1 }
  0x47   : > { %v1820_v3 = vld [vmem:[#allocation2] sm:$0xff]   ;;  %1570 = vmatpush3.bf16.msra.mxu0 %v1819_v2  ;;  %v1824_v7 = vld [vmem:[#allocation2 + $0x8] sm:$0xff]   ;;  %v1827_v10 = vld [vmem:[#allocation2 + $0x90] sm:$0xff]   ;;  %s1785_s16 = smul.u32 88, %s2203_s13  ;;  %s1537_s22 = sshll.u32 %s2203_s13, 5 }
  0x48   : > { %1610 = vmatpush3.bf16.msra.mxu1 %v1820_v3  ;;  %1571 = vmatprep.subr.bf16.mxu0 %v1821_v4  ;;  %v1828_v11 = vld [vmem:[#allocation2 + $0x10] sm:$0xff]   ;;  %v1829_v12 = vld [vmem:[#allocation2 + $0xd8] sm:$0xff]   ;;  %v1833_v16 = vld [vmem:[#allocation2 + $0xe0] sm:$0xff]   ;;  %s198_s25 = scalar_lea.vmem %s2192_s3, %s1537_s22 }
  0x49   : > { %1611 = vmatprep.subr.bf16.mxu1 %v1822_v5  ;;  %v1830_v13 = vld [vmem:[#allocation2 + $0x58] sm:$0xff]   ;;  %v1834_v17 = vld [vmem:[#allocation2 + $0x60] sm:$0xff]   ;;  %v1837_v20 = vld [vmem:[#allocation2 + $0xe8] sm:$0xff]   ;;  %s2084_s21 = scalar_lea.vmem %s2189_s0, %s1785_s16 }
  0x4a   : > { %v1831_v14 = vld [vmem:[#allocation2 + $0x98] sm:$0xff]   ;;  %v1835_v18 = vld [vmem:[#allocation2 + $0xa0] sm:$0xff]   ;;  %v1838_v21 = vld [vmem:[#allocation2 + $0x68] sm:$0xff]  }
  0x4b   : > { %1572 = vmatpush3.bf16.msra.mxu0 %v1823_v6  ;;  %v1832_v15 = vld [vmem:[#allocation2 + $0x18] sm:$0xff]   ;;  %v1836_v19 = vld [vmem:[#allocation2 + $0x20] sm:$0xff]   ;;  %v1839_v22 = vld [vmem:[#allocation2 + $0xa8] sm:$0xff]  }
  0x4c   : > { %1612 = vmatpush3.bf16.msra.mxu1 %v1824_v7  ;;  %1573 = vmatprep.subr.bf16.mxu0 %v1825_v8  ;;  %v1840_v23 = vld [vmem:[#allocation2 + $0x28] sm:$0xff]   ;;  %v1841_v24 = vld [vmem:[#allocation2 + $0xf0] sm:$0xff]   ;;  %v1845_v28 = vld [vmem:[#allocation2 + $0xf8] sm:$0xff]  }
  0x4d   : > { %1613 = vmatprep.subr.bf16.mxu1 %v1826_v9  ;;  %v1842_v25 = vld [vmem:[#allocation2 + $0x70] sm:$0xff]   ;;  %v1846_v29 = vld [vmem:[#allocation2 + $0x78] sm:$0xff]   ;;  %v212_v36 = vld [vmem:[%s2084_s21 + $0x1] sm:$0xff] }
  0x4e   : > { %v1843_v26 = vld [vmem:[#allocation2 + $0xb0] sm:$0xff]   ;;  %v1847_v30 = vld [vmem:[#allocation2 + $0xb8] sm:$0xff]   ;;  %v256_v37 = vld [vmem:[%s2084_s21 + $0x2] sm:$0xff] }
  0x4f   : > { %1574 = vmatpush3.bf16.msra.mxu0 %v1827_v10  ;;  %v1844_v27 = vld [vmem:[#allocation2 + $0x30] sm:$0xff]   ;;  %v1848_v31 = vld [vmem:[#allocation2 + $0x38] sm:$0xff]   ;;  %v200_v42 = vld [vmem:[%s2084_s21] sm:$0xff] }
  0x50   : > { %1614 = vmatpush3.bf16.msra.mxu1 %v1828_v11  ;;  %1575 = vmatprep.subr.bf16.mxu0 %v1829_v12  ;;  %v213_v32 = vld [vmem:[%s2084_s21 + $0x9] sm:$0xff]  ;;  %v214_v33 = vld [vmem:[%s2084_s21 + $0x11] sm:$0xff]  ;;  %v215_v34 = vld [vmem:[%s2084_s21 + $0x19] sm:$0xff] }
  0x51   : > { %1615 = vmatprep.subr.bf16.mxu1 %v1830_v13  ;;  %v269_v35 = vpack.c.bf16 %v214_v33, %v213_v32  ;;  %v2092_v38 = vld [vmem:[%s2084_s21 + $0xa] sm:$0xff]  ;;  %v221_v39 = vpack.c.bf16 %v215_v34, %v214_v33  ;;  %v220_v40 = vpack.c.bf16 %v213_v32, %v212_v36  ;;  %v1849_v45 = vld [vmem:[#allocation2 + $0x140] sm:$0xff]   ;;  %v2099_v55 = vld [vmem:[%s2084_s21 + $0x12] sm:$0xff] }
  0x52   : > { %v264_v41 = vpack.c.bf16 %v2092_v38, %v256_v37  ;;  %v201_v43 = vld [vmem:[%s2084_s21 + $0x8] sm:$0xff]  ;;  %v1850_v46 = vld [vmem:[#allocation2 + $0x1c0] sm:$0xff]   ;;  %v202_v57 = vld [vmem:[%s2084_s21 + $0x10] sm:$0xff] }
  0x53   : > { %1576 = vmatpush3.bf16.msra.mxu0 %v1831_v14  ;;  %434 = vmatprep.mubr.bf16.mxu0 %v269_v35  ;;  %v208_v44 = vpack.c.bf16 %v201_v43, %v200_v42  ;;  %v1851_v47 = vld [vmem:[#allocation2 + $0x100] sm:$0xff]   ;;  %v1853_v49 = vld [vmem:[#allocation2 + $0x148] sm:$0xff]   ;;  %v203_v59 = vld [vmem:[%s2084_s21 + $0x18] sm:$0xff] }
  0x54   : > { %1616 = vmatpush3.bf16.msra.mxu1 %v1832_v15  ;;  %1577 = vmatprep.subr.bf16.mxu0 %v1833_v16  ;;  %v1852_v48 = vld [vmem:[#allocation2 + $0x180] sm:$0xff]   ;;  %v1854_v50 = vld [vmem:[#allocation2 + $0x1c8] sm:$0xff]   ;;  %v209_v60 = vpack.c.bf16 %v203_v59, %v202_v57  ;;  %v1857_v61 = vld [vmem:[#allocation2 + $0x150] sm:$0xff]  }
  0x55   : > { %1617 = vmatprep.subr.bf16.mxu1 %v1834_v17  ;;  %595 = vmatprep.mubr.bf16.mxu1 %v220_v40  ;;  %v1855_v51 = vld [vmem:[#allocation2 + $0x108] sm:$0xff]   ;;  %v2102_v56 = vld [vmem:[%s2084_s21 + $0x1a] sm:$0xff]  ;;  %v1858_v62 = vld [vmem:[#allocation2 + $0x1d0] sm:$0xff]  }
  0x56   : > { %v1856_v52 = vld [vmem:[#allocation2 + $0x188] sm:$0xff]   ;;  %v2107_v58 = vpack.c.bf16 %v2102_v56, %v2099_v55  ;;  %v1859_v63 = vld [vmem:[#allocation2 + $0x110] sm:$0xff]   ;;  %v1861_v1 = vld [vmem:[#allocation2 + $0x158] sm:$0xff]  }
  0x57   : > { %1578 = vmatpush3.bf16.msra.mxu0 %v1835_v18  ;;  %v216_v53 = vld [vmem:[%s2084_s21 + $0x21] sm:$0xff]  ;;  %v1860_v0 = vld [vmem:[#allocation2 + $0x190] sm:$0xff]   ;;  %v1862_v2 = vld [vmem:[#allocation2 + $0x1d8] sm:$0xff]  }
  0x58   : > { %1618 = vmatpush3.bf16.msra.mxu1 %v1836_v19  ;;  %1579 = vmatprep.subr.bf16.mxu0 %v1837_v20  ;;  %v270_v54 = vpack.c.bf16 %v216_v53, %v215_v34  ;;  %v1863_v3 = vld [vmem:[#allocation2 + $0x118] sm:$0xff]   ;;  %v217_v5 = vld [vmem:[%s2084_s21 + $0x29] sm:$0xff]  ;;  %v204_v11 = vld [vmem:[%s2084_s21 + $0x20] sm:$0xff] }
  0x59   : > { %1619 = vmatprep.subr.bf16.mxu1 %v1838_v21  ;;  %v1864_v4 = vld [vmem:[#allocation2 + $0x198] sm:$0xff]   ;;  %v222_v8 = vpack.c.bf16 %v217_v5, %v216_v53  ;;  %v2114_v9 = vld [vmem:[%s2084_s21 + $0x22] sm:$0xff]  ;;  %v2117_v10 = vld [vmem:[%s2084_s21 + $0x2a] sm:$0xff] }
  0x5a   : > { %v218_v6 = vld [vmem:[%s2084_s21 + $0x31] sm:$0xff]  ;;  %v2122_v12 = vpack.c.bf16 %v2117_v10, %v2114_v9  ;;  %v205_v13 = vld [vmem:[%s2084_s21 + $0x28] sm:$0xff]  ;;  %v1865_v15 = vld [vmem:[#allocation2 + $0x160] sm:$0xff]   ;;  %v637_v57 = vpack.c.bf16 %v2114_v9, %v2102_v56 }
  0x5b   : > { %1580 = vmatpush3.bf16.msra.mxu0 %v1839_v22  ;;  %v271_v7 = vpack.c.bf16 %v218_v6, %v217_v5  ;;  %v210_v14 = vpack.c.bf16 %v205_v13, %v204_v11  ;;  %v1866_v16 = vld [vmem:[#allocation2 + $0x1e0] sm:$0xff]   ;;  %v1869_v19 = vld [vmem:[#allocation2 + $0x168] sm:$0xff]   ;;  %v1873_v33 = vld [vmem:[#allocation2 + $0x170] sm:$0xff]  }
  0x5c   : > { %1620 = vmatpush3.bf16.msra.mxu1 %v1840_v23  ;;  %1581 = vmatprep.subr.bf16.mxu0 %v1841_v24  ;;  %v1867_v17 = vld [vmem:[#allocation2 + $0x120] sm:$0xff]   ;;  %v1870_v20 = vld [vmem:[#allocation2 + $0x1e8] sm:$0xff]   ;;  %v1874_v34 = vld [vmem:[#allocation2 + $0x1f0] sm:$0xff]  }
  0x5d   : > { %1621 = vmatprep.subr.bf16.mxu1 %v1842_v25  ;;  %v1868_v18 = vld [vmem:[#allocation2 + $0x1a0] sm:$0xff]   ;;  %v1871_v21 = vld [vmem:[#allocation2 + $0x128] sm:$0xff]   ;;  %v1875_v35 = vld [vmem:[#allocation2 + $0x130] sm:$0xff]  }
  0x5e   : > { %v1872_v22 = vld [vmem:[#allocation2 + $0x1a8] sm:$0xff]   ;;  %v219_v23 = vld [vmem:[%s2084_s21 + $0x39] sm:$0xff]  ;;  %v1876_v36 = vld [vmem:[#allocation2 + $0x1b0] sm:$0xff]  }
  0x5f   : > { %1582 = vmatpush3.bf16.msra.mxu0 %v1843_v26  ;;  %v268_v24 = vld [vmem:[%s2084_s21 + $0x41] sm:$0xff]  ;;  %v223_v26 = vpack.c.bf16 %v219_v23, %v218_v6  ;;  %v1877_v37 = vld [vmem:[#allocation2 + $0x178] sm:$0xff]   ;;  %v640_v42 = vld [vmem:[%s2084_s21 + $0xb] sm:$0xff] }
  0x60   : > { %1622 = vmatpush3.bf16.msra.mxu1 %v1844_v27  ;;  %1583 = vmatprep.subr.bf16.mxu0 %v1845_v28  ;;  %v272_v25 = vpack.c.bf16 %v268_v24, %v219_v23  ;;  %v2129_v27 = vld [vmem:[%s2084_s21 + $0x32] sm:$0xff]  ;;  %v2132_v28 = vld [vmem:[%s2084_s21 + $0x3a] sm:$0xff]  ;;  %v647_v56 = vld [vmem:[%s2084_s21 + $0x43] sm:$0xff] }
  0x61   : > { %1623 = vmatprep.subr.bf16.mxu1 %v1846_v29  ;;  %v206_v29 = vld [vmem:[%s2084_s21 + $0x30] sm:$0xff]  ;;  %v1879_v40 = vld [vmem:[#allocation2 + $0x138] sm:$0xff]   ;;  %v1890_v5 = vld [vmem:[#allocation2 + $0x220] sm:$0xff]  }
  0x62   : > { %v641_v43 = vld [vmem:[%s2084_s21 + $0x13] sm:$0xff]  ;;  %v635_v9 = vld [vmem:[%s2084_s21 + $0x42] sm:$0xff] }
  0x63   : > { %1584 = vmatpush3.bf16.msra.mxu0 %v1847_v30  ;;  %v2137_v30 = vpack.c.bf16 %v2132_v28, %v2129_v27  ;;  %v645_v59 = vld [vmem:[%s2084_s21 + $0x33] sm:$0xff]  ;;  %v1082_v23 = vld [vmem:[%s2084_s21 + $0x24] sm:$0xff] }
  0x64   : > { %1624 = vmatpush3.bf16.msra.mxu1 %v1848_v31  ;;  %1649 = vmatprep.subr.bf16.mxu0 %v1849_v45  ;;  %v207_v31 = vld [vmem:[%s2084_s21 + $0x38] sm:$0xff]  ;;  %v648_v45 = vpack.c.bf16 %v641_v43, %v640_v42  ;;  %v1893_v13 = vld [vmem:[#allocation2 + $0x270] sm:$0xff]  }
  0x65   : > { %1689 = vmatprep.subr.bf16.mxu1 %v1850_v46  ;;  %v211_v32 = vpack.c.bf16 %v207_v31, %v206_v29  ;;  %v867_v46 = vld [vmem:[%s2084_s21 + $0x1b] sm:$0xff]  ;;  %v1083_v24 = vld [vmem:[%s2084_s21 + $0x2c] sm:$0xff] }
  0x66   : > { %435 = vmatmul.mubr.bf16.vlgmr.msra.gmra.mrb[0].mxu0 %v264_v41  ;;  %v1880_v41 = vld [vmem:[#allocation2 + $0x1b8] sm:$0xff]  }
  0x67   : > { %596 = vmatmul.mubr.bf16.vlgmr.msra.gmra.mrb[0].mxu1 %v208_v44  ;;  %1650 = vmatpush3.bf16.msra.mxu0 %v1851_v47  ;;  %v636_v44 = vpack.c.bf16 %v2099_v55, %v2092_v38  ;;  %v874_v47 = vpack.c.bf16 %v867_v46, %v641_v43  ;;  %v1884_v38 = vld [vmem:[#allocation2 + $0x208] sm:$0xff]   ;;  %v1885_v55 = vld [vmem:[#allocation2 + $0x250] sm:$0xff]  }
  0x68   : > { %603 = vmatprep.mubr.bf16.mxu1 %v221_v39  ;;  %1690 = vmatpush3.bf16.msra.mxu1 %v1852_v48  ;;  %v1878_v39 = vld [vmem:[#allocation2 + $0x1f8] sm:$0xff]   ;;  %v1881_v48 = vld [vmem:[#allocation2 + $0x240] sm:$0xff]  }
  0x69   : > { %1651 = vmatprep.subr.bf16.mxu0 %v1853_v49  ;;  %1691 = vmatprep.subr.bf16.mxu1 %v1854_v50  ;;  %v1882_v49 = vld [vmem:[#allocation2 + $0x200] sm:$0xff]   ;;  %v1883_v50 = vld [vmem:[#allocation2 + $0x248] sm:$0xff]   ;;  %v1080_v11 = vld [vmem:[%s2084_s21 + $0x14] sm:$0xff] }
  0x6a   : > { %442 = vmatprep.mubr.bf16.mxu0 %v270_v54 }
  0x6b   : > { %1652 = vmatpush3.bf16.msra.mxu0 %v1855_v51  ;;  %v643_v51 = vld [vmem:[%s2084_s21 + $0x23] sm:$0xff] }
  0x6c   : > { %1692 = vmatpush3.bf16.msra.mxu1 %v1856_v52  ;;  %1653 = vmatprep.subr.bf16.mxu0 %v1857_v61  ;;  %v869_v52 = vld [vmem:[%s2084_s21 + $0x2b] sm:$0xff]  ;;  %v649_v53 = vpack.c.bf16 %v643_v51, %v867_v46  ;;  %v1887_v61 = vld [vmem:[#allocation2 + $0x258] sm:$0xff]  }
  0x6d   : > { %1693 = vmatprep.subr.bf16.mxu1 %v1858_v62  ;;  %v875_v54 = vpack.c.bf16 %v869_v52, %v643_v51  ;;  %v650_v62 = vpack.c.bf16 %v645_v59, %v869_v52 }
  0x6e   : > { %443 = vmatmul.mubr.bf16.gmra.mrb[4].mxu0 %v2107_v58 }
  0x6f   : > { %604 = vmatmul.mubr.bf16.gmra.mrb[4].mxu1 %v209_v60  ;;  %1654 = vmatpush3.bf16.msra.mxu0 %v1859_v63  ;;  %v871_v60 = vld [vmem:[%s2084_s21 + $0x3b] sm:$0xff] }
  0x70   : > { %1694 = vmatpush3.bf16.msra.mxu1 %v1860_v0  ;;  %1655 = vmatprep.subr.bf16.mxu0 %v1861_v1  ;;  %v876_v63 = vpack.c.bf16 %v871_v60, %v645_v59  ;;  %v1888_v0 = vld [vmem:[#allocation2 + $0x218] sm:$0xff]   ;;  %v1889_v1 = vld [vmem:[#allocation2 + $0x260] sm:$0xff]  }
  0x71   : > { %1695 = vmatprep.subr.bf16.mxu1 %v1862_v2  ;;  %450 = vmatprep.mubr.bf16.mxu0 %v271_v7  ;;  %v873_v2 = vld [vmem:[%s2084_s21 + $0x4b] sm:$0xff] }
  0x72   : > { %611 = vmatprep.mubr.bf16.mxu1 %v222_v8  ;;  %v877_v6 = vpack.c.bf16 %v873_v2, %v647_v56  ;;  %v1891_v7 = vld [vmem:[#allocation2 + $0x268] sm:$0xff]  }
  0x73   : > { %1656 = vmatpush3.bf16.msra.mxu0 %v1863_v3  ;;  %v638_v3 = vpack.c.bf16 %v2129_v27, %v2117_v10  ;;  %v1892_v8 = vld [vmem:[#allocation2 + $0x228] sm:$0xff]   ;;  %v1089_v27 = vpack.c.bf16 %v1083_v24, %v1082_v23 }
  0x74   : > { %1696 = vmatpush3.bf16.msra.mxu1 %v1864_v4  ;;  %1657 = vmatprep.subr.bf16.mxu0 %v1865_v15  ;;  %v651_v4 = vpack.c.bf16 %v647_v56, %v871_v60  ;;  %v861_v10 = vld [vmem:[%s2084_s21 + $0x4a] sm:$0xff]  ;;  %v1085_v15 = vld [vmem:[%s2084_s21 + $0x3c] sm:$0xff] }
  0x75   : > { %1697 = vmatprep.subr.bf16.mxu1 %v1866_v16  ;;  %v639_v16 = vpack.c.bf16 %v635_v9, %v2132_v28 }
  0x76   : > { %451 = vmatmul.mubr.bf16.gmra.mrb[8].mxu0 %v2122_v12 }
  0x77   : > { %612 = vmatmul.mubr.bf16.gmra.mrb[8].mxu1 %v210_v14  ;;  %1658 = vmatpush3.bf16.msra.mxu0 %v1867_v17  ;;  %v1084_v14 = vld [vmem:[%s2084_s21 + $0x34] sm:$0xff]  ;;  %v865_v17 = vpack.c.bf16 %v861_v10, %v635_v9 }
  0x78   : > { %1698 = vmatpush3.bf16.msra.mxu1 %v1868_v18  ;;  %1659 = vmatprep.subr.bf16.mxu0 %v1869_v19  ;;  %v1894_v19 = vld [vmem:[#allocation2 + $0x230] sm:$0xff]  }
  0x79   : > { %1699 = vmatprep.subr.bf16.mxu1 %v1870_v20  ;;  %458 = vmatprep.mubr.bf16.mxu0 %v272_v25  ;;  %v1090_v20 = vpack.c.bf16 %v1085_v15, %v1084_v14  ;;  %v1086_v25 = vld [vmem:[%s2084_s21 + $0x44] sm:$0xff] }
  0x7a   : > { %619 = vmatprep.mubr.bf16.mxu1 %v223_v26  ;;  %v1087_v26 = vld [vmem:[%s2084_s21 + $0x4c] sm:$0xff] }
  0x7b   : > { %1660 = vmatpush3.bf16.msra.mxu0 %v1871_v21  ;;  %v1895_v21 = vld [vmem:[#allocation2 + $0x278] sm:$0xff]   ;;  %v1091_v28 = vpack.c.bf16 %v1087_v26, %v1086_v25 }
  0x7c   : > { %1700 = vmatpush3.bf16.msra.mxu1 %v1872_v22  ;;  %1661 = vmatprep.subr.bf16.mxu0 %v1873_v33  ;;  %v1896_v22 = vld [vmem:[#allocation2 + $0x238] sm:$0xff]  }
  0x7d   : > { %1701 = vmatprep.subr.bf16.mxu1 %v1874_v34 }
  0x7e   : > { %459 = vmatmul.mubr.bf16.gmra.mrb[12].mxu0 %v2137_v30 }
  0x7f   : > { %620 = vmatmul.mubr.bf16.gmra.mrb[12].mxu1 %v211_v32  ;;  %1662 = vmatpush3.bf16.msra.mxu0 %v1875_v35 }
  0x80   : > { %1702 = vmatpush3.bf16.msra.mxu1 %v1876_v36  ;;  %1663 = vmatprep.subr.bf16.mxu0 %v1877_v37 }
  0x81   : > { %1703 = vmatprep.subr.bf16.mxu1 %v1878_v39  ;;  %813 = vmatprep.mubr.bf16.mxu0 %v648_v45 }
  0x82   : > { %1039 = vmatprep.mubr.bf16.mxu1 %v874_v47 }
  0x83   : > { %1664 = vmatpush3.bf16.msra.mxu0 %v1879_v40 }
  0x84   : > { %1704 = vmatpush3.bf16.msra.mxu1 %v1880_v41  ;;  %1729 = vmatprep.subr.bf16.mxu0 %v1881_v48 }
  0x85   : > { %1769 = vmatprep.subr.bf16.mxu1 %v1881_v48 }
  0x86   : > { %814 = vmatmul.mubr.bf16.vlgmr.msra.gmra.mrb[16].mxu0 %v636_v44 }
  0x87   : > { %1040 = vmatmul.mubr.bf16.vlgmr.msra.gmra.mrb[16].mxu1 %v2107_v58  ;;  %1730 = vmatpush3.bf16.msra.mxu0 %v1882_v49  ;;  %v1886_v58 = vld [vmem:[#allocation2 + $0x210] sm:$0xff]  }
  0x88   : > { %1777 = vmatpush3.bf16.msra.mxu1 %v1882_v49  ;;  %1731 = vmatprep.subr.bf16.mxu0 %v1883_v50 }
  0x89   : > { %1770 = vmatprep.subr.bf16.mxu1 %v1883_v50  ;;  %821 = vmatprep.mubr.bf16.mxu0 %v649_v53 }
  0x8a   : > { %1047 = vmatprep.mubr.bf16.mxu1 %v875_v54 }
  0x8b   : > { %1732 = vmatpush3.bf16.msra.mxu0 %v1884_v38 }
  0x8c   : > { %1778 = vmatpush3.bf16.msra.mxu1 %v1884_v38  ;;  %1733 = vmatprep.subr.bf16.mxu0 %v1885_v55 }
  0x8d   : > { %1771 = vmatprep.subr.bf16.mxu1 %v1885_v55 }
  0x8e   : > { %822 = vmatmul.mubr.bf16.gmra.mrb[20].mxu0 %v637_v57 }
  0x8f   : > { %1048 = vmatmul.mubr.bf16.gmra.mrb[20].mxu1 %v2122_v12  ;;  %829 = vmatprep.mubr.bf16.mxu0 %v650_v62  ;;  %v1081_v12 = vld [vmem:[%s2084_s21 + $0x1c] sm:$0xff] }
  0x90   : > { %1734 = vmatpush3.bf16.msra.mxu0 %v1886_v58  ;;  %1055 = vmatprep.mubr.bf16.mxu1 %v876_v63  ;;  %v1088_v18 = vpack.c.bf16 %v1081_v12, %v1080_v11 }
  0x91   : > { %1779 = vmatpush3.bf16.msra.mxu1 %v1886_v58  ;;  %1735 = vmatprep.subr.bf16.mxu0 %v1887_v61 }
  0x92   : > { %1772 = vmatprep.subr.bf16.mxu1 %v1887_v61 }
  0x94   : > { %1736 = vmatpush3.bf16.msra.mxu0 %v1888_v0 }
  0x95   : > { %1780 = vmatpush3.bf16.msra.mxu1 %v1888_v0  ;;  %1737 = vmatprep.subr.bf16.mxu0 %v1889_v1 }
  0x96   : > { %830 = vmatmul.mubr.bf16.gmra.mrb[24].mxu0 %v638_v3  ;;  %1773 = vmatprep.subr.bf16.mxu1 %v1889_v1 }
  0x97   : > { %1056 = vmatmul.mubr.bf16.gmra.mrb[24].mxu1 %v2137_v30  ;;  %837 = vmatprep.mubr.bf16.mxu0 %v651_v4 }
  0x98   : > { %1738 = vmatpush3.bf16.msra.mxu0 %v1890_v5  ;;  %1063 = vmatprep.mubr.bf16.mxu1 %v877_v6 }
  0x99   : > { %1781 = vmatpush3.bf16.msra.mxu1 %v1890_v5  ;;  %1739 = vmatprep.subr.bf16.mxu0 %v1891_v7 }
  0x9a   : > { %1774 = vmatprep.subr.bf16.mxu1 %v1891_v7 }
  0x9c   : > { %1740 = vmatpush3.bf16.msra.mxu0 %v1892_v8 }
  0x9d   : > { %1782 = vmatpush3.bf16.msra.mxu1 %v1892_v8  ;;  %1741 = vmatprep.subr.bf16.mxu0 %v1893_v13 }
  0x9e   : > { %838 = vmatmul.mubr.bf16.gmra.mrb[28].mxu0 %v639_v16  ;;  %1775 = vmatprep.subr.bf16.mxu1 %v1893_v13 }
  0x9f   : > { %1064 = vmatmul.mubr.bf16.gmra.mrb[28].mxu1 %v865_v17  ;;  %1253 = vmatprep.mubr.bf16.mxu0 %v1088_v18 }
  0xa0   : > { %1742 = vmatpush3.bf16.msra.mxu0 %v1894_v19  ;;  %1269 = vmatprep.mubr.bf16.mxu1 %v1090_v20 }
  0xa1   : > { %1783 = vmatpush3.bf16.msra.mxu1 %v1894_v19  ;;  %1743 = vmatprep.subr.bf16.mxu0 %v1895_v21 }
  0xa2   : > { %1776 = vmatprep.subr.bf16.mxu1 %v1895_v21 }
  0xa4   : > { %1744 = vmatpush3.bf16.msra.mxu0 %v1896_v22 }
  0xa5   : > { %1784 = vmatpush3.bf16.msra.mxu1 %v1896_v22 }
  0xa7   : > { %1254 = vmatmul.mubr.bf16.vlgmr.msra.gmra.mrb[32].mxu0 %v1088_v18 }
  0xa8   : > { %1270 = vmatmul.mubr.bf16.vlgmr.msra.gmra.mrb[32].mxu1 %v1090_v20  ;;  %1261 = vmatprep.mubr.bf16.mxu0 %v1089_v27 }
  0xa9   : > { %1277 = vmatprep.mubr.bf16.mxu1 %v1091_v28 }
  0xaf   : > { %1262 = vmatmul.mubr.bf16.gmra.mrb[36].mxu0 %v1089_v27 }
  0xb0   : > { %1278 = vmatmul.mubr.bf16.gmra.mrb[36].mxu1 %v1091_v28 }
 0x139   : > { %v1585_v29 = vpop.f32.mrb[0].mxu0 }
 0x13a   : > { %v1625_v30 = vpop.f32.mrb[0].mxu1  ;;  %v1586_v31 = vpop.f32.mrb[1].mxu0 }
 0x13b   : > { %v1587_v32 = vadd.f32 %v1586_v31, %v1585_v29  ;;  %v1626_v33 = vpop.f32.mrb[1].mxu1  ;;  %v1588_v34 = vpop.f32.mrb[2].mxu0 }
 0x13c   : > { %v1627_v35 = vadd.f32 %v1626_v33, %v1625_v30  ;;  %v1628_v36 = vpop.f32.mrb[2].mxu1  ;;  %v1589_v37 = vpop.f32.mrb[3].mxu0 }
 0x13d   : > { %v1590_v39 = vadd.f32 %v1589_v37, %v1588_v34  ;;  %v1629_v40 = vpop.f32.mrb[3].mxu1 }
 0x13e   : > { %v598_v41 = vadd.f32 %v1627_v35, %v1587_v32  ;;  %v1630_v42 = vadd.f32 %v1629_v40, %v1628_v36 }
 0x140   : > { %v601_v43 = vadd.f32 %v1630_v42, %v1590_v39 }
 0x141   : > { %v1591_v44 = vpop.f32.mrb[4].mxu0 }
 0x142   : > { %v1631_v45 = vpop.f32.mrb[4].mxu1  ;;  %v1592_v46 = vpop.f32.mrb[5].mxu0 }
 0x143   : > { %v1593_v47 = vadd.f32 %v1592_v46, %v1591_v44  ;;  %v1632_v48 = vpop.f32.mrb[5].mxu1  ;;  %v1594_v49 = vpop.f32.mrb[6].mxu0 }
 0x144   : > { %v1633_v50 = vadd.f32 %v1632_v48, %v1631_v45  ;;  %v1634_v51 = vpop.f32.mrb[6].mxu1  ;;  %v1595_v52 = vpop.f32.mrb[7].mxu0 }
 0x145   : > { %v1596_v38 = vadd.f32 %v1595_v52, %v1594_v49  ;;  %v1635_v53 = vpop.f32.mrb[7].mxu1 }
 0x146   : > { %v606_v54 = vadd.f32 %v1633_v50, %v1593_v47  ;;  %v1636_v55 = vadd.f32 %v1635_v53, %v1634_v51 }
 0x148   : > { %v609_v57 = vadd.f32 %v1636_v55, %v1596_v38 }
 0x149   : > { %v1597_v58 = vpop.f32.mrb[8].mxu0 }
 0x14a   : > { %v1637_v59 = vpop.f32.mrb[8].mxu1  ;;  %v1598_v60 = vpop.f32.mrb[9].mxu0 }
 0x14b   : > { %v1599_v61 = vadd.f32 %v1598_v60, %v1597_v58  ;;  %v1638_v62 = vpop.f32.mrb[9].mxu1  ;;  %v1600_v63 = vpop.f32.mrb[10].mxu0 }
 0x14c   : > { %v1639_v0 = vadd.f32 %v1638_v62, %v1637_v59  ;;  %v1640_v56 = vpop.f32.mrb[10].mxu1  ;;  %v1601_v1 = vpop.f32.mrb[11].mxu0 }
 0x14d   : > { %v1602_v2 = vadd.f32 %v1601_v1, %v1600_v63  ;;  %v1641_v3 = vpop.f32.mrb[11].mxu1 }
 0x14e   : > { %v614_v4 = vadd.f32 %v1639_v0, %v1599_v61  ;;  %v1642_v5 = vadd.f32 %v1641_v3, %v1640_v56 }
 0x150   : > { %v617_v6 = vadd.f32 %v1642_v5, %v1602_v2 }
 0x151   : > { %v1603_v7 = vpop.f32.mrb[12].mxu0 }
 0x152   : > { %v1643_v8 = vpop.f32.mrb[12].mxu1  ;;  %v1604_v9 = vpop.f32.mrb[13].mxu0 }
 0x153   : > { %v1605_v10 = vadd.f32 %v1604_v9, %v1603_v7  ;;  %v1644_v11 = vpop.f32.mrb[13].mxu1  ;;  %v1606_v12 = vpop.f32.mrb[14].mxu0 }
 0x154   : > { %v1645_v13 = vadd.f32 %v1644_v11, %v1643_v8  ;;  %v1646_v14 = vpop.f32.mrb[14].mxu1  ;;  %v1607_v15 = vpop.f32.mrb[15].mxu0 }
 0x155   : > { %v1608_v16 = vadd.f32 %v1607_v15, %v1606_v12  ;;  %v1647_v17 = vpop.f32.mrb[15].mxu1 }
 0x156   : > { %v622_v18 = vadd.f32 %v1645_v13, %v1605_v10  ;;  %v1648_v19 = vadd.f32 %v1647_v17, %v1646_v14 }
 0x158   : > { %v2170_v20 = vadd.f32 %v1648_v19, %v1608_v16 }
 0x159   : > { %v1665_v21 = vpop.f32.mrb[16].mxu0 }
 0x15a   : > { %v1705_v22 = vpop.f32.mrb[16].mxu1  ;;  %v1666_v23 = vpop.f32.mrb[17].mxu0 }
 0x15b   : > { %v1667_v24 = vadd.f32 %v1666_v23, %v1665_v21  ;;  %v1706_v25 = vpop.f32.mrb[17].mxu1  ;;  %v1668_v26 = vpop.f32.mrb[18].mxu0 }
 0x15c   : > { %v1707_v27 = vadd.f32 %v1706_v25, %v1705_v22  ;;  %v1708_v28 = vpop.f32.mrb[18].mxu1  ;;  %v1669_v29 = vpop.f32.mrb[19].mxu0 }
 0x15d   : > { %v846_v30 = vadd.f32 %v1667_v24, %v598_v41  ;;  %v1670_v31 = vadd.f32 %v1669_v29, %v1668_v26  ;;  %v1709_v32 = vpop.f32.mrb[19].mxu1  ;;  %v1526_v29 = vld [vmem:[#allocation4] ss:$0 sm:$0xff] }
 0x15e   : > { %v1710_v33 = vadd.f32 %v1709_v32, %v1708_v28 }
 0x15f   : > { %v1072_v34 = vadd.f32 %v1707_v27, %v846_v30  ;;  %v847_v35 = vadd.f32 %v1670_v31, %v601_v43 }
 0x161   : > { %v2172_v36 = vadd.f32 %v1710_v33, %v847_v35  ;;  %v1671_v37 = vpop.f32.mrb[20].mxu0 }
 0x162   : > { %v1711_v39 = vpop.f32.mrb[20].mxu1  ;;  %v1672_v40 = vpop.f32.mrb[21].mxu0 }
 0x163   : > { %v1673_v42 = vadd.f32 %v1672_v40, %v1671_v37  ;;  %v1712_v44 = vpop.f32.mrb[21].mxu1  ;;  %v1674_v45 = vpop.f32.mrb[22].mxu0 }
 0x164   : > { %v1713_v46 = vadd.f32 %v1712_v44, %v1711_v39  ;;  %v1714_v47 = vpop.f32.mrb[22].mxu1  ;;  %v1675_v48 = vpop.f32.mrb[23].mxu0 }
 0x165   : > { %v848_v49 = vadd.f32 %v1673_v42, %v606_v54  ;;  %v1676_v50 = vadd.f32 %v1675_v48, %v1674_v45  ;;  %v1715_v51 = vpop.f32.mrb[23].mxu1 }
 0x166   : > { %v1716_v41 = vadd.f32 %v1715_v51, %v1714_v47 }
 0x167   : > { %v2174_v52 = vadd.f32 %v1713_v46, %v848_v49  ;;  %v849_v38 = vadd.f32 %v1676_v50, %v609_v57 }
 0x169   : > { %v2176_v53 = vadd.f32 %v1716_v41, %v849_v38  ;;  %v1677_v43 = vpop.f32.mrb[24].mxu0 }
 0x16a   : > { %v1717_v55 = vpop.f32.mrb[24].mxu1  ;;  %v1678_v58 = vpop.f32.mrb[25].mxu0 }
 0x16b   : > { %v1679_v59 = vadd.f32 %v1678_v58, %v1677_v43  ;;  %v1718_v60 = vpop.f32.mrb[25].mxu1  ;;  %v1680_v61 = vpop.f32.mrb[26].mxu0 }
 0x16c   : > { %v1719_v62 = vadd.f32 %v1718_v60, %v1717_v55  ;;  %v1720_v63 = vpop.f32.mrb[26].mxu1  ;;  %v1681_v0 = vpop.f32.mrb[27].mxu0 }
 0x16d   : > { %v850_v56 = vadd.f32 %v1679_v59, %v614_v4  ;;  %v1682_v1 = vadd.f32 %v1681_v0, %v1680_v61  ;;  %v1721_v54 = vpop.f32.mrb[27].mxu1 }
 0x16e   : > { %v1722_v2 = vadd.f32 %v1721_v54, %v1720_v63 }
 0x16f   : > { %v1076_v3 = vadd.f32 %v1719_v62, %v850_v56  ;;  %v851_v5 = vadd.f32 %v1682_v1, %v617_v6 }
 0x171   : > { %v1077_v7 = vadd.f32 %v1722_v2, %v851_v5  ;;  %v1683_v8 = vpop.f32.mrb[28].mxu0 }
 0x172   : > { %v1723_v57 = vpop.f32.mrb[28].mxu1  ;;  %v1684_v9 = vpop.f32.mrb[29].mxu0 }
 0x173   : > { %v1685_v10 = vadd.f32 %v1684_v9, %v1683_v8  ;;  %v1724_v11 = vpop.f32.mrb[29].mxu1  ;;  %v1686_v12 = vpop.f32.mrb[30].mxu0 }
 0x174   : > { %v1725_v13 = vadd.f32 %v1724_v11, %v1723_v57  ;;  %v1726_v14 = vpop.f32.mrb[30].mxu1  ;;  %v1687_v15 = vpop.f32.mrb[31].mxu0 }
 0x175   : > { %v852_v16 = vadd.f32 %v1685_v10, %v622_v18  ;;  %v1688_v17 = vadd.f32 %v1687_v15, %v1686_v12  ;;  %v1727_v19 = vpop.f32.mrb[31].mxu1 }
 0x176   : > { %v1728_v21 = vadd.f32 %v1727_v19, %v1726_v14 }
 0x177   : > { %v1078_v4 = vadd.f32 %v1725_v13, %v852_v16  ;;  %v853_v22 = vadd.f32 %v1688_v17, %v2170_v20 }
 0x179   : > { %v1079_v23 = vadd.f32 %v1728_v21, %v853_v22 }
 0x17a   : > { %v1745_v24 = vpop.f32.mrb[32].mxu0 }
 0x17b   : > { %v1757_v6 = vpop.f32.mrb[32].mxu1  ;;  %v1746_v25 = vpop.f32.mrb[33].mxu0 }
 0x17c   : > { %v1747_v26 = vadd.f32 %v1746_v25, %v1745_v24  ;;  %v1758_v27 = vpop.f32.mrb[33].mxu1  ;;  %v1748_v28 = vpop.f32.mrb[34].mxu0 }
 0x17d   : > { %v1759_v30 = vadd.f32 %v1758_v27, %v1757_v6  ;;  %v1760_v31 = vpop.f32.mrb[34].mxu1  ;;  %v1749_v32 = vpop.f32.mrb[35].mxu0 }
 0x17e   : > { %v1286_v33 = vadd.f32 %v1747_v26, %v1072_v34  ;;  %v1750_v18 = vadd.f32 %v1749_v32, %v1748_v28  ;;  %v1761_v35 = vpop.f32.mrb[35].mxu1 }
 0x17f   : > { %v1290_v37 = vadd.f32 %v1759_v30, %v1076_v3  ;;  %v1762_v39 = vadd.f32 %v1761_v35, %v1760_v31 }
 0x180   : > { %v1301_v40 = vadd.f32 %v1526_v29, %v1286_v33  ;;  %v1287_v20 = vadd.f32 %v1750_v18, %v2172_v36 }
 0x181   : > { %v1305_v42 = vadd.f32 %v1526_v29, %v1290_v37  ;;  %v1291_v44 = vadd.f32 %v1762_v39, %v1077_v7 }
 0x182   : > { %v1302_v45 = vadd.f32 %v1526_v29, %v1287_v20  ;;  %v1751_v46 = vpop.f32.mrb[36].mxu0  ;;  %v1309_v50 = vmax.f32 %v1301_v40, 0.0 }
 0x183   : > { %v1306_v47 = vadd.f32 %v1526_v29, %v1291_v44  ;;  %v1763_v48 = vpop.f32.mrb[36].mxu1  ;;  %v1752_v49 = vpop.f32.mrb[37].mxu0  ;;  %v1313_v43 = vmax.f32 %v1305_v42, 0.0 }
 0x184   : > { %v1310_v51 = vmax.f32 %v1302_v45, 0.0  ;;  %v1753_v41 = vadd.f32 %v1752_v49, %v1751_v46  ;;  %v1764_v38 = vpop.f32.mrb[37].mxu1  ;;  %v1754_v34 = vpop.f32.mrb[38].mxu0 }
 0x185   : > { %v1314_v55 = vmax.f32 %v1306_v47, 0.0  ;;  %v1765_v36 = vadd.f32 %v1764_v38, %v1763_v48  ;;  %v1766_v58 = vpop.f32.mrb[38].mxu1  ;;  %v1755_v59 = vpop.f32.mrb[39].mxu0 }
 0x186   : > { %v1549_v60 = vpack.c.bf16 %v1310_v51, %v1309_v50  ;;  %v1288_v61 = vadd.f32 %v1753_v41, %v2174_v52  ;;  %v1756_v62 = vadd.f32 %v1755_v59, %v1754_v34  ;;  %v1767_v63 = vpop.f32.mrb[39].mxu1 }
 0x187   : > { %v1559_v0 = vpack.c.bf16 %v1314_v55, %v1313_v43  ;;  %v1292_v56 = vadd.f32 %v1765_v36, %v1078_v4  ;;  %v1768_v1 = vadd.f32 %v1767_v63, %v1766_v58 }
 0x188   : > { %1550 = vst [vmem:[%s198_s25] sm:$0xff] %v1549_v60   ;;  %v1303_v54 = vadd.f32 %v1526_v29, %v1288_v61  ;;  %v1289_v2 = vadd.f32 %v1756_v62, %v2176_v53 }
 0x189   : > { %1567 = vst [vmem:[%s198_s25 + $0x10] sm:$0xff] %v1559_v0   ;;  %v1307_v3 = vadd.f32 %v1526_v29, %v1292_v56  ;;  %v1293_v5 = vadd.f32 %v1768_v1, %v1079_v23 }
 0x18a   : > { %v1304_v7 = vadd.f32 %v1526_v29, %v1289_v2  ;;  %v1311_v57 = vmax.f32 %v1303_v54, 0.0 }
 0x18b   : > { %v1308_v8 = vadd.f32 %v1526_v29, %v1293_v5  ;;  %v1315_v10 = vmax.f32 %v1307_v3, 0.0 }
 0x18c   : > { %v1312_v9 = vmax.f32 %v1304_v7, 0.0 }
 0x18d   : > { %v1316_v11 = vmax.f32 %v1308_v8, 0.0 }
 0x18e   : > { %v1554_v12 = vpack.c.bf16 %v1312_v9, %v1311_v57 }
 0x18f   : > { %v1564_v52 = vpack.c.bf16 %v1316_v11, %v1315_v10 }
 0x190   : > { %1566 = vst [vmem:[%s198_s25 + $0x8] sm:$0xff] %v1554_v12  }
 0x191   : > { %1568 = vst [vmem:[%s198_s25 + $0x18] sm:$0xff] %v1564_v52  }
 0x192 PF: > { %s15_s12 = sadd.s32 1, %s1967_s12  }
 0x193   : > { %p12_p9 = scmp.ge.s32.totalorder %s15_s12, 4  }
 0x195   :  { %14 = sbr.rel (!%p12_p9) target bundleno = 2 (0x2), region = 75 }
 0x19c   :  { %1378 = vsyncpa [#allocation3], 1 }
 0x19d   :  { %1380 = vsyncpa [#allocation3 + $0x1], 1 }
 0x19e   :  { %1381 = vsyncpa [#allocation5], 1 }

// kernel: cnn4_forward.4
= control target key start
LH: loop header
LB: loop body
LE: loop exit
PB: predicated region body
PF: predicated region fallthrough
CT: control target
= control target key end

     0   :  { %8 = vsyncpa [#allocation4], 0  ;;  %s2858_s0 = inlined_call_operand.vmem [shape: bf16[2,840,128], index: 0, kind: input, shape index: {}]   ;;  %s2859_s1 = inlined_call_operand.hbm [shape: bf16[1,128,128], index: 1, kind: input, shape index: {}]   ;;  %s2860_s2 = inlined_call_operand.hbm [shape: f32[1,128], index: 2, kind: input, shape index: {}]   ;;  %s2861_s3 = inlined_call_operand.vmem [shape: f32[2,264,128], index: 3, kind: output, shape index: {}]  }
   0x1   :  { %9 = vsyncpa [#allocation6], 0  ;;  %s2378_s12 = smov 0  }
   0x2 LB: > { %s2384_s13 = sadd.s32 4294967295, %s2350_s12   ;;  %p1805_p0 = scmp.ge.s32.totalorder %s2350_s12, 1  ;;  %s2350_s12 = sphi %s2378_s12, %s15_s12  }
   0x3   : > { %p114_p1 = scmp.lt.s32.totalorder %s2350_s12, 3  ;;  %s2352_s14 = smov [#allocation3]  }
   0x4   : > { %s126_s15 = sshll.u32 %s2352_s14, 4  ;;  %p2862_p3 = scmp.eq.s32.totalorder %s2384_s13, 0  ;;  %s127_s15 = int_to_ptr.vmem [resolvable:$true] %s126_s15 }
   0x5   : > { %p2388_p2 = pnand %p1805_p0, %p114_p1  ;;  %s2353_s17 = smov [#allocation5]  }
   0x6   : > { %s140_s18 = sshll.u32 %s2353_s17, 4  ;;  %s2280_s22 = scalar_lea.hbm %s2859_s1, 1024  ;;  %s2401_s18 = int_to_ptr.vmem [resolvable:$true] %s140_s18 }
   0x7   : > { %s2864_s16 = scalar_select %p2388_p2, 1, 0 }
   0x8   : > { %p2193_p4 = pneg %p2388_p2  ;;  %p2281_p6 = scmp.ne.s32.totalorder %s2859_s1, %s2280_s22 }
   0x9   : > { %p2287_p10 = scmp.lt.u32.totalorder %s2280_s22, %s2859_s1 }
   0xa   : > { %p2397_p5 = pnand %p2862_p3, %p2193_p4 }
   0xc   : > { %p2282_p7 = pneg %p2397_p5 }
   0xe   : > { %p2283_p8 = pnand %p2282_p7, %p2281_p6 }
  0x10   : > { %p2284_p9 = pneg %p2283_p8 }
  0x12   : > { %p2289_p11 = pnand %p2287_p10, %p2284_p9 }
  0x14   : > { %2292 = shalt.err (!%p2289_p11)
}
  0x15   : > { %s2293_s27 = scalar_lea.vmem %s127_s15, 1024  ;;  %p2301_p1 = scmp.lt.s32.totalorder %s127_s15, %s127_s15 }
  0x16   : > { %p2294_p12 = scmp.ne.s32.totalorder %s127_s15, %s2293_s27  ;;  %p2302_p4 = scmp.lt.s32.totalorder %s2293_s27, %s2293_s27 }
  0x18   : > { %p2296_p13 = pnand %p2294_p12, %p2282_p7  ;;  %p2303_p3 = por %p2302_p4, %p2301_p1 }
  0x1a   : > { %p2297_p0 = pneg %p2296_p13 }
  0x1c   : > { %p2304_p2 = pnand %p2303_p3, %p2297_p0 }
  0x1e   : > { %2307 = shalt.err (!%p2304_p2)
}
  0x1f   : > { %s2354_s28 = smov 64   ;;  %s2355_s29 = smov 4  }
  0x20   : > { %2196 = dma.hbm_to_vmem [thread:$0]  (!%p2397_p5), %s2859_s1, 1024, %s127_s15, [#allocation4], %s2354_s28, %s2354_s28, %s2355_s29  }
  0x21   : > { %s2308_s7 = scalar_lea.hbm %s2860_s2, 16 }
  0x22   : > { %p2309_p6 = scmp.ne.s32.totalorder %s2860_s2, %s2308_s7  ;;  %p2315_p8 = scmp.lt.u32.totalorder %s2308_s7, %s2860_s2 }
  0x24   : > { %p2311_p2 = pnand %p2309_p6, %p2282_p7 }
  0x26   : > { %p2312_p3 = pneg %p2311_p2 }
  0x28   : > { %p2317_p9 = pnand %p2315_p8, %p2312_p3 }
  0x2a   : > { %2320 = shalt.err (!%p2317_p9)
}
  0x2b   : > { %s2321_s14 = scalar_lea.vmem %s2401_s18, 16  ;;  %s2328_s15 = scalar_lea.vmem %s2401_s18, 32 }
  0x2c   : > { %p2322_p10 = scmp.ne.s32.totalorder %s2401_s18, %s2321_s14  ;;  %p2329_p13 = scmp.lt.s32.totalorder %s2401_s18, %s2401_s18 }
  0x2d   : > { %p2330_p0 = scmp.lt.s32.totalorder %s2328_s15, %s2321_s14 }
  0x2e   : > { %p2324_p11 = pnand %p2322_p10, %p2282_p7 }
  0x2f   : > { %p2331_p1 = por %p2330_p0, %p2329_p13 }
  0x30   : > { %p2325_p12 = pneg %p2324_p11 }
  0x32   : > { %p2332_p4 = pnand %p2331_p1, %p2325_p12 }
  0x34   : > { %2335 = shalt.err (!%p2332_p4)
}
  0x35   : > { %2199 = dma.hbm_to_vmem [thread:$0]  (!%p2397_p5), %s2860_s2, 16, %s2401_s18, [#allocation6]  }
  0x36   : > { %p2866_p6 = scmp.ne.s32.totalorder %s2864_s16, 0 }
  0x37   : > { %p2867_p7 = scmp.eq.s32.totalorder (!%p2866_p6), %s2384_s13, 0 }
  0x38   : > { %161 = sbr.rel (%p2866_p6) target bundleno = 542 (0x21e), region = 32 }
  0x3f   : > { %2341 = dma.done.wait (%p2867_p7), [#allocation4], 1024   ;;  %p2868_p2 = pmov %p2867_p7 }
  0x41   : > { %2343 = vsyncadd (%p2868_p2), [#allocation4], 4294966272  ;;  %p2869_p3 = pmov %p2868_p2 }
  0x42   : > { %p2870_p8 = pmov %p2868_p2 }
  0x43   : > { %2345 = dma.done.wait (%p2869_p3), [#allocation6], 16  }
  0x44   : > { %2347 = vsyncadd (%p2870_p8), [#allocation6], 4294967280  ;;  %p189_p9 = scmp.lt.s32.totalorder %s2384_s13, 1  ;;  %v2356_v0 = vmov 0.0   ;;  %vm2357_vm0 = vmmov 0   ;;  %v2218_v1 = vld [vmem:[#allocation3] sm:$0xff]  }
  0x45   : > { %1939 = vmatprep.subr.bf16.mxu0 %v2356_v0  ;;  %2167 = vmatprep.subr.bf16.mxu1 %v2356_v0  ;;  %v2219_v2 = vld [vmem:[#allocation3 + $0x8] sm:$0xff]   ;;  %v2220_v3 = vld [vmem:[#allocation3 + $0x10] sm:$0xff]   ;;  %v2221_v4 = vld [vmem:[#allocation3 + $0x18] sm:$0xff]  }
  0x46   : > { %s2872_s13 = smov (!%p189_p9, %s2384_s13), 1  ;;  %1955 = vmatprep.mubr.msk.bf16.mxu0 %vm2357_vm0, %v2356_v0  ;;  %2063 = vmatprep.mubr.msk.bf16.mxu1 %vm2357_vm0, %v2356_v0  ;;  %v2222_v5 = vld [vmem:[#allocation3 + $0x20] sm:$0xff]   ;;  %v2223_v6 = vld [vmem:[#allocation3 + $0x28] sm:$0xff]   ;;  %v2224_v7 = vld [vmem:[#allocation3 + $0x30] sm:$0xff]  }
  0x47   : > { %s2184_s16 = smul.u32 264, %s2872_s13  ;;  %1940 = vmatpush3.bf16.msra.mxu0 %v2218_v1  ;;  %2175 = vmatpush3.bf16.msra.mxu1 %v2218_v1  ;;  %v2225_v8 = vld [vmem:[#allocation3 + $0x38] sm:$0xff]   ;;  %v2718_v62 = vld [vmem:[#allocation5] ss:$0 sm:$0xff] }
  0x48   : > { %1941 = vmatprep.subr.bf16.mxu0 %v2356_v0  ;;  %2168 = vmatprep.subr.bf16.mxu1 %v2356_v0  ;;  %s2183_s22 = smul.u32 420, %s2872_s13 }
  0x49   : > { %s2475_s21 = scalar_lea.vmem %s2861_s3, %s2184_s16 }
  0x4a   : > { %1358 = vst [vmem:[%s2475_s21] sm:$0xff] %v2356_v0  ;;  %1359 = vst [vmem:[%s2475_s21 + $0x8] sm:$0xff] %v2356_v0  ;;  %s2551_s25 = scalar_lea.vmem %s2858_s0, %s2183_s22 }
  0x4b   : > { %1388 = vst [vmem:[%s2475_s21 + $0xf0] sm:$0xff] %v2356_v0  ;;  %1389 = vst [vmem:[%s2475_s21 + $0xf8] sm:$0xff] %v2356_v0  ;;  %1942 = vmatpush3.bf16.msra.mxu0 %v2219_v2  ;;  %2176 = vmatpush3.bf16.msra.mxu1 %v2219_v2  ;;  %v2226_v9 = vld [vmem:[%s2551_s25] sm:$0xff]   ;;  %v2227_v10 = vld [vmem:[%s2551_s25 + $0xd8] sm:$0xff]  }
  0x4c   : > { %1390 = vst [vmem:[%s2475_s21 + $0x100] sm:$0xff] %v2356_v0  ;;  %1360 = vst [vmem:[%s2475_s21 + $0x10] sm:$0xff] %v2356_v0  ;;  %1943 = vmatprep.subr.bf16.mxu0 %v2356_v0  ;;  %2169 = vmatprep.subr.bf16.mxu1 %v2356_v0  ;;  %v2228_v11 = vld [vmem:[%s2551_s25 + $0x8] sm:$0xff]   ;;  %v2229_v12 = vld [vmem:[%s2551_s25 + $0xe0] sm:$0xff]  }
  0x4d   : > { %1361 = vst [vmem:[%s2475_s21 + $0x18] sm:$0xff] %v2356_v0  ;;  %1362 = vst [vmem:[%s2475_s21 + $0x20] sm:$0xff] %v2356_v0  ;;  %v2230_v13 = vld [vmem:[%s2551_s25 + $0x10] sm:$0xff]   ;;  %v2231_v14 = vld [vmem:[%s2551_s25 + $0xe8] sm:$0xff]  }
  0x4e   : > { %1363 = vst [vmem:[%s2475_s21 + $0x28] sm:$0xff] %v2356_v0  ;;  %1364 = vst [vmem:[%s2475_s21 + $0x30] sm:$0xff] %v2356_v0  ;;  %v2232_v15 = vld [vmem:[%s2551_s25 + $0x18] sm:$0xff]   ;;  %v2233_v16 = vld [vmem:[%s2551_s25 + $0xf0] sm:$0xff]  }
  0x4f   : > { %1365 = vst [vmem:[%s2475_s21 + $0x38] sm:$0xff] %v2356_v0  ;;  %1366 = vst [vmem:[%s2475_s21 + $0x40] sm:$0xff] %v2356_v0  ;;  %1944 = vmatpush3.bf16.msra.mxu0 %v2220_v3  ;;  %2177 = vmatpush3.bf16.msra.mxu1 %v2220_v3  ;;  %v2234_v17 = vld [vmem:[%s2551_s25 + $0x20] sm:$0xff]   ;;  %v2235_v18 = vld [vmem:[%s2551_s25 + $0xf8] sm:$0xff]  }
  0x50   : > { %1367 = vst [vmem:[%s2475_s21 + $0x48] sm:$0xff] %v2356_v0  ;;  %1368 = vst [vmem:[%s2475_s21 + $0x50] sm:$0xff] %v2356_v0  ;;  %1945 = vmatprep.subr.bf16.mxu0 %v2356_v0  ;;  %2170 = vmatprep.subr.bf16.mxu1 %v2356_v0  ;;  %v2236_v19 = vld [vmem:[%s2551_s25 + $0x28] sm:$0xff]   ;;  %v2237_v20 = vld [vmem:[%s2551_s25 + $0x100] sm:$0xff]  }
  0x51   : > { %1369 = vst [vmem:[%s2475_s21 + $0x58] sm:$0xff] %v2356_v0  ;;  %1370 = vst [vmem:[%s2475_s21 + $0x60] sm:$0xff] %v2356_v0  ;;  %v2238_v21 = vld [vmem:[%s2551_s25 + $0x30] sm:$0xff]   ;;  %v2239_v22 = vld [vmem:[%s2551_s25 + $0x108] sm:$0xff]  }
  0x52   : > { %1371 = vst [vmem:[%s2475_s21 + $0x68] sm:$0xff] %v2356_v0  ;;  %1372 = vst [vmem:[%s2475_s21 + $0x70] sm:$0xff] %v2356_v0  ;;  %v2240_v23 = vld [vmem:[%s2551_s25 + $0x38] sm:$0xff]   ;;  %v2241_v24 = vld [vmem:[%s2551_s25 + $0x110] sm:$0xff]  }
  0x53   : > { %1373 = vst [vmem:[%s2475_s21 + $0x78] sm:$0xff] %v2356_v0  ;;  %1374 = vst [vmem:[%s2475_s21 + $0x80] sm:$0xff] %v2356_v0  ;;  %1946 = vmatpush3.bf16.msra.mxu0 %v2221_v4  ;;  %2178 = vmatpush3.bf16.msra.mxu1 %v2221_v4  ;;  %v2242_v25 = vld [vmem:[%s2551_s25 + $0x40] sm:$0xff]   ;;  %v2243_v26 = vld [vmem:[%s2551_s25 + $0x118] sm:$0xff]  }
  0x54   : > { %1375 = vst [vmem:[%s2475_s21 + $0x88] sm:$0xff] %v2356_v0  ;;  %1376 = vst [vmem:[%s2475_s21 + $0x90] sm:$0xff] %v2356_v0  ;;  %1947 = vmatprep.subr.bf16.mxu0 %v2356_v0  ;;  %2171 = vmatprep.subr.bf16.mxu1 %v2356_v0  ;;  %v2244_v27 = vld [vmem:[%s2551_s25 + $0x48] sm:$0xff]   ;;  %v2245_v28 = vld [vmem:[%s2551_s25 + $0x120] sm:$0xff]  }
  0x55   : > { %1377 = vst [vmem:[%s2475_s21 + $0x98] sm:$0xff] %v2356_v0  ;;  %1378 = vst [vmem:[%s2475_s21 + $0xa0] sm:$0xff] %v2356_v0  ;;  %v2246_v29 = vld [vmem:[%s2551_s25 + $0x50] sm:$0xff]   ;;  %v2247_v30 = vld [vmem:[%s2551_s25 + $0x128] sm:$0xff]  }
  0x56   : > { %1379 = vst [vmem:[%s2475_s21 + $0xa8] sm:$0xff] %v2356_v0  ;;  %1380 = vst [vmem:[%s2475_s21 + $0xb0] sm:$0xff] %v2356_v0  ;;  %v2248_v31 = vld [vmem:[%s2551_s25 + $0x58] sm:$0xff]   ;;  %v2249_v32 = vld [vmem:[%s2551_s25 + $0x130] sm:$0xff]  }
  0x57   : > { %1381 = vst [vmem:[%s2475_s21 + $0xb8] sm:$0xff] %v2356_v0  ;;  %1382 = vst [vmem:[%s2475_s21 + $0xc0] sm:$0xff] %v2356_v0  ;;  %1948 = vmatpush3.bf16.msra.mxu0 %v2222_v5  ;;  %2179 = vmatpush3.bf16.msra.mxu1 %v2222_v5  ;;  %v2250_v33 = vld [vmem:[%s2551_s25 + $0x60] sm:$0xff]   ;;  %v2251_v34 = vld [vmem:[%s2551_s25 + $0x138] sm:$0xff]  }
  0x58   : > { %1383 = vst [vmem:[%s2475_s21 + $0xc8] sm:$0xff] %v2356_v0  ;;  %1384 = vst [vmem:[%s2475_s21 + $0xd0] sm:$0xff] %v2356_v0  ;;  %1949 = vmatprep.subr.bf16.mxu0 %v2356_v0  ;;  %2172 = vmatprep.subr.bf16.mxu1 %v2356_v0  ;;  %v2252_v35 = vld [vmem:[%s2551_s25 + $0x68] sm:$0xff]   ;;  %v2253_v36 = vld [vmem:[%s2551_s25 + $0x140] sm:$0xff]  }
  0x59   : > { %1385 = vst [vmem:[%s2475_s21 + $0xd8] sm:$0xff] %v2356_v0  ;;  %1386 = vst [vmem:[%s2475_s21 + $0xe0] sm:$0xff] %v2356_v0  ;;  %v2254_v37 = vld [vmem:[%s2551_s25 + $0x70] sm:$0xff]   ;;  %v2255_v38 = vld [vmem:[%s2551_s25 + $0x148] sm:$0xff]  }
  0x5a   : > { %1387 = vst [vmem:[%s2475_s21 + $0xe8] sm:$0xff] %v2356_v0  ;;  %v2256_v39 = vld [vmem:[%s2551_s25 + $0x78] sm:$0xff]   ;;  %v2257_v40 = vld [vmem:[%s2551_s25 + $0x150] sm:$0xff]   ;;  %v2258_v41 = vld [vmem:[%s2551_s25 + $0x80] sm:$0xff]  }
  0x5b   : > { %1950 = vmatpush3.bf16.msra.mxu0 %v2223_v6  ;;  %2180 = vmatpush3.bf16.msra.mxu1 %v2223_v6  ;;  %v2259_v42 = vld [vmem:[%s2551_s25 + $0x158] sm:$0xff]   ;;  %v2260_v43 = vld [vmem:[%s2551_s25 + $0x88] sm:$0xff]   ;;  %v2261_v44 = vld [vmem:[%s2551_s25 + $0x160] sm:$0xff]  }
  0x5c   : > { %1951 = vmatprep.subr.bf16.mxu0 %v2356_v0  ;;  %2173 = vmatprep.subr.bf16.mxu1 %v2356_v0  ;;  %v2262_v45 = vld [vmem:[%s2551_s25 + $0x90] sm:$0xff]   ;;  %v2263_v46 = vld [vmem:[%s2551_s25 + $0x168] sm:$0xff]   ;;  %v2264_v47 = vld [vmem:[%s2551_s25 + $0x98] sm:$0xff]  }
  0x5d   : > { %v2265_v48 = vld [vmem:[%s2551_s25 + $0x170] sm:$0xff]   ;;  %v2266_v49 = vld [vmem:[%s2551_s25 + $0xa0] sm:$0xff]   ;;  %v2267_v50 = vld [vmem:[%s2551_s25 + $0x178] sm:$0xff]  }
  0x5e   : > { %v2268_v51 = vld [vmem:[%s2551_s25 + $0xa8] sm:$0xff]   ;;  %v2269_v52 = vld [vmem:[%s2551_s25 + $0x180] sm:$0xff]   ;;  %v2270_v53 = vld [vmem:[%s2551_s25 + $0xb0] sm:$0xff]  }
  0x5f   : > { %1952 = vmatpush3.bf16.msra.mxu0 %v2224_v7  ;;  %2181 = vmatpush3.bf16.msra.mxu1 %v2224_v7  ;;  %v2271_v54 = vld [vmem:[%s2551_s25 + $0x188] sm:$0xff]   ;;  %v2272_v55 = vld [vmem:[%s2551_s25 + $0xb8] sm:$0xff]   ;;  %v2273_v56 = vld [vmem:[%s2551_s25 + $0x190] sm:$0xff]  }
  0x60   : > { %1953 = vmatprep.subr.bf16.mxu0 %v2356_v0  ;;  %2174 = vmatprep.subr.bf16.mxu1 %v2356_v0  ;;  %v2274_v57 = vld [vmem:[%s2551_s25 + $0xc0] sm:$0xff]   ;;  %v2275_v58 = vld [vmem:[%s2551_s25 + $0x198] sm:$0xff]   ;;  %v2276_v59 = vld [vmem:[%s2551_s25 + $0xc8] sm:$0xff]  }
  0x61   : > { %v2277_v60 = vld [vmem:[%s2551_s25 + $0x1a0] ss:$0 sps:$4 sm:$0xff]   ;;  %v2278_v61 = vld [vmem:[%s2551_s25 + $0xd0] sm:$0xff]  }
  0x63   : > { %1954 = vmatpush3.bf16.msra.mxu0 %v2225_v8  ;;  %2182 = vmatpush3.bf16.msra.mxu1 %v2225_v8 }
  0x66   : > { %1956 = vmatmul.mubr.bf16.vlgmr.msra.gmra.mrb[0].mxu0 %v2226_v9  ;;  %2064 = vmatmul.mubr.bf16.vlgmr.msra.gmra.mrb[0].mxu1 %v2227_v10 }
  0x67   : > { %1959 = vmatprep.mubr.msk.bf16.mxu0 %vm2357_vm0, %v2356_v0  ;;  %2067 = vmatprep.mubr.msk.bf16.mxu1 %vm2357_vm0, %v2356_v0 }
  0x6e   : > { %1960 = vmatmul.mubr.bf16.gmra.mrb[4].mxu0 %v2228_v11  ;;  %2068 = vmatmul.mubr.bf16.gmra.mrb[4].mxu1 %v2229_v12 }
  0x6f   : > { %1963 = vmatprep.mubr.msk.bf16.mxu0 %vm2357_vm0, %v2356_v0  ;;  %2071 = vmatprep.mubr.msk.bf16.mxu1 %vm2357_vm0, %v2356_v0 }
  0x76   : > { %1964 = vmatmul.mubr.bf16.gmra.mrb[8].mxu0 %v2230_v13  ;;  %2072 = vmatmul.mubr.bf16.gmra.mrb[8].mxu1 %v2231_v14 }
  0x77   : > { %1967 = vmatprep.mubr.msk.bf16.mxu0 %vm2357_vm0, %v2356_v0  ;;  %2075 = vmatprep.mubr.msk.bf16.mxu1 %vm2357_vm0, %v2356_v0 }
  0x7e   : > { %1968 = vmatmul.mubr.bf16.gmra.mrb[12].mxu0 %v2232_v15  ;;  %2076 = vmatmul.mubr.bf16.gmra.mrb[12].mxu1 %v2233_v16 }
  0x7f   : > { %1971 = vmatprep.mubr.msk.bf16.mxu0 %vm2357_vm0, %v2356_v0  ;;  %2079 = vmatprep.mubr.msk.bf16.mxu1 %vm2357_vm0, %v2356_v0 }
  0x86   : > { %1972 = vmatmul.mubr.bf16.gmra.mrb[16].mxu0 %v2234_v17  ;;  %2080 = vmatmul.mubr.bf16.gmra.mrb[16].mxu1 %v2235_v18 }
  0x87   : > { %1975 = vmatprep.mubr.msk.bf16.mxu0 %vm2357_vm0, %v2356_v0  ;;  %2083 = vmatprep.mubr.msk.bf16.mxu1 %vm2357_vm0, %v2356_v0 }
  0x8e   : > { %1976 = vmatmul.mubr.bf16.gmra.mrb[20].mxu0 %v2236_v19  ;;  %2084 = vmatmul.mubr.bf16.gmra.mrb[20].mxu1 %v2237_v20 }
  0x8f   : > { %1979 = vmatprep.mubr.msk.bf16.mxu0 %vm2357_vm0, %v2356_v0  ;;  %2087 = vmatprep.mubr.msk.bf16.mxu1 %vm2357_vm0, %v2356_v0 }
  0x96   : > { %1980 = vmatmul.mubr.bf16.gmra.mrb[24].mxu0 %v2238_v21  ;;  %2088 = vmatmul.mubr.bf16.gmra.mrb[24].mxu1 %v2239_v22 }
  0x97   : > { %1983 = vmatprep.mubr.msk.bf16.mxu0 %vm2357_vm0, %v2356_v0  ;;  %2091 = vmatprep.mubr.msk.bf16.mxu1 %vm2357_vm0, %v2356_v0 }
  0x9e   : > { %1984 = vmatmul.mubr.bf16.gmra.mrb[28].mxu0 %v2240_v23  ;;  %2092 = vmatmul.mubr.bf16.gmra.mrb[28].mxu1 %v2241_v24 }
  0x9f   : > { %1987 = vmatprep.mubr.msk.bf16.mxu0 %vm2357_vm0, %v2356_v0  ;;  %2095 = vmatprep.mubr.msk.bf16.mxu1 %vm2357_vm0, %v2356_v0 }
  0xa6   : > { %1988 = vmatmul.mubr.bf16.gmra.mrb[32].mxu0 %v2242_v25  ;;  %2096 = vmatmul.mubr.bf16.gmra.mrb[32].mxu1 %v2243_v26 }
  0xa7   : > { %1991 = vmatprep.mubr.msk.bf16.mxu0 %vm2357_vm0, %v2356_v0  ;;  %2099 = vmatprep.mubr.msk.bf16.mxu1 %vm2357_vm0, %v2356_v0 }
  0xae   : > { %1992 = vmatmul.mubr.bf16.gmra.mrb[36].mxu0 %v2244_v27  ;;  %2100 = vmatmul.mubr.bf16.gmra.mrb[36].mxu1 %v2245_v28 }
  0xaf   : > { %1995 = vmatprep.mubr.msk.bf16.mxu0 %vm2357_vm0, %v2356_v0  ;;  %2103 = vmatprep.mubr.msk.bf16.mxu1 %vm2357_vm0, %v2356_v0 }
  0xb6   : > { %1996 = vmatmul.mubr.bf16.gmra.mrb[40].mxu0 %v2246_v29  ;;  %2104 = vmatmul.mubr.bf16.gmra.mrb[40].mxu1 %v2247_v30 }
  0xb7   : > { %1999 = vmatprep.mubr.msk.bf16.mxu0 %vm2357_vm0, %v2356_v0  ;;  %2107 = vmatprep.mubr.msk.bf16.mxu1 %vm2357_vm0, %v2356_v0 }
  0xbe   : > { %2000 = vmatmul.mubr.bf16.gmra.mrb[44].mxu0 %v2248_v31  ;;  %2108 = vmatmul.mubr.bf16.gmra.mrb[44].mxu1 %v2249_v32 }
  0xbf   : > { %2003 = vmatprep.mubr.msk.bf16.mxu0 %vm2357_vm0, %v2356_v0  ;;  %2111 = vmatprep.mubr.msk.bf16.mxu1 %vm2357_vm0, %v2356_v0 }
  0xc6   : > { %2004 = vmatmul.mubr.bf16.gmra.mrb[48].mxu0 %v2250_v33  ;;  %2112 = vmatmul.mubr.bf16.gmra.mrb[48].mxu1 %v2251_v34 }
  0xc7   : > { %2007 = vmatprep.mubr.msk.bf16.mxu0 %vm2357_vm0, %v2356_v0  ;;  %2115 = vmatprep.mubr.msk.bf16.mxu1 %vm2357_vm0, %v2356_v0 }
  0xce   : > { %2008 = vmatmul.mubr.bf16.gmra.mrb[52].mxu0 %v2252_v35  ;;  %2116 = vmatmul.mubr.bf16.gmra.mrb[52].mxu1 %v2253_v36 }
  0xcf   : > { %2011 = vmatprep.mubr.msk.bf16.mxu0 %vm2357_vm0, %v2356_v0  ;;  %2119 = vmatprep.mubr.msk.bf16.mxu1 %vm2357_vm0, %v2356_v0 }
  0xd6   : > { %2012 = vmatmul.mubr.bf16.gmra.mrb[56].mxu0 %v2254_v37  ;;  %2120 = vmatmul.mubr.bf16.gmra.mrb[56].mxu1 %v2255_v38 }
  0xd7   : > { %2015 = vmatprep.mubr.msk.bf16.mxu0 %vm2357_vm0, %v2356_v0  ;;  %2123 = vmatprep.mubr.msk.bf16.mxu1 %vm2357_vm0, %v2356_v0 }
  0xde   : > { %2016 = vmatmul.mubr.bf16.gmra.mrb[60].mxu0 %v2256_v39  ;;  %2124 = vmatmul.mubr.bf16.gmra.mrb[60].mxu1 %v2257_v40 }
  0xdf   : > { %2019 = vmatprep.mubr.msk.bf16.mxu0 %vm2357_vm0, %v2356_v0  ;;  %2127 = vmatprep.mubr.msk.bf16.mxu1 %vm2357_vm0, %v2356_v0 }
  0xe6   : > { %2020 = vmatmul.mubr.bf16.gmra.mrb[64].mxu0 %v2258_v41  ;;  %2128 = vmatmul.mubr.bf16.gmra.mrb[64].mxu1 %v2259_v42 }
  0xe7   : > { %2023 = vmatprep.mubr.msk.bf16.mxu0 %vm2357_vm0, %v2356_v0  ;;  %2131 = vmatprep.mubr.msk.bf16.mxu1 %vm2357_vm0, %v2356_v0 }
  0xee   : > { %2024 = vmatmul.mubr.bf16.gmra.mrb[68].mxu0 %v2260_v43  ;;  %2132 = vmatmul.mubr.bf16.gmra.mrb[68].mxu1 %v2261_v44 }
  0xef   : > { %2027 = vmatprep.mubr.msk.bf16.mxu0 %vm2357_vm0, %v2356_v0  ;;  %2135 = vmatprep.mubr.msk.bf16.mxu1 %vm2357_vm0, %v2356_v0 }
  0xf6   : > { %2028 = vmatmul.mubr.bf16.gmra.mrb[72].mxu0 %v2262_v45  ;;  %2136 = vmatmul.mubr.bf16.gmra.mrb[72].mxu1 %v2263_v46 }
  0xf7   : > { %2031 = vmatprep.mubr.msk.bf16.mxu0 %vm2357_vm0, %v2356_v0  ;;  %2139 = vmatprep.mubr.msk.bf16.mxu1 %vm2357_vm0, %v2356_v0 }
  0xfe   : > { %2032 = vmatmul.mubr.bf16.gmra.mrb[76].mxu0 %v2264_v47  ;;  %2140 = vmatmul.mubr.bf16.gmra.mrb[76].mxu1 %v2265_v48 }
  0xff   : > { %2035 = vmatprep.mubr.msk.bf16.mxu0 %vm2357_vm0, %v2356_v0  ;;  %2143 = vmatprep.mubr.msk.bf16.mxu1 %vm2357_vm0, %v2356_v0 }
 0x106   : > { %2036 = vmatmul.mubr.bf16.gmra.mrb[80].mxu0 %v2266_v49  ;;  %2144 = vmatmul.mubr.bf16.gmra.mrb[80].mxu1 %v2267_v50 }
 0x107   : > { %2039 = vmatprep.mubr.msk.bf16.mxu0 %vm2357_vm0, %v2356_v0  ;;  %2147 = vmatprep.mubr.msk.bf16.mxu1 %vm2357_vm0, %v2356_v0 }
 0x10e   : > { %2040 = vmatmul.mubr.bf16.gmra.mrb[84].mxu0 %v2268_v51  ;;  %2148 = vmatmul.mubr.bf16.gmra.mrb[84].mxu1 %v2269_v52 }
 0x10f   : > { %2043 = vmatprep.mubr.msk.bf16.mxu0 %vm2357_vm0, %v2356_v0  ;;  %2151 = vmatprep.mubr.msk.bf16.mxu1 %vm2357_vm0, %v2356_v0 }
 0x116   : > { %2044 = vmatmul.mubr.bf16.gmra.mrb[88].mxu0 %v2270_v53  ;;  %2152 = vmatmul.mubr.bf16.gmra.mrb[88].mxu1 %v2271_v54 }
 0x117   : > { %2047 = vmatprep.mubr.msk.bf16.mxu0 %vm2357_vm0, %v2356_v0  ;;  %2155 = vmatprep.mubr.msk.bf16.mxu1 %vm2357_vm0, %v2356_v0 }
 0x11e   : > { %2048 = vmatmul.mubr.bf16.gmra.mrb[92].mxu0 %v2272_v55  ;;  %2156 = vmatmul.mubr.bf16.gmra.mrb[92].mxu1 %v2273_v56 }
 0x11f   : > { %2051 = vmatprep.mubr.msk.bf16.mxu0 %vm2357_vm0, %v2356_v0  ;;  %2159 = vmatprep.mubr.msk.bf16.mxu1 %vm2357_vm0, %v2356_v0 }
 0x126   : > { %2052 = vmatmul.mubr.bf16.gmra.mrb[96].mxu0 %v2274_v57  ;;  %2160 = vmatmul.mubr.bf16.gmra.mrb[96].mxu1 %v2275_v58 }
 0x127   : > { %2055 = vmatprep.mubr.msk.bf16.mxu0 %vm2357_vm0, %v2356_v0  ;;  %2163 = vmatprep.mubr.msk.bf16.mxu1 %vm2357_vm0, %v2356_v0 }
 0x12e   : > { %2056 = vmatmul.mubr.bf16.gmra.mrb[100].mxu0 %v2276_v59  ;;  %2164 = vmatmul.mubr.bf16.gmra.mrb[100].mxu1 %v2277_v60 }
 0x12f   : > { %2059 = vmatprep.mubr.msk.bf16.mxu0 %vm2357_vm0, %v2356_v0 }
 0x136   : > { %2060 = vmatmul.mubr.bf16.gmra.mrb[104].mxu0 %v2278_v61 }
 0x139   : > { %v726_v63 = vpop.f32.mrb[0].mxu0  ;;  %v942_v1 = vpop.f32.mrb[0].mxu1 }
 0x13a   : > { %v727_v2 = vadd.f32 %v2718_v62, %v726_v63  ;;  %v1957_v3 = vpop.f32.mrb[1].mxu0  ;;  %v943_v4 = vadd.f32 %v2718_v62, %v942_v1  ;;  %v2065_v5 = vpop.f32.mrb[1].mxu1 }
 0x13b   : > { %v729_v6 = vpop.f32.mrb[2].mxu0  ;;  %v945_v7 = vpop.f32.mrb[2].mxu1 }
 0x13c   : > { %v1148_v8 = vmax.f32 %v727_v2, 0.0  ;;  %v730_v9 = vadd.f32 %v2718_v62, %v729_v6  ;;  %v1958_v10 = vpop.f32.mrb[3].mxu0  ;;  %v1202_v11 = vmax.f32 %v943_v4, 0.0  ;;  %v946_v0 = vadd.f32 %v2718_v62, %v945_v7  ;;  %v2066_v12 = vpop.f32.mrb[3].mxu1 }
 0x13e   : > { %1253 = vst [vmem:[#allocation2] sm:$0xff] %v1148_v8  ;;  %v1149_v13 = vmax.f32 %v730_v9, 0.0  ;;  %1307 = vst [vmem:[#allocation2 + $0x1b0] sm:$0xff] %v1202_v11  ;;  %v1203_v14 = vmax.f32 %v946_v0, 0.0 }
 0x140   : > { %1254 = vst [vmem:[#allocation2 + $0x8] sm:$0xff] %v1149_v13  ;;  %1308 = vst [vmem:[#allocation2 + $0x1b8] sm:$0xff] %v1203_v14 }
 0x141   : > { %v734_v15 = vpop.f32.mrb[4].mxu0  ;;  %v950_v16 = vpop.f32.mrb[4].mxu1 }
 0x142   : > { %v735_v17 = vadd.f32 %v2718_v62, %v734_v15  ;;  %v1961_v18 = vpop.f32.mrb[5].mxu0  ;;  %v951_v19 = vadd.f32 %v2718_v62, %v950_v16  ;;  %v2069_v20 = vpop.f32.mrb[5].mxu1 }
 0x143   : > { %v737_v21 = vpop.f32.mrb[6].mxu0  ;;  %v953_v22 = vpop.f32.mrb[6].mxu1 }
 0x144   : > { %v1150_v23 = vmax.f32 %v735_v17, 0.0  ;;  %v738_v24 = vadd.f32 %v2718_v62, %v737_v21  ;;  %v1962_v25 = vpop.f32.mrb[7].mxu0  ;;  %v1204_v26 = vmax.f32 %v951_v19, 0.0  ;;  %v954_v27 = vadd.f32 %v2718_v62, %v953_v22  ;;  %v2070_v28 = vpop.f32.mrb[7].mxu1 }
 0x146   : > { %1255 = vst [vmem:[#allocation2 + $0x10] sm:$0xff] %v1150_v23  ;;  %v1151_v29 = vmax.f32 %v738_v24, 0.0  ;;  %1309 = vst [vmem:[#allocation2 + $0x1c0] sm:$0xff] %v1204_v26  ;;  %v1205_v30 = vmax.f32 %v954_v27, 0.0 }
 0x147   : > { %v1391_v55 = vld [vmem:[#allocation2] ss:$2 sm:$0xff]  ;;  %v1395_v63 = vld [vmem:[#allocation2 + $0x1] ss:$2 sm:$0xff] }
 0x148   : > { %1256 = vst [vmem:[#allocation2 + $0x18] sm:$0xff] %v1151_v29  ;;  %1310 = vst [vmem:[#allocation2 + $0x1c8] sm:$0xff] %v1205_v30  ;;  %v1561_v1 = vld [vmem:[#allocation2 + $0x1b4] ss:$2 sm:$0x3f]  ;;  %v1406_v7 = vmax.f32 %v1391_v55, %v1395_v63 }
 0x149   : > { %v742_v31 = vpop.f32.mrb[8].mxu0  ;;  %v958_v32 = vpop.f32.mrb[8].mxu1  ;;  %v1565_v2 = vld [vmem:[#allocation2 + $0x1b5] ss:$2 sm:$0x3f] }
 0x14a   : > { %v743_v33 = vadd.f32 %v2718_v62, %v742_v31  ;;  %v959_v34 = vadd.f32 %v2718_v62, %v958_v32  ;;  %v1965_v35 = vpop.f32.mrb[9].mxu0  ;;  %v2073_v36 = vpop.f32.mrb[9].mxu1  ;;  %v1575_v11 = vmax.f32 %v1561_v1, %v1565_v2 }
 0x14b   : > { %v745_v37 = vpop.f32.mrb[10].mxu0  ;;  %v961_v38 = vpop.f32.mrb[10].mxu1 }
 0x14c   : > { %v1152_v39 = vmax.f32 %v743_v33, 0.0  ;;  %v1206_v40 = vmax.f32 %v959_v34, 0.0  ;;  %v746_v41 = vadd.f32 %v2718_v62, %v745_v37  ;;  %v962_v42 = vadd.f32 %v2718_v62, %v961_v38  ;;  %v1966_v43 = vpop.f32.mrb[11].mxu0  ;;  %v2074_v44 = vpop.f32.mrb[11].mxu1 }
 0x14e   : > { %1257 = vst [vmem:[#allocation2 + $0x20] sm:$0xff] %v1152_v39  ;;  %1311 = vst [vmem:[#allocation2 + $0x1d0] sm:$0xff] %v1206_v40  ;;  %v1153_v45 = vmax.f32 %v746_v41, 0.0  ;;  %v1207_v46 = vmax.f32 %v962_v42, 0.0 }
 0x14f   : > { %v1393_v28 = vld [vmem:[#allocation2 + $0x10] ss:$2 sm:$0x3f]  ;;  %v1397_v29 = vld [vmem:[#allocation2 + $0x11] ss:$2 sm:$0x3f] }
 0x150   : > { %1258 = vst [vmem:[#allocation2 + $0x28] sm:$0xff] %v1153_v45  ;;  %1312 = vst [vmem:[#allocation2 + $0x1d8] sm:$0xff] %v1207_v46  ;;  %v1407_v34 = vmax.f32 %v1393_v28, %v1397_v29 }
 0x151   : > { %v750_v47 = vpop.f32.mrb[12].mxu0  ;;  %v966_v48 = vpop.f32.mrb[12].mxu1 }
 0x152   : > { %v751_v49 = vadd.f32 %v2718_v62, %v750_v47  ;;  %v1969_v50 = vpop.f32.mrb[13].mxu0  ;;  %v967_v51 = vadd.f32 %v2718_v62, %v966_v48  ;;  %v2077_v52 = vpop.f32.mrb[13].mxu1 }
 0x153   : > { %v753_v53 = vpop.f32.mrb[14].mxu0  ;;  %v969_v54 = vpop.f32.mrb[14].mxu1 }
 0x154   : > { %v1154_v56 = vmax.f32 %v751_v49, 0.0  ;;  %v754_v57 = vadd.f32 %v2718_v62, %v753_v53  ;;  %v1970_v58 = vpop.f32.mrb[15].mxu0  ;;  %v1208_v59 = vmax.f32 %v967_v51, 0.0  ;;  %v970_v60 = vadd.f32 %v2718_v62, %v969_v54  ;;  %v2078_v61 = vpop.f32.mrb[15].mxu1 }
 0x156   : > { %1259 = vst [vmem:[#allocation2 + $0x30] sm:$0xff] %v1154_v56  ;;  %v1155_v3 = vmax.f32 %v754_v57, 0.0  ;;  %1313 = vst [vmem:[#allocation2 + $0x1e0] sm:$0xff] %v1208_v59  ;;  %v1209_v4 = vmax.f32 %v970_v60, 0.0 }
 0x157   : > { %v1399_v5 = vld [vmem:[#allocation2 + $0x1e] ss:$2 sm:$0xff]  ;;  %v1403_v6 = vld [vmem:[#allocation2 + $0x1f] ss:$2 sm:$0xff] }
 0x158   : > { %v1408_v8 = vmax.f32 %v1399_v5, %v1403_v6  ;;  %v1569_v9 = vld [vmem:[#allocation2 + $0x1d2] ss:$2 sm:$0x3f]  ;;  %v1573_v10 = vld [vmem:[#allocation2 + $0x1d3] ss:$2 sm:$0x3f] }
 0x159   : > { %1260 = vst [vmem:[#allocation2 + $0x38] sm:$0xff] %v1155_v3  ;;  %1314 = vst [vmem:[#allocation2 + $0x1e8] sm:$0xff] %v1209_v4  ;;  %v1577_v0 = vmax.f32 %v1569_v9, %v1573_v10  ;;  %v758_v12 = vpop.f32.mrb[16].mxu0  ;;  %v974_v13 = vpop.f32.mrb[16].mxu1 }
 0x15a   : > { %v1410_v14 = vmax.f32 %v1406_v7, %v1408_v8  ;;  %v759_v15 = vadd.f32 %v2718_v62, %v758_v12  ;;  %v1973_v16 = vpop.f32.mrb[17].mxu0  ;;  %v975_v17 = vadd.f32 %v2718_v62, %v974_v13  ;;  %v2081_v18 = vpop.f32.mrb[17].mxu1 }
 0x15b   : > { %v1579_v19 = vmax.f32 %v1575_v11, %v1577_v0  ;;  %v761_v20 = vpop.f32.mrb[18].mxu0  ;;  %v977_v21 = vpop.f32.mrb[18].mxu1 }
 0x15c   : > { %1412 = vst [vmem:[%s2475_s21 + $0x11] sm:$0xff] %v1410_v14  ;;  %v1156_v22 = vmax.f32 %v759_v15, 0.0  ;;  %v762_v23 = vadd.f32 %v2718_v62, %v761_v20  ;;  %v1974_v24 = vpop.f32.mrb[19].mxu0  ;;  %v1210_v25 = vmax.f32 %v975_v17, 0.0  ;;  %v978_v26 = vadd.f32 %v2718_v62, %v977_v21  ;;  %v2082_v27 = vpop.f32.mrb[19].mxu1 }
 0x15d   : > { %1581 = vst [vmem:[%s2475_s21 + $0x89] sm:$0x3f] %v1579_v19 }
 0x15e   : > { %1261 = vst [vmem:[#allocation2 + $0x40] sm:$0xff] %v1156_v22  ;;  %v1157_v30 = vmax.f32 %v762_v23, 0.0  ;;  %1315 = vst [vmem:[#allocation2 + $0x1f0] sm:$0xff] %v1210_v25  ;;  %v1211_v31 = vmax.f32 %v978_v26, 0.0 }
 0x160   : > { %v1401_v32 = vld [vmem:[#allocation2 + $0x2e] ss:$2 sm:$0x3f]  ;;  %v1405_v33 = vld [vmem:[#allocation2 + $0x2f] ss:$2 sm:$0x3f] }
 0x161   : > { %v1409_v35 = vmax.f32 %v1401_v32, %v1405_v33  ;;  %1262 = vst [vmem:[#allocation2 + $0x48] sm:$0xff] %v1157_v30  ;;  %1316 = vst [vmem:[#allocation2 + $0x1f8] sm:$0xff] %v1211_v31  ;;  %v766_v36 = vpop.f32.mrb[20].mxu0  ;;  %v982_v37 = vpop.f32.mrb[20].mxu1  ;;  %v1583_v5 = vld [vmem:[#allocation2 + $0x1e0] ss:$2 sm:$0xff] }
 0x162   : > { %v767_v39 = vadd.f32 %v2718_v62, %v766_v36  ;;  %v983_v40 = vadd.f32 %v2718_v62, %v982_v37  ;;  %v1977_v41 = vpop.f32.mrb[21].mxu0  ;;  %v2085_v42 = vpop.f32.mrb[21].mxu1  ;;  %v1587_v6 = vld [vmem:[#allocation2 + $0x1e1] ss:$2 sm:$0xff] }
 0x163   : > { %v1411_v38 = vmax.f32 %v1407_v34, %v1409_v35  ;;  %v769_v43 = vpop.f32.mrb[22].mxu0  ;;  %v985_v44 = vpop.f32.mrb[22].mxu1  ;;  %v1598_v11 = vmax.f32 %v1583_v5, %v1587_v6 }
 0x164   : > { %v1158_v45 = vmax.f32 %v767_v39, 0.0  ;;  %v1212_v46 = vmax.f32 %v983_v40, 0.0  ;;  %v770_v47 = vadd.f32 %v2718_v62, %v769_v43  ;;  %v986_v48 = vadd.f32 %v2718_v62, %v985_v44  ;;  %v1978_v49 = vpop.f32.mrb[23].mxu0  ;;  %v2086_v50 = vpop.f32.mrb[23].mxu1 }
 0x165   : > { %1413 = vst [vmem:[%s2475_s21 + $0x19] sm:$0x3f] %v1411_v38 }
 0x166   : > { %1263 = vst [vmem:[#allocation2 + $0x50] sm:$0xff] %v1158_v45  ;;  %1317 = vst [vmem:[#allocation2 + $0x200] sm:$0xff] %v1212_v46  ;;  %v1159_v51 = vmax.f32 %v770_v47, 0.0  ;;  %v1213_v52 = vmax.f32 %v986_v48, 0.0 }
 0x168   : > { %1264 = vst [vmem:[#allocation2 + $0x58] sm:$0xff] %v1159_v51  ;;  %1318 = vst [vmem:[#allocation2 + $0x208] sm:$0xff] %v1213_v52  ;;  %v1415_v21 = vld [vmem:[#allocation2 + $0x3c] ss:$2 sm:$0xff]  ;;  %v1419_v28 = vld [vmem:[#allocation2 + $0x3d] ss:$2 sm:$0xff] }
 0x169   : > { %v774_v53 = vpop.f32.mrb[24].mxu0  ;;  %v990_v54 = vpop.f32.mrb[24].mxu1  ;;  %v1585_v29 = vld [vmem:[#allocation2 + $0x1f0] ss:$2 sm:$0x3f]  ;;  %v1430_v35 = vmax.f32 %v1415_v21, %v1419_v28 }
 0x16a   : > { %v775_v55 = vadd.f32 %v2718_v62, %v774_v53  ;;  %v991_v56 = vadd.f32 %v2718_v62, %v990_v54  ;;  %v1981_v57 = vpop.f32.mrb[25].mxu0  ;;  %v2089_v58 = vpop.f32.mrb[25].mxu1  ;;  %v1589_v30 = vld [vmem:[#allocation2 + $0x1f1] ss:$2 sm:$0x3f] }
 0x16b   : > { %v777_v59 = vpop.f32.mrb[26].mxu0  ;;  %v993_v60 = vpop.f32.mrb[26].mxu1  ;;  %v1599_v39 = vmax.f32 %v1585_v29, %v1589_v30 }
 0x16c   : > { %v1160_v61 = vmax.f32 %v775_v55, 0.0  ;;  %v1214_v63 = vmax.f32 %v991_v56, 0.0  ;;  %v778_v1 = vadd.f32 %v2718_v62, %v777_v59  ;;  %v994_v2 = vadd.f32 %v2718_v62, %v993_v60  ;;  %v1982_v3 = vpop.f32.mrb[27].mxu0  ;;  %v2090_v4 = vpop.f32.mrb[27].mxu1 }
 0x16d   : > { %v1417_v43 = vld [vmem:[#allocation2 + $0x4c] ss:$2 sm:$0x3f]  ;;  %v1421_v49 = vld [vmem:[#allocation2 + $0x4d] ss:$2 sm:$0x3f] }
 0x16e   : > { %1265 = vst [vmem:[#allocation2 + $0x60] sm:$0xff] %v1160_v61  ;;  %1319 = vst [vmem:[#allocation2 + $0x210] sm:$0xff] %v1214_v63  ;;  %v1161_v7 = vmax.f32 %v778_v1, 0.0  ;;  %v1215_v8 = vmax.f32 %v994_v2, 0.0  ;;  %v1431_v61 = vmax.f32 %v1417_v43, %v1421_v49 }
 0x16f   : > { %v1591_v9 = vld [vmem:[#allocation2 + $0x1fe] ss:$2 sm:$0xff]  ;;  %v1595_v10 = vld [vmem:[#allocation2 + $0x1ff] ss:$2 sm:$0xff] }
 0x170   : > { %v1600_v0 = vmax.f32 %v1591_v9, %v1595_v10  ;;  %1266 = vst [vmem:[#allocation2 + $0x68] sm:$0xff] %v1161_v7  ;;  %1320 = vst [vmem:[#allocation2 + $0x218] sm:$0xff] %v1215_v8 }
 0x171   : > { %v782_v12 = vpop.f32.mrb[28].mxu0  ;;  %v998_v13 = vpop.f32.mrb[28].mxu1 }
 0x172   : > { %v1602_v14 = vmax.f32 %v1598_v11, %v1600_v0  ;;  %v783_v15 = vadd.f32 %v2718_v62, %v782_v12  ;;  %v999_v16 = vadd.f32 %v2718_v62, %v998_v13  ;;  %v1985_v17 = vpop.f32.mrb[29].mxu0  ;;  %v2093_v18 = vpop.f32.mrb[29].mxu1 }
 0x173   : > { %v785_v19 = vpop.f32.mrb[30].mxu0  ;;  %v1001_v20 = vpop.f32.mrb[30].mxu1 }
 0x174   : > { %1604 = vst [vmem:[%s2475_s21 + $0x91] sm:$0xff] %v1602_v14  ;;  %v1162_v22 = vmax.f32 %v783_v15, 0.0  ;;  %v1216_v23 = vmax.f32 %v999_v16, 0.0  ;;  %v786_v24 = vadd.f32 %v2718_v62, %v785_v19  ;;  %v1002_v25 = vadd.f32 %v2718_v62, %v1001_v20  ;;  %v1986_v26 = vpop.f32.mrb[31].mxu0  ;;  %v2094_v27 = vpop.f32.mrb[31].mxu1 }
 0x176   : > { %1267 = vst [vmem:[#allocation2 + $0x70] sm:$0xff] %v1162_v22  ;;  %1321 = vst [vmem:[#allocation2 + $0x220] sm:$0xff] %v1216_v23  ;;  %v1163_v31 = vmax.f32 %v786_v24, 0.0  ;;  %v1217_v32 = vmax.f32 %v1002_v25, 0.0 }
 0x177   : > { %v1423_v33 = vld [vmem:[#allocation2 + $0x5a] ss:$2 sm:$0xff]  ;;  %v1427_v34 = vld [vmem:[#allocation2 + $0x5b] ss:$2 sm:$0xff] }
 0x178   : > { %v1432_v36 = vmax.f32 %v1423_v33, %v1427_v34  ;;  %v1593_v37 = vld [vmem:[#allocation2 + $0x20e] ss:$2 sm:$0x3f]  ;;  %v1597_v38 = vld [vmem:[#allocation2 + $0x20f] ss:$2 sm:$0x3f] }
 0x179   : > { %1268 = vst [vmem:[#allocation2 + $0x78] sm:$0xff] %v1163_v31  ;;  %1322 = vst [vmem:[#allocation2 + $0x228] sm:$0xff] %v1217_v32  ;;  %v1601_v40 = vmax.f32 %v1593_v37, %v1597_v38  ;;  %v790_v41 = vpop.f32.mrb[32].mxu0  ;;  %v1006_v42 = vpop.f32.mrb[32].mxu1 }
 0x17a   : > { %v1434_v44 = vmax.f32 %v1430_v35, %v1432_v36  ;;  %v791_v45 = vadd.f32 %v2718_v62, %v790_v41  ;;  %v1989_v46 = vpop.f32.mrb[33].mxu0  ;;  %v1007_v47 = vadd.f32 %v2718_v62, %v1006_v42  ;;  %v2097_v48 = vpop.f32.mrb[33].mxu1 }
 0x17b   : > { %v1603_v50 = vmax.f32 %v1599_v39, %v1601_v40  ;;  %v793_v51 = vpop.f32.mrb[34].mxu0  ;;  %v1009_v52 = vpop.f32.mrb[34].mxu1 }
 0x17c   : > { %1436 = vst [vmem:[%s2475_s21 + $0x21] sm:$0xff] %v1434_v44  ;;  %v1164_v53 = vmax.f32 %v791_v45, 0.0  ;;  %v794_v54 = vadd.f32 %v2718_v62, %v793_v51  ;;  %v1218_v55 = vmax.f32 %v1007_v47, 0.0  ;;  %v1990_v56 = vpop.f32.mrb[35].mxu0  ;;  %v1010_v57 = vadd.f32 %v2718_v62, %v1009_v52  ;;  %v2098_v58 = vpop.f32.mrb[35].mxu1 }
 0x17d   : > { %1605 = vst [vmem:[%s2475_s21 + $0x99] sm:$0x3f] %v1603_v50  ;;  %v1425_v59 = vld [vmem:[#allocation2 + $0x6a] ss:$2 sm:$0x3f] }
 0x17e   : > { %v1429_v60 = vld [vmem:[#allocation2 + $0x6b] ss:$2 sm:$0x3f]  ;;  %1269 = vst [vmem:[#allocation2 + $0x80] sm:$0xff] %v1164_v53  ;;  %v1165_v1 = vmax.f32 %v794_v54, 0.0  ;;  %1323 = vst [vmem:[#allocation2 + $0x230] sm:$0xff] %v1218_v55 }
 0x17f   : > { %v1433_v63 = vmax.f32 %v1425_v59, %v1429_v60  ;;  %v1219_v2 = vmax.f32 %v1010_v57, 0.0 }
 0x180   : > { %1270 = vst [vmem:[#allocation2 + $0x88] sm:$0xff] %v1165_v1  ;;  %v1607_v33 = vld [vmem:[#allocation2 + $0x21c] ss:$2 sm:$0xff]  ;;  %v1611_v34 = vld [vmem:[#allocation2 + $0x21d] ss:$2 sm:$0xff] }
 0x181   : > { %v1435_v3 = vmax.f32 %v1431_v61, %v1433_v63  ;;  %1324 = vst [vmem:[#allocation2 + $0x238] sm:$0xff] %v1219_v2  ;;  %v798_v4 = vpop.f32.mrb[36].mxu0  ;;  %v1014_v5 = vpop.f32.mrb[36].mxu1  ;;  %v1622_v39 = vmax.f32 %v1607_v33, %v1611_v34 }
 0x182   : > { %v799_v6 = vadd.f32 %v2718_v62, %v798_v4  ;;  %v1015_v7 = vadd.f32 %v2718_v62, %v1014_v5  ;;  %v1993_v8 = vpop.f32.mrb[37].mxu0  ;;  %v2101_v9 = vpop.f32.mrb[37].mxu1 }
 0x183   : > { %1437 = vst [vmem:[%s2475_s21 + $0x29] sm:$0x3f] %v1435_v3  ;;  %v801_v10 = vpop.f32.mrb[38].mxu0  ;;  %v1017_v11 = vpop.f32.mrb[38].mxu1 }
 0x184   : > { %v1166_v0 = vmax.f32 %v799_v6, 0.0  ;;  %v1220_v12 = vmax.f32 %v1015_v7, 0.0  ;;  %v802_v13 = vadd.f32 %v2718_v62, %v801_v10  ;;  %v1018_v14 = vadd.f32 %v2718_v62, %v1017_v11  ;;  %v1994_v15 = vpop.f32.mrb[39].mxu0  ;;  %v2102_v16 = vpop.f32.mrb[39].mxu1 }
 0x185   : > { %v1439_v40 = vld [vmem:[#allocation2 + $0x78] ss:$2 sm:$0xff]  ;;  %v1443_v41 = vld [vmem:[#allocation2 + $0x79] ss:$2 sm:$0xff] }
 0x186   : > { %1271 = vst [vmem:[#allocation2 + $0x90] sm:$0xff] %v1166_v0  ;;  %1325 = vst [vmem:[#allocation2 + $0x240] sm:$0xff] %v1220_v12  ;;  %v1167_v17 = vmax.f32 %v802_v13, 0.0  ;;  %v1221_v18 = vmax.f32 %v1018_v14, 0.0  ;;  %v1454_v63 = vmax.f32 %v1439_v40, %v1443_v41 }
 0x187   : > { %v1609_v45 = vld [vmem:[#allocation2 + $0x22c] ss:$2 sm:$0x3f]  ;;  %v1613_v50 = vld [vmem:[#allocation2 + $0x22d] ss:$2 sm:$0x3f] }
 0x188   : > { %1272 = vst [vmem:[#allocation2 + $0x98] sm:$0xff] %v1167_v17  ;;  %1326 = vst [vmem:[#allocation2 + $0x248] sm:$0xff] %v1221_v18  ;;  %v1623_v4 = vmax.f32 %v1609_v45, %v1613_v50 }
 0x189   : > { %v806_v19 = vpop.f32.mrb[40].mxu0  ;;  %v1022_v20 = vpop.f32.mrb[40].mxu1 }
 0x18a   : > { %v807_v21 = vadd.f32 %v2718_v62, %v806_v19  ;;  %v1023_v22 = vadd.f32 %v2718_v62, %v1022_v20  ;;  %v1997_v23 = vpop.f32.mrb[41].mxu0  ;;  %v2105_v24 = vpop.f32.mrb[41].mxu1 }
 0x18b   : > { %v809_v25 = vpop.f32.mrb[42].mxu0  ;;  %v1025_v26 = vpop.f32.mrb[42].mxu1 }
 0x18c   : > { %v1168_v27 = vmax.f32 %v807_v21, 0.0  ;;  %v1222_v28 = vmax.f32 %v1023_v22, 0.0  ;;  %v810_v29 = vadd.f32 %v2718_v62, %v809_v25  ;;  %v1998_v30 = vpop.f32.mrb[43].mxu0  ;;  %v1026_v31 = vadd.f32 %v2718_v62, %v1025_v26  ;;  %v2106_v32 = vpop.f32.mrb[43].mxu1 }
 0x18d   : > { %v1441_v0 = vld [vmem:[#allocation2 + $0x88] ss:$2 sm:$0x3f]  ;;  %v1445_v16 = vld [vmem:[#allocation2 + $0x89] ss:$2 sm:$0x3f] }
 0x18e   : > { %1273 = vst [vmem:[#allocation2 + $0xa0] sm:$0xff] %v1168_v27  ;;  %1327 = vst [vmem:[#allocation2 + $0x250] sm:$0xff] %v1222_v28  ;;  %v1169_v35 = vmax.f32 %v810_v29, 0.0  ;;  %v1223_v36 = vmax.f32 %v1026_v31, 0.0  ;;  %v1455_v27 = vmax.f32 %v1441_v0, %v1445_v16 }
 0x18f   : > { %v1615_v37 = vld [vmem:[#allocation2 + $0x23a] ss:$2 sm:$0xff]  ;;  %v1619_v38 = vld [vmem:[#allocation2 + $0x23b] ss:$2 sm:$0xff] }
 0x190   : > { %1274 = vst [vmem:[#allocation2 + $0xa8] sm:$0xff] %v1169_v35  ;;  %1328 = vst [vmem:[#allocation2 + $0x258] sm:$0xff] %v1223_v36  ;;  %v1624_v42 = vmax.f32 %v1615_v37, %v1619_v38 }
 0x191   : > { %v814_v43 = vpop.f32.mrb[44].mxu0  ;;  %v1030_v44 = vpop.f32.mrb[44].mxu1 }
 0x192   : > { %v815_v46 = vadd.f32 %v2718_v62, %v814_v43  ;;  %v2001_v47 = vpop.f32.mrb[45].mxu0  ;;  %v1031_v48 = vadd.f32 %v2718_v62, %v1030_v44  ;;  %v2109_v49 = vpop.f32.mrb[45].mxu1  ;;  %v1626_v51 = vmax.f32 %v1622_v39, %v1624_v42 }
 0x193   : > { %v817_v52 = vpop.f32.mrb[46].mxu0  ;;  %v1033_v53 = vpop.f32.mrb[46].mxu1 }
 0x194   : > { %v1170_v54 = vmax.f32 %v815_v46, 0.0  ;;  %v818_v55 = vadd.f32 %v2718_v62, %v817_v52  ;;  %v1224_v56 = vmax.f32 %v1031_v48, 0.0  ;;  %v2002_v57 = vpop.f32.mrb[47].mxu0  ;;  %v1034_v58 = vadd.f32 %v2718_v62, %v1033_v53  ;;  %v2110_v59 = vpop.f32.mrb[47].mxu1  ;;  %1628 = vst [vmem:[%s2475_s21 + $0xa1] sm:$0xff] %v1626_v51 }
 0x195   : > { %v1447_v60 = vld [vmem:[#allocation2 + $0x96] ss:$2 sm:$0xff]  ;;  %v1451_v61 = vld [vmem:[#allocation2 + $0x97] ss:$2 sm:$0xff] }
 0x196   : > { %v1456_v1 = vmax.f32 %v1447_v60, %v1451_v61  ;;  %v1617_v2 = vld [vmem:[#allocation2 + $0x24a] ss:$2 sm:$0x3f]  ;;  %v1621_v3 = vld [vmem:[#allocation2 + $0x24b] ss:$2 sm:$0x3f] }
 0x197   : > { %1275 = vst [vmem:[#allocation2 + $0xb0] sm:$0xff] %v1170_v54  ;;  %1329 = vst [vmem:[#allocation2 + $0x260] sm:$0xff] %v1224_v56  ;;  %v1625_v5 = vmax.f32 %v1617_v2, %v1621_v3  ;;  %v1171_v6 = vmax.f32 %v818_v55, 0.0  ;;  %v1225_v7 = vmax.f32 %v1034_v58, 0.0 }
 0x198   : > { %v1458_v8 = vmax.f32 %v1454_v63, %v1456_v1 }
 0x199   : > { %v1627_v9 = vmax.f32 %v1623_v4, %v1625_v5  ;;  %1276 = vst [vmem:[#allocation2 + $0xb8] sm:$0xff] %v1171_v6  ;;  %v822_v10 = vpop.f32.mrb[48].mxu0  ;;  %1330 = vst [vmem:[#allocation2 + $0x268] sm:$0xff] %v1225_v7  ;;  %v1038_v11 = vpop.f32.mrb[48].mxu1 }
 0x19a   : > { %1460 = vst [vmem:[%s2475_s21 + $0x31] sm:$0xff] %v1458_v8  ;;  %v823_v12 = vadd.f32 %v2718_v62, %v822_v10  ;;  %v2005_v13 = vpop.f32.mrb[49].mxu0  ;;  %v1039_v14 = vadd.f32 %v2718_v62, %v1038_v11  ;;  %v2113_v15 = vpop.f32.mrb[49].mxu1 }
 0x19b   : > { %1629 = vst [vmem:[%s2475_s21 + $0xa9] sm:$0x3f] %v1627_v9  ;;  %v825_v17 = vpop.f32.mrb[50].mxu0  ;;  %v1041_v18 = vpop.f32.mrb[50].mxu1 }
 0x19c   : > { %v1172_v19 = vmax.f32 %v823_v12, 0.0  ;;  %v826_v20 = vadd.f32 %v2718_v62, %v825_v17  ;;  %v1226_v21 = vmax.f32 %v1039_v14, 0.0  ;;  %v2006_v22 = vpop.f32.mrb[51].mxu0  ;;  %v1042_v23 = vadd.f32 %v2718_v62, %v1041_v18  ;;  %v2114_v24 = vpop.f32.mrb[51].mxu1 }
 0x19e   : > { %v1449_v25 = vld [vmem:[#allocation2 + $0xa6] ss:$2 sm:$0x3f]  ;;  %v1453_v26 = vld [vmem:[#allocation2 + $0xa7] ss:$2 sm:$0x3f] }
 0x19f   : > { %v1457_v28 = vmax.f32 %v1449_v25, %v1453_v26  ;;  %1277 = vst [vmem:[#allocation2 + $0xc0] sm:$0xff] %v1172_v19  ;;  %v1173_v29 = vmax.f32 %v826_v20, 0.0  ;;  %1331 = vst [vmem:[#allocation2 + $0x270] sm:$0xff] %v1226_v21  ;;  %v1227_v30 = vmax.f32 %v1042_v23, 0.0  ;;  %v1631_v54 = vld [vmem:[#allocation2 + $0x258] ss:$2 sm:$0xff] }
 0x1a0   : > { %v1635_v55 = vld [vmem:[#allocation2 + $0x259] ss:$2 sm:$0xff] }
 0x1a1   : > { %v1459_v31 = vmax.f32 %v1455_v27, %v1457_v28  ;;  %1278 = vst [vmem:[#allocation2 + $0xc8] sm:$0xff] %v1173_v29  ;;  %1332 = vst [vmem:[#allocation2 + $0x278] sm:$0xff] %v1227_v30  ;;  %v830_v32 = vpop.f32.mrb[52].mxu0  ;;  %v1046_v33 = vpop.f32.mrb[52].mxu1  ;;  %v1646_v4 = vmax.f32 %v1631_v54, %v1635_v55 }
 0x1a2   : > { %v831_v34 = vadd.f32 %v2718_v62, %v830_v32  ;;  %v1047_v35 = vadd.f32 %v2718_v62, %v1046_v33  ;;  %v2009_v36 = vpop.f32.mrb[53].mxu0  ;;  %v2117_v37 = vpop.f32.mrb[53].mxu1 }
 0x1a3   : > { %1461 = vst [vmem:[%s2475_s21 + $0x39] sm:$0x3f] %v1459_v31  ;;  %v833_v38 = vpop.f32.mrb[54].mxu0  ;;  %v1049_v39 = vpop.f32.mrb[54].mxu1 }
 0x1a4   : > { %v1174_v40 = vmax.f32 %v831_v34, 0.0  ;;  %v1228_v41 = vmax.f32 %v1047_v35, 0.0  ;;  %v834_v42 = vadd.f32 %v2718_v62, %v833_v38  ;;  %v2010_v43 = vpop.f32.mrb[55].mxu0  ;;  %v1050_v44 = vadd.f32 %v2718_v62, %v1049_v39  ;;  %v2118_v45 = vpop.f32.mrb[55].mxu1 }
 0x1a6   : > { %1279 = vst [vmem:[#allocation2 + $0xd0] sm:$0xff] %v1174_v40  ;;  %1333 = vst [vmem:[#allocation2 + $0x280] sm:$0xff] %v1228_v41  ;;  %v1175_v46 = vmax.f32 %v834_v42, 0.0  ;;  %v1229_v47 = vmax.f32 %v1050_v44, 0.0  ;;  %v1463_v9 = vld [vmem:[#allocation2 + $0xb4] ss:$2 sm:$0xff] }
 0x1a7   : > { %v1467_v10 = vld [vmem:[#allocation2 + $0xb5] ss:$2 sm:$0xff]  ;;  %v1633_v13 = vld [vmem:[#allocation2 + $0x268] ss:$2 sm:$0x3f] }
 0x1a8   : > { %1280 = vst [vmem:[#allocation2 + $0xd8] sm:$0xff] %v1175_v46  ;;  %1334 = vst [vmem:[#allocation2 + $0x288] sm:$0xff] %v1229_v47  ;;  %v1465_v12 = vld [vmem:[#allocation2 + $0xc4] ss:$2 sm:$0x3f]  ;;  %v1478_v30 = vmax.f32 %v1463_v9, %v1467_v10 }
 0x1a9   : > { %v838_v48 = vpop.f32.mrb[56].mxu0  ;;  %v1054_v49 = vpop.f32.mrb[56].mxu1  ;;  %v1637_v14 = vld [vmem:[#allocation2 + $0x269] ss:$2 sm:$0x3f] }
 0x1aa   : > { %v839_v50 = vadd.f32 %v2718_v62, %v838_v48  ;;  %v1055_v51 = vadd.f32 %v2718_v62, %v1054_v49  ;;  %v2013_v52 = vpop.f32.mrb[57].mxu0  ;;  %v2121_v53 = vpop.f32.mrb[57].mxu1  ;;  %v1469_v19 = vld [vmem:[#allocation2 + $0xc5] ss:$2 sm:$0x3f]  ;;  %v1647_v35 = vmax.f32 %v1633_v13, %v1637_v14 }
 0x1ab   : > { %v841_v56 = vpop.f32.mrb[58].mxu0  ;;  %v1057_v57 = vpop.f32.mrb[58].mxu1  ;;  %v1479_v34 = vmax.f32 %v1465_v12, %v1469_v19 }
 0x1ac   : > { %v1176_v58 = vmax.f32 %v839_v50, 0.0  ;;  %v1230_v59 = vmax.f32 %v1055_v51, 0.0  ;;  %v842_v60 = vadd.f32 %v2718_v62, %v841_v56  ;;  %v2014_v61 = vpop.f32.mrb[59].mxu0  ;;  %v1058_v63 = vadd.f32 %v2718_v62, %v1057_v57  ;;  %v2122_v1 = vpop.f32.mrb[59].mxu1 }
 0x1ad   : > { %v1639_v2 = vld [vmem:[#allocation2 + $0x276] ss:$2 sm:$0xff]  ;;  %v1643_v3 = vld [vmem:[#allocation2 + $0x277] ss:$2 sm:$0xff] }
 0x1ae   : > { %v1648_v5 = vmax.f32 %v1639_v2, %v1643_v3  ;;  %1281 = vst [vmem:[#allocation2 + $0xe0] sm:$0xff] %v1176_v58  ;;  %1335 = vst [vmem:[#allocation2 + $0x290] sm:$0xff] %v1230_v59  ;;  %v1177_v6 = vmax.f32 %v842_v60, 0.0  ;;  %v1231_v7 = vmax.f32 %v1058_v63, 0.0 }
 0x1b0   : > { %v1650_v8 = vmax.f32 %v1646_v4, %v1648_v5  ;;  %1282 = vst [vmem:[#allocation2 + $0xe8] sm:$0xff] %v1177_v6  ;;  %1336 = vst [vmem:[#allocation2 + $0x298] sm:$0xff] %v1231_v7 }
 0x1b1   : > { %v846_v11 = vpop.f32.mrb[60].mxu0  ;;  %v1062_v0 = vpop.f32.mrb[60].mxu1 }
 0x1b2   : > { %1652 = vst [vmem:[%s2475_s21 + $0xb1] sm:$0xff] %v1650_v8  ;;  %v847_v15 = vadd.f32 %v2718_v62, %v846_v11  ;;  %v2017_v16 = vpop.f32.mrb[61].mxu0  ;;  %v1063_v17 = vadd.f32 %v2718_v62, %v1062_v0  ;;  %v2125_v18 = vpop.f32.mrb[61].mxu1 }
 0x1b3   : > { %v849_v20 = vpop.f32.mrb[62].mxu0  ;;  %v1065_v21 = vpop.f32.mrb[62].mxu1 }
 0x1b4   : > { %v1178_v22 = vmax.f32 %v847_v15, 0.0  ;;  %v850_v23 = vadd.f32 %v2718_v62, %v849_v20  ;;  %v1232_v24 = vmax.f32 %v1063_v17, 0.0  ;;  %v2018_v25 = vpop.f32.mrb[63].mxu0  ;;  %v1066_v26 = vadd.f32 %v2718_v62, %v1065_v21  ;;  %v2126_v27 = vpop.f32.mrb[63].mxu1 }
 0x1b5   : > { %v1471_v28 = vld [vmem:[#allocation2 + $0xd2] ss:$2 sm:$0xff]  ;;  %v1475_v29 = vld [vmem:[#allocation2 + $0xd3] ss:$2 sm:$0xff] }
 0x1b6   : > { %v1480_v31 = vmax.f32 %v1471_v28, %v1475_v29  ;;  %v1641_v32 = vld [vmem:[#allocation2 + $0x286] ss:$2 sm:$0x3f]  ;;  %v1645_v33 = vld [vmem:[#allocation2 + $0x287] ss:$2 sm:$0x3f] }
 0x1b7   : > { %1283 = vst [vmem:[#allocation2 + $0xf0] sm:$0xff] %v1178_v22  ;;  %1337 = vst [vmem:[#allocation2 + $0x2a0] sm:$0xff] %v1232_v24  ;;  %v1649_v36 = vmax.f32 %v1641_v32, %v1645_v33  ;;  %v1473_v37 = vld [vmem:[#allocation2 + $0xe2] ss:$2 sm:$0x3f]  ;;  %v1179_v41 = vmax.f32 %v850_v23, 0.0 }
 0x1b8   : > { %v1477_v38 = vld [vmem:[#allocation2 + $0xe3] ss:$2 sm:$0x3f]  ;;  %v1482_v39 = vmax.f32 %v1478_v30, %v1480_v31  ;;  %v1233_v42 = vmax.f32 %v1066_v26, 0.0 }
 0x1b9   : > { %v1481_v40 = vmax.f32 %v1473_v37, %v1477_v38  ;;  %v1651_v43 = vmax.f32 %v1647_v35, %v1649_v36  ;;  %v854_v44 = vpop.f32.mrb[64].mxu0  ;;  %v1070_v45 = vpop.f32.mrb[64].mxu1  ;;  %1284 = vst [vmem:[#allocation2 + $0xf8] sm:$0xff] %v1179_v41 }
 0x1ba   : > { %1484 = vst [vmem:[%s2475_s21 + $0x41] sm:$0xff] %v1482_v39  ;;  %v855_v47 = vadd.f32 %v2718_v62, %v854_v44  ;;  %v2021_v48 = vpop.f32.mrb[65].mxu0  ;;  %1338 = vst [vmem:[#allocation2 + $0x2a8] sm:$0xff] %v1233_v42  ;;  %v1071_v49 = vadd.f32 %v2718_v62, %v1070_v45  ;;  %v2129_v50 = vpop.f32.mrb[65].mxu1 }
 0x1bb   : > { %v1483_v46 = vmax.f32 %v1479_v34, %v1481_v40  ;;  %1653 = vst [vmem:[%s2475_s21 + $0xb9] sm:$0x3f] %v1651_v43  ;;  %v857_v51 = vpop.f32.mrb[66].mxu0  ;;  %v1073_v52 = vpop.f32.mrb[66].mxu1  ;;  %v2812_v48 = vld [vmem:[#allocation5] ss:$0 sm:$0xff] }
 0x1bc   : > { %v1180_v53 = vmax.f32 %v855_v47, 0.0  ;;  %v858_v54 = vadd.f32 %v2718_v62, %v857_v51  ;;  %v2022_v55 = vpop.f32.mrb[67].mxu0  ;;  %v1234_v56 = vmax.f32 %v1071_v49, 0.0  ;;  %v1074_v57 = vadd.f32 %v2718_v62, %v1073_v52  ;;  %v2130_v58 = vpop.f32.mrb[67].mxu1 }
 0x1bd   : > { %1485 = vst [vmem:[%s2475_s21 + $0x49] sm:$0x3f] %v1483_v46 }
 0x1be   : > { %1285 = vst [vmem:[#allocation2 + $0x100] sm:$0xff] %v1180_v53  ;;  %v1181_v59 = vmax.f32 %v858_v54, 0.0  ;;  %1339 = vst [vmem:[#allocation2 + $0x2b0] sm:$0xff] %v1234_v56  ;;  %v1235_v60 = vmax.f32 %v1074_v57, 0.0  ;;  %v1655_v20 = vld [vmem:[#allocation2 + $0x294] ss:$2 sm:$0xff] }
 0x1bf   : > { %v1659_v21 = vld [vmem:[#allocation2 + $0x295] ss:$2 sm:$0xff] }
 0x1c0   : > { %1286 = vst [vmem:[#allocation2 + $0x108] sm:$0xff] %v1181_v59  ;;  %1340 = vst [vmem:[#allocation2 + $0x2b8] sm:$0xff] %v1235_v60  ;;  %v1670_v32 = vmax.f32 %v1655_v20, %v1659_v21  ;;  %v1487_v36 = vld [vmem:[#allocation2 + $0xf0] ss:$2 sm:$0xff]  ;;  %v1491_v37 = vld [vmem:[#allocation2 + $0xf1] ss:$2 sm:$0xff] }
 0x1c1   : > { %v862_v61 = vpop.f32.mrb[68].mxu0  ;;  %v1078_v63 = vpop.f32.mrb[68].mxu1  ;;  %v1657_v38 = vld [vmem:[#allocation2 + $0x2a4] ss:$2 sm:$0x3f]  ;;  %v1502_v44 = vmax.f32 %v1487_v36, %v1491_v37 }
 0x1c2   : > { %v863_v1 = vadd.f32 %v2718_v62, %v862_v61  ;;  %v1079_v2 = vadd.f32 %v2718_v62, %v1078_v63  ;;  %v2025_v3 = vpop.f32.mrb[69].mxu0  ;;  %v2133_v4 = vpop.f32.mrb[69].mxu1  ;;  %v1661_v39 = vld [vmem:[#allocation2 + $0x2a5] ss:$2 sm:$0x3f] }
 0x1c3   : > { %v865_v7 = vpop.f32.mrb[70].mxu0  ;;  %v1081_v8 = vpop.f32.mrb[70].mxu1  ;;  %v1671_v51 = vmax.f32 %v1657_v38, %v1661_v39 }
 0x1c4   : > { %v1182_v5 = vmax.f32 %v863_v1, 0.0  ;;  %v1236_v6 = vmax.f32 %v1079_v2, 0.0  ;;  %v866_v9 = vadd.f32 %v2718_v62, %v865_v7  ;;  %v1082_v10 = vadd.f32 %v2718_v62, %v1081_v8  ;;  %v2026_v11 = vpop.f32.mrb[71].mxu0  ;;  %v2134_v0 = vpop.f32.mrb[71].mxu1 }
 0x1c6   : > { %1287 = vst [vmem:[#allocation2 + $0x110] sm:$0xff] %v1182_v5  ;;  %1341 = vst [vmem:[#allocation2 + $0x2c0] sm:$0xff] %v1236_v6  ;;  %v1183_v12 = vmax.f32 %v866_v9, 0.0  ;;  %v1237_v13 = vmax.f32 %v1082_v10, 0.0 }
 0x1c7   : > { %v1489_v52 = vld [vmem:[#allocation2 + $0x100] ss:$2 sm:$0x3f]  ;;  %v1493_v61 = vld [vmem:[#allocation2 + $0x101] ss:$2 sm:$0x3f] }
 0x1c8   : > { %1288 = vst [vmem:[#allocation2 + $0x118] sm:$0xff] %v1183_v12  ;;  %1342 = vst [vmem:[#allocation2 + $0x2c8] sm:$0xff] %v1237_v13  ;;  %v1503_v7 = vmax.f32 %v1489_v52, %v1493_v61 }
 0x1c9   : > { %v870_v14 = vpop.f32.mrb[72].mxu0  ;;  %v1086_v15 = vpop.f32.mrb[72].mxu1 }
 0x1ca   : > { %v871_v16 = vadd.f32 %v2718_v62, %v870_v14  ;;  %v2029_v17 = vpop.f32.mrb[73].mxu0  ;;  %v1087_v18 = vadd.f32 %v2718_v62, %v1086_v15  ;;  %v2137_v19 = vpop.f32.mrb[73].mxu1 }
 0x1cb   : > { %v873_v22 = vpop.f32.mrb[74].mxu0  ;;  %v1089_v23 = vpop.f32.mrb[74].mxu1 }
 0x1cc   : > { %v1184_v24 = vmax.f32 %v871_v16, 0.0  ;;  %v874_v25 = vadd.f32 %v2718_v62, %v873_v22  ;;  %v2030_v26 = vpop.f32.mrb[75].mxu0  ;;  %v1238_v27 = vmax.f32 %v1087_v18, 0.0  ;;  %v1090_v28 = vadd.f32 %v2718_v62, %v1089_v23  ;;  %v2138_v29 = vpop.f32.mrb[75].mxu1 }
 0x1cd   : > { %v1663_v30 = vld [vmem:[#allocation2 + $0x2b2] ss:$2 sm:$0xff]  ;;  %v1667_v31 = vld [vmem:[#allocation2 + $0x2b3] ss:$2 sm:$0xff] }
 0x1ce   : > { %v1672_v33 = vmax.f32 %v1663_v30, %v1667_v31  ;;  %1289 = vst [vmem:[#allocation2 + $0x120] sm:$0xff] %v1184_v24  ;;  %v1185_v34 = vmax.f32 %v874_v25, 0.0  ;;  %1343 = vst [vmem:[#allocation2 + $0x2d0] sm:$0xff] %v1238_v27  ;;  %v1239_v35 = vmax.f32 %v1090_v28, 0.0 }
 0x1cf   : > { %v1495_v41 = vld [vmem:[#allocation2 + $0x10e] ss:$2 sm:$0xff]  ;;  %v1499_v42 = vld [vmem:[#allocation2 + $0x10f] ss:$2 sm:$0xff] }
 0x1d0   : > { %v1674_v40 = vmax.f32 %v1670_v32, %v1672_v33  ;;  %1290 = vst [vmem:[#allocation2 + $0x128] sm:$0xff] %v1185_v34  ;;  %1344 = vst [vmem:[#allocation2 + $0x2d8] sm:$0xff] %v1239_v35  ;;  %v1504_v45 = vmax.f32 %v1495_v41, %v1499_v42  ;;  %v1665_v46 = vld [vmem:[#allocation2 + $0x2c2] ss:$2 sm:$0x3f] }
 0x1d1   : > { %v878_v62 = vpop.f32.mrb[76].mxu0  ;;  %v1094_v43 = vpop.f32.mrb[76].mxu1  ;;  %v1669_v47 = vld [vmem:[#allocation2 + $0x2c3] ss:$2 sm:$0x3f] }
 0x1d2   : > { %1676 = vst [vmem:[%s2475_s21 + $0xc1] sm:$0xff] %v1674_v40  ;;  %v879_v49 = vadd.f32 %v2812_v48, %v878_v62  ;;  %v1095_v50 = vadd.f32 %v2812_v48, %v1094_v43  ;;  %v1673_v53 = vmax.f32 %v1665_v46, %v1669_v47  ;;  %v2033_v54 = vpop.f32.mrb[77].mxu0  ;;  %v2141_v55 = vpop.f32.mrb[77].mxu1  ;;  %v1506_v56 = vmax.f32 %v1502_v44, %v1504_v45 }
 0x1d3   : > { %v881_v58 = vpop.f32.mrb[78].mxu0  ;;  %v1097_v60 = vpop.f32.mrb[78].mxu1 }
 0x1d4   : > { %v1186_v57 = vmax.f32 %v879_v49, 0.0  ;;  %v1240_v59 = vmax.f32 %v1095_v50, 0.0  ;;  %v1675_v63 = vmax.f32 %v1671_v51, %v1673_v53  ;;  %v882_v1 = vadd.f32 %v2812_v48, %v881_v58  ;;  %v2034_v2 = vpop.f32.mrb[79].mxu0  ;;  %v2142_v4 = vpop.f32.mrb[79].mxu1  ;;  %1508 = vst [vmem:[%s2475_s21 + $0x51] sm:$0xff] %v1506_v56 }
 0x1d5   : > { %v1098_v3 = vadd.f32 %v2812_v48, %v1097_v60 }
 0x1d6   : > { %1291 = vst [vmem:[#allocation2 + $0x130] sm:$0xff] %v1186_v57  ;;  %1345 = vst [vmem:[#allocation2 + $0x2e0] sm:$0xff] %v1240_v59  ;;  %v1187_v9 = vmax.f32 %v882_v1, 0.0 }
 0x1d7   : > { %1677 = vst [vmem:[%s2475_s21 + $0xc9] sm:$0x3f] %v1675_v63  ;;  %v1497_v5 = vld [vmem:[#allocation2 + $0x11e] ss:$2 sm:$0x3f]  ;;  %v1241_v10 = vmax.f32 %v1098_v3, 0.0 }
 0x1d8   : > { %v1501_v6 = vld [vmem:[#allocation2 + $0x11f] ss:$2 sm:$0x3f]  ;;  %1292 = vst [vmem:[#allocation2 + $0x138] sm:$0xff] %v1187_v9  ;;  %v1679_v37 = vld [vmem:[#allocation2 + $0x2d0] ss:$2 sm:$0xff] }
 0x1d9   : > { %v1505_v8 = vmax.f32 %v1497_v5, %v1501_v6  ;;  %v886_v11 = vpop.f32.mrb[80].mxu0  ;;  %v1102_v0 = vpop.f32.mrb[80].mxu1  ;;  %1346 = vst [vmem:[#allocation2 + $0x2e8] sm:$0xff] %v1241_v10  ;;  %v1683_v38 = vld [vmem:[#allocation2 + $0x2d1] ss:$2 sm:$0xff] }
 0x1da   : > { %v887_v13 = vadd.f32 %v2812_v48, %v886_v11  ;;  %v1103_v14 = vadd.f32 %v2812_v48, %v1102_v0  ;;  %v2037_v15 = vpop.f32.mrb[81].mxu0  ;;  %v2145_v16 = vpop.f32.mrb[81].mxu1  ;;  %v1694_v46 = vmax.f32 %v1679_v37, %v1683_v38 }
 0x1db   : > { %v1507_v12 = vmax.f32 %v1503_v7, %v1505_v8  ;;  %v889_v17 = vpop.f32.mrb[82].mxu0  ;;  %v1105_v18 = vpop.f32.mrb[82].mxu1 }
 0x1dc   : > { %v1188_v19 = vmax.f32 %v887_v13, 0.0  ;;  %v1242_v20 = vmax.f32 %v1103_v14, 0.0  ;;  %v890_v21 = vadd.f32 %v2812_v48, %v889_v17  ;;  %v1106_v22 = vadd.f32 %v2812_v48, %v1105_v18  ;;  %v2038_v23 = vpop.f32.mrb[83].mxu0  ;;  %v2146_v24 = vpop.f32.mrb[83].mxu1 }
 0x1dd   : > { %1509 = vst [vmem:[%s2475_s21 + $0x59] sm:$0x3f] %v1507_v12 }
 0x1de   : > { %1293 = vst [vmem:[#allocation2 + $0x140] sm:$0xff] %v1188_v19  ;;  %1347 = vst [vmem:[#allocation2 + $0x2f0] sm:$0xff] %v1242_v20  ;;  %v1189_v25 = vmax.f32 %v890_v21, 0.0  ;;  %v1243_v26 = vmax.f32 %v1106_v22, 0.0 }
 0x1df   : > { %v1511_v2 = vld [vmem:[#allocation2 + $0x12c] ss:$2 sm:$0xff]  ;;  %v1515_v3 = vld [vmem:[#allocation2 + $0x12d] ss:$2 sm:$0xff] }
 0x1e0   : > { %1294 = vst [vmem:[#allocation2 + $0x148] sm:$0xff] %v1189_v25  ;;  %1348 = vst [vmem:[#allocation2 + $0x2f8] sm:$0xff] %v1243_v26  ;;  %v1681_v6 = vld [vmem:[#allocation2 + $0x2e0] ss:$2 sm:$0x3f]  ;;  %v1526_v10 = vmax.f32 %v1511_v2, %v1515_v3 }
 0x1e1   : > { %v894_v27 = vpop.f32.mrb[84].mxu0  ;;  %v1110_v28 = vpop.f32.mrb[84].mxu1  ;;  %v1685_v7 = vld [vmem:[#allocation2 + $0x2e1] ss:$2 sm:$0x3f] }
 0x1e2   : > { %v895_v29 = vadd.f32 %v2812_v48, %v894_v27  ;;  %v1111_v30 = vadd.f32 %v2812_v48, %v1110_v28  ;;  %v2041_v31 = vpop.f32.mrb[85].mxu0  ;;  %v2149_v32 = vpop.f32.mrb[85].mxu1  ;;  %v1695_v13 = vmax.f32 %v1681_v6, %v1685_v7 }
 0x1e3   : > { %v897_v35 = vpop.f32.mrb[86].mxu0  ;;  %v1113_v36 = vpop.f32.mrb[86].mxu1 }
 0x1e4   : > { %v1190_v33 = vmax.f32 %v895_v29, 0.0  ;;  %v1244_v34 = vmax.f32 %v1111_v30, 0.0  ;;  %v898_v39 = vadd.f32 %v2812_v48, %v897_v35  ;;  %v1114_v40 = vadd.f32 %v2812_v48, %v1113_v36  ;;  %v2042_v41 = vpop.f32.mrb[87].mxu0  ;;  %v2150_v42 = vpop.f32.mrb[87].mxu1 }
 0x1e5   : > { %v1513_v14 = vld [vmem:[#allocation2 + $0x13c] ss:$2 sm:$0x3f]  ;;  %v1517_v18 = vld [vmem:[#allocation2 + $0x13d] ss:$2 sm:$0x3f] }
 0x1e6   : > { %1295 = vst [vmem:[#allocation2 + $0x150] sm:$0xff] %v1190_v33  ;;  %1349 = vst [vmem:[#allocation2 + $0x300] sm:$0xff] %v1244_v34  ;;  %v1191_v44 = vmax.f32 %v898_v39, 0.0  ;;  %v1245_v45 = vmax.f32 %v1114_v40, 0.0  ;;  %v1527_v31 = vmax.f32 %v1513_v14, %v1517_v18 }
 0x1e7   : > { %v1687_v62 = vld [vmem:[#allocation2 + $0x2ee] ss:$2 sm:$0xff]  ;;  %v1691_v43 = vld [vmem:[#allocation2 + $0x2ef] ss:$2 sm:$0xff] }
 0x1e8   : > { %v1696_v47 = vmax.f32 %v1687_v62, %v1691_v43  ;;  %1296 = vst [vmem:[#allocation2 + $0x158] sm:$0xff] %v1191_v44  ;;  %1350 = vst [vmem:[#allocation2 + $0x308] sm:$0xff] %v1245_v45 }
 0x1e9   : > { %v902_v49 = vpop.f32.mrb[88].mxu0  ;;  %v1118_v50 = vpop.f32.mrb[88].mxu1 }
 0x1ea   : > { %v1698_v51 = vmax.f32 %v1694_v46, %v1696_v47  ;;  %v903_v52 = vadd.f32 %v2812_v48, %v902_v49  ;;  %v1119_v53 = vadd.f32 %v2812_v48, %v1118_v50  ;;  %v2045_v54 = vpop.f32.mrb[89].mxu0  ;;  %v2153_v55 = vpop.f32.mrb[89].mxu1 }
 0x1eb   : > { %v905_v56 = vpop.f32.mrb[90].mxu0  ;;  %v1121_v57 = vpop.f32.mrb[90].mxu1 }
 0x1ec   : > { %1700 = vst [vmem:[%s2475_s21 + $0xd1] sm:$0xff] %v1698_v51  ;;  %v1192_v58 = vmax.f32 %v903_v52, 0.0  ;;  %v1246_v59 = vmax.f32 %v1119_v53, 0.0  ;;  %v906_v60 = vadd.f32 %v2812_v48, %v905_v56  ;;  %v1122_v61 = vadd.f32 %v2812_v48, %v1121_v57  ;;  %v2046_v63 = vpop.f32.mrb[91].mxu0  ;;  %v2154_v1 = vpop.f32.mrb[91].mxu1 }
 0x1ee   : > { %1297 = vst [vmem:[#allocation2 + $0x160] sm:$0xff] %v1192_v58  ;;  %1351 = vst [vmem:[#allocation2 + $0x310] sm:$0xff] %v1246_v59  ;;  %v1193_v4 = vmax.f32 %v906_v60, 0.0  ;;  %v1247_v5 = vmax.f32 %v1122_v61, 0.0 }
 0x1ef   : > { %v1519_v8 = vld [vmem:[#allocation2 + $0x14a] ss:$2 sm:$0xff]  ;;  %v1523_v9 = vld [vmem:[#allocation2 + $0x14b] ss:$2 sm:$0xff] }
 0x1f0   : > { %1298 = vst [vmem:[#allocation2 + $0x168] sm:$0xff] %v1193_v4  ;;  %1352 = vst [vmem:[#allocation2 + $0x318] sm:$0xff] %v1247_v5  ;;  %v1528_v11 = vmax.f32 %v1519_v8, %v1523_v9  ;;  %v1689_v0 = vld [vmem:[#allocation2 + $0x2fe] ss:$2 sm:$0x3f] }
 0x1f1   : > { %v1693_v12 = vld [vmem:[#allocation2 + $0x2ff] ss:$2 sm:$0x3f]  ;;  %v910_v16 = vpop.f32.mrb[92].mxu0  ;;  %v1126_v17 = vpop.f32.mrb[92].mxu1 }
 0x1f2   : > { %v1697_v15 = vmax.f32 %v1689_v0, %v1693_v12  ;;  %v1530_v19 = vmax.f32 %v1526_v10, %v1528_v11  ;;  %v911_v20 = vadd.f32 %v2812_v48, %v910_v16  ;;  %v2049_v21 = vpop.f32.mrb[93].mxu0  ;;  %v1127_v22 = vadd.f32 %v2812_v48, %v1126_v17  ;;  %v2157_v23 = vpop.f32.mrb[93].mxu1 }
 0x1f3   : > { %v913_v25 = vpop.f32.mrb[94].mxu0  ;;  %v1129_v26 = vpop.f32.mrb[94].mxu1 }
 0x1f4   : > { %v1699_v24 = vmax.f32 %v1695_v13, %v1697_v15  ;;  %1532 = vst [vmem:[%s2475_s21 + $0x61] sm:$0xff] %v1530_v19  ;;  %v914_v29 = vadd.f32 %v2812_v48, %v913_v25  ;;  %v1130_v30 = vadd.f32 %v2812_v48, %v1129_v26  ;;  %v1194_v33 = vmax.f32 %v911_v20, 0.0  ;;  %v2050_v35 = vpop.f32.mrb[95].mxu0  ;;  %v2158_v36 = vpop.f32.mrb[95].mxu1 }
 0x1f5   : > { %v1521_v27 = vld [vmem:[#allocation2 + $0x15a] ss:$2 sm:$0x3f]  ;;  %v1525_v28 = vld [vmem:[#allocation2 + $0x15b] ss:$2 sm:$0x3f] }
 0x1f6   : > { %1701 = vst [vmem:[%s2475_s21 + $0xd9] sm:$0x3f] %v1699_v24  ;;  %v1529_v32 = vmax.f32 %v1521_v27, %v1525_v28  ;;  %v1248_v34 = vmax.f32 %v1127_v22, 0.0  ;;  %v1195_v37 = vmax.f32 %v914_v29, 0.0  ;;  %v1249_v38 = vmax.f32 %v1130_v30, 0.0  ;;  %1299 = vst [vmem:[#allocation2 + $0x170] sm:$0xff] %v1194_v33 }
 0x1f7   : > { %v1703_v7 = vld [vmem:[#allocation2 + $0x30c] ss:$2 sm:$0xff]  ;;  %v1707_v8 = vld [vmem:[#allocation2 + $0x30d] ss:$2 sm:$0xff] }
 0x1f8   : > { %v1531_v39 = vmax.f32 %v1527_v31, %v1529_v32  ;;  %1353 = vst [vmem:[#allocation2 + $0x320] sm:$0xff] %v1248_v34  ;;  %1300 = vst [vmem:[#allocation2 + $0x178] sm:$0xff] %v1195_v37  ;;  %v1718_v0 = vmax.f32 %v1703_v7, %v1707_v8 }
 0x1f9   : > { %1354 = vst [vmem:[#allocation2 + $0x328] sm:$0xff] %v1249_v38  ;;  %v918_v40 = vpop.f32.mrb[96].mxu0  ;;  %v1134_v41 = vpop.f32.mrb[96].mxu1 }
 0x1fa   : > { %1533 = vst [vmem:[%s2475_s21 + $0x69] sm:$0x3f] %v1531_v39  ;;  %v919_v42 = vadd.f32 %v2812_v48, %v918_v40  ;;  %v1135_v62 = vadd.f32 %v2812_v48, %v1134_v41  ;;  %v2053_v43 = vpop.f32.mrb[97].mxu0  ;;  %v2161_v44 = vpop.f32.mrb[97].mxu1  ;;  %v1567_v39 = vld [vmem:[#allocation2 + $0x1c2] ss:$2 sm:$0xff] }
 0x1fb   : > { %v921_v45 = vpop.f32.mrb[98].mxu0  ;;  %v1137_v46 = vpop.f32.mrb[98].mxu1  ;;  %v1571_v40 = vld [vmem:[#allocation2 + $0x1c3] ss:$2 sm:$0xff] }
 0x1fc   : > { %v1196_v47 = vmax.f32 %v919_v42, 0.0  ;;  %v1250_v49 = vmax.f32 %v1135_v62, 0.0  ;;  %v922_v50 = vadd.f32 %v2812_v48, %v921_v45  ;;  %v1138_v51 = vadd.f32 %v2812_v48, %v1137_v46  ;;  %v2054_v52 = vpop.f32.mrb[99].mxu0  ;;  %v2162_v53 = vpop.f32.mrb[99].mxu1 }
 0x1fd   : > { %v1535_v14 = vld [vmem:[#allocation2 + $0x168] ss:$2 sm:$0xff]  ;;  %v1539_v18 = vld [vmem:[#allocation2 + $0x169] ss:$2 sm:$0xff]  ;;  %v1576_v45 = vmax.f32 %v1567_v39, %v1571_v40 }
 0x1fe   : > { %1301 = vst [vmem:[#allocation2 + $0x180] sm:$0xff] %v1196_v47  ;;  %1355 = vst [vmem:[#allocation2 + $0x330] sm:$0xff] %v1250_v49  ;;  %v1197_v54 = vmax.f32 %v922_v50, 0.0  ;;  %v1251_v55 = vmax.f32 %v1138_v51, 0.0  ;;  %v1550_v27 = vmax.f32 %v1535_v14, %v1539_v18 }
 0x1ff   : > { %v1705_v19 = vld [vmem:[#allocation2 + $0x31c] ss:$2 sm:$0x3f]  ;;  %v1709_v21 = vld [vmem:[#allocation2 + $0x31d] ss:$2 sm:$0x3f] }
 0x200   : > { %1302 = vst [vmem:[#allocation2 + $0x188] sm:$0xff] %v1197_v54  ;;  %1356 = vst [vmem:[#allocation2 + $0x338] sm:$0xff] %v1251_v55  ;;  %v1719_v31 = vmax.f32 %v1705_v19, %v1709_v21 }
 0x201   : > { %v926_v56 = vpop.f32.mrb[100].mxu0  ;;  %v1142_v57 = vpop.f32.mrb[100].mxu1 }
 0x202   : > { %v927_v58 = vadd.f32 %v2812_v48, %v926_v56  ;;  %v1143_v59 = vadd.f32 %v2812_v48, %v1142_v57  ;;  %v2057_v60 = vpop.f32.mrb[101].mxu0  ;;  %v2165_v61 = vpop.f32.mrb[101].mxu1 }
 0x203   : > { %v929_v63 = vpop.f32.mrb[102].mxu0  ;;  %v1145_v1 = vpop.f32.mrb[102].mxu1 }
 0x204   : > { %v1198_v2 = vmax.f32 %v927_v58, 0.0  ;;  %v1252_v3 = vmax.f32 %v1143_v59, 0.0  ;;  %v930_v4 = vadd.f32 %v2812_v48, %v929_v63  ;;  %v2058_v5 = vpop.f32.mrb[103].mxu0  ;;  %v2166_v6 = vpop.f32.mrb[103].mxu1 }
 0x205   : > { %v1537_v36 = vld [vmem:[#allocation2 + $0x178] ss:$2 sm:$0x3f] }
 0x206   : > { %1303 = vst [vmem:[#allocation2 + $0x190] sm:$0xff] %v1198_v2  ;;  %1357 = vst [vmem:[#allocation2 + $0x340] sm:$0xff] %v1252_v3  ;;  %v1199_v9 = vmax.f32 %v930_v4, 0.0 }
 0x207   : > { %v1711_v10 = vld [vmem:[#allocation2 + $0x32a] ss:$2 sm:$0xff]  ;;  %v1715_v11 = vld [vmem:[#allocation2 + $0x32b] ss:$2 sm:$0xff] }
 0x208   : > { %v1720_v12 = vmax.f32 %v1711_v10, %v1715_v11  ;;  %1304 = vst [vmem:[#allocation2 + $0x198] sm:$0xff] %v1199_v9 }
 0x209   : > { %v934_v13 = vpop.f32.mrb[104].mxu0 }
 0x20a   : > { %v1722_v15 = vmax.f32 %v1718_v0, %v1720_v12  ;;  %v935_v16 = vadd.f32 %v2812_v48, %v934_v13  ;;  %v2061_v17 = vpop.f32.mrb[105].mxu0 }
 0x20b   : > { %v937_v20 = vpop.f32.mrb[106].mxu0 }
 0x20c   : > { %1724 = vst [vmem:[%s2475_s21 + $0xe1] sm:$0xff] %v1722_v15  ;;  %v1200_v22 = vmax.f32 %v935_v16, 0.0  ;;  %v938_v23 = vadd.f32 %v2812_v48, %v937_v20  ;;  %v2062_v24 = vpop.f32.mrb[107].mxu0  ;;  %v1541_v48 = vld [vmem:[#allocation2 + $0x179] ss:$2 sm:$0x3f] }
 0x20d   : > { %v1543_v25 = vld [vmem:[#allocation2 + $0x186] ss:$2 sm:$0xff]  ;;  %v1547_v26 = vld [vmem:[#allocation2 + $0x187] ss:$2 sm:$0xff]  ;;  %v1551_v41 = vmax.f32 %v1537_v36, %v1541_v48 }
 0x20e   : > { %v1552_v28 = vmax.f32 %v1543_v25, %v1547_v26  ;;  %v1713_v29 = vld [vmem:[#allocation2 + $0x33a] ss:$2 sm:$0x3f]  ;;  %v1717_v30 = vld [vmem:[#allocation2 + $0x33b] ss:$2 sm:$0x3f] }
 0x20f   : > { %1305 = vst [vmem:[#allocation2 + $0x1a0] sm:$0xff] %v1200_v22  ;;  %v1721_v32 = vmax.f32 %v1713_v29, %v1717_v30  ;;  %v1201_v33 = vmax.f32 %v938_v23, 0.0 }
 0x210   : > { %v1554_v34 = vmax.f32 %v1550_v27, %v1552_v28 }
 0x211   : > { %v1723_v35 = vmax.f32 %v1719_v31, %v1721_v32  ;;  %1306 = vst [vmem:[#allocation2 + $0x1a8] sm:$0xff] %v1201_v33 }
 0x212   : > { %1556 = vst [vmem:[%s2475_s21 + $0x71] sm:$0xff] %v1554_v34 }
 0x213   : > { %1725 = vst [vmem:[%s2475_s21 + $0xe9] sm:$0x3f] %v1723_v35 }
 0x216   : > { %v1545_v37 = vld [vmem:[#allocation2 + $0x196] ss:$2 sm:$0x3f]  ;;  %v1549_v38 = vld [vmem:[#allocation2 + $0x197] ss:$2 sm:$0x3f] }
 0x217   : > { %v1553_v42 = vmax.f32 %v1545_v37, %v1549_v38 }
 0x218   : > { %v1559_v43 = vld [vmem:[#allocation2 + $0x1a4] ss:$2 sm:$0xff]  ;;  %v1563_v44 = vld [vmem:[#allocation2 + $0x1a5] ss:$2 sm:$0xff] }
 0x219   : > { %v1555_v62 = vmax.f32 %v1551_v41, %v1553_v42  ;;  %v1574_v46 = vmax.f32 %v1559_v43, %v1563_v44 }
 0x21b   : > { %1557 = vst [vmem:[%s2475_s21 + $0x79] sm:$0x3f] %v1555_v62  ;;  %v1578_v47 = vmax.f32 %v1574_v46, %v1576_v45 }
 0x21d   : > { %1580 = vst [vmem:[%s2475_s21 + $0x81] sm:$0xff] %v1578_v47 }
 0x21e PF: > { %s15_s12 = sadd.s32 1, %s2350_s12  }
 0x21f   : > { %p12_p5 = scmp.ge.s32.totalorder %s15_s12, 4  }
 0x221   :  { %14 = sbr.rel (!%p12_p5) target bundleno = 2 (0x2), region = 182 }
 0x228   :  { %1747 = vsyncpa [#allocation4], 1 }
 0x229   :  { %1749 = vsyncpa [#allocation4 + $0x1], 1 }
 0x22a   :  { %1750 = vsyncpa [#allocation6], 1 }

// kernel: cnn4_forward.5
= control target key start
LH: loop header
LB: loop body
LE: loop exit
PB: predicated region body
PF: predicated region fallthrough
CT: control target
= control target key end

     0   :  { %8 = vsyncpa [#allocation4], 0  ;;  %s3707_s0 = inlined_call_operand.vmem [shape: f32[2,264,128], index: 0, kind: input, shape index: {}]   ;;  %s3708_s1 = inlined_call_operand.hbm [shape: bf16[5,256,128], index: 1, kind: input, shape index: {}]   ;;  %s3709_s2 = inlined_call_operand.hbm [shape: f32[1,128], index: 2, kind: input, shape index: {}]   ;;  %s3710_s3 = inlined_call_operand.vmem [shape: f32[2,88,128], index: 3, kind: output, shape index: {}]  }
   0x1   :  { %9 = vsyncpa [#allocation6], 0  ;;  %s3075_s12 = smov 0  }
   0x2 LB: > { %s3081_s13 = sadd.s32 4294967295, %s3048_s12   ;;  %p2256_p0 = scmp.ge.s32.totalorder %s3048_s12, 1  ;;  %s3048_s12 = sphi %s3075_s12, %s15_s12  }
   0x3   : > { %p114_p1 = scmp.lt.s32.totalorder %s3048_s12, 3  ;;  %s3050_s14 = smov [#allocation3]  }
   0x4   : > { %s126_s15 = sshll.u32 %s3050_s14, 4  ;;  %p3711_p3 = scmp.eq.s32.totalorder %s3081_s13, 0  ;;  %s127_s15 = int_to_ptr.vmem [resolvable:$true] %s126_s15 }
   0x5   : > { %p3085_p2 = pnand %p2256_p0, %p114_p1  ;;  %s3051_s17 = smov [#allocation5]  }
   0x6   : > { %s140_s18 = sshll.u32 %s3051_s17, 4  ;;  %s2978_s22 = scalar_lea.hbm %s3708_s1, 10240  ;;  %s3098_s18 = int_to_ptr.vmem [resolvable:$true] %s140_s18 }
   0x7   : > { %s3713_s16 = scalar_select %p3085_p2, 1, 0 }
   0x8   : > { %p2874_p4 = pneg %p3085_p2  ;;  %p2979_p6 = scmp.ne.s32.totalorder %s3708_s1, %s2978_s22 }
   0x9   : > { %p2985_p10 = scmp.lt.u32.totalorder %s2978_s22, %s3708_s1 }
   0xa   : > { %p3094_p5 = pnand %p3711_p3, %p2874_p4 }
   0xc   : > { %p2980_p7 = pneg %p3094_p5 }
   0xe   : > { %p2981_p8 = pnand %p2980_p7, %p2979_p6 }
  0x10   : > { %p2982_p9 = pneg %p2981_p8 }
  0x12   : > { %p2987_p11 = pnand %p2985_p10, %p2982_p9 }
  0x14   : > { %2990 = shalt.err (!%p2987_p11)
}
  0x15   : > { %s2991_s27 = scalar_lea.vmem %s127_s15, 10240  ;;  %p2999_p1 = scmp.lt.s32.totalorder %s127_s15, %s127_s15 }
  0x16   : > { %p2992_p12 = scmp.ne.s32.totalorder %s127_s15, %s2991_s27  ;;  %p3000_p4 = scmp.lt.s32.totalorder %s2991_s27, %s2991_s27 }
  0x18   : > { %p2994_p13 = pnand %p2992_p12, %p2980_p7  ;;  %p3001_p3 = por %p3000_p4, %p2999_p1 }
  0x1a   : > { %p2995_p0 = pneg %p2994_p13 }
  0x1c   : > { %p3002_p2 = pnand %p3001_p3, %p2995_p0 }
  0x1e   : > { %3005 = shalt.err (!%p3002_p2)
}
  0x1f   : > { %s3052_s28 = smov 64   ;;  %s3053_s29 = smov 4  }
  0x20   : > { %2877 = dma.hbm_to_vmem [thread:$0]  (!%p3094_p5), %s3708_s1, 10240, %s127_s15, [#allocation4], %s3052_s28, %s3052_s28, %s3053_s29  }
  0x21   : > { %s3006_s7 = scalar_lea.hbm %s3709_s2, 16 }
  0x22   : > { %p3007_p6 = scmp.ne.s32.totalorder %s3709_s2, %s3006_s7  ;;  %p3013_p8 = scmp.lt.u32.totalorder %s3006_s7, %s3709_s2 }
  0x24   : > { %p3009_p2 = pnand %p3007_p6, %p2980_p7 }
  0x26   : > { %p3010_p3 = pneg %p3009_p2 }
  0x28   : > { %p3015_p9 = pnand %p3013_p8, %p3010_p3 }
  0x2a   : > { %3018 = shalt.err (!%p3015_p9)
}
  0x2b   : > { %s3019_s14 = scalar_lea.vmem %s3098_s18, 16  ;;  %s3026_s15 = scalar_lea.vmem %s3098_s18, 32 }
  0x2c   : > { %p3020_p10 = scmp.ne.s32.totalorder %s3098_s18, %s3019_s14  ;;  %p3027_p13 = scmp.lt.s32.totalorder %s3098_s18, %s3098_s18 }
  0x2d   : > { %p3028_p0 = scmp.lt.s32.totalorder %s3026_s15, %s3019_s14 }
  0x2e   : > { %p3022_p11 = pnand %p3020_p10, %p2980_p7 }
  0x2f   : > { %p3029_p1 = por %p3028_p0, %p3027_p13 }
  0x30   : > { %p3023_p12 = pneg %p3022_p11 }
  0x32   : > { %p3030_p4 = pnand %p3029_p1, %p3023_p12 }
  0x34   : > { %3033 = shalt.err (!%p3030_p4)
}
  0x35   : > { %2880 = dma.hbm_to_vmem [thread:$0]  (!%p3094_p5), %s3709_s2, 16, %s3098_s18, [#allocation6]  }
  0x36   : > { %p3715_p6 = scmp.ne.s32.totalorder %s3713_s16, 0 }
  0x37   : > { %p3716_p7 = scmp.eq.s32.totalorder (!%p3715_p6), %s3081_s13, 0 }
  0x38   : > { %161 = sbr.rel (%p3715_p6) target bundleno = 611 (0x263), region = 32 }
  0x3f   : > { %3039 = dma.done.wait (%p3716_p7), [#allocation4], 10240   ;;  %p3717_p2 = pmov %p3716_p7 }
  0x41   : > { %3041 = vsyncadd (%p3717_p2), [#allocation4], 4294957056  ;;  %p3718_p3 = pmov %p3717_p2 }
  0x42   : > { %p3719_p8 = pmov %p3717_p2 }
  0x43   : > { %3043 = dma.done.wait (%p3718_p3), [#allocation6], 16  }
  0x44   : > { %3045 = vsyncadd (%p3719_p8), [#allocation6], 4294967280  ;;  %v2898_v0 = vld [vmem:[#allocation3 + $0xc0] sm:$0xff]   ;;  %p189_p5 = scmp.lt.s32.totalorder %s3081_s13, 1  ;;  %v2900_v2 = vld [vmem:[#allocation3 + $0xc8] sm:$0xff]  }
  0x45   : > { %v2899_v1 = vld [vmem:[#allocation3 + $0x80] sm:$0xff]   ;;  %2348 = vmatprep.subr.bf16.mxu0 %v2898_v0  ;;  %2848 = vmatprep.subr.bf16.mxu1 %v2898_v0  ;;  %v2901_v3 = vld [vmem:[#allocation3 + $0x88] sm:$0xff]   ;;  %v2902_v4 = vld [vmem:[#allocation3 + $0xd0] sm:$0xff]  }
  0x46   : > { %2349 = vmatpush3.bf16.msra.mxu0 %v2899_v1  ;;  %2856 = vmatpush3.bf16.msra.mxu1 %v2899_v1  ;;  %s3721_s13 = smov (!%p189_p5, %s3081_s13), 1  ;;  %v2903_v5 = vld [vmem:[#allocation3 + $0x90] sm:$0xff]   ;;  %v2904_v6 = vld [vmem:[#allocation3 + $0xd8] sm:$0xff]   ;;  %v2906_v8 = vld [vmem:[#allocation3 + $0xe0] sm:$0xff]  }
  0x47   : > { %2350 = vmatprep.subr.bf16.mxu0 %v2900_v2  ;;  %2849 = vmatprep.subr.bf16.mxu1 %v2900_v2  ;;  %s2864_s16 = smul.u32 264, %s3721_s13  ;;  %v2905_v7 = vld [vmem:[#allocation3 + $0x98] sm:$0xff]   ;;  %v2907_v9 = vld [vmem:[#allocation3 + $0xa0] sm:$0xff]   ;;  %v2908_v10 = vld [vmem:[#allocation3 + $0xe8] sm:$0xff]  }
  0x48   : > { %v2909_v17 = vld [vmem:[#allocation3 + $0xa8] sm:$0xff]   ;;  %v2910_v18 = vld [vmem:[#allocation3 + $0xf0] sm:$0xff]   ;;  %v2912_v20 = vld [vmem:[#allocation3 + $0xf8] sm:$0xff]   ;;  %s2865_s22 = smul.u32 88, %s3721_s13 }
  0x49   : > { %s3166_s21 = scalar_lea.vmem %s3707_s0, %s2864_s16  ;;  %v2911_v19 = vld [vmem:[#allocation3 + $0xb0] sm:$0xff]   ;;  %v2913_v21 = vld [vmem:[#allocation3 + $0xb8] sm:$0xff]   ;;  %v2914_v26 = vld [vmem:[#allocation3 + $0x40] sm:$0xff]  }
  0x4a   : > { %2351 = vmatpush3.bf16.msra.mxu0 %v2901_v3  ;;  %2857 = vmatpush3.bf16.msra.mxu1 %v2901_v3  ;;  %v202_v11 = vld [vmem:[%s3166_s21 + $0x10] sm:$0xff]  ;;  %v203_v12 = vld [vmem:[%s3166_s21 + $0x18] sm:$0xff]  ;;  %v216_v13 = vld [vmem:[%s3166_s21 + $0x80] sm:$0xff]  ;;  %s3548_s25 = scalar_lea.vmem %s3710_s3, %s2865_s22 }
  0x4b   : > { %2352 = vmatprep.subr.bf16.mxu0 %v2902_v4  ;;  %2850 = vmatprep.subr.bf16.mxu1 %v2902_v4  ;;  %v3171_v14 = vpack.c.bf16 %v203_v12, %v202_v11  ;;  %v217_v15 = vld [vmem:[%s3166_s21 + $0x88] sm:$0xff]  ;;  %v330_v24 = vld [vmem:[%s3166_s21 + $0x72] sm:$0xff]  ;;  %v331_v25 = vld [vmem:[%s3166_s21 + $0x7a] sm:$0xff] }
  0x4c   : > { %v3174_v16 = vpack.c.bf16 %v217_v15, %v216_v13  ;;  %v316_v22 = vld [vmem:[%s3166_s21 + $0x2] sm:$0xff]  ;;  %v317_v23 = vld [vmem:[%s3166_s21 + $0xa] sm:$0xff]  ;;  %v219_v31 = vld [vmem:[%s3166_s21 + $0x98] sm:$0xff]  ;;  %v3186_v33 = vpack.c.bf16 %v331_v25, %v330_v24 }
  0x4d   : > { %522 = vmatprep.mubr.bf16.mxu0 %v3171_v14  ;;  %v2916_v27 = vld [vmem:[#allocation3 + $0x140] sm:$0xff]   ;;  %v205_v29 = vld [vmem:[%s3166_s21 + $0x28] sm:$0xff]  ;;  %v218_v30 = vld [vmem:[%s3166_s21 + $0x90] sm:$0xff]  ;;  %v344_v32 = vpack.c.bf16 %v317_v23, %v316_v22 }
  0x4e   : > { %2353 = vmatpush3.bf16.msra.mxu0 %v2903_v5  ;;  %2858 = vmatpush3.bf16.msra.mxu1 %v2903_v5  ;;  %v204_v28 = vld [vmem:[%s3166_s21 + $0x20] sm:$0xff]  ;;  %v3190_v37 = vpack.c.bf16 %v219_v31, %v218_v30  ;;  %v2918_v38 = vld [vmem:[#allocation3 + $0x48] sm:$0xff]   ;;  %v318_v39 = vld [vmem:[%s3166_s21 + $0x12] sm:$0xff] }
  0x4f   : > { %2354 = vmatprep.subr.bf16.mxu0 %v2904_v6  ;;  %2851 = vmatprep.subr.bf16.mxu1 %v2904_v6  ;;  %v2915_v34 = vld [vmem:[#allocation3] sm:$0xff]   ;;  %v3188_v36 = vpack.c.bf16 %v205_v29, %v204_v28  ;;  %v333_v42 = vld [vmem:[%s3166_s21 + $0x8a] sm:$0xff]  ;;  %v207_v48 = vld [vmem:[%s3166_s21 + $0x38] sm:$0xff] }
  0x50   : > { %578 = vmatprep.mubr.bf16.mxu1 %v3174_v16  ;;  %v2917_v35 = vld [vmem:[#allocation3 + $0x100] sm:$0xff]   ;;  %v2919_v43 = vld [vmem:[#allocation3 + $0x8] sm:$0xff]   ;;  %v2922_v46 = vld [vmem:[#allocation3 + $0x50] sm:$0xff]  }
  0x51   : > { %v319_v40 = vld [vmem:[%s3166_s21 + $0x1a] sm:$0xff]  ;;  %v332_v41 = vld [vmem:[%s3166_s21 + $0x82] sm:$0xff]  ;;  %v206_v47 = vld [vmem:[%s3166_s21 + $0x30] sm:$0xff] }
  0x52   : > { %2355 = vmatpush3.bf16.msra.mxu0 %v2905_v7  ;;  %2859 = vmatpush3.bf16.msra.mxu1 %v2905_v7  ;;  %v2920_v44 = vld [vmem:[#allocation3 + $0x148] sm:$0xff]   ;;  %v220_v49 = vld [vmem:[%s3166_s21 + $0xa0] sm:$0xff]  ;;  %v2924_v51 = vld [vmem:[#allocation3 + $0x150] sm:$0xff]   ;;  %v3203_v52 = vpack.c.bf16 %v319_v40, %v318_v39  ;;  %v3205_v53 = vpack.c.bf16 %v333_v42, %v332_v41  ;;  %v3207_v54 = vpack.c.bf16 %v207_v48, %v206_v47 }
  0x53   : > { %2356 = vmatprep.subr.bf16.mxu0 %v2906_v8  ;;  %2852 = vmatprep.subr.bf16.mxu1 %v2906_v8  ;;  %v2921_v45 = vld [vmem:[#allocation3 + $0x108] sm:$0xff]   ;;  %v2923_v56 = vld [vmem:[#allocation3 + $0x10] sm:$0xff]   ;;  %v335_v61 = vld [vmem:[%s3166_s21 + $0x9a] sm:$0xff] }
  0x54   : > { %v221_v50 = vld [vmem:[%s3166_s21 + $0xa8] sm:$0xff]  ;;  %v2925_v57 = vld [vmem:[#allocation3 + $0x110] sm:$0xff]   ;;  %v2926_v62 = vld [vmem:[#allocation3 + $0x58] sm:$0xff]  }
  0x55   : > { %v3209_v55 = vpack.c.bf16 %v221_v50, %v220_v49  ;;  %v320_v58 = vld [vmem:[%s3166_s21 + $0x22] sm:$0xff]  ;;  %v321_v59 = vld [vmem:[%s3166_s21 + $0x2a] sm:$0xff]  ;;  %v334_v60 = vld [vmem:[%s3166_s21 + $0x92] sm:$0xff] }
  0x56   : > { %2357 = vmatpush3.bf16.msra.mxu0 %v2907_v9  ;;  %2860 = vmatpush3.bf16.msra.mxu1 %v2907_v9  ;;  %v2928_v63 = vld [vmem:[#allocation3 + $0x158] sm:$0xff]   ;;  %v208_v1 = vld [vmem:[%s3166_s21 + $0x40] sm:$0xff]  ;;  %v209_v2 = vld [vmem:[%s3166_s21 + $0x48] sm:$0xff]  ;;  %v3223_v8 = vpack.c.bf16 %v321_v59, %v320_v58  ;;  %v3225_v9 = vpack.c.bf16 %v335_v61, %v334_v60 }
  0x57   : > { %2358 = vmatprep.subr.bf16.mxu0 %v2908_v10  ;;  %2853 = vmatprep.subr.bf16.mxu1 %v2908_v10  ;;  %v2927_v0 = vld [vmem:[#allocation3 + $0x18] sm:$0xff]   ;;  %v222_v3 = vld [vmem:[%s3166_s21 + $0xb0] sm:$0xff]  ;;  %v2930_v6 = vld [vmem:[#allocation3 + $0x60] sm:$0xff]   ;;  %v3227_v10 = vpack.c.bf16 %v209_v2, %v208_v1 }
  0x58   : > { %v223_v4 = vld [vmem:[%s3166_s21 + $0xb8] sm:$0xff]  ;;  %v2932_v7 = vld [vmem:[#allocation3 + $0x160] sm:$0xff]   ;;  %v225_v23 = vld [vmem:[%s3166_s21 + $0xc8] sm:$0xff] }
  0x59   : > { %v2929_v5 = vld [vmem:[#allocation3 + $0x118] sm:$0xff]   ;;  %v3229_v11 = vpack.c.bf16 %v223_v4, %v222_v3  ;;  %v2931_v12 = vld [vmem:[#allocation3 + $0x20] sm:$0xff]   ;;  %v2934_v24 = vld [vmem:[#allocation3 + $0x68] sm:$0xff]  }
  0x5a   : > { %2359 = vmatpush3.bf16.msra.mxu0 %v2909_v17  ;;  %2861 = vmatpush3.bf16.msra.mxu1 %v2909_v17  ;;  %v2933_v13 = vld [vmem:[#allocation3 + $0x120] sm:$0xff]   ;;  %v322_v15 = vld [vmem:[%s3166_s21 + $0x32] sm:$0xff]  ;;  %v2935_v25 = vld [vmem:[#allocation3 + $0x28] sm:$0xff]  }
  0x5b   : > { %2360 = vmatprep.subr.bf16.mxu0 %v2910_v18  ;;  %2854 = vmatprep.subr.bf16.mxu1 %v2910_v18  ;;  %v323_v17 = vld [vmem:[%s3166_s21 + $0x3a] sm:$0xff]  ;;  %v336_v18 = vld [vmem:[%s3166_s21 + $0xa2] sm:$0xff]  ;;  %v2939_v40 = vld [vmem:[#allocation3 + $0x30] sm:$0xff]  }
  0x5c   : > { %v224_v22 = vld [vmem:[%s3166_s21 + $0xc0] sm:$0xff]  ;;  %v3243_v28 = vpack.c.bf16 %v323_v17, %v322_v15  ;;  %v2940_v42 = vld [vmem:[#allocation3 + $0x170] sm:$0xff]   ;;  %v2944_v59 = vld [vmem:[#allocation3 + $0x178] sm:$0xff]  }
  0x5d   : > { %v3249_v31 = vpack.c.bf16 %v225_v23, %v224_v22  ;;  %v339_v39 = vld [vmem:[%s3166_s21 + $0xba] sm:$0xff]  ;;  %v340_v60 = vld [vmem:[%s3166_s21 + $0xc2] sm:$0xff]  ;;  %v329_v15 = vld [vmem:[%s3166_s21 + $0x6a] sm:$0xff] }
  0x5e   : > { %2361 = vmatpush3.bf16.msra.mxu0 %v2911_v19  ;;  %2862 = vmatpush3.bf16.msra.mxu1 %v2911_v19  ;;  %v337_v19 = vld [vmem:[%s3166_s21 + $0xaa] sm:$0xff]  ;;  %v212_v41 = vld [vmem:[%s3166_s21 + $0x60] sm:$0xff]  ;;  %v2945_v61 = vld [vmem:[#allocation3 + $0x138] sm:$0xff]  }
  0x5f   : > { %2362 = vmatprep.subr.bf16.mxu0 %v2912_v20  ;;  %2855 = vmatprep.subr.bf16.mxu1 %v2912_v20  ;;  %v210_v20 = vld [vmem:[%s3166_s21 + $0x50] sm:$0xff]  ;;  %v3245_v29 = vpack.c.bf16 %v337_v19, %v336_v18  ;;  %v327_v58 = vld [vmem:[%s3166_s21 + $0x5a] sm:$0xff]  ;;  %v359_v2 = vld [vmem:[%s3166_s21 + $0xe8] sm:$0xff] }
  0x60   : > { %v358_v1 = vld [vmem:[%s3166_s21 + $0xe0] sm:$0xff]  ;;  %v342_v17 = vld [vmem:[%s3166_s21 + $0xd2] sm:$0xff] }
  0x61   : > { %v2946_v3 = vld [vmem:[#allocation3 + $0x1c0] sm:$0xff]  }
  0x62   : > { %2363 = vmatpush3.bf16.msra.mxu0 %v2913_v21  ;;  %2863 = vmatpush3.bf16.msra.mxu1 %v2913_v21  ;;  %v211_v21 = vld [vmem:[%s3166_s21 + $0x58] sm:$0xff]  ;;  %v242_v19 = vld [vmem:[%s3166_s21 + $0x1] sm:$0xff] }
  0x63   : > { %2448 = vmatprep.subr.bf16.mxu1 %v2914_v26  ;;  %2548 = vmatprep.subr.bf16.mxu0 %v2916_v27  ;;  %v2936_v26 = vld [vmem:[#allocation3 + $0x168] sm:$0xff]   ;;  %v3247_v30 = vpack.c.bf16 %v211_v21, %v210_v20  ;;  %v343_v18 = vld [vmem:[%s3166_s21 + $0xda] sm:$0xff] }
  0x64   : > { %v2937_v27 = vld [vmem:[#allocation3 + $0x128] sm:$0xff]   ;;  %v3300_v22 = vpack.c.bf16 %v343_v18, %v342_v17  ;;  %v2970_v18 = vld [vmem:[#allocation3 + $0x1f0] sm:$0xff]  }
  0x65   : > { %523 = vmatmul.mubr.bf16.vlgmr.msra.gmra.mrb[0].mxu0 %v344_v32  ;;  %579 = vmatmul.mubr.bf16.vlgmr.msra.gmra.mrb[0].mxu1 %v3186_v33  ;;  %v2938_v32 = vld [vmem:[#allocation3 + $0x70] sm:$0xff]   ;;  %v2969_v17 = vld [vmem:[#allocation3 + $0x228] sm:$0xff]  }
  0x66   : > { %2449 = vmatpush3.bf16.msra.mxu1 %v2915_v34  ;;  %2549 = vmatpush3.bf16.msra.mxu0 %v2917_v35  ;;  %v324_v34 = vld [vmem:[%s3166_s21 + $0x42] sm:$0xff]  ;;  %v325_v35 = vld [vmem:[%s3166_s21 + $0x4a] sm:$0xff] }
  0x67   : > { %530 = vmatprep.mubr.bf16.mxu0 %v3188_v36  ;;  %586 = vmatprep.mubr.bf16.mxu1 %v3190_v37  ;;  %v3263_v47 = vpack.c.bf16 %v325_v35, %v324_v34  ;;  %v243_v20 = vld [vmem:[%s3166_s21 + $0x9] sm:$0xff]  ;;  %v2947_v35 = vld [vmem:[#allocation3 + $0x180] sm:$0xff]  }
  0x68   : > { %2450 = vmatprep.subr.bf16.mxu1 %v2918_v38  ;;  %2550 = vmatprep.subr.bf16.mxu0 %v2920_v44  ;;  %v338_v38 = vld [vmem:[%s3166_s21 + $0xb2] sm:$0xff]  ;;  %v213_v44 = vld [vmem:[%s3166_s21 + $0x68] sm:$0xff]  ;;  %v270_v23 = vpack.c.bf16 %v243_v20, %v242_v19 }
  0x69   : > { %v3265_v48 = vpack.c.bf16 %v339_v39, %v338_v38  ;;  %v3267_v49 = vpack.c.bf16 %v213_v44, %v212_v41  ;;  %v2949_v38 = vld [vmem:[#allocation3 + $0x200] sm:$0xff]   ;;  %v2950_v39 = vld [vmem:[#allocation3 + $0x1c8] sm:$0xff]   ;;  %v2972_v19 = vld [vmem:[#allocation3 + $0x270] sm:$0xff]  }
  0x6a   : > { %2451 = vmatpush3.bf16.msra.mxu1 %v2919_v43  ;;  %2551 = vmatpush3.bf16.msra.mxu0 %v2921_v45  ;;  %v2941_v43 = vld [vmem:[#allocation3 + $0x130] sm:$0xff]   ;;  %v2953_v44 = vld [vmem:[#allocation3 + $0x208] sm:$0xff]  }
  0x6b   : > { %2452 = vmatprep.subr.bf16.mxu1 %v2922_v46  ;;  %2552 = vmatprep.subr.bf16.mxu0 %v2924_v51  ;;  %v226_v45 = vld [vmem:[%s3166_s21 + $0xd0] sm:$0xff]  ;;  %v227_v46 = vld [vmem:[%s3166_s21 + $0xd8] sm:$0xff] }
  0x6c   : > { %v3269_v50 = vpack.c.bf16 %v227_v46, %v226_v45  ;;  %v2942_v51 = vld [vmem:[#allocation3 + $0x78] sm:$0xff]   ;;  %v879_v41 = vld [vmem:[%s3166_s21 + $0x29] sm:$0xff] }
  0x6d   : > { %531 = vmatmul.mubr.bf16.gmra.mrb[4].mxu0 %v3203_v52  ;;  %587 = vmatmul.mubr.bf16.gmra.mrb[4].mxu1 %v3205_v53  ;;  %v2954_v45 = vld [vmem:[#allocation3 + $0x1d0] sm:$0xff]  }
  0x6e   : > { %538 = vmatprep.mubr.bf16.mxu0 %v3207_v54  ;;  %594 = vmatprep.mubr.bf16.mxu1 %v3209_v55 }
  0x6f   : > { %2453 = vmatpush3.bf16.msra.mxu1 %v2923_v56  ;;  %2553 = vmatpush3.bf16.msra.mxu0 %v2925_v57  ;;  %v2943_v56 = vld [vmem:[#allocation3 + $0x38] sm:$0xff]  }
  0x70   : > { %2454 = vmatprep.subr.bf16.mxu1 %v2926_v62  ;;  %2554 = vmatprep.subr.bf16.mxu0 %v2928_v63  ;;  %v326_v57 = vld [vmem:[%s3166_s21 + $0x52] sm:$0xff]  ;;  %v341_v62 = vld [vmem:[%s3166_s21 + $0xca] sm:$0xff] }
  0x71   : > { %v214_v63 = vld [vmem:[%s3166_s21 + $0x70] sm:$0xff]  ;;  %v3283_v4 = vpack.c.bf16 %v327_v58, %v326_v57  ;;  %v2958_v57 = vld [vmem:[#allocation3 + $0x1d8] sm:$0xff]  }
  0x72   : > { %v880_v58 = vld [vmem:[%s3166_s21 + $0x31] sm:$0xff] }
  0x73   : > { %2455 = vmatpush3.bf16.msra.mxu1 %v2927_v0  ;;  %2555 = vmatpush3.bf16.msra.mxu0 %v2929_v5  ;;  %v215_v0 = vld [vmem:[%s3166_s21 + $0x78] sm:$0xff]  ;;  %v3285_v5 = vpack.c.bf16 %v341_v62, %v340_v60 }
  0x74   : > { %2456 = vmatprep.subr.bf16.mxu1 %v2930_v6  ;;  %2556 = vmatprep.subr.bf16.mxu0 %v2932_v7  ;;  %v3287_v6 = vpack.c.bf16 %v215_v0, %v214_v63  ;;  %v360_v7 = vpack.c.bf16 %v359_v2, %v358_v1  ;;  %v881_v60 = vld [vmem:[%s3166_s21 + $0x39] sm:$0xff] }
  0x75   : > { %539 = vmatmul.mubr.bf16.gmra.mrb[8].mxu0 %v3223_v8  ;;  %595 = vmatmul.mubr.bf16.gmra.mrb[8].mxu1 %v3225_v9  ;;  %v2961_v62 = vld [vmem:[#allocation3 + $0x218] sm:$0xff]   ;;  %v2962_v63 = vld [vmem:[#allocation3 + $0x1e0] sm:$0xff]   ;;  %v3320_v1 = vpack.c.bf16 %v881_v60, %v880_v58 }
  0x76   : > { %546 = vmatprep.mubr.bf16.mxu0 %v3227_v10  ;;  %602 = vmatprep.mubr.bf16.mxu1 %v3229_v11  ;;  %v2964_v0 = vld [vmem:[#allocation3 + $0x260] sm:$0xff]  }
  0x77   : > { %2457 = vmatpush3.bf16.msra.mxu1 %v2931_v12  ;;  %2557 = vmatpush3.bf16.msra.mxu0 %v2933_v13  ;;  %v2948_v12 = vld [vmem:[#allocation3 + $0x240] sm:$0xff]  }
  0x78   : > { %2458 = vmatprep.subr.bf16.mxu1 %v2934_v24  ;;  %2558 = vmatprep.subr.bf16.mxu0 %v2936_v26  ;;  %v328_v13 = vld [vmem:[%s3166_s21 + $0x62] sm:$0xff]  ;;  %v876_v26 = vld [vmem:[%s3166_s21 + $0x11] sm:$0xff] }
  0x79   : > { %v3298_v21 = vpack.c.bf16 %v329_v15, %v328_v13  ;;  %v200_v24 = vld [vmem:[%s3166_s21] sm:$0xff]  ;;  %v883_v13 = vld [vmem:[%s3166_s21 + $0x49] sm:$0xff] }
  0x7a   : > { %v2965_v2 = vld [vmem:[#allocation3 + $0x220] sm:$0xff]   ;;  %v2967_v15 = vld [vmem:[#allocation3 + $0x1a8] sm:$0xff]  }
  0x7b   : > { %2459 = vmatpush3.bf16.msra.mxu1 %v2935_v25  ;;  %2559 = vmatpush3.bf16.msra.mxu0 %v2937_v27  ;;  %v201_v25 = vld [vmem:[%s3166_s21 + $0x8] sm:$0xff]  ;;  %v877_v27 = vld [vmem:[%s3166_s21 + $0x19] sm:$0xff] }
  0x7c   : > { %2460 = vmatprep.subr.bf16.mxu1 %v2938_v32  ;;  %2560 = vmatprep.subr.bf16.mxu0 %v2940_v42  ;;  %v228_v32 = vpack.c.bf16 %v201_v25, %v200_v24  ;;  %v904_v34 = vpack.c.bf16 %v877_v27, %v876_v26  ;;  %v2951_v42 = vld [vmem:[#allocation3 + $0x188] sm:$0xff]   ;;  %v2974_v24 = vld [vmem:[#allocation3 + $0x1f8] sm:$0xff]  }
  0x7d   : > { %547 = vmatmul.mubr.bf16.gmra.mrb[12].mxu0 %v3243_v28  ;;  %603 = vmatmul.mubr.bf16.gmra.mrb[12].mxu1 %v3245_v29  ;;  %v2976_v25 = vld [vmem:[#allocation3 + $0x278] sm:$0xff]  }
  0x7e   : > { %554 = vmatprep.mubr.bf16.mxu0 %v3247_v30  ;;  %610 = vmatprep.mubr.bf16.mxu1 %v3249_v31  ;;  %v884_v26 = vld [vmem:[%s3166_s21 + $0x51] sm:$0xff]  ;;  %v885_v27 = vld [vmem:[%s3166_s21 + $0x59] sm:$0xff] }
  0x7f   : > { %2461 = vmatpush3.bf16.msra.mxu1 %v2939_v40  ;;  %2561 = vmatpush3.bf16.msra.mxu0 %v2941_v43  ;;  %v878_v40 = vld [vmem:[%s3166_s21 + $0x21] sm:$0xff] }
  0x80   : > { %2462 = vmatprep.subr.bf16.mxu1 %v2942_v51  ;;  %2562 = vmatprep.subr.bf16.mxu0 %v2944_v59  ;;  %v2952_v43 = vld [vmem:[#allocation3 + $0x248] sm:$0xff]   ;;  %v3312_v46 = vpack.c.bf16 %v879_v41, %v878_v40  ;;  %v2955_v51 = vld [vmem:[#allocation3 + $0x190] sm:$0xff]   ;;  %v2960_v59 = vld [vmem:[#allocation3 + $0x258] sm:$0xff]  }
  0x81   : > { %v888_v41 = vld [vmem:[%s3166_s21 + $0x71] sm:$0xff] }
  0x83   : > { %2463 = vmatpush3.bf16.msra.mxu1 %v2943_v56  ;;  %2563 = vmatpush3.bf16.msra.mxu0 %v2945_v61  ;;  %v2957_v56 = vld [vmem:[#allocation3 + $0x210] sm:$0xff]   ;;  %v2959_v61 = vld [vmem:[#allocation3 + $0x198] sm:$0xff]  }
  0x84   : > { %2648 = vmatprep.subr.bf16.mxu1 %v2946_v3  ;;  %2748 = vmatprep.subr.bf16.mxu0 %v2948_v12  ;;  %v2966_v3 = vld [vmem:[#allocation3 + $0x1e8] sm:$0xff]  }
  0x85   : > { %555 = vmatmul.mubr.bf16.gmra.mrb[16].mxu0 %v3263_v47  ;;  %611 = vmatmul.mubr.bf16.gmra.mrb[16].mxu1 %v3265_v48  ;;  %v882_v12 = vld [vmem:[%s3166_s21 + $0x41] sm:$0xff] }
  0x86   : > { %562 = vmatprep.mubr.bf16.mxu0 %v3267_v49  ;;  %618 = vmatprep.mubr.bf16.mxu1 %v3269_v50  ;;  %v3328_v20 = vpack.c.bf16 %v883_v13, %v882_v12 }
  0x8d   : > { %563 = vmatmul.mubr.bf16.gmra.mrb[20].mxu0 %v3283_v4  ;;  %619 = vmatmul.mubr.bf16.gmra.mrb[20].mxu1 %v3285_v5 }
  0x8e   : > { %570 = vmatprep.mubr.bf16.mxu0 %v3287_v6  ;;  %626 = vmatprep.mubr.bf16.mxu1 %v360_v7  ;;  %v2968_v7 = vld [vmem:[#allocation3 + $0x268] sm:$0xff]  }
  0x95   : > { %571 = vmatmul.mubr.bf16.gmra.mrb[24].mxu0 %v3298_v21  ;;  %627 = vmatmul.mubr.bf16.gmra.mrb[24].mxu1 %v3300_v22 }
  0x96   : > { %763 = vmatprep.mubr.bf16.mxu1 %v270_v23  ;;  %1121 = vmatprep.mubr.bf16.mxu0 %v3203_v52  ;;  %v2956_v52 = vld [vmem:[#allocation3 + $0x250] sm:$0xff]  }
  0x97   : > { %v2973_v23 = vld [vmem:[#allocation3 + $0x230] sm:$0xff]  }
  0x9d   : > { %764 = vmatmul.mubr.bf16.vlgmr.msra.gmra.mrb[28].mxu1 %v228_v32  ;;  %1122 = vmatmul.mubr.bf16.vlgmr.msra.gmra.mrb[28].mxu0 %v904_v34  ;;  %v2975_v32 = vld [vmem:[#allocation3 + $0x1b8] sm:$0xff]  }
  0x9e   : > { %2649 = vmatpush3.bf16.msra.mxu1 %v2947_v35  ;;  %2749 = vmatpush3.bf16.msra.mxu0 %v2949_v38  ;;  %v3336_v35 = vpack.c.bf16 %v885_v27, %v884_v26  ;;  %v886_v38 = vld [vmem:[%s3166_s21 + $0x61] sm:$0xff]  ;;  %v1665_v27 = vld [vmem:[%s3166_s21 + $0xaa] sm:$0xff] }
  0x9f   : > { %771 = vmatprep.mubr.bf16.mxu1 %v904_v34  ;;  %1129 = vmatprep.mubr.bf16.mxu0 %v3223_v8  ;;  %v2977_v34 = vld [vmem:[#allocation3 + $0x238] sm:$0xff]   ;;  %v1664_v26 = vld [vmem:[%s3166_s21 + $0xa2] sm:$0xff] }
  0xa0   : > { %2650 = vmatprep.subr.bf16.mxu1 %v2950_v39  ;;  %2750 = vmatprep.subr.bf16.mxu0 %v2952_v43  ;;  %v887_v39 = vld [vmem:[%s3166_s21 + $0x69] sm:$0xff] }
  0xa1   : > { %v3344_v40 = vpack.c.bf16 %v887_v39, %v886_v38 }
  0xa2   : > { %2651 = vmatpush3.bf16.msra.mxu1 %v2951_v42  ;;  %2751 = vmatpush3.bf16.msra.mxu0 %v2953_v44  ;;  %v889_v42 = vld [vmem:[%s3166_s21 + $0x79] sm:$0xff]  ;;  %v890_v44 = vld [vmem:[%s3166_s21 + $0x81] sm:$0xff] }
  0xa3   : > { %2652 = vmatprep.subr.bf16.mxu1 %v2954_v45  ;;  %2752 = vmatprep.subr.bf16.mxu0 %v2956_v52  ;;  %v3352_v43 = vpack.c.bf16 %v889_v42, %v888_v41  ;;  %v891_v45 = vld [vmem:[%s3166_s21 + $0x89] sm:$0xff] }
  0xa4   : > { %v3360_v52 = vpack.c.bf16 %v891_v45, %v890_v44  ;;  %v1684_v44 = vpack.c.bf16 %v1665_v27, %v1664_v26 }
  0xa5   : > { %772 = vmatmul.mubr.bf16.gmra.mrb[32].mxu1 %v3171_v14  ;;  %1130 = vmatmul.mubr.bf16.gmra.mrb[32].mxu0 %v3312_v46  ;;  %v2963_v14 = vld [vmem:[#allocation3 + $0x1a0] sm:$0xff]  }
  0xa6   : > { %779 = vmatprep.mubr.bf16.mxu1 %v3312_v46  ;;  %1137 = vmatprep.mubr.bf16.mxu0 %v3243_v28 }
  0xa7   : > { %2653 = vmatpush3.bf16.msra.mxu1 %v2955_v51  ;;  %2753 = vmatpush3.bf16.msra.mxu0 %v2957_v56  ;;  %v893_v51 = vld [vmem:[%s3166_s21 + $0x99] sm:$0xff] }
  0xa8   : > { %2654 = vmatprep.subr.bf16.mxu1 %v2958_v57  ;;  %2754 = vmatprep.subr.bf16.mxu0 %v2960_v59  ;;  %v895_v57 = vld [vmem:[%s3166_s21 + $0xa9] sm:$0xff] }
  0xa9   : > { %v899_v59 = vld [vmem:[%s3166_s21 + $0xc9] sm:$0xff] }
  0xab   : > { %2655 = vmatpush3.bf16.msra.mxu1 %v2959_v61  ;;  %2755 = vmatpush3.bf16.msra.mxu0 %v2961_v62  ;;  %v944_v61 = vld [vmem:[%s3166_s21 + $0xe2] sm:$0xff] }
  0xac   : > { %2656 = vmatprep.subr.bf16.mxu1 %v2962_v63  ;;  %2756 = vmatprep.subr.bf16.mxu0 %v2964_v0 }
  0xad   : > { %780 = vmatmul.mubr.bf16.gmra.mrb[36].mxu1 %v3188_v36  ;;  %1138 = vmatmul.mubr.bf16.gmra.mrb[36].mxu0 %v3320_v1  ;;  %v2971_v36 = vld [vmem:[#allocation3 + $0x1b0] sm:$0xff]  }
  0xae   : > { %787 = vmatprep.mubr.bf16.mxu1 %v3320_v1  ;;  %1145 = vmatprep.mubr.bf16.mxu0 %v3263_v47 }
  0xaf   : > { %2657 = vmatpush3.bf16.msra.mxu1 %v2963_v14  ;;  %2757 = vmatpush3.bf16.msra.mxu0 %v2965_v2  ;;  %v1262_v14 = vld [vmem:[%s3166_s21 + $0x20] sm:$0xff] }
  0xb0   : > { %2658 = vmatprep.subr.bf16.mxu1 %v2966_v3  ;;  %2758 = vmatprep.subr.bf16.mxu0 %v2968_v7 }
  0xb3   : > { %2659 = vmatpush3.bf16.msra.mxu1 %v2967_v15  ;;  %2759 = vmatpush3.bf16.msra.mxu0 %v2969_v17 }
  0xb4   : > { %2660 = vmatprep.subr.bf16.mxu1 %v2970_v18  ;;  %2760 = vmatprep.subr.bf16.mxu0 %v2972_v19 }
  0xb5   : > { %788 = vmatmul.mubr.bf16.gmra.mrb[40].mxu1 %v3207_v54  ;;  %1146 = vmatmul.mubr.bf16.gmra.mrb[40].mxu0 %v3328_v20 }
  0xb6   : > { %795 = vmatprep.mubr.bf16.mxu1 %v3328_v20  ;;  %1153 = vmatprep.mubr.bf16.mxu0 %v3283_v4 }
  0xb7   : > { %2661 = vmatpush3.bf16.msra.mxu1 %v2971_v36  ;;  %2761 = vmatpush3.bf16.msra.mxu0 %v2973_v23 }
  0xb8   : > { %2662 = vmatprep.subr.bf16.mxu1 %v2974_v24  ;;  %2762 = vmatprep.subr.bf16.mxu0 %v2976_v25  ;;  %v1276_v24 = vld [vmem:[%s3166_s21 + $0x90] sm:$0xff]  ;;  %v1277_v25 = vld [vmem:[%s3166_s21 + $0x98] sm:$0xff] }
  0xb9   : > { %v1297_v39 = vpack.c.bf16 %v1277_v25, %v1276_v24  ;;  %v1670_v24 = vld [vmem:[%s3166_s21 + $0xd2] sm:$0xff]  ;;  %v1671_v25 = vld [vmem:[%s3166_s21 + $0xda] sm:$0xff] }
  0xbb   : > { %2663 = vmatpush3.bf16.msra.mxu1 %v2975_v32  ;;  %2763 = vmatpush3.bf16.msra.mxu0 %v2977_v34 }
  0xbd   : > { %796 = vmatmul.mubr.bf16.gmra.mrb[44].mxu1 %v3227_v10  ;;  %1154 = vmatmul.mubr.bf16.gmra.mrb[44].mxu0 %v3336_v35 }
  0xbe   : > { %803 = vmatprep.mubr.bf16.mxu1 %v3336_v35  ;;  %1161 = vmatprep.mubr.bf16.mxu0 %v3298_v21 }
  0xc5   : > { %804 = vmatmul.mubr.bf16.gmra.mrb[48].mxu1 %v3247_v30  ;;  %1162 = vmatmul.mubr.bf16.gmra.mrb[48].mxu0 %v3344_v40 }
  0xc6   : > { %811 = vmatprep.mubr.bf16.mxu1 %v3344_v40  ;;  %1169 = vmatprep.mubr.bf16.mxu0 %v3186_v33  ;;  %v892_v33 = vld [vmem:[%s3166_s21 + $0x91] sm:$0xff] }
  0xc7   : > { %v3368_v56 = vpack.c.bf16 %v893_v51, %v892_v33 }
  0xcd   : > { %812 = vmatmul.mubr.bf16.gmra.mrb[52].mxu1 %v3267_v49  ;;  %1170 = vmatmul.mubr.bf16.gmra.mrb[52].mxu0 %v3352_v43 }
  0xce   : > { %819 = vmatprep.mubr.bf16.mxu1 %v3352_v43  ;;  %1177 = vmatprep.mubr.bf16.mxu0 %v3205_v53  ;;  %v894_v53 = vld [vmem:[%s3166_s21 + $0xa1] sm:$0xff] }
  0xcf   : > { %v3376_v58 = vpack.c.bf16 %v895_v57, %v894_v53  ;;  %v1279_v53 = vld [vmem:[%s3166_s21 + $0xa8] sm:$0xff]  ;;  %v1666_v57 = vld [vmem:[%s3166_s21 + $0xb2] sm:$0xff] }
  0xd5   : > { %820 = vmatmul.mubr.bf16.gmra.mrb[56].mxu1 %v3287_v6  ;;  %1178 = vmatmul.mubr.bf16.gmra.mrb[56].mxu0 %v3360_v52 }
  0xd6   : > { %827 = vmatprep.mubr.bf16.mxu1 %v3360_v52  ;;  %1185 = vmatprep.mubr.bf16.mxu0 %v3225_v9  ;;  %v897_v9 = vld [vmem:[%s3166_s21 + $0xb9] sm:$0xff] }
  0xdd   : > { %828 = vmatmul.mubr.bf16.gmra.mrb[60].mxu1 %v3174_v16  ;;  %1186 = vmatmul.mubr.bf16.gmra.mrb[60].mxu0 %v3368_v56  ;;  %v896_v16 = vld [vmem:[%s3166_s21 + $0xb1] sm:$0xff] }
  0xde   : > { %835 = vmatprep.mubr.bf16.mxu1 %v3368_v56  ;;  %1193 = vmatprep.mubr.bf16.mxu0 %v3245_v29  ;;  %v3384_v29 = vpack.c.bf16 %v897_v9, %v896_v16  ;;  %v1667_v16 = vld [vmem:[%s3166_s21 + $0xba] sm:$0xff] }
  0xe5   : > { %836 = vmatmul.mubr.bf16.gmra.mrb[64].mxu1 %v3190_v37  ;;  %1194 = vmatmul.mubr.bf16.gmra.mrb[64].mxu0 %v3376_v58  ;;  %v898_v37 = vld [vmem:[%s3166_s21 + $0xc1] sm:$0xff] }
  0xe6   : > { %843 = vmatprep.mubr.bf16.mxu1 %v3376_v58  ;;  %1201 = vmatprep.mubr.bf16.mxu0 %v3265_v48  ;;  %v3392_v60 = vpack.c.bf16 %v899_v59, %v898_v37  ;;  %v901_v48 = vld [vmem:[%s3166_s21 + $0xd9] sm:$0xff] }
  0xed   : > { %844 = vmatmul.mubr.bf16.gmra.mrb[68].mxu1 %v3209_v55  ;;  %1202 = vmatmul.mubr.bf16.gmra.mrb[68].mxu0 %v3384_v29  ;;  %v900_v55 = vld [vmem:[%s3166_s21 + $0xd1] sm:$0xff] }
  0xee   : > { %851 = vmatprep.mubr.bf16.mxu1 %v3384_v29  ;;  %1209 = vmatprep.mubr.bf16.mxu0 %v3285_v5  ;;  %v945_v5 = vld [vmem:[%s3166_s21 + $0xea] sm:$0xff]  ;;  %v3402_v62 = vpack.c.bf16 %v901_v48, %v900_v55 }
  0xef   : > { %v3404_v63 = vpack.c.bf16 %v945_v5, %v944_v61 }
  0xf5   : > { %852 = vmatmul.mubr.bf16.gmra.mrb[72].mxu1 %v3229_v11  ;;  %1210 = vmatmul.mubr.bf16.gmra.mrb[72].mxu0 %v3392_v60  ;;  %v902_v11 = vld [vmem:[%s3166_s21 + $0xe1] sm:$0xff] }
  0xf6   : > { %859 = vmatprep.mubr.bf16.mxu1 %v3392_v60  ;;  %1217 = vmatprep.mubr.bf16.mxu0 %v3300_v22  ;;  %v903_v22 = vld [vmem:[%s3166_s21 + $0xe9] sm:$0xff] }
  0xf7   : > { %v3412_v0 = vpack.c.bf16 %v903_v22, %v902_v11  ;;  %v1685_v22 = vpack.c.bf16 %v1667_v16, %v1666_v57  ;;  %v1285_v57 = vld [vmem:[%s3166_s21 + $0xd8] sm:$0xff] }
  0xfd   : > { %860 = vmatmul.mubr.bf16.gmra.mrb[76].mxu1 %v3249_v31  ;;  %1218 = vmatmul.mubr.bf16.gmra.mrb[76].mxu0 %v3402_v62  ;;  %v1263_v31 = vld [vmem:[%s3166_s21 + $0x28] sm:$0xff] }
  0xfe   : > { %867 = vmatprep.mubr.bf16.mxu1 %v3402_v62  ;;  %1225 = vmatprep.mubr.bf16.mxu0 %v3404_v63  ;;  %v1290_v2 = vpack.c.bf16 %v1263_v31, %v1262_v14 }
 0x105   : > { %868 = vmatmul.mubr.bf16.gmra.mrb[80].mxu1 %v3269_v50  ;;  %1226 = vmatmul.mubr.bf16.gmra.mrb[80].mxu0 %v3412_v0  ;;  %v1274_v50 = vld [vmem:[%s3166_s21 + $0x80] sm:$0xff] }
 0x106   : > { %1507 = vmatprep.mubr.bf16.mxu1 %v3312_v46  ;;  %1851 = vmatprep.mubr.bf16.mxu0 %v3223_v8  ;;  %v1662_v46 = vld [vmem:[%s3166_s21 + $0x92] sm:$0xff] }
 0x10d   : > { %1508 = vmatmul.mubr.bf16.vlgmr.msra.gmra.mrb[84].mxu1 %v1290_v2  ;;  %1852 = vmatmul.mubr.bf16.vlgmr.msra.gmra.mrb[84].mxu0 %v3223_v8  ;;  %v1659_v8 = vld [vmem:[%s3166_s21 + $0x7a] sm:$0xff] }
 0x10e   : > { %1515 = vmatprep.mubr.bf16.mxu1 %v3320_v1  ;;  %1859 = vmatprep.mubr.bf16.mxu0 %v3243_v28  ;;  %v1663_v1 = vld [vmem:[%s3166_s21 + $0x9a] sm:$0xff] }
 0x10f   : > { %v1683_v18 = vpack.c.bf16 %v1663_v1, %v1662_v46 }
 0x115   : > { %1516 = vmatmul.mubr.bf16.gmra.mrb[88].mxu1 %v3207_v54  ;;  %1860 = vmatmul.mubr.bf16.gmra.mrb[88].mxu0 %v3243_v28  ;;  %v1658_v54 = vld [vmem:[%s3166_s21 + $0x72] sm:$0xff]  ;;  %v1660_v28 = vld [vmem:[%s3166_s21 + $0x82] sm:$0xff] }
 0x116   : > { %1523 = vmatprep.mubr.bf16.mxu1 %v3328_v20  ;;  %1867 = vmatprep.mubr.bf16.mxu0 %v3263_v47 }
 0x11d   : > { %1524 = vmatmul.mubr.bf16.gmra.mrb[92].mxu1 %v3227_v10  ;;  %1868 = vmatmul.mubr.bf16.gmra.mrb[92].mxu0 %v3263_v47  ;;  %v1681_v10 = vpack.c.bf16 %v1659_v8, %v1658_v54  ;;  %v1280_v8 = vld [vmem:[%s3166_s21 + $0xb0] sm:$0xff] }
 0x11e   : > { %1531 = vmatprep.mubr.bf16.mxu1 %v3336_v35  ;;  %1875 = vmatprep.mubr.bf16.mxu0 %v3283_v4 }
 0x125   : > { %1532 = vmatmul.mubr.bf16.gmra.mrb[96].mxu1 %v3247_v30  ;;  %1876 = vmatmul.mubr.bf16.gmra.mrb[96].mxu0 %v3283_v4  ;;  %v1661_v30 = vld [vmem:[%s3166_s21 + $0x8a] sm:$0xff] }
 0x126   : > { %1539 = vmatprep.mubr.bf16.mxu1 %v3344_v40  ;;  %1883 = vmatprep.mubr.bf16.mxu0 %v3298_v21  ;;  %v1682_v47 = vpack.c.bf16 %v1661_v30, %v1660_v28  ;;  %v1275_v4 = vld [vmem:[%s3166_s21 + $0x88] sm:$0xff] }
 0x127   : > { %v1296_v12 = vpack.c.bf16 %v1275_v4, %v1274_v50  ;;  %v1668_v28 = vld [vmem:[%s3166_s21 + $0xc2] sm:$0xff]  ;;  %v1669_v30 = vld [vmem:[%s3166_s21 + $0xca] sm:$0xff] }
 0x12d   : > { %1540 = vmatmul.mubr.bf16.gmra.mrb[100].mxu1 %v3267_v49  ;;  %1884 = vmatmul.mubr.bf16.gmra.mrb[100].mxu0 %v3298_v21 }
 0x12e   : > { %1547 = vmatprep.mubr.bf16.mxu1 %v3352_v43  ;;  %1891 = vmatprep.mubr.bf16.mxu0 %v1681_v10 }
 0x135   : > { %1548 = vmatmul.mubr.bf16.gmra.mrb[104].mxu1 %v3287_v6  ;;  %1892 = vmatmul.mubr.bf16.gmra.mrb[104].mxu0 %v1681_v10  ;;  %v1281_v10 = vld [vmem:[%s3166_s21 + $0xb8] sm:$0xff] }
 0x136   : > { %1555 = vmatprep.mubr.bf16.mxu1 %v3360_v52  ;;  %1899 = vmatprep.mubr.bf16.mxu0 %v1682_v47  ;;  %v1299_v1 = vpack.c.bf16 %v1281_v10, %v1280_v8  ;;  %v1286_v10 = vld [vmem:[%s3166_s21 + $0xe0] sm:$0xff] }
 0x138   : > { %v2364_v3 = vpop.f32.mrb[0].mxu0  ;;  %v2406_v49 = vpop.f32.mrb[0].mxu1 }
 0x139   : > { %v2365_v7 = vpop.f32.mrb[1].mxu0  ;;  %v2407_v21 = vpop.f32.mrb[1].mxu1 }
 0x13a   : > { %v3448_v13 = vadd.f32 %v2365_v7, %v2364_v3  ;;  %v3450_v6 = vadd.f32 %v2407_v21, %v2406_v49  ;;  %v2367_v15 = vpop.f32.mrb[2].mxu0  ;;  %v2409_v17 = vpop.f32.mrb[2].mxu1  ;;  %v1686_v21 = vpack.c.bf16 %v1669_v30, %v1668_v28  ;;  %v1287_v28 = vld [vmem:[%s3166_s21 + $0xe8] sm:$0xff]  ;;  %v1330_v30 = vld [vmem:[%s3166_s21 + $0xf1] sm:$0xff] }
 0x13b   : > { %v2368_v19 = vpop.f32.mrb[3].mxu0  ;;  %v2410_v20 = vpop.f32.mrb[3].mxu1 }
 0x13c   : > { %v3452_v36 = vadd.f32 %v2368_v19, %v2367_v15  ;;  %v3454_v23 = vadd.f32 %v2410_v20, %v2409_v17  ;;  %v1282_v19 = vld [vmem:[%s3166_s21 + $0xc0] sm:$0xff]  ;;  %v1283_v20 = vld [vmem:[%s3166_s21 + $0xc8] sm:$0xff] }
 0x13d   : > { %1556 = vmatmul.mubr.bf16.gmra.mrb[108].mxu1 %v1296_v12  ;;  %1900 = vmatmul.mubr.bf16.gmra.mrb[108].mxu0 %v1682_v47 }
 0x13e   : > { %1563 = vmatprep.mubr.bf16.mxu1 %v3368_v56  ;;  %1907 = vmatprep.mubr.bf16.mxu0 %v1683_v18  ;;  %v1278_v56 = vld [vmem:[%s3166_s21 + $0xa0] sm:$0xff] }
 0x13f   : > { %v1298_v48 = vpack.c.bf16 %v1279_v53, %v1278_v56  ;;  %v1284_v53 = vld [vmem:[%s3166_s21 + $0xd0] sm:$0xff] }
 0x140   : > { %v2370_v32 = vpop.f32.mrb[4].mxu0  ;;  %v2412_v34 = vpop.f32.mrb[4].mxu1 }
 0x141   : > { %v2371_v35 = vpop.f32.mrb[5].mxu0  ;;  %v2413_v38 = vpop.f32.mrb[5].mxu1 }
 0x142   : > { %v3461_v40 = vadd.f32 %v2371_v35, %v2370_v32  ;;  %v3463_v41 = vadd.f32 %v2413_v38, %v2412_v34  ;;  %v2373_v42 = vpop.f32.mrb[6].mxu0  ;;  %v2415_v43 = vpop.f32.mrb[6].mxu1  ;;  %v1300_v35 = vpack.c.bf16 %v1283_v20, %v1282_v19 }
 0x143   : > { %v2374_v45 = vpop.f32.mrb[7].mxu0  ;;  %v2416_v52 = vpop.f32.mrb[7].mxu1 }
 0x144   : > { %v3465_v33 = vadd.f32 %v2374_v45, %v2373_v42  ;;  %v3467_v51 = vadd.f32 %v2416_v52, %v2415_v43 }
 0x145   : > { %1564 = vmatmul.mubr.bf16.gmra.mrb[112].mxu1 %v1297_v39  ;;  %1908 = vmatmul.mubr.bf16.gmra.mrb[112].mxu0 %v1683_v18 }
 0x146   : > { %1571 = vmatprep.mubr.bf16.mxu1 %v3376_v58  ;;  %1915 = vmatprep.mubr.bf16.mxu0 %v1684_v44 }
 0x148   : > { %v2376_v9 = vpop.f32.mrb[8].mxu0  ;;  %v2418_v37 = vpop.f32.mrb[8].mxu1 }
 0x149   : > { %v2377_v59 = vpop.f32.mrb[9].mxu0  ;;  %v2419_v55 = vpop.f32.mrb[9].mxu1 }
 0x14a   : > { %v3474_v61 = vadd.f32 %v2377_v59, %v2376_v9  ;;  %v3476_v5 = vadd.f32 %v2419_v55, %v2418_v37  ;;  %v2379_v11 = vpop.f32.mrb[10].mxu0  ;;  %v2421_v58 = vpop.f32.mrb[10].mxu1  ;;  %v1301_v55 = vpack.c.bf16 %v1285_v57, %v1284_v53 }
 0x14b   : > { %v2380_v14 = vpop.f32.mrb[11].mxu0  ;;  %v2422_v31 = vpop.f32.mrb[11].mxu1 }
 0x14c   : > { %v3478_v2 = vadd.f32 %v2380_v14, %v2379_v11  ;;  %v3480_v54 = vadd.f32 %v2422_v31, %v2421_v58 }
 0x14d   : > { %1572 = vmatmul.mubr.bf16.gmra.mrb[116].mxu1 %v1298_v48  ;;  %1916 = vmatmul.mubr.bf16.gmra.mrb[116].mxu0 %v1684_v44  ;;  %v1687_v44 = vpack.c.bf16 %v1671_v25, %v1670_v24 }
 0x14e   : > { %1579 = vmatprep.mubr.bf16.mxu1 %v3384_v29  ;;  %1923 = vmatprep.mubr.bf16.mxu0 %v1685_v22 }
 0x150   : > { %v2382_v47 = vpop.f32.mrb[12].mxu0  ;;  %v2424_v50 = vpop.f32.mrb[12].mxu1 }
 0x151   : > { %v2383_v4 = vpop.f32.mrb[13].mxu0  ;;  %v2425_v46 = vpop.f32.mrb[13].mxu1 }
 0x152   : > { %v3487_v3 = vadd.f32 %v2383_v4, %v2382_v47  ;;  %v3489_v49 = vadd.f32 %v2425_v46, %v2424_v50  ;;  %v2385_v7 = vpop.f32.mrb[14].mxu0  ;;  %v2427_v29 = vpop.f32.mrb[14].mxu1  ;;  %v1331_v47 = vld [vmem:[%s3166_s21 + $0xf9] sm:$0xff] }
 0x153   : > { %v2386_v12 = vpop.f32.mrb[15].mxu0  ;;  %v2428_v15 = vpop.f32.mrb[15].mxu1  ;;  %v1674_v50 = vld [vmem:[%s3166_s21 + $0xf2] sm:$0xff]  ;;  %v1675_v4 = vld [vmem:[%s3166_s21 + $0xfa] sm:$0xff]  ;;  %v1345_v20 = vpack.c.bf16 %v1331_v47, %v1330_v30  ;;  %v3054_v30 = vmov 0.0  }
 0x154   : > { %v3491_v17 = vadd.f32 %v2386_v12, %v2385_v7  ;;  %v3493_v18 = vadd.f32 %v2428_v15, %v2427_v29  ;;  %v1689_v24 = vpack.c.bf16 %v1675_v4, %v1674_v50  ;;  %2083 = vst [vmem:[%s3548_s25] sm:$0xff] %v3054_v30  ;;  %2084 = vst [vmem:[%s3548_s25 + $0x8] sm:$0xff] %v3054_v30 }
 0x155   : > { %1580 = vmatmul.mubr.bf16.gmra.mrb[120].mxu1 %v1299_v1  ;;  %1924 = vmatmul.mubr.bf16.gmra.mrb[120].mxu0 %v1685_v22  ;;  %2085 = vst [vmem:[%s3548_s25 + $0x10] sm:$0xff] %v3054_v30  ;;  %2092 = vst [vmem:[%s3548_s25 + $0x48] sm:$0xff] %v3054_v30 }
 0x156   : > { %1587 = vmatprep.mubr.bf16.mxu1 %v3392_v60  ;;  %1931 = vmatprep.mubr.bf16.mxu0 %v1686_v21  ;;  %2093 = vst [vmem:[%s3548_s25 + $0x50] sm:$0xff] %v3054_v30  ;;  %2086 = vst [vmem:[%s3548_s25 + $0x18] sm:$0xff] %v3054_v30 }
 0x157   : > { %2087 = vst [vmem:[%s3548_s25 + $0x20] sm:$0xff] %v3054_v30  ;;  %2088 = vst [vmem:[%s3548_s25 + $0x28] sm:$0xff] %v3054_v30 }
 0x158   : > { %v2388_v26 = vpop.f32.mrb[16].mxu0  ;;  %v2430_v27 = vpop.f32.mrb[16].mxu1  ;;  %2089 = vst [vmem:[%s3548_s25 + $0x30] sm:$0xff] %v3054_v30  ;;  %2090 = vst [vmem:[%s3548_s25 + $0x38] sm:$0xff] %v3054_v30 }
 0x159   : > { %v2389_v32 = vpop.f32.mrb[17].mxu0  ;;  %v2431_v34 = vpop.f32.mrb[17].mxu1  ;;  %2091 = vst [vmem:[%s3548_s25 + $0x40] sm:$0xff] %v3054_v30 }
 0x15a   : > { %v3500_v38 = vadd.f32 %v2389_v32, %v2388_v26  ;;  %v3502_v39 = vadd.f32 %v2431_v34, %v2430_v27  ;;  %v2391_v42 = vpop.f32.mrb[18].mxu0  ;;  %v2433_v43 = vpop.f32.mrb[18].mxu1  ;;  %v1288_v34 = vld [vmem:[%s3166_s21 + $0xf0] sm:$0xff] }
 0x15b   : > { %v2392_v60 = vpop.f32.mrb[19].mxu0  ;;  %v2434_v45 = vpop.f32.mrb[19].mxu1 }
 0x15c   : > { %v3504_v52 = vadd.f32 %v2392_v60, %v2391_v42  ;;  %v3506_v56 = vadd.f32 %v2434_v45, %v2433_v43 }
 0x15d   : > { %1588 = vmatmul.mubr.bf16.gmra.mrb[124].mxu1 %v1300_v35  ;;  %1932 = vmatmul.mubr.bf16.gmra.mrb[124].mxu0 %v1686_v21  ;;  %v1302_v21 = vpack.c.bf16 %v1287_v28, %v1286_v10  ;;  %v1289_v35 = vld [vmem:[%s3166_s21 + $0xf8] sm:$0xff] }
 0x15e   : > { %1595 = vmatprep.mubr.bf16.mxu1 %v3402_v62  ;;  %1939 = vmatprep.mubr.bf16.mxu0 %v1687_v44  ;;  %v1303_v45 = vpack.c.bf16 %v1289_v35, %v1288_v34 }
 0x160   : > { %v2394_v16 = vpop.f32.mrb[20].mxu0  ;;  %v2436_v9 = vpop.f32.mrb[20].mxu1 }
 0x161   : > { %v2395_v37 = vpop.f32.mrb[21].mxu0  ;;  %v2437_v59 = vpop.f32.mrb[21].mxu1 }
 0x162   : > { %v3511_v48 = vadd.f32 %v2395_v37, %v2394_v16  ;;  %v3513_v11 = vadd.f32 %v2437_v59, %v2436_v9  ;;  %v2397_v58 = vpop.f32.mrb[22].mxu0  ;;  %v2439_v62 = vpop.f32.mrb[22].mxu1 }
 0x163   : > { %v2398_v22 = vpop.f32.mrb[23].mxu0  ;;  %v2440_v14 = vpop.f32.mrb[23].mxu1 }
 0x164   : > { %v3515_v31 = vadd.f32 %v2398_v22, %v2397_v58  ;;  %v3517_v8 = vadd.f32 %v2440_v14, %v2439_v62 }
 0x165   : > { %1596 = vmatmul.mubr.bf16.gmra.mrb[128].mxu1 %v1301_v55  ;;  %1940 = vmatmul.mubr.bf16.gmra.mrb[128].mxu0 %v1687_v44 }
 0x166   : > { %1603 = vmatprep.mubr.bf16.mxu1 %v3412_v0  ;;  %1947 = vmatprep.mubr.bf16.mxu0 %v3404_v63 }
 0x168   : > { %v2400_v46 = vpop.f32.mrb[24].mxu0  ;;  %v2442_v1 = vpop.f32.mrb[24].mxu1 }
 0x169   : > { %v2401_v7 = vpop.f32.mrb[25].mxu0  ;;  %v2443_v29 = vpop.f32.mrb[25].mxu1 }
 0x16a   : > { %v3527_v12 = vadd.f32 %v2401_v7, %v2400_v46  ;;  %v3529_v15 = vadd.f32 %v2443_v29, %v2442_v1  ;;  %v2403_v0 = vpop.f32.mrb[26].mxu0  ;;  %v2445_v19 = vpop.f32.mrb[26].mxu1 }
 0x16b   : > { %v2404_v25 = vpop.f32.mrb[27].mxu0  ;;  %v2446_v26 = vpop.f32.mrb[27].mxu1 }
 0x16c   : > { %v3531_v27 = vadd.f32 %v2404_v25, %v2403_v0  ;;  %v3533_v32 = vadd.f32 %v2446_v26, %v2445_v19 }
 0x16d   : > { %1604 = vmatmul.mubr.bf16.gmra.mrb[132].mxu1 %v1302_v21  ;;  %1948 = vmatmul.mubr.bf16.gmra.mrb[132].mxu0 %v3404_v63 }
 0x16e   : > { %1611 = vmatprep.mubr.bf16.mxu1 %v1345_v20  ;;  %1955 = vmatprep.mubr.bf16.mxu0 %v1689_v24 }
 0x170   : > { %v2464_v42 = vpop.f32.mrb[28].mxu1  ;;  %v2564_v43 = vpop.f32.mrb[28].mxu0 }
 0x171   : > { %v2465_v44 = vpop.f32.mrb[29].mxu1  ;;  %v2565_v60 = vpop.f32.mrb[29].mxu0 }
 0x172   : > { %v2466_v53 = vadd.f32 %v2465_v44, %v2464_v42  ;;  %v2566_v57 = vadd.f32 %v2565_v60, %v2564_v43  ;;  %v2467_v16 = vpop.f32.mrb[30].mxu1  ;;  %v2567_v9 = vpop.f32.mrb[30].mxu0 }
 0x173   : > { %v2468_v37 = vpop.f32.mrb[31].mxu1  ;;  %v2568_v59 = vpop.f32.mrb[31].mxu0 }
 0x174   : > { %v766_v55 = vadd.f32 %v2466_v53, %v3448_v13  ;;  %v2469_v58 = vadd.f32 %v2468_v37, %v2467_v16  ;;  %v2569_v63 = vadd.f32 %v2568_v59, %v2567_v9 }
 0x175   : > { %1612 = vmatmul.mubr.bf16.gmra.mrb[136].mxu1 %v1303_v45  ;;  %1956 = vmatmul.mubr.bf16.gmra.mrb[136].mxu0 %v1689_v24 }
 0x176   : > { %v3539_v62 = vadd.f32 %v2566_v57, %v766_v55  ;;  %v769_v22 = vadd.f32 %v2469_v58, %v3452_v36 }
 0x178   : > { %v3543_v14 = vadd.f32 %v2569_v63, %v769_v22  ;;  %v2470_v10 = vpop.f32.mrb[32].mxu1  ;;  %v2570_v28 = vpop.f32.mrb[32].mxu0 }
 0x179   : > { %v2471_v13 = vpop.f32.mrb[33].mxu1  ;;  %v2571_v36 = vpop.f32.mrb[33].mxu0 }
 0x17a   : > { %v2472_v47 = vadd.f32 %v2471_v13, %v2470_v10  ;;  %v2572_v50 = vadd.f32 %v2571_v36, %v2570_v28  ;;  %v2473_v4 = vpop.f32.mrb[34].mxu1  ;;  %v2573_v46 = vpop.f32.mrb[34].mxu0 }
 0x17b   : > { %v2474_v1 = vpop.f32.mrb[35].mxu1  ;;  %v2574_v7 = vpop.f32.mrb[35].mxu0 }
 0x17c   : > { %v774_v29 = vadd.f32 %v2472_v47, %v3461_v40  ;;  %v2475_v21 = vadd.f32 %v2474_v1, %v2473_v4  ;;  %v2575_v0 = vadd.f32 %v2574_v7, %v2573_v46 }
 0x17e   : > { %v3562_v19 = vadd.f32 %v2572_v50, %v774_v29  ;;  %v777_v20 = vadd.f32 %v2475_v21, %v3465_v33 }
 0x180   : > { %v3565_v24 = vadd.f32 %v2575_v0, %v777_v20  ;;  %v2476_v25 = vpop.f32.mrb[36].mxu1  ;;  %v2576_v26 = vpop.f32.mrb[36].mxu0 }
 0x181   : > { %v2477_v34 = vpop.f32.mrb[37].mxu1  ;;  %v2577_v35 = vpop.f32.mrb[37].mxu0 }
 0x182   : > { %v2478_v42 = vadd.f32 %v2477_v34, %v2476_v25  ;;  %v2578_v43 = vadd.f32 %v2577_v35, %v2576_v26  ;;  %v2479_v44 = vpop.f32.mrb[38].mxu1  ;;  %v2579_v60 = vpop.f32.mrb[38].mxu0 }
 0x183   : > { %v2480_v45 = vpop.f32.mrb[39].mxu1  ;;  %v2580_v53 = vpop.f32.mrb[39].mxu0 }
 0x184   : > { %v782_v40 = vadd.f32 %v2478_v42, %v3474_v61  ;;  %v2481_v57 = vadd.f32 %v2480_v45, %v2479_v44  ;;  %v2581_v16 = vadd.f32 %v2580_v53, %v2579_v60 }
 0x186   : > { %v3568_v9 = vadd.f32 %v2578_v43, %v782_v40  ;;  %v785_v33 = vadd.f32 %v2481_v57, %v3478_v2 }
 0x188   : > { %v3571_v37 = vadd.f32 %v2581_v16, %v785_v33  ;;  %v2482_v59 = vpop.f32.mrb[40].mxu1  ;;  %v2582_v55 = vpop.f32.mrb[40].mxu0 }
 0x189   : > { %v2483_v58 = vpop.f32.mrb[41].mxu1  ;;  %v2583_v63 = vpop.f32.mrb[41].mxu0 }
 0x18a   : > { %v2484_v22 = vadd.f32 %v2483_v58, %v2482_v59  ;;  %v2584_v10 = vadd.f32 %v2583_v63, %v2582_v55  ;;  %v2485_v28 = vpop.f32.mrb[42].mxu1  ;;  %v2585_v13 = vpop.f32.mrb[42].mxu0 }
 0x18b   : > { %v2486_v36 = vpop.f32.mrb[43].mxu1  ;;  %v2586_v30 = vpop.f32.mrb[43].mxu0 }
 0x18c   : > { %v790_v61 = vadd.f32 %v2484_v22, %v3487_v3  ;;  %v2487_v47 = vadd.f32 %v2486_v36, %v2485_v28  ;;  %v2587_v50 = vadd.f32 %v2586_v30, %v2585_v13 }
 0x18e   : > { %v3574_v4 = vadd.f32 %v2584_v10, %v790_v61  ;;  %v793_v2 = vadd.f32 %v2487_v47, %v3491_v17 }
 0x190   : > { %v3577_v46 = vadd.f32 %v2587_v50, %v793_v2  ;;  %v2488_v1 = vpop.f32.mrb[44].mxu1  ;;  %v2588_v7 = vpop.f32.mrb[44].mxu0 }
 0x191   : > { %v2489_v29 = vpop.f32.mrb[45].mxu1  ;;  %v2589_v21 = vpop.f32.mrb[45].mxu0 }
 0x192   : > { %v2490_v0 = vadd.f32 %v2489_v29, %v2488_v1  ;;  %v2590_v20 = vadd.f32 %v2589_v21, %v2588_v7  ;;  %v2491_v25 = vpop.f32.mrb[46].mxu1  ;;  %v2591_v26 = vpop.f32.mrb[46].mxu0 }
 0x193   : > { %v2492_v34 = vpop.f32.mrb[47].mxu1  ;;  %v2592_v35 = vpop.f32.mrb[47].mxu0 }
 0x194   : > { %v798_v3 = vadd.f32 %v2490_v0, %v3500_v38  ;;  %v2493_v42 = vadd.f32 %v2492_v34, %v2491_v25  ;;  %v2593_v43 = vadd.f32 %v2592_v35, %v2591_v26 }
 0x196   : > { %v3580_v44 = vadd.f32 %v2590_v20, %v798_v3  ;;  %v801_v17 = vadd.f32 %v2493_v42, %v3504_v52 }
 0x198   : > { %v3583_v60 = vadd.f32 %v2593_v43, %v801_v17  ;;  %v2494_v45 = vpop.f32.mrb[48].mxu1  ;;  %v2594_v53 = vpop.f32.mrb[48].mxu0 }
 0x199   : > { %v2495_v40 = vpop.f32.mrb[49].mxu1  ;;  %v2595_v57 = vpop.f32.mrb[49].mxu0 }
 0x19a   : > { %v2496_v16 = vadd.f32 %v2495_v40, %v2494_v45  ;;  %v2596_v33 = vadd.f32 %v2595_v57, %v2594_v53  ;;  %v2497_v59 = vpop.f32.mrb[50].mxu1  ;;  %v2597_v55 = vpop.f32.mrb[50].mxu0 }
 0x19b   : > { %v2498_v58 = vpop.f32.mrb[51].mxu1  ;;  %v2598_v63 = vpop.f32.mrb[51].mxu0 }
 0x19c   : > { %v806_v38 = vadd.f32 %v2496_v16, %v3511_v48  ;;  %v2499_v22 = vadd.f32 %v2498_v58, %v2497_v59  ;;  %v2599_v10 = vadd.f32 %v2598_v63, %v2597_v55 }
 0x19e   : > { %v3586_v28 = vadd.f32 %v2596_v33, %v806_v38  ;;  %v809_v52 = vadd.f32 %v2499_v22, %v3515_v31 }
 0x1a0   : > { %v3589_v13 = vadd.f32 %v2599_v10, %v809_v52  ;;  %v2500_v36 = vpop.f32.mrb[52].mxu1  ;;  %v2600_v30 = vpop.f32.mrb[52].mxu0 }
 0x1a1   : > { %v2501_v61 = vpop.f32.mrb[53].mxu1  ;;  %v2601_v47 = vpop.f32.mrb[53].mxu0 }
 0x1a2   : > { %v2502_v50 = vadd.f32 %v2501_v61, %v2500_v36  ;;  %v2602_v2 = vadd.f32 %v2601_v47, %v2600_v30  ;;  %v2503_v1 = vpop.f32.mrb[54].mxu1  ;;  %v2603_v7 = vpop.f32.mrb[54].mxu0 }
 0x1a3   : > { %v2504_v29 = vpop.f32.mrb[55].mxu1  ;;  %v2604_v21 = vpop.f32.mrb[55].mxu0 }
 0x1a4   : > { %v814_v48 = vadd.f32 %v2502_v50, %v3527_v12  ;;  %v2505_v0 = vadd.f32 %v2504_v29, %v2503_v1  ;;  %v2605_v20 = vadd.f32 %v2604_v21, %v2603_v7 }
 0x1a6   : > { %v3592_v25 = vadd.f32 %v2602_v2, %v814_v48  ;;  %v817_v31 = vadd.f32 %v2505_v0, %v3531_v27 }
 0x1a8   : > { %v3595_v26 = vadd.f32 %v2605_v20, %v817_v31  ;;  %v2506_v34 = vpop.f32.mrb[56].mxu1  ;;  %v2606_v35 = vpop.f32.mrb[56].mxu0 }
 0x1a9   : > { %v2507_v3 = vpop.f32.mrb[57].mxu1  ;;  %v2607_v42 = vpop.f32.mrb[57].mxu0 }
 0x1aa   : > { %v2508_v43 = vadd.f32 %v2507_v3, %v2506_v34  ;;  %v2608_v17 = vadd.f32 %v2607_v42, %v2606_v35  ;;  %v2509_v45 = vpop.f32.mrb[58].mxu1  ;;  %v2609_v53 = vpop.f32.mrb[58].mxu0 }
 0x1ab   : > { %v2510_v40 = vpop.f32.mrb[59].mxu1  ;;  %v2610_v57 = vpop.f32.mrb[59].mxu0 }
 0x1ac   : > { %v822_v12 = vadd.f32 %v2508_v43, %v3450_v6  ;;  %v2511_v16 = vadd.f32 %v2510_v40, %v2509_v45  ;;  %v2611_v33 = vadd.f32 %v2610_v57, %v2609_v53 }
 0x1ae   : > { %v3598_v59 = vadd.f32 %v2608_v17, %v822_v12  ;;  %v825_v27 = vadd.f32 %v2511_v16, %v3454_v23 }
 0x1b0   : > { %v3601_v55 = vadd.f32 %v2611_v33, %v825_v27  ;;  %v2512_v58 = vpop.f32.mrb[60].mxu1  ;;  %v2612_v63 = vpop.f32.mrb[60].mxu0 }
 0x1b1   : > { %v2513_v38 = vpop.f32.mrb[61].mxu1  ;;  %v2613_v22 = vpop.f32.mrb[61].mxu0 }
 0x1b2   : > { %v2514_v10 = vadd.f32 %v2513_v38, %v2512_v58  ;;  %v2614_v52 = vadd.f32 %v2613_v22, %v2612_v63  ;;  %v2515_v36 = vpop.f32.mrb[62].mxu1  ;;  %v2615_v30 = vpop.f32.mrb[62].mxu0 }
 0x1b3   : > { %v2516_v61 = vpop.f32.mrb[63].mxu1  ;;  %v2616_v47 = vpop.f32.mrb[63].mxu0 }
 0x1b4   : > { %v830_v6 = vadd.f32 %v2514_v10, %v3463_v41  ;;  %v2517_v50 = vadd.f32 %v2516_v61, %v2515_v36  ;;  %v2617_v2 = vadd.f32 %v2616_v47, %v2615_v30 }
 0x1b6   : > { %v3604_v1 = vadd.f32 %v2614_v52, %v830_v6  ;;  %v833_v23 = vadd.f32 %v2517_v50, %v3467_v51 }
 0x1b8   : > { %v3607_v7 = vadd.f32 %v2617_v2, %v833_v23  ;;  %v2518_v29 = vpop.f32.mrb[64].mxu1  ;;  %v2618_v21 = vpop.f32.mrb[64].mxu0 }
 0x1b9   : > { %v2519_v48 = vpop.f32.mrb[65].mxu1  ;;  %v2619_v0 = vpop.f32.mrb[65].mxu0 }
 0x1ba   : > { %v2520_v20 = vadd.f32 %v2519_v48, %v2518_v29  ;;  %v2620_v31 = vadd.f32 %v2619_v0, %v2618_v21  ;;  %v2521_v34 = vpop.f32.mrb[66].mxu1  ;;  %v2621_v35 = vpop.f32.mrb[66].mxu0 }
 0x1bb   : > { %v2522_v3 = vpop.f32.mrb[67].mxu1  ;;  %v2622_v42 = vpop.f32.mrb[67].mxu0 }
 0x1bc   : > { %v838_v41 = vadd.f32 %v2520_v20, %v3476_v5  ;;  %v2523_v43 = vadd.f32 %v2522_v3, %v2521_v34  ;;  %v2623_v17 = vadd.f32 %v2622_v42, %v2621_v35 }
 0x1be   : > { %v3610_v45 = vadd.f32 %v2620_v31, %v838_v41  ;;  %v841_v51 = vadd.f32 %v2523_v43, %v3480_v54 }
 0x1c0   : > { %v3613_v53 = vadd.f32 %v2623_v17, %v841_v51  ;;  %v2524_v40 = vpop.f32.mrb[68].mxu1  ;;  %v2624_v57 = vpop.f32.mrb[68].mxu0 }
 0x1c1   : > { %v2525_v12 = vpop.f32.mrb[69].mxu1  ;;  %v2625_v16 = vpop.f32.mrb[69].mxu0 }
 0x1c2   : > { %v2526_v33 = vadd.f32 %v2525_v12, %v2524_v40  ;;  %v2626_v27 = vadd.f32 %v2625_v16, %v2624_v57  ;;  %v2527_v58 = vpop.f32.mrb[70].mxu1  ;;  %v2627_v63 = vpop.f32.mrb[70].mxu0 }
 0x1c3   : > { %v2528_v38 = vpop.f32.mrb[71].mxu1  ;;  %v2628_v22 = vpop.f32.mrb[71].mxu0 }
 0x1c4   : > { %v846_v5 = vadd.f32 %v2526_v33, %v3489_v49  ;;  %v2529_v10 = vadd.f32 %v2528_v38, %v2527_v58  ;;  %v2629_v52 = vadd.f32 %v2628_v22, %v2627_v63 }
 0x1c6   : > { %v3616_v36 = vadd.f32 %v2626_v27, %v846_v5  ;;  %v849_v54 = vadd.f32 %v2529_v10, %v3493_v18 }
 0x1c8   : > { %v3619_v30 = vadd.f32 %v2629_v52, %v849_v54  ;;  %v2530_v61 = vpop.f32.mrb[72].mxu1  ;;  %v2630_v47 = vpop.f32.mrb[72].mxu0 }
 0x1c9   : > { %v2531_v6 = vpop.f32.mrb[73].mxu1  ;;  %v2631_v50 = vpop.f32.mrb[73].mxu0 }
 0x1ca   : > { %v2532_v2 = vadd.f32 %v2531_v6, %v2530_v61  ;;  %v2632_v23 = vadd.f32 %v2631_v50, %v2630_v47  ;;  %v2533_v29 = vpop.f32.mrb[74].mxu1  ;;  %v2633_v21 = vpop.f32.mrb[74].mxu0 }
 0x1cb   : > { %v2534_v48 = vpop.f32.mrb[75].mxu1  ;;  %v2634_v0 = vpop.f32.mrb[75].mxu0 }
 0x1cc   : > { %v854_v49 = vadd.f32 %v2532_v2, %v3502_v39  ;;  %v2535_v20 = vadd.f32 %v2534_v48, %v2533_v29  ;;  %v2635_v31 = vadd.f32 %v2634_v0, %v2633_v21 }
 0x1ce   : > { %v3622_v34 = vadd.f32 %v2632_v23, %v854_v49  ;;  %v857_v18 = vadd.f32 %v2535_v20, %v3506_v56 }
 0x1d0   : > { %v3625_v35 = vadd.f32 %v2635_v31, %v857_v18  ;;  %v2536_v3 = vpop.f32.mrb[76].mxu1  ;;  %v2636_v42 = vpop.f32.mrb[76].mxu0 }
 0x1d1   : > { %v2537_v41 = vpop.f32.mrb[77].mxu1  ;;  %v2637_v43 = vpop.f32.mrb[77].mxu0 }
 0x1d2   : > { %v2538_v17 = vadd.f32 %v2537_v41, %v2536_v3  ;;  %v2638_v51 = vadd.f32 %v2637_v43, %v2636_v42  ;;  %v2539_v40 = vpop.f32.mrb[78].mxu1  ;;  %v2639_v57 = vpop.f32.mrb[78].mxu0 }
 0x1d3   : > { %v2540_v12 = vpop.f32.mrb[79].mxu1  ;;  %v2640_v16 = vpop.f32.mrb[79].mxu0 }
 0x1d4   : > { %v862_v39 = vadd.f32 %v2538_v17, %v3513_v11  ;;  %v2541_v33 = vadd.f32 %v2540_v12, %v2539_v40  ;;  %v2641_v27 = vadd.f32 %v2640_v16, %v2639_v57  ;;  %v3640_v40 = vld [vmem:[#allocation5] ss:$0 sm:$0xff] }
 0x1d6   : > { %v3628_v58 = vadd.f32 %v2638_v51, %v862_v39  ;;  %v865_v56 = vadd.f32 %v2541_v33, %v3517_v8 }
 0x1d8   : > { %v3631_v63 = vadd.f32 %v2641_v27, %v865_v56  ;;  %v2542_v38 = vpop.f32.mrb[80].mxu1  ;;  %v2642_v22 = vpop.f32.mrb[80].mxu0 }
 0x1d9   : > { %v2543_v5 = vpop.f32.mrb[81].mxu1  ;;  %v2643_v10 = vpop.f32.mrb[81].mxu0 }
 0x1da   : > { %v2544_v52 = vadd.f32 %v2543_v5, %v2542_v38  ;;  %v2644_v54 = vadd.f32 %v2643_v10, %v2642_v22  ;;  %v2545_v61 = vpop.f32.mrb[82].mxu1  ;;  %v2645_v47 = vpop.f32.mrb[82].mxu0 }
 0x1db   : > { %v2546_v6 = vpop.f32.mrb[83].mxu1  ;;  %v2646_v50 = vpop.f32.mrb[83].mxu0 }
 0x1dc   : > { %v870_v11 = vadd.f32 %v2544_v52, %v3529_v15  ;;  %v2547_v2 = vadd.f32 %v2546_v6, %v2545_v61  ;;  %v2647_v23 = vadd.f32 %v2646_v50, %v2645_v47 }
 0x1de   : > { %v3634_v29 = vadd.f32 %v2644_v54, %v870_v11  ;;  %v873_v8 = vadd.f32 %v2547_v2, %v3533_v32 }
 0x1e0   : > { %v3637_v21 = vadd.f32 %v2647_v23, %v873_v8  ;;  %v2664_v48 = vpop.f32.mrb[84].mxu1  ;;  %v2764_v0 = vpop.f32.mrb[84].mxu0 }
 0x1e1   : > { %v2665_v49 = vpop.f32.mrb[85].mxu1  ;;  %v2765_v20 = vpop.f32.mrb[85].mxu0 }
 0x1e2   : > { %v2666_v31 = vadd.f32 %v2665_v49, %v2664_v48  ;;  %v2766_v18 = vadd.f32 %v2765_v20, %v2764_v0  ;;  %v2667_v3 = vpop.f32.mrb[86].mxu1  ;;  %v2767_v42 = vpop.f32.mrb[86].mxu0 }
 0x1e3   : > { %v2668_v41 = vpop.f32.mrb[87].mxu1  ;;  %v2768_v43 = vpop.f32.mrb[87].mxu0 }
 0x1e4   : > { %v1620_v15 = vadd.f32 %v2666_v31, %v3539_v62  ;;  %v2669_v17 = vadd.f32 %v2668_v41, %v2667_v3  ;;  %v2769_v51 = vadd.f32 %v2768_v43, %v2767_v42 }
 0x1e6   : > { %v1964_v57 = vadd.f32 %v2766_v18, %v1620_v15  ;;  %v1621_v32 = vadd.f32 %v2669_v17, %v3543_v14 }
 0x1e8   : > { %v1999_v12 = vadd.f32 %v3640_v40, %v1964_v57  ;;  %v1965_v16 = vadd.f32 %v2769_v51, %v1621_v32  ;;  %v2670_v39 = vpop.f32.mrb[88].mxu1  ;;  %v2770_v33 = vpop.f32.mrb[88].mxu0 }
 0x1e9   : > { %v2671_v27 = vpop.f32.mrb[89].mxu1  ;;  %v2771_v56 = vpop.f32.mrb[89].mxu0 }
 0x1ea   : > { %v2027_v38 = vmax.f32 %v1999_v12, 0.0  ;;  %v2000_v22 = vadd.f32 %v3640_v40, %v1965_v16  ;;  %v2672_v5 = vadd.f32 %v2671_v27, %v2670_v39  ;;  %v2772_v10 = vadd.f32 %v2771_v56, %v2770_v33  ;;  %v2673_v62 = vpop.f32.mrb[90].mxu1  ;;  %v2773_v52 = vpop.f32.mrb[90].mxu0 }
 0x1eb   : > { %v2674_v54 = vpop.f32.mrb[91].mxu1  ;;  %v2774_v61 = vpop.f32.mrb[91].mxu0 }
 0x1ec   : > { %2055 = vst [vmem:[#allocation2] sm:$0xff] %v2027_v38  ;;  %v2028_v47 = vmax.f32 %v2000_v22, 0.0  ;;  %v1622_v14 = vadd.f32 %v2672_v5, %v3562_v19  ;;  %v2675_v6 = vadd.f32 %v2674_v54, %v2673_v62  ;;  %v2775_v50 = vadd.f32 %v2774_v61, %v2773_v52 }
 0x1ee   : > { %2056 = vst [vmem:[#allocation2 + $0x8] sm:$0xff] %v2028_v47  ;;  %v1966_v11 = vadd.f32 %v2772_v10, %v1622_v14  ;;  %v1623_v2 = vadd.f32 %v2675_v6, %v3565_v24 }
 0x1f0   : > { %v2001_v23 = vadd.f32 %v3640_v40, %v1966_v11  ;;  %v1967_v8 = vadd.f32 %v2775_v50, %v1623_v2  ;;  %v2676_v48 = vpop.f32.mrb[92].mxu1  ;;  %v2776_v0 = vpop.f32.mrb[92].mxu0 }
 0x1f1   : > { %v2677_v49 = vpop.f32.mrb[93].mxu1  ;;  %v2777_v20 = vpop.f32.mrb[93].mxu0 }
 0x1f2   : > { %v2029_v31 = vmax.f32 %v2001_v23, 0.0  ;;  %v2002_v18 = vadd.f32 %v3640_v40, %v1967_v8  ;;  %v2678_v3 = vadd.f32 %v2677_v49, %v2676_v48  ;;  %v2778_v42 = vadd.f32 %v2777_v20, %v2776_v0  ;;  %v2679_v41 = vpop.f32.mrb[94].mxu1  ;;  %v2779_v19 = vpop.f32.mrb[94].mxu0 }
 0x1f3   : > { %v2680_v43 = vpop.f32.mrb[95].mxu1  ;;  %v2780_v15 = vpop.f32.mrb[95].mxu0 }
 0x1f4   : > { %2057 = vst [vmem:[#allocation2 + $0x10] sm:$0xff] %v2029_v31  ;;  %v2030_v17 = vmax.f32 %v2002_v18, 0.0  ;;  %v1624_v24 = vadd.f32 %v2678_v3, %v3568_v9  ;;  %v2681_v51 = vadd.f32 %v2680_v43, %v2679_v41  ;;  %v2781_v57 = vadd.f32 %v2780_v15, %v2779_v19 }
 0x1f5   : > { %v2094_v22 = vld [vmem:[#allocation2] ss:$2 sm:$0x7f]  ;;  %v2096_v61 = vld [vmem:[#allocation2 + $0x1] ss:$2 sm:$0x7f] }
 0x1f6   : > { %2058 = vst [vmem:[#allocation2 + $0x18] sm:$0xff] %v2030_v17  ;;  %v1968_v32 = vadd.f32 %v2778_v42, %v1624_v24  ;;  %v1625_v12 = vadd.f32 %v2681_v51, %v3571_v37  ;;  %v2101_v8 = vmax.f32 %v2094_v22, %v2096_v61 }
 0x1f8   : > { %v2003_v16 = vadd.f32 %v3640_v40, %v1968_v32  ;;  %v1969_v39 = vadd.f32 %v2781_v57, %v1625_v12  ;;  %v2682_v33 = vpop.f32.mrb[96].mxu1  ;;  %v2782_v27 = vpop.f32.mrb[96].mxu0 }
 0x1f9   : > { %v2683_v56 = vpop.f32.mrb[97].mxu1  ;;  %v2783_v38 = vpop.f32.mrb[97].mxu0 }
 0x1fa   : > { %v2031_v5 = vmax.f32 %v2003_v16, 0.0  ;;  %v2004_v10 = vadd.f32 %v3640_v40, %v1969_v39  ;;  %v2684_v62 = vadd.f32 %v2683_v56, %v2682_v33  ;;  %v2784_v52 = vadd.f32 %v2783_v38, %v2782_v27  ;;  %v2685_v9 = vpop.f32.mrb[98].mxu1  ;;  %v2785_v54 = vpop.f32.mrb[98].mxu0 }
 0x1fb   : > { %v2686_v47 = vpop.f32.mrb[99].mxu1  ;;  %v2786_v14 = vpop.f32.mrb[99].mxu0 }
 0x1fc   : > { %2059 = vst [vmem:[#allocation2 + $0x20] sm:$0xff] %v2031_v5  ;;  %v2032_v37 = vmax.f32 %v2004_v10, 0.0  ;;  %v1626_v6 = vadd.f32 %v2684_v62, %v3574_v4  ;;  %v2687_v50 = vadd.f32 %v2686_v47, %v2685_v9  ;;  %v2787_v11 = vadd.f32 %v2786_v14, %v2785_v54 }
 0x1fd   : > { %v2098_v2 = vld [vmem:[#allocation2 + $0x10] ss:$2 sm:$0x7f]  ;;  %v2100_v23 = vld [vmem:[#allocation2 + $0x11] ss:$2 sm:$0x7f] }
 0x1fe   : > { %v2102_v48 = vmax.f32 %v2098_v2, %v2100_v23  ;;  %2060 = vst [vmem:[#allocation2 + $0x28] sm:$0xff] %v2032_v37  ;;  %v1970_v0 = vadd.f32 %v2784_v52, %v1626_v6  ;;  %v1627_v49 = vadd.f32 %v2687_v50, %v3577_v46 }
 0x200   : > { %v2103_v20 = vmax.f32 %v2101_v8, %v2102_v48  ;;  %v2005_v31 = vadd.f32 %v3640_v40, %v1970_v0  ;;  %v1971_v18 = vadd.f32 %v2787_v11, %v1627_v49  ;;  %v2688_v3 = vpop.f32.mrb[100].mxu1  ;;  %v2788_v42 = vpop.f32.mrb[100].mxu0 }
 0x201   : > { %v2689_v41 = vpop.f32.mrb[101].mxu1  ;;  %v2789_v19 = vpop.f32.mrb[101].mxu0 }
 0x202   : > { %2104 = vst [vmem:[%s3548_s25 + $0xa] sm:$0x7f] %v2103_v20  ;;  %v2033_v4 = vmax.f32 %v2005_v31, 0.0  ;;  %v2006_v43 = vadd.f32 %v3640_v40, %v1971_v18  ;;  %v2690_v15 = vadd.f32 %v2689_v41, %v2688_v3  ;;  %v2790_v17 = vadd.f32 %v2789_v19, %v2788_v42  ;;  %v2691_v24 = vpop.f32.mrb[102].mxu1  ;;  %v2791_v51 = vpop.f32.mrb[102].mxu0 }
 0x203   : > { %v2692_v57 = vpop.f32.mrb[103].mxu1  ;;  %v2792_v32 = vpop.f32.mrb[103].mxu0 }
 0x204   : > { %2061 = vst [vmem:[#allocation2 + $0x30] sm:$0xff] %v2033_v4  ;;  %v2034_v46 = vmax.f32 %v2006_v43, 0.0  ;;  %v1628_v12 = vadd.f32 %v2690_v15, %v3580_v44  ;;  %v2693_v16 = vadd.f32 %v2692_v57, %v2691_v24  ;;  %v2793_v39 = vadd.f32 %v2792_v32, %v2791_v51 }
 0x205   : > { %v2106_v52 = vld [vmem:[#allocation2 + $0x20] ss:$2 sm:$0x7f]  ;;  %v2108_v37 = vld [vmem:[#allocation2 + $0x21] ss:$2 sm:$0x7f] }
 0x206   : > { %2062 = vst [vmem:[#allocation2 + $0x38] sm:$0xff] %v2034_v46  ;;  %v1972_v33 = vadd.f32 %v2790_v17, %v1628_v12  ;;  %v1629_v27 = vadd.f32 %v2693_v16, %v3583_v60  ;;  %v2113_v0 = vmax.f32 %v2106_v52, %v2108_v37 }
 0x208   : > { %v2007_v56 = vadd.f32 %v3640_v40, %v1972_v33  ;;  %v1973_v38 = vadd.f32 %v2793_v39, %v1629_v27  ;;  %v2694_v22 = vpop.f32.mrb[104].mxu1  ;;  %v2794_v5 = vpop.f32.mrb[104].mxu0 }
 0x209   : > { %v2695_v10 = vpop.f32.mrb[105].mxu1  ;;  %v2795_v62 = vpop.f32.mrb[105].mxu0 }
 0x20a   : > { %v2035_v9 = vmax.f32 %v2007_v56, 0.0  ;;  %v2008_v54 = vadd.f32 %v3640_v40, %v1973_v38  ;;  %v2696_v61 = vadd.f32 %v2695_v10, %v2694_v22  ;;  %v2796_v47 = vadd.f32 %v2795_v62, %v2794_v5  ;;  %v2697_v44 = vpop.f32.mrb[106].mxu1  ;;  %v2797_v14 = vpop.f32.mrb[106].mxu0 }
 0x20b   : > { %v2698_v6 = vpop.f32.mrb[107].mxu1  ;;  %v2798_v50 = vpop.f32.mrb[107].mxu0 }
 0x20c   : > { %2063 = vst [vmem:[#allocation2 + $0x40] sm:$0xff] %v2035_v9  ;;  %v2036_v60 = vmax.f32 %v2008_v54, 0.0  ;;  %v1630_v11 = vadd.f32 %v2696_v61, %v3586_v28  ;;  %v2699_v2 = vadd.f32 %v2698_v6, %v2697_v44  ;;  %v2799_v23 = vadd.f32 %v2798_v50, %v2797_v14 }
 0x20d   : > { %v2110_v8 = vld [vmem:[#allocation2 + $0x30] ss:$2 sm:$0x7f]  ;;  %v2112_v48 = vld [vmem:[#allocation2 + $0x31] ss:$2 sm:$0x7f] }
 0x20e   : > { %v2114_v49 = vmax.f32 %v2110_v8, %v2112_v48  ;;  %2064 = vst [vmem:[#allocation2 + $0x48] sm:$0xff] %v2036_v60  ;;  %v1974_v20 = vadd.f32 %v2796_v47, %v1630_v11  ;;  %v1631_v31 = vadd.f32 %v2699_v2, %v3589_v13 }
 0x210   : > { %v2115_v18 = vmax.f32 %v2113_v0, %v2114_v49  ;;  %v2009_v3 = vadd.f32 %v3640_v40, %v1974_v20  ;;  %v1975_v42 = vadd.f32 %v2799_v23, %v1631_v31  ;;  %v2700_v41 = vpop.f32.mrb[108].mxu1  ;;  %v2800_v19 = vpop.f32.mrb[108].mxu0 }
 0x211   : > { %v2701_v4 = vpop.f32.mrb[109].mxu1  ;;  %v2801_v43 = vpop.f32.mrb[109].mxu0 }
 0x212   : > { %2116 = vst [vmem:[%s3548_s25 + $0x13] sm:$0x7f] %v2115_v18  ;;  %v2037_v28 = vmax.f32 %v2009_v3, 0.0  ;;  %v2010_v15 = vadd.f32 %v3640_v40, %v1975_v42  ;;  %v2702_v17 = vadd.f32 %v2701_v4, %v2700_v41  ;;  %v2802_v24 = vadd.f32 %v2801_v43, %v2800_v19  ;;  %v2703_v51 = vpop.f32.mrb[110].mxu1  ;;  %v2803_v57 = vpop.f32.mrb[110].mxu0 }
 0x213   : > { %v2704_v32 = vpop.f32.mrb[111].mxu1  ;;  %v2804_v46 = vpop.f32.mrb[111].mxu0 }
 0x214   : > { %2065 = vst [vmem:[#allocation2 + $0x50] sm:$0xff] %v2037_v28  ;;  %v2038_v13 = vmax.f32 %v2010_v15, 0.0  ;;  %v1632_v12 = vadd.f32 %v2702_v17, %v3592_v25  ;;  %v2705_v16 = vadd.f32 %v2704_v32, %v2703_v51  ;;  %v2805_v39 = vadd.f32 %v2804_v46, %v2803_v57 }
 0x215   : > { %v2118_v52 = vld [vmem:[#allocation2 + $0x40] ss:$2 sm:$0x7f]  ;;  %v2120_v14 = vld [vmem:[#allocation2 + $0x41] ss:$2 sm:$0x7f] }
 0x216   : > { %2066 = vst [vmem:[#allocation2 + $0x58] sm:$0xff] %v2038_v13  ;;  %v1976_v33 = vadd.f32 %v2802_v24, %v1632_v12  ;;  %v1633_v27 = vadd.f32 %v2705_v16, %v3595_v26  ;;  %v2125_v8 = vmax.f32 %v2118_v52, %v2120_v14 }
 0x218   : > { %v2011_v56 = vadd.f32 %v3640_v40, %v1976_v33  ;;  %v1977_v38 = vadd.f32 %v2805_v39, %v1633_v27  ;;  %v2706_v22 = vpop.f32.mrb[112].mxu1  ;;  %v2806_v5 = vpop.f32.mrb[112].mxu0 }
 0x219   : > { %v2707_v10 = vpop.f32.mrb[113].mxu1  ;;  %v2807_v62 = vpop.f32.mrb[113].mxu0 }
 0x21a   : > { %v2039_v9 = vmax.f32 %v2011_v56, 0.0  ;;  %v2012_v54 = vadd.f32 %v3640_v40, %v1977_v38  ;;  %v2708_v61 = vadd.f32 %v2707_v10, %v2706_v22  ;;  %v2808_v47 = vadd.f32 %v2807_v62, %v2806_v5  ;;  %v2709_v25 = vpop.f32.mrb[114].mxu1  ;;  %v2809_v44 = vpop.f32.mrb[114].mxu0 }
 0x21b   : > { %v2710_v37 = vpop.f32.mrb[115].mxu1  ;;  %v2810_v6 = vpop.f32.mrb[115].mxu0 }
 0x21c   : > { %2067 = vst [vmem:[#allocation2 + $0x60] sm:$0xff] %v2039_v9  ;;  %v2040_v26 = vmax.f32 %v2012_v54, 0.0  ;;  %v1634_v50 = vadd.f32 %v2708_v61, %v3598_v59  ;;  %v2711_v60 = vadd.f32 %v2710_v37, %v2709_v25  ;;  %v2811_v11 = vadd.f32 %v2810_v6, %v2809_v44 }
 0x21d   : > { %v2122_v2 = vld [vmem:[#allocation2 + $0x50] ss:$2 sm:$0x7f]  ;;  %v2124_v23 = vld [vmem:[#allocation2 + $0x51] ss:$2 sm:$0x7f] }
 0x21e   : > { %v2126_v48 = vmax.f32 %v2122_v2, %v2124_v23  ;;  %2068 = vst [vmem:[#allocation2 + $0x68] sm:$0xff] %v2040_v26  ;;  %v1978_v0 = vadd.f32 %v2808_v47, %v1634_v50  ;;  %v1635_v49 = vadd.f32 %v2711_v60, %v3601_v55 }
 0x220   : > { %v2127_v20 = vmax.f32 %v2125_v8, %v2126_v48  ;;  %v2013_v31 = vadd.f32 %v3640_v40, %v1978_v0  ;;  %v1979_v18 = vadd.f32 %v2811_v11, %v1635_v49  ;;  %v2712_v3 = vpop.f32.mrb[116].mxu1  ;;  %v2812_v42 = vpop.f32.mrb[116].mxu0 }
 0x221   : > { %v2713_v41 = vpop.f32.mrb[117].mxu1  ;;  %v2813_v19 = vpop.f32.mrb[117].mxu0 }
 0x222   : > { %2128 = vst [vmem:[%s3548_s25 + $0x1c] sm:$0x7f] %v2127_v20  ;;  %v2041_v59 = vmax.f32 %v2013_v31, 0.0  ;;  %v2014_v4 = vadd.f32 %v3640_v40, %v1979_v18  ;;  %v2714_v43 = vadd.f32 %v2713_v41, %v2712_v3  ;;  %v2814_v28 = vadd.f32 %v2813_v19, %v2812_v42  ;;  %v2715_v15 = vpop.f32.mrb[118].mxu1  ;;  %v2815_v17 = vpop.f32.mrb[118].mxu0 }
 0x223   : > { %v2716_v24 = vpop.f32.mrb[119].mxu1  ;;  %v2816_v51 = vpop.f32.mrb[119].mxu0 }
 0x224   : > { %2069 = vst [vmem:[#allocation2 + $0x70] sm:$0xff] %v2041_v59  ;;  %v2042_v55 = vmax.f32 %v2014_v4, 0.0  ;;  %v1636_v57 = vadd.f32 %v2714_v43, %v3604_v1  ;;  %v2717_v32 = vadd.f32 %v2716_v24, %v2715_v15  ;;  %v2817_v46 = vadd.f32 %v2816_v51, %v2815_v17 }
 0x225   : > { %v2130_v22 = vld [vmem:[#allocation2 + $0x60] ss:$2 sm:$0x7f]  ;;  %v2132_v54 = vld [vmem:[#allocation2 + $0x61] ss:$2 sm:$0x7f] }
 0x226   : > { %2070 = vst [vmem:[#allocation2 + $0x78] sm:$0xff] %v2042_v55  ;;  %v1980_v13 = vadd.f32 %v2814_v28, %v1636_v57  ;;  %v1637_v12 = vadd.f32 %v2717_v32, %v3607_v7  ;;  %v2137_v26 = vmax.f32 %v2130_v22, %v2132_v54 }
 0x228   : > { %v2015_v16 = vadd.f32 %v3640_v40, %v1980_v13  ;;  %v1981_v39 = vadd.f32 %v2817_v46, %v1637_v12  ;;  %v2718_v33 = vpop.f32.mrb[120].mxu1  ;;  %v2818_v27 = vpop.f32.mrb[120].mxu0 }
 0x229   : > { %v2719_v56 = vpop.f32.mrb[121].mxu1  ;;  %v2819_v38 = vpop.f32.mrb[121].mxu0 }
 0x22a   : > { %v2043_v5 = vmax.f32 %v2015_v16, 0.0  ;;  %v2016_v10 = vadd.f32 %v3640_v40, %v1981_v39  ;;  %v2720_v62 = vadd.f32 %v2719_v56, %v2718_v33  ;;  %v2820_v52 = vadd.f32 %v2819_v38, %v2818_v27  ;;  %v2721_v1 = vpop.f32.mrb[122].mxu1  ;;  %v2821_v9 = vpop.f32.mrb[122].mxu0 }
 0x22b   : > { %v2722_v61 = vpop.f32.mrb[123].mxu1  ;;  %v2822_v47 = vpop.f32.mrb[123].mxu0 }
 0x22c   : > { %2071 = vst [vmem:[#allocation2 + $0x80] sm:$0xff] %v2043_v5  ;;  %v2044_v7 = vmax.f32 %v2016_v10, 0.0  ;;  %v1638_v25 = vadd.f32 %v2720_v62, %v3610_v45  ;;  %v2723_v44 = vadd.f32 %v2722_v61, %v2721_v1  ;;  %v2823_v14 = vadd.f32 %v2822_v47, %v2821_v9 }
 0x22d   : > { %v2134_v37 = vld [vmem:[#allocation2 + $0x70] ss:$2 sm:$0x7f]  ;;  %v2136_v6 = vld [vmem:[#allocation2 + $0x71] ss:$2 sm:$0x7f] }
 0x22e   : > { %v2138_v50 = vmax.f32 %v2134_v37, %v2136_v6  ;;  %2072 = vst [vmem:[#allocation2 + $0x88] sm:$0xff] %v2044_v7  ;;  %v1982_v60 = vadd.f32 %v2820_v52, %v1638_v25  ;;  %v1639_v11 = vadd.f32 %v2723_v44, %v3613_v53 }
 0x230   : > { %v2139_v2 = vmax.f32 %v2137_v26, %v2138_v50  ;;  %v2017_v23 = vadd.f32 %v3640_v40, %v1982_v60  ;;  %v1983_v8 = vadd.f32 %v2823_v14, %v1639_v11  ;;  %v2724_v48 = vpop.f32.mrb[124].mxu1  ;;  %v2824_v0 = vpop.f32.mrb[124].mxu0 }
 0x231   : > { %v2725_v49 = vpop.f32.mrb[125].mxu1  ;;  %v2825_v20 = vpop.f32.mrb[125].mxu0 }
 0x232   : > { %2140 = vst [vmem:[%s3548_s25 + $0x25] sm:$0x7f] %v2139_v2  ;;  %v2045_v45 = vmax.f32 %v2017_v23, 0.0  ;;  %v2018_v31 = vadd.f32 %v3640_v40, %v1983_v8  ;;  %v2726_v18 = vadd.f32 %v2725_v49, %v2724_v48  ;;  %v2826_v3 = vadd.f32 %v2825_v20, %v2824_v0  ;;  %v2727_v42 = vpop.f32.mrb[126].mxu1  ;;  %v2827_v41 = vpop.f32.mrb[126].mxu0 }
 0x233   : > { %v2728_v19 = vpop.f32.mrb[127].mxu1  ;;  %v2828_v59 = vpop.f32.mrb[127].mxu0 }
 0x234   : > { %2073 = vst [vmem:[#allocation2 + $0x90] sm:$0xff] %v2045_v45  ;;  %v2046_v53 = vmax.f32 %v2018_v31, 0.0  ;;  %v1640_v4 = vadd.f32 %v2726_v18, %v3616_v36  ;;  %v2729_v43 = vadd.f32 %v2728_v19, %v2727_v42  ;;  %v2829_v28 = vadd.f32 %v2828_v59, %v2827_v41 }
 0x235   : > { %v2142_v13 = vld [vmem:[#allocation2 + $0x80] ss:$2 sm:$0x7f]  ;;  %v2144_v56 = vld [vmem:[#allocation2 + $0x81] ss:$2 sm:$0x7f] }
 0x236   : > { %2074 = vst [vmem:[#allocation2 + $0x98] sm:$0xff] %v2046_v53  ;;  %v1984_v15 = vadd.f32 %v2826_v3, %v1640_v4  ;;  %v1641_v17 = vadd.f32 %v2729_v43, %v3619_v30  ;;  %v2149_v9 = vmax.f32 %v2142_v13, %v2144_v56 }
 0x238   : > { %v2019_v24 = vadd.f32 %v3640_v40, %v1984_v15  ;;  %v1985_v51 = vadd.f32 %v2829_v28, %v1641_v17  ;;  %v2730_v55 = vpop.f32.mrb[128].mxu1  ;;  %v2830_v57 = vpop.f32.mrb[128].mxu0 }
 0x239   : > { %v2731_v32 = vpop.f32.mrb[129].mxu1  ;;  %v2831_v46 = vpop.f32.mrb[129].mxu0 }
 0x23a   : > { %v2047_v12 = vmax.f32 %v2019_v24, 0.0  ;;  %v2020_v16 = vadd.f32 %v3640_v40, %v1985_v51  ;;  %v2732_v39 = vadd.f32 %v2731_v32, %v2730_v55  ;;  %v2832_v33 = vadd.f32 %v2831_v46, %v2830_v57  ;;  %v2733_v36 = vpop.f32.mrb[130].mxu1  ;;  %v2833_v27 = vpop.f32.mrb[130].mxu0 }
 0x23b   : > { %v2734_v38 = vpop.f32.mrb[131].mxu1  ;;  %v2834_v22 = vpop.f32.mrb[131].mxu0 }
 0x23c   : > { %2075 = vst [vmem:[#allocation2 + $0xa0] sm:$0xff] %v2047_v12  ;;  %v2048_v30 = vmax.f32 %v2020_v16, 0.0  ;;  %v1642_v5 = vadd.f32 %v2732_v39, %v3622_v34  ;;  %v2735_v10 = vadd.f32 %v2734_v38, %v2733_v36  ;;  %v2835_v62 = vadd.f32 %v2834_v22, %v2833_v27 }
 0x23d   : > { %v2146_v52 = vld [vmem:[#allocation2 + $0x90] ss:$2 sm:$0x7f]  ;;  %v2148_v1 = vld [vmem:[#allocation2 + $0x91] ss:$2 sm:$0x7f] }
 0x23e   : > { %v2150_v54 = vmax.f32 %v2146_v52, %v2148_v1  ;;  %2076 = vst [vmem:[#allocation2 + $0xa8] sm:$0xff] %v2048_v30  ;;  %v1986_v61 = vadd.f32 %v2832_v33, %v1642_v5  ;;  %v1643_v47 = vadd.f32 %v2735_v10, %v3625_v35 }
 0x240   : > { %v2151_v7 = vmax.f32 %v2149_v9, %v2150_v54  ;;  %v2021_v25 = vadd.f32 %v3640_v40, %v1986_v61  ;;  %v1987_v44 = vadd.f32 %v2835_v62, %v1643_v47  ;;  %v2736_v14 = vpop.f32.mrb[132].mxu1  ;;  %v2836_v37 = vpop.f32.mrb[132].mxu0 }
 0x241   : > { %v2737_v6 = vpop.f32.mrb[133].mxu1  ;;  %v2837_v26 = vpop.f32.mrb[133].mxu0 }
 0x242   : > { %2152 = vst [vmem:[%s3548_s25 + $0x2e] sm:$0x7f] %v2151_v7  ;;  %v2049_v34 = vmax.f32 %v2021_v25, 0.0  ;;  %v2022_v50 = vadd.f32 %v3640_v40, %v1987_v44  ;;  %v2738_v60 = vadd.f32 %v2737_v6, %v2736_v14  ;;  %v2838_v11 = vadd.f32 %v2837_v26, %v2836_v37  ;;  %v2739_v2 = vpop.f32.mrb[134].mxu1  ;;  %v2839_v23 = vpop.f32.mrb[134].mxu0 }
 0x243   : > { %v2740_v8 = vpop.f32.mrb[135].mxu1  ;;  %v2840_v48 = vpop.f32.mrb[135].mxu0 }
 0x244   : > { %2077 = vst [vmem:[#allocation2 + $0xb0] sm:$0xff] %v2049_v34  ;;  %v2050_v35 = vmax.f32 %v2022_v50, 0.0  ;;  %v1644_v0 = vadd.f32 %v2738_v60, %v3628_v58  ;;  %v2741_v49 = vadd.f32 %v2740_v8, %v2739_v2  ;;  %v2841_v20 = vadd.f32 %v2840_v48, %v2839_v23 }
 0x245   : > { %v2154_v53 = vld [vmem:[#allocation2 + $0xa0] ss:$2 sm:$0x7f]  ;;  %v2156_v24 = vld [vmem:[#allocation2 + $0xa1] ss:$2 sm:$0x7f] }
 0x246   : > { %2078 = vst [vmem:[#allocation2 + $0xb8] sm:$0xff] %v2050_v35  ;;  %v1988_v45 = vadd.f32 %v2838_v11, %v1644_v0  ;;  %v1645_v31 = vadd.f32 %v2741_v49, %v3631_v63  ;;  %v2161_v16 = vmax.f32 %v2154_v53, %v2156_v24 }
 0x248   : > { %v2023_v18 = vadd.f32 %v3640_v40, %v1988_v45  ;;  %v1989_v3 = vadd.f32 %v2841_v20, %v1645_v31  ;;  %v2742_v42 = vpop.f32.mrb[136].mxu1  ;;  %v2842_v41 = vpop.f32.mrb[136].mxu0 }
 0x249   : > { %v2743_v19 = vpop.f32.mrb[137].mxu1  ;;  %v2843_v59 = vpop.f32.mrb[137].mxu0 }
 0x24a   : > { %v2051_v4 = vmax.f32 %v2023_v18, 0.0  ;;  %v2024_v43 = vadd.f32 %v3640_v40, %v1989_v3  ;;  %v2744_v28 = vadd.f32 %v2743_v19, %v2742_v42  ;;  %v2844_v15 = vadd.f32 %v2843_v59, %v2842_v41  ;;  %v2745_v58 = vpop.f32.mrb[138].mxu1  ;;  %v2845_v17 = vpop.f32.mrb[138].mxu0 }
 0x24b   : > { %v2746_v51 = vpop.f32.mrb[139].mxu1  ;;  %v2846_v55 = vpop.f32.mrb[139].mxu0 }
 0x24c   : > { %2079 = vst [vmem:[#allocation2 + $0xc0] sm:$0xff] %v2051_v4  ;;  %v2052_v63 = vmax.f32 %v2024_v43, 0.0  ;;  %v1646_v57 = vadd.f32 %v2744_v28, %v3634_v29  ;;  %v2747_v32 = vadd.f32 %v2746_v51, %v2745_v58  ;;  %v2847_v46 = vadd.f32 %v2846_v55, %v2845_v17 }
 0x24d   : > { %v2158_v13 = vld [vmem:[#allocation2 + $0xb0] ss:$2 sm:$0x7f]  ;;  %v2160_v12 = vld [vmem:[#allocation2 + $0xb1] ss:$2 sm:$0x7f] }
 0x24e   : > { %v2162_v39 = vmax.f32 %v2158_v13, %v2160_v12  ;;  %2080 = vst [vmem:[#allocation2 + $0xc8] sm:$0xff] %v2052_v63  ;;  %v1990_v33 = vadd.f32 %v2844_v15, %v1646_v57  ;;  %v1647_v36 = vadd.f32 %v2747_v32, %v3637_v21 }
 0x250   : > { %v2163_v27 = vmax.f32 %v2161_v16, %v2162_v39  ;;  %v2025_v56 = vadd.f32 %v3640_v40, %v1990_v33  ;;  %v1991_v38 = vadd.f32 %v2847_v46, %v1647_v36 }
 0x252   : > { %2164 = vst [vmem:[%s3548_s25 + $0x37] sm:$0x7f] %v2163_v27  ;;  %v2053_v22 = vmax.f32 %v2025_v56, 0.0  ;;  %v2026_v30 = vadd.f32 %v3640_v40, %v1991_v38 }
 0x254   : > { %2081 = vst [vmem:[#allocation2 + $0xd0] sm:$0xff] %v2053_v22  ;;  %v2054_v29 = vmax.f32 %v2026_v30, 0.0 }
 0x255   : > { %v2166_v5 = vld [vmem:[#allocation2 + $0xc0] ss:$2 sm:$0x7f]  ;;  %v2168_v10 = vld [vmem:[#allocation2 + $0xc1] ss:$2 sm:$0x7f] }
 0x256   : > { %2082 = vst [vmem:[#allocation2 + $0xd8] sm:$0xff] %v2054_v29  ;;  %v2173_v1 = vmax.f32 %v2166_v5, %v2168_v10 }
 0x25d   : > { %v2170_v62 = vld [vmem:[#allocation2 + $0xd0] ss:$2 sm:$0x7f]  ;;  %v2172_v52 = vld [vmem:[#allocation2 + $0xd1] ss:$2 sm:$0x7f] }
 0x25e   : > { %v2174_v9 = vmax.f32 %v2170_v62, %v2172_v52 }
 0x260   : > { %v2175_v54 = vmax.f32 %v2173_v1, %v2174_v9 }
 0x262   : > { %2176 = vst [vmem:[%s3548_s25 + $0x40] sm:$0x7f] %v2175_v54 }
 0x263 PF: > { %s15_s12 = sadd.s32 1, %s3048_s12  }
 0x264   : > { %p12_p9 = scmp.ge.s32.totalorder %s15_s12, 4  }
 0x266   :  { %14 = sbr.rel (!%p12_p9) target bundleno = 2 (0x2), region = 102 }
 0x26d   :  { %2198 = vsyncpa [#allocation4], 1 }
 0x26e   :  { %2200 = vsyncpa [#allocation4 + $0x1], 1 }
 0x26f   :  { %2201 = vsyncpa [#allocation6], 1 }

// kernel: cnn4_forward.7
= control target key start
LH: loop header
LB: loop body
LE: loop exit
PB: predicated region body
PF: predicated region fallthrough
CT: control target
= control target key end

     0   :  { %10 = vsyncpa [#allocation3], 0  ;;  %s11533_s0 = inlined_call_operand.vmem [shape: bf16[2,8192], index: 0, kind: input, shape index: {}]   ;;  %s11534_s1 = inlined_call_operand.hbm [shape: bf16[8192,256], index: 1, kind: input, shape index: {}]   ;;  %s11535_s2 = inlined_call_operand.hbm [shape: f32[1,256], index: 2, kind: input, shape index: {}]   ;;  %s11536_s3 = inlined_call_operand.hbm [shape: bf16[256,128], index: 3, kind: input, shape index: {}]   ;;  %s11537_s4 = inlined_call_operand.hbm [shape: f32[1,128], index: 4, kind: input, shape index: {}]   ;;  %s11538_s5 = inlined_call_operand.hbm [shape: f32[2,128], index: 5, kind: output, shape index: {}]  }
   0x1   :  { %11 = vsyncpa [#allocation6], 0 }
   0x2   :  { %12 = vsyncpa [#allocation9], 0 }
   0x3   :  { %13 = vsyncpa [#allocation4], 0  ;;  %s11093_s18 = smov [#allocation5]   ;;  %s11094_s20 = smov [#allocation2]  }
   0x4   :  { %s34_s19 = sshll.u32 %s11093_s18, 4  ;;  %s21_s21 = sshll.u32 %s11094_s20, 4  ;;  %s35_s19 = int_to_ptr.vmem [resolvable:$true] %s34_s19  ;;  %s11133_s21 = int_to_ptr.vmem [resolvable:$true] %s21_s21 }
   0x5   :  { %s10975_s24 = scalar_lea.hbm %s11535_s2, 32 }
   0x6   :  { %p10976_p0 = scmp.ne.s32.totalorder %s11535_s2, %s10975_s24  ;;  %p10979_p1 = scmp.lt.u32.totalorder %s10975_s24, %s11535_s2 }
   0x8   :  { %p10981_p2 = pnand %p10979_p1, %p10976_p0 }
   0xa   :  { %10984 = shalt.err (!%p10981_p2)
}
   0xb   :  { %s10985_s29 = scalar_lea.vmem %s35_s19, 32  ;;  %p10990_p4 = scmp.lt.s32.totalorder %s35_s19, %s35_s19 }
   0xc   :  { %p10986_p3 = scmp.ne.s32.totalorder %s35_s19, %s10985_s29  ;;  %p10991_p5 = scmp.lt.s32.totalorder %s10985_s29, %s10985_s29 }
   0xe   :  { %p10992_p6 = por %p10991_p5, %p10990_p4 }
  0x10   :  { %p10993_p7 = pnand %p10992_p6, %p10986_p3 }
  0x12   :  { %10996 = shalt.err (!%p10993_p7)
}
  0x13   :  { %37 = dma.hbm_to_vmem [thread:$0]  %s11535_s2, 32, %s35_s19, [#allocation6]  }
  0x14   :  { %s10997_s9 = scalar_lea.hbm %s11534_s1, 131072 }
  0x15   :  { %p10998_p8 = scmp.ne.s32.totalorder %s11534_s1, %s10997_s9  ;;  %p11001_p9 = scmp.lt.u32.totalorder %s10997_s9, %s11534_s1 }
  0x17   :  { %p11003_p10 = pnand %p11001_p9, %p10998_p8 }
  0x19   :  { %11006 = shalt.err (!%p11003_p10)
}
  0x1a   :  { %s11007_s14 = scalar_lea.vmem %s11133_s21, 131072  ;;  %p11012_p12 = scmp.lt.s32.totalorder %s11133_s21, %s11133_s21 }
  0x1b   :  { %p11008_p11 = scmp.ne.s32.totalorder %s11133_s21, %s11007_s14  ;;  %p11013_p13 = scmp.lt.s32.totalorder %s11007_s14, %s11007_s14 }
  0x1d   :  { %p11014_p0 = por %p11013_p13, %p11012_p12 }
  0x1f   :  { %p11015_p1 = pnand %p11014_p0, %p11008_p11 }
  0x21   :  { %11018 = shalt.err (!%p11015_p1)
}
  0x22   :  { %s11095_s2 = smov 128   ;;  %s11096_s15 = smov 8  }
  0x23   :  { %27 = dma.hbm_to_vmem [thread:$0]  %s11534_s1, 131072, %s11133_s21, [#allocation3], %s11095_s2, %s11095_s2, %s11096_s15  }
  0x24   :  { %s11097_s18 = smov [#allocation7]   ;;  %s11019_s23 = scalar_lea.hbm %s11536_s3, 2048 }
  0x25   :  { %s43_s19 = sshll.u32 %s11097_s18, 4  ;;  %p11020_p2 = scmp.ne.s32.totalorder %s11536_s3, %s11019_s23  ;;  %s44_s19 = int_to_ptr.vmem [resolvable:$true] %s43_s19 }
  0x26   :  { %p11023_p3 = scmp.lt.u32.totalorder %s11019_s23, %s11536_s3 }
  0x28   :  { %p11025_p4 = pnand %p11023_p3, %p11020_p2 }
  0x2a   :  { %11028 = shalt.err (!%p11025_p4)
}
  0x2b   :  { %s11029_s28 = scalar_lea.vmem %s44_s19, 2048  ;;  %p11034_p6 = scmp.lt.s32.totalorder %s44_s19, %s44_s19 }
  0x2c   :  { %p11030_p5 = scmp.ne.s32.totalorder %s44_s19, %s11029_s28  ;;  %p11035_p7 = scmp.lt.s32.totalorder %s11029_s28, %s11029_s28 }
  0x2e   :  { %p11036_p8 = por %p11035_p7, %p11034_p6 }
  0x30   :  { %p11037_p9 = pnand %p11036_p8, %p11030_p5 }
  0x32   :  { %11040 = shalt.err (!%p11037_p9)
}
  0x33   :  { %s11098_s1 = smov 64   ;;  %s11099_s21 = smov 4  }
  0x34   :  { %49 = dma.hbm_to_vmem [thread:$0]  %s11536_s3, 2048, %s44_s19, [#allocation6], %s11098_s1, %s11098_s1, %s11099_s21  }
  0x35   :  { %s11100_s6 = smov [#allocation8]   ;;  %s11041_s10 = scalar_lea.hbm %s11537_s4, 16 }
  0x36   :  { %s56_s7 = sshll.u32 %s11100_s6, 4  ;;  %p11042_p10 = scmp.ne.s32.totalorder %s11537_s4, %s11041_s10  ;;  %s57_s7 = int_to_ptr.vmem [resolvable:$true] %s56_s7 }
  0x37   :  { %p11045_p11 = scmp.lt.u32.totalorder %s11041_s10, %s11537_s4 }
  0x39   :  { %p11047_p12 = pnand %p11045_p11, %p11042_p10 }
  0x3b   :  { %11050 = shalt.err (!%p11047_p12)
}
  0x3c   :  { %s11051_s2 = scalar_lea.vmem %s57_s7, 16  ;;  %s11055_s3 = scalar_lea.vmem %s57_s7, 32 }
  0x3d   :  { %p11052_p13 = scmp.ne.s32.totalorder %s57_s7, %s11051_s2  ;;  %p11056_p0 = scmp.lt.s32.totalorder %s57_s7, %s57_s7 }
  0x3e   :  { %p11057_p1 = scmp.lt.s32.totalorder %s11055_s3, %s11051_s2 }
  0x40   :  { %p11058_p2 = por %p11057_p1, %p11056_p0 }
  0x42   :  { %p11059_p3 = pnand %p11058_p2, %p11052_p13 }
  0x44   :  { %11062 = shalt.err (!%p11059_p3)
}
  0x45   :  { %59 = dma.hbm_to_vmem [thread:$0]  %s11537_s4, 16, %s57_s7, [#allocation9]  }
  0x46   :  { %11085 = dma.done.wait [#allocation3], 131072  }
  0x47   :  { %11086 = vsyncadd [#allocation3], 4294836224 }
  0x48   :  { %11087 = dma.done.wait [#allocation6], 2080  }
  0x49   :  { %11088 = vsyncadd [#allocation6], 4294965216 }
  0x4a   :  { %11089 = dma.done.wait [#allocation9], 16  }
  0x4b   :  { %11090 = vsyncadd [#allocation9], 4294967280  ;;  %v9407_v0 = vld [vmem:[#allocation2 + $0x4] ss:$8 sps:$4 sm:$0xff]   ;;  %v9411_v2 = vld [vmem:[#allocation2] ss:$8 sps:$4 sm:$0xff]   ;;  %v1107_v36 = vlaneseq }
  0x4c   :  { %v9409_v1 = vld [vmem:[#allocation2 + $0x1004] ss:$8 sps:$4 sm:$0xff]   ;;  %6701 = vmatprep.subr.bf16.mxu1 %v9407_v0  ;;  %v9412_v3 = vld [vmem:[#allocation2 + $0x1000] ss:$8 sps:$4 sm:$0xff]   ;;  %v9413_v4 = vld [vmem:[#allocation2 + $0x14] ss:$8 sps:$4 sm:$0xff]  }
  0x4d   :  { %7357 = vmatprep.subr.bf16.mxu0 %v9409_v1  ;;  %6702 = vmatpush1.bf16.msra.mxu1 %v9411_v2  ;;  %v9415_v5 = vld [vmem:[#allocation2 + $0x1014] ss:$8 sps:$4 sm:$0xff]   ;;  %v9417_v6 = vld [vmem:[#allocation2 + $0x10] ss:$8 sps:$4 sm:$0xff]   ;;  %v9419_v8 = vld [vmem:[#allocation2 + $0x24] ss:$8 sps:$4 sm:$0xff]  }
  0x4e   :  { %7358 = vmatpush1.bf16.msra.mxu0 %v9412_v3  ;;  %6703 = vmatprep.subr.bf16.mxu1 %v9413_v4  ;;  %v9418_v7 = vld [vmem:[#allocation2 + $0x1010] ss:$8 sps:$4 sm:$0xff]   ;;  %v9421_v9 = vld [vmem:[#allocation2 + $0x1024] ss:$8 sps:$4 sm:$0xff]   ;;  %v9423_v10 = vld [vmem:[#allocation2 + $0x20] ss:$8 sps:$4 sm:$0xff]  }
  0x4f   :  { %7359 = vmatprep.subr.bf16.mxu0 %v9415_v5  ;;  %v9424_v11 = vld [vmem:[#allocation2 + $0x1020] ss:$8 sps:$4 sm:$0xff]   ;;  %v9425_v12 = vld [vmem:[#allocation2 + $0x34] ss:$8 sps:$4 sm:$0xff]   ;;  %v9429_v14 = vld [vmem:[#allocation2 + $0x30] ss:$8 sps:$4 sm:$0xff]  }
  0x50   :  { %v9427_v13 = vld [vmem:[#allocation2 + $0x1034] ss:$8 sps:$4 sm:$0xff]   ;;  %v9430_v15 = vld [vmem:[#allocation2 + $0x1030] ss:$8 sps:$4 sm:$0xff]   ;;  %v9431_v16 = vld [vmem:[#allocation2 + $0x44] ss:$8 sps:$4 sm:$0xff]  }
  0x51   :  { %6704 = vmatpush1.bf16.msra.mxu1 %v9417_v6  ;;  %v9433_v17 = vld [vmem:[#allocation2 + $0x1044] ss:$8 sps:$4 sm:$0xff]   ;;  %v9435_v18 = vld [vmem:[#allocation2 + $0x40] ss:$8 sps:$4 sm:$0xff]   ;;  %v9437_v20 = vld [vmem:[#allocation2 + $0x54] ss:$8 sps:$4 sm:$0xff]  }
  0x52   :  { %7360 = vmatpush1.bf16.msra.mxu0 %v9418_v7  ;;  %6705 = vmatprep.subr.bf16.mxu1 %v9419_v8  ;;  %v9436_v19 = vld [vmem:[#allocation2 + $0x1040] ss:$8 sps:$4 sm:$0xff]   ;;  %v9439_v21 = vld [vmem:[#allocation2 + $0x1054] ss:$8 sps:$4 sm:$0xff]   ;;  %v9441_v22 = vld [vmem:[#allocation2 + $0x50] ss:$8 sps:$4 sm:$0xff]  }
  0x53   :  { %7361 = vmatprep.subr.bf16.mxu0 %v9421_v9  ;;  %v9442_v23 = vld [vmem:[#allocation2 + $0x1050] ss:$8 sps:$4 sm:$0xff]   ;;  %v9443_v24 = vld [vmem:[#allocation2 + $0x64] ss:$8 sps:$4 sm:$0xff]   ;;  %v9447_v26 = vld [vmem:[#allocation2 + $0x60] ss:$8 sps:$4 sm:$0xff]  }
  0x54   :  { %v9445_v25 = vld [vmem:[#allocation2 + $0x1064] ss:$8 sps:$4 sm:$0xff]   ;;  %v9448_v27 = vld [vmem:[#allocation2 + $0x1060] ss:$8 sps:$4 sm:$0xff]   ;;  %v9449_v28 = vld [vmem:[#allocation2 + $0x74] ss:$8 sps:$4 sm:$0xff]  }
  0x55   :  { %6706 = vmatpush1.bf16.msra.mxu1 %v9423_v10  ;;  %v9451_v29 = vld [vmem:[#allocation2 + $0x1074] ss:$8 sps:$4 sm:$0xff]   ;;  %v9453_v30 = vld [vmem:[#allocation2 + $0x70] ss:$8 sps:$4 sm:$0xff]   ;;  %v9455_v32 = vld [vmem:[#allocation2 + $0x84] ss:$8 sps:$4 sm:$0xff]  }
  0x56   :  { %7362 = vmatpush1.bf16.msra.mxu0 %v9424_v11  ;;  %6707 = vmatprep.subr.bf16.mxu1 %v9425_v12  ;;  %v9454_v31 = vld [vmem:[#allocation2 + $0x1070] ss:$8 sps:$4 sm:$0xff]   ;;  %v9457_v33 = vld [vmem:[#allocation2 + $0x1084] ss:$8 sps:$4 sm:$0xff]   ;;  %v9459_v34 = vld [vmem:[#allocation2 + $0x80] ss:$8 sps:$4 sm:$0xff]  }
  0x57   :  { %7363 = vmatprep.subr.bf16.mxu0 %v9427_v13  ;;  %v9460_v35 = vld [vmem:[#allocation2 + $0x1080] ss:$8 sps:$4 sm:$0xff]   ;;  %v11101_v37 = vmov 1966171168   ;;  %v9461_v39 = vld [vmem:[#allocation2 + $0x94] ss:$8 sps:$4 sm:$0xff]  }
  0x58   :  { %v1127_v38 = vunpack.c.l.s4 %v11101_v37  ;;  %v9463_v40 = vld [vmem:[#allocation2 + $0x1094] ss:$8 sps:$4 sm:$0xff]   ;;  %v9465_v41 = vld [vmem:[#allocation2 + $0x90] ss:$8 sps:$4 sm:$0xff]   ;;  %v11188_v42 = vshrl.u32 %v1107_v36, 7  ;;  %v11196_v52 = vld [vmem:[%s11533_s0] sm:$0xff] }
  0x59   :  { %6708 = vmatpush1.bf16.msra.mxu1 %v9429_v14  ;;  %v9466_v44 = vld [vmem:[#allocation2 + $0x1090] ss:$8 sps:$4 sm:$0xff]   ;;  %v9467_v45 = vld [vmem:[#allocation2 + $0xa4] ss:$8 sps:$4 sm:$0xff]   ;;  %v9471_v47 = vld [vmem:[#allocation2 + $0xa0] ss:$8 sps:$4 sm:$0xff]  }
  0x5a   :  { %7364 = vmatpush1.bf16.msra.mxu0 %v9430_v15  ;;  %6709 = vmatprep.subr.bf16.mxu1 %v9431_v16  ;;  %v1128_v43 = vunpack.c.0.s8 %v1127_v38  ;;  %v9469_v46 = vld [vmem:[#allocation2 + $0x10a4] ss:$8 sps:$4 sm:$0xff]   ;;  %v9472_v48 = vld [vmem:[#allocation2 + $0x10a0] ss:$8 sps:$4 sm:$0xff]   ;;  %v9473_v50 = vld [vmem:[#allocation2 + $0xb4] ss:$8 sps:$4 sm:$0xff]  }
  0x5b   :  { %7365 = vmatprep.subr.bf16.mxu0 %v9433_v17  ;;  %v9475_v51 = vld [vmem:[#allocation2 + $0x10b4] ss:$8 sps:$4 sm:$0xff]   ;;  %v9477_v53 = vld [vmem:[#allocation2 + $0xb0] ss:$8 sps:$4 sm:$0xff]   ;;  %v11203_v56 = vld [vmem:[%s11533_s0 + $0x20] sm:$0xff] }
  0x5c   :  { %v11191_v49 = vsub.s32 %v1128_v43, %v11188_v42  ;;  %v9478_v55 = vld [vmem:[#allocation2 + $0x10b0] ss:$8 sps:$4 sm:$0xff]   ;;  %v9479_v57 = vld [vmem:[#allocation2 + $0xc4] ss:$8 sps:$4 sm:$0xff]   ;;  %v9483_v63 = vld [vmem:[#allocation2 + $0xc0] ss:$8 sps:$4 sm:$0xff]  }
  0x5d   :  { %6710 = vmatpush1.bf16.msra.mxu1 %v9435_v18  ;;  %v9481_v58 = vld [vmem:[#allocation2 + $0x10c4] ss:$8 sps:$4 sm:$0xff]   ;;  %v9484_v0 = vld [vmem:[#allocation2 + $0x10c0] ss:$8 sps:$4 sm:$0xff]   ;;  %v9485_v1 = vld [vmem:[#allocation2 + $0xd4] ss:$8 sps:$4 sm:$0xff]  }
  0x5e   :  { %7366 = vmatpush1.bf16.msra.mxu0 %v9436_v19  ;;  %6711 = vmatprep.subr.bf16.mxu1 %v9437_v20  ;;  %v1132_v54 = vrot.slane %v11196_v52, %v11191_v49  ;;  %v1328_v60 = vrot.slane %v11203_v56, %v11191_v49  ;;  %v9487_v2 = vld [vmem:[#allocation2 + $0x10d4] ss:$8 sps:$4 sm:$0xff]   ;;  %v9489_v4 = vld [vmem:[#allocation2 + $0xd0] ss:$8 sps:$4 sm:$0xff]   ;;  %v9491_v6 = vld [vmem:[#allocation2 + $0xe4] ss:$8 sps:$4 sm:$0xff]  }
  0x5f   :  { %7367 = vmatprep.subr.bf16.mxu0 %v9439_v21  ;;  %v9490_v5 = vld [vmem:[#allocation2 + $0x10d0] ss:$8 sps:$4 sm:$0xff]   ;;  %v9493_v7 = vld [vmem:[#allocation2 + $0x10e4] ss:$8 sps:$4 sm:$0xff]   ;;  %v9495_v8 = vld [vmem:[#allocation2 + $0xe0] ss:$8 sps:$4 sm:$0xff]  }
  0x60   :  { %v1140_v59 = vcombine.high %v1132_v54, %v1132_v54  ;;  %v1336_v62 = vcombine.high %v1328_v60, %v1328_v60  ;;  %v9496_v9 = vld [vmem:[#allocation2 + $0x10e0] ss:$8 sps:$4 sm:$0xff]   ;;  %v9497_v10 = vld [vmem:[#allocation2 + $0xf4] ss:$8 sps:$4 sm:$0xff]   ;;  %v9501_v12 = vld [vmem:[#allocation2 + $0xf0] ss:$8 sps:$4 sm:$0xff]   ;;  %v11210_v16 = vrot.slane %v1132_v54, %v11191_v49  ;;  %v11213_v17 = vrot.slane %v1328_v60, %v11191_v49 }
  0x61   :  { %6712 = vmatpush1.bf16.msra.mxu1 %v9441_v22  ;;  %v9499_v11 = vld [vmem:[#allocation2 + $0x10f4] ss:$8 sps:$4 sm:$0xff]   ;;  %v9502_v13 = vld [vmem:[#allocation2 + $0x10f0] ss:$8 sps:$4 sm:$0xff]   ;;  %v9506_v14 = vld [vmem:[#allocation2 + $0x104] ss:$8 sps:$4 sm:$0xff]  }
  0x62   :  { %7368 = vmatpush1.bf16.msra.mxu0 %v9442_v23  ;;  %6713 = vmatprep.subr.bf16.mxu1 %v9443_v24  ;;  %v1162_v61 = vrot.slane %v1140_v59, %v11191_v49  ;;  %v1358_v3 = vrot.slane %v1336_v62, %v11191_v49  ;;  %v9510_v15 = vld [vmem:[#allocation2 + $0x1104] ss:$8 sps:$4 sm:$0xff]   ;;  %v9504_v18 = vld [vmem:[#allocation2 + $0x100] ss:$8 sps:$4 sm:$0xff]   ;;  %v9513_v20 = vld [vmem:[#allocation2 + $0x114] ss:$8 sps:$4 sm:$0xff]  }
  0x63   :  { %7369 = vmatprep.subr.bf16.mxu0 %v9445_v25  ;;  %v9508_v19 = vld [vmem:[#allocation2 + $0x1100] ss:$8 sps:$4 sm:$0xff]   ;;  %v9516_v21 = vld [vmem:[#allocation2 + $0x1114] ss:$8 sps:$4 sm:$0xff]   ;;  %v9511_v24 = vld [vmem:[#allocation2 + $0x110] ss:$8 sps:$4 sm:$0xff]  }
  0x64   :  { %6733 = vmatprep.mubr.bf16.mxu1 %v1162_v61  ;;  %7389 = vmatprep.mubr.bf16.mxu0 %v1358_v3  ;;  %v1172_v22 = vcombine.high %v1162_v61, %v1162_v61  ;;  %v1368_v23 = vcombine.high %v1358_v3, %v1358_v3  ;;  %v9514_v25 = vld [vmem:[#allocation2 + $0x1110] ss:$8 sps:$4 sm:$0xff]   ;;  %v9529_v36 = vld [vmem:[#allocation2 + $0x140] ss:$8 sps:$4 sm:$0xff]   ;;  %v9537_v38 = vld [vmem:[#allocation2 + $0x154] ss:$8 sps:$4 sm:$0xff]  }
  0x65   :  { %6714 = vmatpush1.bf16.msra.mxu1 %v9447_v26  ;;  %v9519_v26 = vld [vmem:[#allocation2 + $0x124] ss:$8 sps:$4 sm:$0xff]   ;;  %v9532_v37 = vld [vmem:[#allocation2 + $0x1140] ss:$8 sps:$4 sm:$0xff]   ;;  %v9564_v59 = vld [vmem:[#allocation2 + $0x1194] ss:$8 sps:$4 sm:$0xff]  }
  0x66   :  { %7370 = vmatpush1.bf16.msra.mxu0 %v9448_v27  ;;  %6715 = vmatprep.subr.bf16.mxu1 %v9449_v28  ;;  %v9522_v27 = vld [vmem:[#allocation2 + $0x1124] ss:$8 sps:$4 sm:$0xff]   ;;  %v9517_v28 = vld [vmem:[#allocation2 + $0x120] ss:$8 sps:$4 sm:$0xff]   ;;  %v9559_v60 = vld [vmem:[#allocation2 + $0x190] ss:$8 sps:$4 sm:$0xff]  }
  0x67   :  { %7371 = vmatprep.subr.bf16.mxu0 %v9451_v29  ;;  %v9520_v29 = vld [vmem:[#allocation2 + $0x1120] ss:$8 sps:$4 sm:$0xff]   ;;  %v9543_v43 = vld [vmem:[#allocation2 + $0x164] ss:$8 sps:$4 sm:$0xff]   ;;  %v9562_v61 = vld [vmem:[#allocation2 + $0x1190] ss:$8 sps:$4 sm:$0xff]  }
  0x68   :  { %v9558_v54 = vld [vmem:[#allocation2 + $0x1184] ss:$8 sps:$4 sm:$0xff]   ;;  %v9576_v3 = vld [vmem:[#allocation2 + $0x11b4] ss:$8 sps:$4 sm:$0xff]  }
  0x69   :  { %6716 = vmatpush1.bf16.msra.mxu1 %v9453_v30  ;;  %v9525_v30 = vld [vmem:[#allocation2 + $0x134] ss:$8 sps:$4 sm:$0xff]   ;;  %v9567_v62 = vld [vmem:[#allocation2 + $0x1a4] ss:$8 sps:$4 sm:$0xff]  }
  0x6a   :  { %7372 = vmatpush1.bf16.msra.mxu0 %v9454_v31  ;;  %6717 = vmatprep.subr.bf16.mxu1 %v9455_v32  ;;  %v9528_v31 = vld [vmem:[#allocation2 + $0x1134] ss:$8 sps:$4 sm:$0xff]   ;;  %v9523_v32 = vld [vmem:[#allocation2 + $0x130] ss:$8 sps:$4 sm:$0xff]  }
  0x6b   :  { %7373 = vmatprep.subr.bf16.mxu0 %v9457_v33  ;;  %v9526_v33 = vld [vmem:[#allocation2 + $0x1130] ss:$8 sps:$4 sm:$0xff]  }
  0x6d   :  { %6718 = vmatpush1.bf16.msra.mxu1 %v9459_v34  ;;  %v9531_v34 = vld [vmem:[#allocation2 + $0x144] ss:$8 sps:$4 sm:$0xff]  }
  0x6e   :  { %7374 = vmatpush1.bf16.msra.mxu0 %v9460_v35  ;;  %6719 = vmatprep.subr.bf16.mxu1 %v9461_v39  ;;  %v9534_v35 = vld [vmem:[#allocation2 + $0x1144] ss:$8 sps:$4 sm:$0xff]   ;;  %v9540_v39 = vld [vmem:[#allocation2 + $0x1154] ss:$8 sps:$4 sm:$0xff]  }
  0x6f   :  { %7375 = vmatprep.subr.bf16.mxu0 %v9463_v40  ;;  %v9535_v40 = vld [vmem:[#allocation2 + $0x150] ss:$8 sps:$4 sm:$0xff]  }
  0x71   :  { %6720 = vmatpush1.bf16.msra.mxu1 %v9465_v41  ;;  %v9538_v41 = vld [vmem:[#allocation2 + $0x1150] ss:$8 sps:$4 sm:$0xff]  }
  0x72   :  { %7376 = vmatpush1.bf16.msra.mxu0 %v9466_v44  ;;  %6721 = vmatprep.subr.bf16.mxu1 %v9467_v45  ;;  %v9546_v44 = vld [vmem:[#allocation2 + $0x1164] ss:$8 sps:$4 sm:$0xff]   ;;  %v9541_v45 = vld [vmem:[#allocation2 + $0x160] ss:$8 sps:$4 sm:$0xff]  }
  0x73   :  { %7377 = vmatprep.subr.bf16.mxu0 %v9469_v46  ;;  %v9544_v46 = vld [vmem:[#allocation2 + $0x1160] ss:$8 sps:$4 sm:$0xff]  }
  0x75   :  { %6722 = vmatpush1.bf16.msra.mxu1 %v9471_v47  ;;  %v9549_v47 = vld [vmem:[#allocation2 + $0x174] ss:$8 sps:$4 sm:$0xff]  }
  0x76   :  { %7378 = vmatpush1.bf16.msra.mxu0 %v9472_v48  ;;  %6723 = vmatprep.subr.bf16.mxu1 %v9473_v50  ;;  %v9552_v48 = vld [vmem:[#allocation2 + $0x1174] ss:$8 sps:$4 sm:$0xff]   ;;  %v9547_v50 = vld [vmem:[#allocation2 + $0x170] ss:$8 sps:$4 sm:$0xff]  }
  0x77   :  { %7379 = vmatprep.subr.bf16.mxu0 %v9475_v51  ;;  %v9550_v51 = vld [vmem:[#allocation2 + $0x1170] ss:$8 sps:$4 sm:$0xff]  }
  0x79   :  { %6724 = vmatpush1.bf16.msra.mxu1 %v9477_v53  ;;  %v9555_v53 = vld [vmem:[#allocation2 + $0x184] ss:$8 sps:$4 sm:$0xff]  }
  0x7a   :  { %7380 = vmatpush1.bf16.msra.mxu0 %v9478_v55  ;;  %6725 = vmatprep.subr.bf16.mxu1 %v9479_v57  ;;  %v9553_v55 = vld [vmem:[#allocation2 + $0x180] ss:$8 sps:$4 sm:$0xff]  }
  0x7b   :  { %7381 = vmatprep.subr.bf16.mxu0 %v9481_v58  ;;  %v9556_v57 = vld [vmem:[#allocation2 + $0x1180] ss:$8 sps:$4 sm:$0xff]   ;;  %v9561_v58 = vld [vmem:[#allocation2 + $0x194] ss:$8 sps:$4 sm:$0xff]  }
  0x7d   :  { %6726 = vmatpush1.bf16.msra.mxu1 %v9483_v63  ;;  %v9570_v63 = vld [vmem:[#allocation2 + $0x11a4] ss:$8 sps:$4 sm:$0xff]  }
  0x7e   :  { %7382 = vmatpush1.bf16.msra.mxu0 %v9484_v0  ;;  %6727 = vmatprep.subr.bf16.mxu1 %v9485_v1  ;;  %v9565_v0 = vld [vmem:[#allocation2 + $0x1a0] ss:$8 sps:$4 sm:$0xff]  }
  0x7f   :  { %7383 = vmatprep.subr.bf16.mxu0 %v9487_v2  ;;  %v9568_v1 = vld [vmem:[#allocation2 + $0x11a0] ss:$8 sps:$4 sm:$0xff]   ;;  %v9573_v2 = vld [vmem:[#allocation2 + $0x1b4] ss:$8 sps:$4 sm:$0xff]  }
  0x81   :  { %6728 = vmatpush1.bf16.msra.mxu1 %v9489_v4  ;;  %v9571_v4 = vld [vmem:[#allocation2 + $0x1b0] ss:$8 sps:$4 sm:$0xff]  }
  0x82   :  { %7384 = vmatpush1.bf16.msra.mxu0 %v9490_v5  ;;  %6729 = vmatprep.subr.bf16.mxu1 %v9491_v6  ;;  %v9574_v5 = vld [vmem:[#allocation2 + $0x11b0] ss:$8 sps:$4 sm:$0xff]   ;;  %v9579_v6 = vld [vmem:[#allocation2 + $0x1c4] ss:$8 sps:$4 sm:$0xff]  }
  0x83   :  { %7385 = vmatprep.subr.bf16.mxu0 %v9493_v7  ;;  %v9582_v7 = vld [vmem:[#allocation2 + $0x11c4] ss:$8 sps:$4 sm:$0xff]  }
  0x85   :  { %6730 = vmatpush1.bf16.msra.mxu1 %v9495_v8  ;;  %v9577_v8 = vld [vmem:[#allocation2 + $0x1c0] ss:$8 sps:$4 sm:$0xff]  }
  0x86   :  { %7386 = vmatpush1.bf16.msra.mxu0 %v9496_v9  ;;  %6731 = vmatprep.subr.bf16.mxu1 %v9497_v10  ;;  %v9580_v9 = vld [vmem:[#allocation2 + $0x11c0] ss:$8 sps:$4 sm:$0xff]   ;;  %v9585_v10 = vld [vmem:[#allocation2 + $0x1d4] ss:$8 sps:$4 sm:$0xff]  }
  0x87   :  { %7387 = vmatprep.subr.bf16.mxu0 %v9499_v11  ;;  %v9588_v11 = vld [vmem:[#allocation2 + $0x11d4] ss:$8 sps:$4 sm:$0xff]  }
  0x89   :  { %6732 = vmatpush1.bf16.msra.mxu1 %v9501_v12  ;;  %v9583_v12 = vld [vmem:[#allocation2 + $0x1d0] ss:$8 sps:$4 sm:$0xff]  }
  0x8a   :  { %7388 = vmatpush1.bf16.msra.mxu0 %v9502_v13  ;;  %6742 = vmatprep.subr.bf16.mxu1 %v9506_v14  ;;  %v9586_v13 = vld [vmem:[#allocation2 + $0x11d0] ss:$8 sps:$4 sm:$0xff]   ;;  %v9591_v14 = vld [vmem:[#allocation2 + $0x1e4] ss:$8 sps:$4 sm:$0xff]  }
  0x8b   :  { %7398 = vmatprep.subr.bf16.mxu0 %v9510_v15  ;;  %v9594_v15 = vld [vmem:[#allocation2 + $0x11e4] ss:$8 sps:$4 sm:$0xff]  }
  0x8c   :  { %6734 = vmatmul.mubr.bf16.vlgmr.msra.gmra.mrb[0].mxu1 %v11210_v16 }
  0x8d   :  { %7390 = vmatmul.mubr.bf16.vlgmr.msra.gmra.mrb[0].mxu0 %v11213_v17  ;;  %6743 = vmatpush1.bf16.msra.mxu1 %v9504_v18  ;;  %v1125_v18 = vcombine.high %v11196_v52, %v11196_v52  ;;  %v9595_v52 = vld [vmem:[#allocation2 + $0x1f0] ss:$8 sps:$4 sm:$0xff]  }
  0x8e   :  { %7399 = vmatpush1.bf16.msra.mxu0 %v9508_v19  ;;  %6744 = vmatprep.subr.bf16.mxu1 %v9513_v20  ;;  %v1321_v19 = vcombine.high %v11203_v56, %v11203_v56  ;;  %v9589_v20 = vld [vmem:[#allocation2 + $0x1e0] ss:$8 sps:$4 sm:$0xff]   ;;  %v9603_v56 = vld [vmem:[#allocation2 + $0x204] ss:$8 sps:$4 sm:$0xff]  }
  0x8f   :  { %7400 = vmatprep.subr.bf16.mxu0 %v9516_v21  ;;  %6774 = vmatprep.mubr.bf16.mxu1 %v1172_v22  ;;  %v9592_v21 = vld [vmem:[#allocation2 + $0x11e0] ss:$8 sps:$4 sm:$0xff]   ;;  %v9597_v22 = vld [vmem:[#allocation2 + $0x1f4] ss:$8 sps:$4 sm:$0xff]  }
  0x90   :  { %7430 = vmatprep.mubr.bf16.mxu0 %v1368_v23  ;;  %v9600_v23 = vld [vmem:[#allocation2 + $0x11f4] ss:$8 sps:$4 sm:$0xff]  }
  0x91   :  { %6745 = vmatpush1.bf16.msra.mxu1 %v9511_v24  ;;  %v11222_v24 = vrot.slane %v1125_v18, %v11191_v49  ;;  %v9667_v18 = vld [vmem:[#allocation2 + $0x2b0] ss:$8 sps:$4 sm:$0xff]  }
  0x92   :  { %7401 = vmatpush1.bf16.msra.mxu0 %v9514_v25  ;;  %6746 = vmatprep.subr.bf16.mxu1 %v9519_v26  ;;  %v11225_v25 = vrot.slane %v1321_v19, %v11191_v49  ;;  %v9598_v26 = vld [vmem:[#allocation2 + $0x11f0] ss:$8 sps:$4 sm:$0xff]  }
  0x93   :  { %7402 = vmatprep.subr.bf16.mxu0 %v9522_v27  ;;  %v9606_v27 = vld [vmem:[#allocation2 + $0x1204] ss:$8 sps:$4 sm:$0xff]   ;;  %v9670_v19 = vld [vmem:[#allocation2 + $0x12b0] ss:$8 sps:$4 sm:$0xff]  }
  0x95   :  { %6747 = vmatpush1.bf16.msra.mxu1 %v9517_v28  ;;  %v1141_v28 = vcombine.high %v11222_v24, %v11222_v24 }
  0x96   :  { %7403 = vmatpush1.bf16.msra.mxu0 %v9520_v29  ;;  %6748 = vmatprep.subr.bf16.mxu1 %v9525_v30  ;;  %v1337_v29 = vcombine.high %v11225_v25, %v11225_v25  ;;  %v1170_v30 = vcombine.high %v11210_v16, %v11210_v16  ;;  %v9607_v16 = vld [vmem:[#allocation2 + $0x210] ss:$8 sps:$4 sm:$0xff]  }
  0x97   :  { %7404 = vmatprep.subr.bf16.mxu0 %v9528_v31  ;;  %v1366_v31 = vcombine.high %v11213_v17, %v11213_v17  ;;  %v9610_v17 = vld [vmem:[#allocation2 + $0x1210] ss:$8 sps:$4 sm:$0xff]  }
  0x99   :  { %6749 = vmatpush1.bf16.msra.mxu1 %v9523_v32  ;;  %v9601_v32 = vld [vmem:[#allocation2 + $0x200] ss:$8 sps:$4 sm:$0xff]  }
  0x9a   :  { %7405 = vmatpush1.bf16.msra.mxu0 %v9526_v33  ;;  %6750 = vmatprep.subr.bf16.mxu1 %v9531_v34  ;;  %v9604_v33 = vld [vmem:[#allocation2 + $0x1200] ss:$8 sps:$4 sm:$0xff]   ;;  %v9609_v34 = vld [vmem:[#allocation2 + $0x214] ss:$8 sps:$4 sm:$0xff]  }
  0x9b   :  { %7406 = vmatprep.subr.bf16.mxu0 %v9534_v35  ;;  %v9612_v35 = vld [vmem:[#allocation2 + $0x1214] ss:$8 sps:$4 sm:$0xff]  }
  0x9d   :  { %6751 = vmatpush1.bf16.msra.mxu1 %v9529_v36  ;;  %v11236_v36 = vrot.slane %v1141_v28, %v11191_v49  ;;  %v9687_v28 = vld [vmem:[#allocation2 + $0x2e4] ss:$8 sps:$4 sm:$0xff]  }
  0x9e   :  { %7407 = vmatpush1.bf16.msra.mxu0 %v9532_v37  ;;  %6752 = vmatprep.subr.bf16.mxu1 %v9537_v38  ;;  %v11239_v37 = vrot.slane %v1337_v29, %v11191_v49  ;;  %v9615_v38 = vld [vmem:[#allocation2 + $0x224] ss:$8 sps:$4 sm:$0xff]  }
  0x9f   :  { %7408 = vmatprep.subr.bf16.mxu0 %v9540_v39  ;;  %v9618_v39 = vld [vmem:[#allocation2 + $0x1224] ss:$8 sps:$4 sm:$0xff]  }
  0xa0   :  { %v9690_v29 = vld [vmem:[#allocation2 + $0x12e4] ss:$8 sps:$4 sm:$0xff]  }
  0xa1   :  { %6753 = vmatpush1.bf16.msra.mxu1 %v9535_v40  ;;  %v9613_v40 = vld [vmem:[#allocation2 + $0x220] ss:$8 sps:$4 sm:$0xff]  }
  0xa2   :  { %7409 = vmatpush1.bf16.msra.mxu0 %v9538_v41  ;;  %6754 = vmatprep.subr.bf16.mxu1 %v9543_v43  ;;  %v9616_v41 = vld [vmem:[#allocation2 + $0x1220] ss:$8 sps:$4 sm:$0xff]   ;;  %v9621_v43 = vld [vmem:[#allocation2 + $0x234] ss:$8 sps:$4 sm:$0xff]  }
  0xa3   :  { %7410 = vmatprep.subr.bf16.mxu0 %v9546_v44  ;;  %v9624_v44 = vld [vmem:[#allocation2 + $0x1234] ss:$8 sps:$4 sm:$0xff]  }
  0xa5   :  { %6755 = vmatpush1.bf16.msra.mxu1 %v9541_v45  ;;  %v9619_v45 = vld [vmem:[#allocation2 + $0x230] ss:$8 sps:$4 sm:$0xff]  }
  0xa6   :  { %7411 = vmatpush1.bf16.msra.mxu0 %v9544_v46  ;;  %6756 = vmatprep.subr.bf16.mxu1 %v9549_v47  ;;  %v9622_v46 = vld [vmem:[#allocation2 + $0x1230] ss:$8 sps:$4 sm:$0xff]   ;;  %v9627_v47 = vld [vmem:[#allocation2 + $0x244] ss:$8 sps:$4 sm:$0xff]  }
  0xa7   :  { %7412 = vmatprep.subr.bf16.mxu0 %v9552_v48  ;;  %v9630_v48 = vld [vmem:[#allocation2 + $0x1244] ss:$8 sps:$4 sm:$0xff]  }
  0xa9   :  { %6757 = vmatpush1.bf16.msra.mxu1 %v9547_v50  ;;  %v9625_v50 = vld [vmem:[#allocation2 + $0x240] ss:$8 sps:$4 sm:$0xff]  }
  0xaa   :  { %7413 = vmatpush1.bf16.msra.mxu0 %v9550_v51  ;;  %6758 = vmatprep.subr.bf16.mxu1 %v9555_v53  ;;  %v9628_v51 = vld [vmem:[#allocation2 + $0x1240] ss:$8 sps:$4 sm:$0xff]   ;;  %v9633_v53 = vld [vmem:[#allocation2 + $0x254] ss:$8 sps:$4 sm:$0xff]  }
  0xab   :  { %7414 = vmatprep.subr.bf16.mxu0 %v9558_v54  ;;  %v9636_v54 = vld [vmem:[#allocation2 + $0x1254] ss:$8 sps:$4 sm:$0xff]  }
  0xad   :  { %6759 = vmatpush1.bf16.msra.mxu1 %v9553_v55  ;;  %v9631_v55 = vld [vmem:[#allocation2 + $0x250] ss:$8 sps:$4 sm:$0xff]  }
  0xae   :  { %7415 = vmatpush1.bf16.msra.mxu0 %v9556_v57  ;;  %6760 = vmatprep.subr.bf16.mxu1 %v9561_v58  ;;  %v9634_v57 = vld [vmem:[#allocation2 + $0x1250] ss:$8 sps:$4 sm:$0xff]   ;;  %v9639_v58 = vld [vmem:[#allocation2 + $0x264] ss:$8 sps:$4 sm:$0xff]  }
  0xaf   :  { %7416 = vmatprep.subr.bf16.mxu0 %v9564_v59  ;;  %v9642_v59 = vld [vmem:[#allocation2 + $0x1264] ss:$8 sps:$4 sm:$0xff]  }
  0xb1   :  { %6761 = vmatpush1.bf16.msra.mxu1 %v9559_v60  ;;  %v9637_v60 = vld [vmem:[#allocation2 + $0x260] ss:$8 sps:$4 sm:$0xff]  }
  0xb2   :  { %7417 = vmatpush1.bf16.msra.mxu0 %v9562_v61  ;;  %6762 = vmatprep.subr.bf16.mxu1 %v9567_v62  ;;  %v9640_v61 = vld [vmem:[#allocation2 + $0x1260] ss:$8 sps:$4 sm:$0xff]   ;;  %v9645_v62 = vld [vmem:[#allocation2 + $0x274] ss:$8 sps:$4 sm:$0xff]  }
  0xb3   :  { %7418 = vmatprep.subr.bf16.mxu0 %v9570_v63  ;;  %v9648_v63 = vld [vmem:[#allocation2 + $0x1274] ss:$8 sps:$4 sm:$0xff]  }
  0xb5   :  { %6763 = vmatpush1.bf16.msra.mxu1 %v9565_v0  ;;  %v9643_v0 = vld [vmem:[#allocation2 + $0x270] ss:$8 sps:$4 sm:$0xff]  }
  0xb6   :  { %7419 = vmatpush1.bf16.msra.mxu0 %v9568_v1  ;;  %6764 = vmatprep.subr.bf16.mxu1 %v9573_v2  ;;  %v9646_v1 = vld [vmem:[#allocation2 + $0x1270] ss:$8 sps:$4 sm:$0xff]   ;;  %v9651_v2 = vld [vmem:[#allocation2 + $0x284] ss:$8 sps:$4 sm:$0xff]  }
  0xb7   :  { %7420 = vmatprep.subr.bf16.mxu0 %v9576_v3  ;;  %v9654_v3 = vld [vmem:[#allocation2 + $0x1284] ss:$8 sps:$4 sm:$0xff]  }
  0xb9   :  { %6765 = vmatpush1.bf16.msra.mxu1 %v9571_v4  ;;  %v9649_v4 = vld [vmem:[#allocation2 + $0x280] ss:$8 sps:$4 sm:$0xff]  }
  0xba   :  { %7421 = vmatpush1.bf16.msra.mxu0 %v9574_v5  ;;  %6766 = vmatprep.subr.bf16.mxu1 %v9579_v6  ;;  %v9652_v5 = vld [vmem:[#allocation2 + $0x1280] ss:$8 sps:$4 sm:$0xff]   ;;  %v9657_v6 = vld [vmem:[#allocation2 + $0x294] ss:$8 sps:$4 sm:$0xff]  }
  0xbb   :  { %7422 = vmatprep.subr.bf16.mxu0 %v9582_v7  ;;  %v9660_v7 = vld [vmem:[#allocation2 + $0x1294] ss:$8 sps:$4 sm:$0xff]  }
  0xbd   :  { %6767 = vmatpush1.bf16.msra.mxu1 %v9577_v8  ;;  %v9655_v8 = vld [vmem:[#allocation2 + $0x290] ss:$8 sps:$4 sm:$0xff]  }
  0xbe   :  { %7423 = vmatpush1.bf16.msra.mxu0 %v9580_v9  ;;  %6768 = vmatprep.subr.bf16.mxu1 %v9585_v10  ;;  %v9658_v9 = vld [vmem:[#allocation2 + $0x1290] ss:$8 sps:$4 sm:$0xff]   ;;  %v9663_v10 = vld [vmem:[#allocation2 + $0x2a4] ss:$8 sps:$4 sm:$0xff]  }
  0xbf   :  { %7424 = vmatprep.subr.bf16.mxu0 %v9588_v11  ;;  %v9666_v11 = vld [vmem:[#allocation2 + $0x12a4] ss:$8 sps:$4 sm:$0xff]  }
  0xc1   :  { %6769 = vmatpush1.bf16.msra.mxu1 %v9583_v12  ;;  %v9661_v12 = vld [vmem:[#allocation2 + $0x2a0] ss:$8 sps:$4 sm:$0xff]  }
  0xc2   :  { %7425 = vmatpush1.bf16.msra.mxu0 %v9586_v13  ;;  %6770 = vmatprep.subr.bf16.mxu1 %v9591_v14  ;;  %v9664_v13 = vld [vmem:[#allocation2 + $0x12a0] ss:$8 sps:$4 sm:$0xff]   ;;  %v9669_v14 = vld [vmem:[#allocation2 + $0x2b4] ss:$8 sps:$4 sm:$0xff]  }
  0xc3   :  { %7426 = vmatprep.subr.bf16.mxu0 %v9594_v15  ;;  %v9672_v15 = vld [vmem:[#allocation2 + $0x12b4] ss:$8 sps:$4 sm:$0xff]  }
  0xc5   :  { %6771 = vmatpush1.bf16.msra.mxu1 %v9589_v20  ;;  %v9675_v20 = vld [vmem:[#allocation2 + $0x2c4] ss:$8 sps:$4 sm:$0xff]  }
  0xc6   :  { %7427 = vmatpush1.bf16.msra.mxu0 %v9592_v21  ;;  %6772 = vmatprep.subr.bf16.mxu1 %v9597_v22  ;;  %v9678_v21 = vld [vmem:[#allocation2 + $0x12c4] ss:$8 sps:$4 sm:$0xff]   ;;  %v9673_v22 = vld [vmem:[#allocation2 + $0x2c0] ss:$8 sps:$4 sm:$0xff]  }
  0xc7   :  { %7428 = vmatprep.subr.bf16.mxu0 %v9600_v23  ;;  %v9676_v23 = vld [vmem:[#allocation2 + $0x12c0] ss:$8 sps:$4 sm:$0xff]  }
  0xc9   :  { %6773 = vmatpush1.bf16.msra.mxu1 %v9595_v52  ;;  %v9681_v52 = vld [vmem:[#allocation2 + $0x2d4] ss:$8 sps:$4 sm:$0xff]  }
  0xca   :  { %7429 = vmatpush1.bf16.msra.mxu0 %v9598_v26  ;;  %6783 = vmatprep.subr.bf16.mxu1 %v9603_v56  ;;  %v9684_v26 = vld [vmem:[#allocation2 + $0x12d4] ss:$8 sps:$4 sm:$0xff]   ;;  %v9679_v56 = vld [vmem:[#allocation2 + $0x2d0] ss:$8 sps:$4 sm:$0xff]  }
  0xcb   :  { %7439 = vmatprep.subr.bf16.mxu0 %v9606_v27  ;;  %v9682_v27 = vld [vmem:[#allocation2 + $0x12d0] ss:$8 sps:$4 sm:$0xff]  }
  0xcc   :  { %6775 = vmatmul.mubr.bf16.vlgmr.msra.gmra.mrb[0].mxu1 %v1170_v30  ;;  %v9685_v30 = vld [vmem:[#allocation2 + $0x2e0] ss:$8 sps:$4 sm:$0xff]  }
  0xcd   :  { %7431 = vmatmul.mubr.bf16.vlgmr.msra.gmra.mrb[0].mxu0 %v1366_v31  ;;  %6784 = vmatpush1.bf16.msra.mxu1 %v9601_v32  ;;  %v9688_v31 = vld [vmem:[#allocation2 + $0x12e0] ss:$8 sps:$4 sm:$0xff]   ;;  %v9693_v32 = vld [vmem:[#allocation2 + $0x2f4] ss:$8 sps:$4 sm:$0xff]  }
  0xce   :  { %7440 = vmatpush1.bf16.msra.mxu0 %v9604_v33  ;;  %6785 = vmatprep.subr.bf16.mxu1 %v9609_v34  ;;  %v9696_v33 = vld [vmem:[#allocation2 + $0x12f4] ss:$8 sps:$4 sm:$0xff]   ;;  %v9691_v34 = vld [vmem:[#allocation2 + $0x2f0] ss:$8 sps:$4 sm:$0xff]  }
  0xcf   :  { %7441 = vmatprep.subr.bf16.mxu0 %v9612_v35  ;;  %6815 = vmatprep.mubr.bf16.mxu1 %v11236_v36  ;;  %v9694_v35 = vld [vmem:[#allocation2 + $0x12f0] ss:$8 sps:$4 sm:$0xff]  }
  0xd0   :  { %7471 = vmatprep.mubr.bf16.mxu0 %v11239_v37 }
  0xd1   :  { %6786 = vmatpush1.bf16.msra.mxu1 %v9607_v16  ;;  %v9699_v16 = vld [vmem:[#allocation2 + $0x304] ss:$8 sps:$4 sm:$0xff]  }
  0xd2   :  { %7442 = vmatpush1.bf16.msra.mxu0 %v9610_v17  ;;  %6787 = vmatprep.subr.bf16.mxu1 %v9615_v38  ;;  %v9702_v17 = vld [vmem:[#allocation2 + $0x1304] ss:$8 sps:$4 sm:$0xff]   ;;  %v11245_v38 = vrot.slane %v11222_v24, %v11191_v49  ;;  %v9703_v24 = vld [vmem:[#allocation2 + $0x310] ss:$8 sps:$4 sm:$0xff]  }
  0xd3   :  { %7443 = vmatprep.subr.bf16.mxu0 %v9618_v39  ;;  %v11249_v39 = vrot.slane %v11225_v25, %v11191_v49  ;;  %v9706_v25 = vld [vmem:[#allocation2 + $0x1310] ss:$8 sps:$4 sm:$0xff]  }
  0xd5   :  { %6788 = vmatpush1.bf16.msra.mxu1 %v9613_v40  ;;  %v9697_v40 = vld [vmem:[#allocation2 + $0x300] ss:$8 sps:$4 sm:$0xff]  }
  0xd6   :  { %7444 = vmatpush1.bf16.msra.mxu0 %v9616_v41  ;;  %6789 = vmatprep.subr.bf16.mxu1 %v9621_v43  ;;  %v9700_v41 = vld [vmem:[#allocation2 + $0x1300] ss:$8 sps:$4 sm:$0xff]   ;;  %v9705_v43 = vld [vmem:[#allocation2 + $0x314] ss:$8 sps:$4 sm:$0xff]  }
  0xd7   :  { %7445 = vmatprep.subr.bf16.mxu0 %v9624_v44  ;;  %v9708_v44 = vld [vmem:[#allocation2 + $0x1314] ss:$8 sps:$4 sm:$0xff]  }
  0xd9   :  { %6790 = vmatpush1.bf16.msra.mxu1 %v9619_v45  ;;  %v1173_v45 = vcombine.high %v11236_v36, %v11236_v36  ;;  %v9709_v36 = vld [vmem:[#allocation2 + $0x320] ss:$8 sps:$4 sm:$0xff]  }
  0xda   :  { %7446 = vmatpush1.bf16.msra.mxu0 %v9622_v46  ;;  %6791 = vmatprep.subr.bf16.mxu1 %v9627_v47  ;;  %v1369_v46 = vcombine.high %v11239_v37, %v11239_v37  ;;  %v9711_v47 = vld [vmem:[#allocation2 + $0x324] ss:$8 sps:$4 sm:$0xff]   ;;  %v9717_v37 = vld [vmem:[#allocation2 + $0x334] ss:$8 sps:$4 sm:$0xff]  }
  0xdb   :  { %7447 = vmatprep.subr.bf16.mxu0 %v9630_v48  ;;  %v9714_v48 = vld [vmem:[#allocation2 + $0x1324] ss:$8 sps:$4 sm:$0xff]  }
  0xdd   :  { %6792 = vmatpush1.bf16.msra.mxu1 %v9625_v50  ;;  %v9712_v50 = vld [vmem:[#allocation2 + $0x1320] ss:$8 sps:$4 sm:$0xff]  }
  0xde   :  { %7448 = vmatpush1.bf16.msra.mxu0 %v9628_v51  ;;  %6793 = vmatprep.subr.bf16.mxu1 %v9633_v53  ;;  %v9720_v51 = vld [vmem:[#allocation2 + $0x1334] ss:$8 sps:$4 sm:$0xff]   ;;  %v9715_v53 = vld [vmem:[#allocation2 + $0x330] ss:$8 sps:$4 sm:$0xff]  }
  0xdf   :  { %7449 = vmatprep.subr.bf16.mxu0 %v9636_v54  ;;  %v9718_v54 = vld [vmem:[#allocation2 + $0x1330] ss:$8 sps:$4 sm:$0xff]  }
  0xe1   :  { %6794 = vmatpush1.bf16.msra.mxu1 %v9631_v55  ;;  %v9723_v55 = vld [vmem:[#allocation2 + $0x344] ss:$8 sps:$4 sm:$0xff]  }
  0xe2   :  { %7450 = vmatpush1.bf16.msra.mxu0 %v9634_v57  ;;  %6795 = vmatprep.subr.bf16.mxu1 %v9639_v58  ;;  %v9726_v57 = vld [vmem:[#allocation2 + $0x1344] ss:$8 sps:$4 sm:$0xff]   ;;  %v9721_v58 = vld [vmem:[#allocation2 + $0x340] ss:$8 sps:$4 sm:$0xff]  }
  0xe3   :  { %7451 = vmatprep.subr.bf16.mxu0 %v9642_v59  ;;  %v9724_v59 = vld [vmem:[#allocation2 + $0x1340] ss:$8 sps:$4 sm:$0xff]  }
  0xe5   :  { %6796 = vmatpush1.bf16.msra.mxu1 %v9637_v60  ;;  %v9729_v60 = vld [vmem:[#allocation2 + $0x354] ss:$8 sps:$4 sm:$0xff]  }
  0xe6   :  { %7452 = vmatpush1.bf16.msra.mxu0 %v9640_v61  ;;  %6797 = vmatprep.subr.bf16.mxu1 %v9645_v62  ;;  %v9732_v61 = vld [vmem:[#allocation2 + $0x1354] ss:$8 sps:$4 sm:$0xff]   ;;  %v9727_v62 = vld [vmem:[#allocation2 + $0x350] ss:$8 sps:$4 sm:$0xff]  }
  0xe7   :  { %7453 = vmatprep.subr.bf16.mxu0 %v9648_v63  ;;  %v9730_v63 = vld [vmem:[#allocation2 + $0x1350] ss:$8 sps:$4 sm:$0xff]  }
  0xe9   :  { %6798 = vmatpush1.bf16.msra.mxu1 %v9643_v0  ;;  %v9735_v0 = vld [vmem:[#allocation2 + $0x364] ss:$8 sps:$4 sm:$0xff]  }
  0xea   :  { %7454 = vmatpush1.bf16.msra.mxu0 %v9646_v1  ;;  %6799 = vmatprep.subr.bf16.mxu1 %v9651_v2  ;;  %v9738_v1 = vld [vmem:[#allocation2 + $0x1364] ss:$8 sps:$4 sm:$0xff]   ;;  %v9733_v2 = vld [vmem:[#allocation2 + $0x360] ss:$8 sps:$4 sm:$0xff]  }
  0xeb   :  { %7455 = vmatprep.subr.bf16.mxu0 %v9654_v3  ;;  %v9736_v3 = vld [vmem:[#allocation2 + $0x1360] ss:$8 sps:$4 sm:$0xff]  }
  0xed   :  { %6800 = vmatpush1.bf16.msra.mxu1 %v9649_v4  ;;  %v9741_v4 = vld [vmem:[#allocation2 + $0x374] ss:$8 sps:$4 sm:$0xff]  }
  0xee   :  { %7456 = vmatpush1.bf16.msra.mxu0 %v9652_v5  ;;  %6801 = vmatprep.subr.bf16.mxu1 %v9657_v6  ;;  %v9744_v5 = vld [vmem:[#allocation2 + $0x1374] ss:$8 sps:$4 sm:$0xff]   ;;  %v9739_v6 = vld [vmem:[#allocation2 + $0x370] ss:$8 sps:$4 sm:$0xff]  }
  0xef   :  { %7457 = vmatprep.subr.bf16.mxu0 %v9660_v7  ;;  %v9742_v7 = vld [vmem:[#allocation2 + $0x1370] ss:$8 sps:$4 sm:$0xff]  }
  0xf1   :  { %6802 = vmatpush1.bf16.msra.mxu1 %v9655_v8  ;;  %v9747_v8 = vld [vmem:[#allocation2 + $0x384] ss:$8 sps:$4 sm:$0xff]  }
  0xf2   :  { %7458 = vmatpush1.bf16.msra.mxu0 %v9658_v9  ;;  %6803 = vmatprep.subr.bf16.mxu1 %v9663_v10  ;;  %v9750_v9 = vld [vmem:[#allocation2 + $0x1384] ss:$8 sps:$4 sm:$0xff]   ;;  %v9745_v10 = vld [vmem:[#allocation2 + $0x380] ss:$8 sps:$4 sm:$0xff]  }
  0xf3   :  { %7459 = vmatprep.subr.bf16.mxu0 %v9666_v11  ;;  %v9748_v11 = vld [vmem:[#allocation2 + $0x1380] ss:$8 sps:$4 sm:$0xff]  }
  0xf5   :  { %6804 = vmatpush1.bf16.msra.mxu1 %v9661_v12  ;;  %v9753_v12 = vld [vmem:[#allocation2 + $0x394] ss:$8 sps:$4 sm:$0xff]  }
  0xf6   :  { %7460 = vmatpush1.bf16.msra.mxu0 %v9664_v13  ;;  %6805 = vmatprep.subr.bf16.mxu1 %v9669_v14  ;;  %v9756_v13 = vld [vmem:[#allocation2 + $0x1394] ss:$8 sps:$4 sm:$0xff]   ;;  %v9751_v14 = vld [vmem:[#allocation2 + $0x390] ss:$8 sps:$4 sm:$0xff]  }
  0xf7   :  { %7461 = vmatprep.subr.bf16.mxu0 %v9672_v15  ;;  %v9754_v15 = vld [vmem:[#allocation2 + $0x1390] ss:$8 sps:$4 sm:$0xff]  }
  0xf9   :  { %6806 = vmatpush1.bf16.msra.mxu1 %v9667_v18  ;;  %v9759_v18 = vld [vmem:[#allocation2 + $0x3a4] ss:$8 sps:$4 sm:$0xff]  }
  0xfa   :  { %7462 = vmatpush1.bf16.msra.mxu0 %v9670_v19  ;;  %6807 = vmatprep.subr.bf16.mxu1 %v9675_v20  ;;  %v9762_v19 = vld [vmem:[#allocation2 + $0x13a4] ss:$8 sps:$4 sm:$0xff]   ;;  %v9757_v20 = vld [vmem:[#allocation2 + $0x3a0] ss:$8 sps:$4 sm:$0xff]  }
  0xfb   :  { %7463 = vmatprep.subr.bf16.mxu0 %v9678_v21  ;;  %v9760_v21 = vld [vmem:[#allocation2 + $0x13a0] ss:$8 sps:$4 sm:$0xff]  }
  0xfd   :  { %6808 = vmatpush1.bf16.msra.mxu1 %v9673_v22  ;;  %v9765_v22 = vld [vmem:[#allocation2 + $0x3b4] ss:$8 sps:$4 sm:$0xff]  }
  0xfe   :  { %7464 = vmatpush1.bf16.msra.mxu0 %v9676_v23  ;;  %6809 = vmatprep.subr.bf16.mxu1 %v9681_v52  ;;  %v9768_v23 = vld [vmem:[#allocation2 + $0x13b4] ss:$8 sps:$4 sm:$0xff]   ;;  %v9763_v52 = vld [vmem:[#allocation2 + $0x3b0] ss:$8 sps:$4 sm:$0xff]  }
  0xff   :  { %7465 = vmatprep.subr.bf16.mxu0 %v9684_v26  ;;  %v9766_v26 = vld [vmem:[#allocation2 + $0x13b0] ss:$8 sps:$4 sm:$0xff]  }
 0x101   :  { %6810 = vmatpush1.bf16.msra.mxu1 %v9679_v56  ;;  %v9771_v56 = vld [vmem:[#allocation2 + $0x3c4] ss:$8 sps:$4 sm:$0xff]  }
 0x102   :  { %7466 = vmatpush1.bf16.msra.mxu0 %v9682_v27  ;;  %6811 = vmatprep.subr.bf16.mxu1 %v9687_v28  ;;  %v9774_v27 = vld [vmem:[#allocation2 + $0x13c4] ss:$8 sps:$4 sm:$0xff]   ;;  %v9769_v28 = vld [vmem:[#allocation2 + $0x3c0] ss:$8 sps:$4 sm:$0xff]  }
 0x103   :  { %7467 = vmatprep.subr.bf16.mxu0 %v9690_v29  ;;  %v9772_v29 = vld [vmem:[#allocation2 + $0x13c0] ss:$8 sps:$4 sm:$0xff]  }
 0x105   :  { %6812 = vmatpush1.bf16.msra.mxu1 %v9685_v30  ;;  %v9777_v30 = vld [vmem:[#allocation2 + $0x3d4] ss:$8 sps:$4 sm:$0xff]  }
 0x106   :  { %7468 = vmatpush1.bf16.msra.mxu0 %v9688_v31  ;;  %6813 = vmatprep.subr.bf16.mxu1 %v9693_v32  ;;  %v9780_v31 = vld [vmem:[#allocation2 + $0x13d4] ss:$8 sps:$4 sm:$0xff]   ;;  %v9775_v32 = vld [vmem:[#allocation2 + $0x3d0] ss:$8 sps:$4 sm:$0xff]  }
 0x107   :  { %7469 = vmatprep.subr.bf16.mxu0 %v9696_v33  ;;  %v9778_v33 = vld [vmem:[#allocation2 + $0x13d0] ss:$8 sps:$4 sm:$0xff]  }
 0x109   :  { %6814 = vmatpush1.bf16.msra.mxu1 %v9691_v34  ;;  %v9783_v34 = vld [vmem:[#allocation2 + $0x3e4] ss:$8 sps:$4 sm:$0xff]  }
 0x10a   :  { %7470 = vmatpush1.bf16.msra.mxu0 %v9694_v35  ;;  %6824 = vmatprep.subr.bf16.mxu1 %v9699_v16  ;;  %v9786_v35 = vld [vmem:[#allocation2 + $0x13e4] ss:$8 sps:$4 sm:$0xff]   ;;  %v9781_v16 = vld [vmem:[#allocation2 + $0x3e0] ss:$8 sps:$4 sm:$0xff]  }
 0x10b   :  { %7480 = vmatprep.subr.bf16.mxu0 %v9702_v17  ;;  %v9784_v17 = vld [vmem:[#allocation2 + $0x13e0] ss:$8 sps:$4 sm:$0xff]  }
 0x10c   :  { %6816 = vmatmul.mubr.bf16.vlgmr.msra.gmra.mrb[0].mxu1 %v11245_v38 }
 0x10d   :  { %7472 = vmatmul.mubr.bf16.vlgmr.msra.gmra.mrb[0].mxu0 %v11249_v39  ;;  %6825 = vmatpush1.bf16.msra.mxu1 %v9697_v40  ;;  %v11260_v40 = vld.sshfl [vmem:[%s11533_s0 + $0x8] sm:$0xff pattern:$0x75316420] }
 0x10e   :  { %7481 = vmatpush1.bf16.msra.mxu0 %v9700_v41  ;;  %6826 = vmatprep.subr.bf16.mxu1 %v9705_v43  ;;  %v11265_v41 = vld.sshfl [vmem:[%s11533_s0 + $0x28] sm:$0xff pattern:$0x75316420]  ;;  %v9789_v43 = vld [vmem:[#allocation2 + $0x3f4] ss:$8 sps:$4 sm:$0xff]  }
 0x10f   :  { %7482 = vmatprep.subr.bf16.mxu0 %v9708_v44  ;;  %6856 = vmatprep.mubr.bf16.mxu1 %v1173_v45  ;;  %v9792_v44 = vld [vmem:[#allocation2 + $0x13f4] ss:$8 sps:$4 sm:$0xff]   ;;  %v9787_v45 = vld [vmem:[#allocation2 + $0x3f0] ss:$8 sps:$4 sm:$0xff]  }
 0x110   :  { %7512 = vmatprep.mubr.bf16.mxu0 %v1369_v46  ;;  %v9790_v46 = vld [vmem:[#allocation2 + $0x13f0] ss:$8 sps:$4 sm:$0xff]  }
 0x111   :  { %6827 = vmatpush1.bf16.msra.mxu1 %v9703_v24  ;;  %v9795_v24 = vld [vmem:[#allocation2 + $0x404] ss:$8 sps:$4 sm:$0xff]  }
 0x112   :  { %7483 = vmatpush1.bf16.msra.mxu0 %v9706_v25  ;;  %6828 = vmatprep.subr.bf16.mxu1 %v9711_v47  ;;  %v9798_v25 = vld [vmem:[#allocation2 + $0x1404] ss:$8 sps:$4 sm:$0xff]   ;;  %v1189_v47 = vcombine.high %v11260_v40, %v11260_v40 }
 0x113   :  { %7484 = vmatprep.subr.bf16.mxu0 %v9714_v48  ;;  %v1385_v48 = vcombine.high %v11265_v41, %v11265_v41 }
 0x115   :  { %6829 = vmatpush1.bf16.msra.mxu1 %v9709_v36  ;;  %v9793_v36 = vld [vmem:[#allocation2 + $0x400] ss:$8 sps:$4 sm:$0xff]  }
 0x116   :  { %7485 = vmatpush1.bf16.msra.mxu0 %v9712_v50  ;;  %6830 = vmatprep.subr.bf16.mxu1 %v9717_v37  ;;  %v9796_v50 = vld [vmem:[#allocation2 + $0x1400] ss:$8 sps:$4 sm:$0xff]   ;;  %v1171_v37 = vcombine.high %v11245_v38, %v11245_v38  ;;  %v9807_v38 = vld [vmem:[#allocation2 + $0x424] ss:$8 sps:$4 sm:$0xff]  }
 0x117   :  { %7486 = vmatprep.subr.bf16.mxu0 %v9720_v51  ;;  %v1367_v51 = vcombine.high %v11249_v39, %v11249_v39  ;;  %v9810_v39 = vld [vmem:[#allocation2 + $0x1424] ss:$8 sps:$4 sm:$0xff]  }
 0x119   :  { %6831 = vmatpush1.bf16.msra.mxu1 %v9715_v53  ;;  %v9801_v53 = vld [vmem:[#allocation2 + $0x414] ss:$8 sps:$4 sm:$0xff]  }
 0x11a   :  { %7487 = vmatpush1.bf16.msra.mxu0 %v9718_v54  ;;  %6832 = vmatprep.subr.bf16.mxu1 %v9723_v55  ;;  %v9804_v54 = vld [vmem:[#allocation2 + $0x1414] ss:$8 sps:$4 sm:$0xff]   ;;  %v11276_v55 = vrot.slane %v1189_v47, %v11191_v49  ;;  %v9879_v47 = vld [vmem:[#allocation2 + $0x4e4] ss:$8 sps:$4 sm:$0xff]  }
 0x11b   :  { %7488 = vmatprep.subr.bf16.mxu0 %v9726_v57  ;;  %v11279_v57 = vrot.slane %v1385_v48, %v11191_v49  ;;  %v9882_v48 = vld [vmem:[#allocation2 + $0x14e4] ss:$8 sps:$4 sm:$0xff]  }
 0x11d   :  { %6833 = vmatpush1.bf16.msra.mxu1 %v9721_v58  ;;  %v9799_v58 = vld [vmem:[#allocation2 + $0x410] ss:$8 sps:$4 sm:$0xff]  }
 0x11e   :  { %7489 = vmatpush1.bf16.msra.mxu0 %v9724_v59  ;;  %6834 = vmatprep.subr.bf16.mxu1 %v9729_v60  ;;  %v9802_v59 = vld [vmem:[#allocation2 + $0x1410] ss:$8 sps:$4 sm:$0xff]   ;;  %v9805_v60 = vld [vmem:[#allocation2 + $0x420] ss:$8 sps:$4 sm:$0xff]  }
 0x11f   :  { %7490 = vmatprep.subr.bf16.mxu0 %v9732_v61  ;;  %v9808_v61 = vld [vmem:[#allocation2 + $0x1420] ss:$8 sps:$4 sm:$0xff]  }
 0x121   :  { %6835 = vmatpush1.bf16.msra.mxu1 %v9727_v62  ;;  %v9813_v62 = vld [vmem:[#allocation2 + $0x434] ss:$8 sps:$4 sm:$0xff]  }
 0x122   :  { %7491 = vmatpush1.bf16.msra.mxu0 %v9730_v63  ;;  %6836 = vmatprep.subr.bf16.mxu1 %v9735_v0  ;;  %v9816_v63 = vld [vmem:[#allocation2 + $0x1434] ss:$8 sps:$4 sm:$0xff]   ;;  %v9811_v0 = vld [vmem:[#allocation2 + $0x430] ss:$8 sps:$4 sm:$0xff]  }
 0x123   :  { %7492 = vmatprep.subr.bf16.mxu0 %v9738_v1  ;;  %v9814_v1 = vld [vmem:[#allocation2 + $0x1430] ss:$8 sps:$4 sm:$0xff]  }
 0x125   :  { %6837 = vmatpush1.bf16.msra.mxu1 %v9733_v2  ;;  %v9819_v2 = vld [vmem:[#allocation2 + $0x444] ss:$8 sps:$4 sm:$0xff]  }
 0x126   :  { %7493 = vmatpush1.bf16.msra.mxu0 %v9736_v3  ;;  %6838 = vmatprep.subr.bf16.mxu1 %v9741_v4  ;;  %v9822_v3 = vld [vmem:[#allocation2 + $0x1444] ss:$8 sps:$4 sm:$0xff]   ;;  %v9817_v4 = vld [vmem:[#allocation2 + $0x440] ss:$8 sps:$4 sm:$0xff]  }
 0x127   :  { %7494 = vmatprep.subr.bf16.mxu0 %v9744_v5  ;;  %v9820_v5 = vld [vmem:[#allocation2 + $0x1440] ss:$8 sps:$4 sm:$0xff]  }
 0x129   :  { %6839 = vmatpush1.bf16.msra.mxu1 %v9739_v6  ;;  %v9825_v6 = vld [vmem:[#allocation2 + $0x454] ss:$8 sps:$4 sm:$0xff]  }
 0x12a   :  { %7495 = vmatpush1.bf16.msra.mxu0 %v9742_v7  ;;  %6840 = vmatprep.subr.bf16.mxu1 %v9747_v8  ;;  %v9828_v7 = vld [vmem:[#allocation2 + $0x1454] ss:$8 sps:$4 sm:$0xff]   ;;  %v9823_v8 = vld [vmem:[#allocation2 + $0x450] ss:$8 sps:$4 sm:$0xff]  }
 0x12b   :  { %7496 = vmatprep.subr.bf16.mxu0 %v9750_v9  ;;  %v9826_v9 = vld [vmem:[#allocation2 + $0x1450] ss:$8 sps:$4 sm:$0xff]  }
 0x12d   :  { %6841 = vmatpush1.bf16.msra.mxu1 %v9745_v10  ;;  %v9831_v10 = vld [vmem:[#allocation2 + $0x464] ss:$8 sps:$4 sm:$0xff]  }
 0x12e   :  { %7497 = vmatpush1.bf16.msra.mxu0 %v9748_v11  ;;  %6842 = vmatprep.subr.bf16.mxu1 %v9753_v12  ;;  %v9834_v11 = vld [vmem:[#allocation2 + $0x1464] ss:$8 sps:$4 sm:$0xff]   ;;  %v9829_v12 = vld [vmem:[#allocation2 + $0x460] ss:$8 sps:$4 sm:$0xff]  }
 0x12f   :  { %7498 = vmatprep.subr.bf16.mxu0 %v9756_v13  ;;  %v9832_v13 = vld [vmem:[#allocation2 + $0x1460] ss:$8 sps:$4 sm:$0xff]  }
 0x131   :  { %6843 = vmatpush1.bf16.msra.mxu1 %v9751_v14  ;;  %v9837_v14 = vld [vmem:[#allocation2 + $0x474] ss:$8 sps:$4 sm:$0xff]  }
 0x132   :  { %7499 = vmatpush1.bf16.msra.mxu0 %v9754_v15  ;;  %6844 = vmatprep.subr.bf16.mxu1 %v9759_v18  ;;  %v9840_v15 = vld [vmem:[#allocation2 + $0x1474] ss:$8 sps:$4 sm:$0xff]   ;;  %v9835_v18 = vld [vmem:[#allocation2 + $0x470] ss:$8 sps:$4 sm:$0xff]  }
 0x133   :  { %7500 = vmatprep.subr.bf16.mxu0 %v9762_v19  ;;  %v9838_v19 = vld [vmem:[#allocation2 + $0x1470] ss:$8 sps:$4 sm:$0xff]  }
 0x135   :  { %6845 = vmatpush1.bf16.msra.mxu1 %v9757_v20  ;;  %v9843_v20 = vld [vmem:[#allocation2 + $0x484] ss:$8 sps:$4 sm:$0xff]  }
 0x136   :  { %7501 = vmatpush1.bf16.msra.mxu0 %v9760_v21  ;;  %6846 = vmatprep.subr.bf16.mxu1 %v9765_v22  ;;  %v9846_v21 = vld [vmem:[#allocation2 + $0x1484] ss:$8 sps:$4 sm:$0xff]   ;;  %v9841_v22 = vld [vmem:[#allocation2 + $0x480] ss:$8 sps:$4 sm:$0xff]  }
 0x137   :  { %7502 = vmatprep.subr.bf16.mxu0 %v9768_v23  ;;  %v9844_v23 = vld [vmem:[#allocation2 + $0x1480] ss:$8 sps:$4 sm:$0xff]  }
 0x139   :  { %6847 = vmatpush1.bf16.msra.mxu1 %v9763_v52  ;;  %v9849_v52 = vld [vmem:[#allocation2 + $0x494] ss:$8 sps:$4 sm:$0xff]  }
 0x13a   :  { %7503 = vmatpush1.bf16.msra.mxu0 %v9766_v26  ;;  %6848 = vmatprep.subr.bf16.mxu1 %v9771_v56  ;;  %v9852_v26 = vld [vmem:[#allocation2 + $0x1494] ss:$8 sps:$4 sm:$0xff]   ;;  %v9847_v56 = vld [vmem:[#allocation2 + $0x490] ss:$8 sps:$4 sm:$0xff]  }
 0x13b   :  { %7504 = vmatprep.subr.bf16.mxu0 %v9774_v27  ;;  %v9850_v27 = vld [vmem:[#allocation2 + $0x1490] ss:$8 sps:$4 sm:$0xff]  }
 0x13d   :  { %6849 = vmatpush1.bf16.msra.mxu1 %v9769_v28  ;;  %v9855_v28 = vld [vmem:[#allocation2 + $0x4a4] ss:$8 sps:$4 sm:$0xff]  }
 0x13e   :  { %7505 = vmatpush1.bf16.msra.mxu0 %v9772_v29  ;;  %6850 = vmatprep.subr.bf16.mxu1 %v9777_v30  ;;  %v9858_v29 = vld [vmem:[#allocation2 + $0x14a4] ss:$8 sps:$4 sm:$0xff]   ;;  %v9853_v30 = vld [vmem:[#allocation2 + $0x4a0] ss:$8 sps:$4 sm:$0xff]  }
 0x13f   :  { %7506 = vmatprep.subr.bf16.mxu0 %v9780_v31  ;;  %v9856_v31 = vld [vmem:[#allocation2 + $0x14a0] ss:$8 sps:$4 sm:$0xff]  }
 0x141   :  { %6851 = vmatpush1.bf16.msra.mxu1 %v9775_v32  ;;  %v9861_v32 = vld [vmem:[#allocation2 + $0x4b4] ss:$8 sps:$4 sm:$0xff]  }
 0x142   :  { %7507 = vmatpush1.bf16.msra.mxu0 %v9778_v33  ;;  %6852 = vmatprep.subr.bf16.mxu1 %v9783_v34  ;;  %v9864_v33 = vld [vmem:[#allocation2 + $0x14b4] ss:$8 sps:$4 sm:$0xff]   ;;  %v9859_v34 = vld [vmem:[#allocation2 + $0x4b0] ss:$8 sps:$4 sm:$0xff]  }
 0x143   :  { %7508 = vmatprep.subr.bf16.mxu0 %v9786_v35  ;;  %v9862_v35 = vld [vmem:[#allocation2 + $0x14b0] ss:$8 sps:$4 sm:$0xff]  }
 0x145   :  { %6853 = vmatpush1.bf16.msra.mxu1 %v9781_v16  ;;  %v9867_v16 = vld [vmem:[#allocation2 + $0x4c4] ss:$8 sps:$4 sm:$0xff]  }
 0x146   :  { %7509 = vmatpush1.bf16.msra.mxu0 %v9784_v17  ;;  %6854 = vmatprep.subr.bf16.mxu1 %v9789_v43  ;;  %v9870_v17 = vld [vmem:[#allocation2 + $0x14c4] ss:$8 sps:$4 sm:$0xff]   ;;  %v9865_v43 = vld [vmem:[#allocation2 + $0x4c0] ss:$8 sps:$4 sm:$0xff]  }
 0x147   :  { %7510 = vmatprep.subr.bf16.mxu0 %v9792_v44  ;;  %v9868_v44 = vld [vmem:[#allocation2 + $0x14c0] ss:$8 sps:$4 sm:$0xff]  }
 0x149   :  { %6855 = vmatpush1.bf16.msra.mxu1 %v9787_v45  ;;  %v9873_v45 = vld [vmem:[#allocation2 + $0x4d4] ss:$8 sps:$4 sm:$0xff]  }
 0x14a   :  { %7511 = vmatpush1.bf16.msra.mxu0 %v9790_v46  ;;  %6865 = vmatprep.subr.bf16.mxu1 %v9795_v24  ;;  %v9876_v46 = vld [vmem:[#allocation2 + $0x14d4] ss:$8 sps:$4 sm:$0xff]   ;;  %v9871_v24 = vld [vmem:[#allocation2 + $0x4d0] ss:$8 sps:$4 sm:$0xff]  }
 0x14b   :  { %7521 = vmatprep.subr.bf16.mxu0 %v9798_v25  ;;  %v9874_v25 = vld [vmem:[#allocation2 + $0x14d0] ss:$8 sps:$4 sm:$0xff]  }
 0x14c   :  { %6857 = vmatmul.mubr.bf16.vlgmr.msra.gmra.mrb[0].mxu1 %v1171_v37  ;;  %v9885_v37 = vld [vmem:[#allocation2 + $0x4f4] ss:$8 sps:$4 sm:$0xff]  }
 0x14d   :  { %7513 = vmatmul.mubr.bf16.vlgmr.msra.gmra.mrb[0].mxu0 %v1367_v51  ;;  %6866 = vmatpush1.bf16.msra.mxu1 %v9793_v36  ;;  %v9877_v36 = vld [vmem:[#allocation2 + $0x4e0] ss:$8 sps:$4 sm:$0xff]   ;;  %v9888_v51 = vld [vmem:[#allocation2 + $0x14f4] ss:$8 sps:$4 sm:$0xff]  }
 0x14e   :  { %7522 = vmatpush1.bf16.msra.mxu0 %v9796_v50  ;;  %6867 = vmatprep.subr.bf16.mxu1 %v9801_v53  ;;  %v9880_v50 = vld [vmem:[#allocation2 + $0x14e0] ss:$8 sps:$4 sm:$0xff]   ;;  %v9883_v53 = vld [vmem:[#allocation2 + $0x4f0] ss:$8 sps:$4 sm:$0xff]  }
 0x14f   :  { %7523 = vmatprep.subr.bf16.mxu0 %v9804_v54  ;;  %6897 = vmatprep.mubr.bf16.mxu1 %v11276_v55  ;;  %v9886_v54 = vld [vmem:[#allocation2 + $0x14f0] ss:$8 sps:$4 sm:$0xff]  }
 0x150   :  { %7553 = vmatprep.mubr.bf16.mxu0 %v11279_v57 }
 0x151   :  { %6868 = vmatpush1.bf16.msra.mxu1 %v9799_v58  ;;  %v9891_v58 = vld [vmem:[#allocation2 + $0x504] ss:$8 sps:$4 sm:$0xff]  }
 0x152   :  { %7524 = vmatpush1.bf16.msra.mxu0 %v9802_v59  ;;  %6869 = vmatprep.subr.bf16.mxu1 %v9807_v38  ;;  %v9894_v59 = vld [vmem:[#allocation2 + $0x1504] ss:$8 sps:$4 sm:$0xff]   ;;  %v11285_v38 = vrot.slane %v11260_v40, %v11191_v49  ;;  %v9895_v40 = vld [vmem:[#allocation2 + $0x510] ss:$8 sps:$4 sm:$0xff]  }
 0x153   :  { %7525 = vmatprep.subr.bf16.mxu0 %v9810_v39  ;;  %v11289_v39 = vrot.slane %v11265_v41, %v11191_v49  ;;  %v9898_v41 = vld [vmem:[#allocation2 + $0x1510] ss:$8 sps:$4 sm:$0xff]  }
 0x155   :  { %6870 = vmatpush1.bf16.msra.mxu1 %v9805_v60  ;;  %v9889_v60 = vld [vmem:[#allocation2 + $0x500] ss:$8 sps:$4 sm:$0xff]  }
 0x156   :  { %7526 = vmatpush1.bf16.msra.mxu0 %v9808_v61  ;;  %6871 = vmatprep.subr.bf16.mxu1 %v9813_v62  ;;  %v9892_v61 = vld [vmem:[#allocation2 + $0x1500] ss:$8 sps:$4 sm:$0xff]   ;;  %v9897_v62 = vld [vmem:[#allocation2 + $0x514] ss:$8 sps:$4 sm:$0xff]  }
 0x157   :  { %7527 = vmatprep.subr.bf16.mxu0 %v9816_v63  ;;  %v9900_v63 = vld [vmem:[#allocation2 + $0x1514] ss:$8 sps:$4 sm:$0xff]  }
 0x159   :  { %6872 = vmatpush1.bf16.msra.mxu1 %v9811_v0  ;;  %v1221_v0 = vcombine.high %v11276_v55, %v11276_v55  ;;  %v9901_v55 = vld [vmem:[#allocation2 + $0x520] ss:$8 sps:$4 sm:$0xff]  }
 0x15a   :  { %7528 = vmatpush1.bf16.msra.mxu0 %v9814_v1  ;;  %6873 = vmatprep.subr.bf16.mxu1 %v9819_v2  ;;  %v1417_v1 = vcombine.high %v11279_v57, %v11279_v57  ;;  %v9903_v2 = vld [vmem:[#allocation2 + $0x524] ss:$8 sps:$4 sm:$0xff]   ;;  %v9909_v57 = vld [vmem:[#allocation2 + $0x534] ss:$8 sps:$4 sm:$0xff]  }
 0x15b   :  { %7529 = vmatprep.subr.bf16.mxu0 %v9822_v3  ;;  %v9906_v3 = vld [vmem:[#allocation2 + $0x1524] ss:$8 sps:$4 sm:$0xff]  }
 0x15d   :  { %6874 = vmatpush1.bf16.msra.mxu1 %v9817_v4  ;;  %v9904_v4 = vld [vmem:[#allocation2 + $0x1520] ss:$8 sps:$4 sm:$0xff]  }
 0x15e   :  { %7530 = vmatpush1.bf16.msra.mxu0 %v9820_v5  ;;  %6875 = vmatprep.subr.bf16.mxu1 %v9825_v6  ;;  %v9912_v5 = vld [vmem:[#allocation2 + $0x1534] ss:$8 sps:$4 sm:$0xff]   ;;  %v9907_v6 = vld [vmem:[#allocation2 + $0x530] ss:$8 sps:$4 sm:$0xff]  }
 0x15f   :  { %7531 = vmatprep.subr.bf16.mxu0 %v9828_v7  ;;  %v9910_v7 = vld [vmem:[#allocation2 + $0x1530] ss:$8 sps:$4 sm:$0xff]  }
 0x161   :  { %6876 = vmatpush1.bf16.msra.mxu1 %v9823_v8  ;;  %v9915_v8 = vld [vmem:[#allocation2 + $0x544] ss:$8 sps:$4 sm:$0xff]  }
 0x162   :  { %7532 = vmatpush1.bf16.msra.mxu0 %v9826_v9  ;;  %6877 = vmatprep.subr.bf16.mxu1 %v9831_v10  ;;  %v9918_v9 = vld [vmem:[#allocation2 + $0x1544] ss:$8 sps:$4 sm:$0xff]   ;;  %v9913_v10 = vld [vmem:[#allocation2 + $0x540] ss:$8 sps:$4 sm:$0xff]  }
 0x163   :  { %7533 = vmatprep.subr.bf16.mxu0 %v9834_v11  ;;  %v9916_v11 = vld [vmem:[#allocation2 + $0x1540] ss:$8 sps:$4 sm:$0xff]  }
 0x165   :  { %6878 = vmatpush1.bf16.msra.mxu1 %v9829_v12  ;;  %v9921_v12 = vld [vmem:[#allocation2 + $0x554] ss:$8 sps:$4 sm:$0xff]  }
 0x166   :  { %7534 = vmatpush1.bf16.msra.mxu0 %v9832_v13  ;;  %6879 = vmatprep.subr.bf16.mxu1 %v9837_v14  ;;  %v9924_v13 = vld [vmem:[#allocation2 + $0x1554] ss:$8 sps:$4 sm:$0xff]   ;;  %v9919_v14 = vld [vmem:[#allocation2 + $0x550] ss:$8 sps:$4 sm:$0xff]  }
 0x167   :  { %7535 = vmatprep.subr.bf16.mxu0 %v9840_v15  ;;  %v9922_v15 = vld [vmem:[#allocation2 + $0x1550] ss:$8 sps:$4 sm:$0xff]  }
 0x169   :  { %6880 = vmatpush1.bf16.msra.mxu1 %v9835_v18  ;;  %v9927_v18 = vld [vmem:[#allocation2 + $0x564] ss:$8 sps:$4 sm:$0xff]  }
 0x16a   :  { %7536 = vmatpush1.bf16.msra.mxu0 %v9838_v19  ;;  %6881 = vmatprep.subr.bf16.mxu1 %v9843_v20  ;;  %v9930_v19 = vld [vmem:[#allocation2 + $0x1564] ss:$8 sps:$4 sm:$0xff]   ;;  %v9925_v20 = vld [vmem:[#allocation2 + $0x560] ss:$8 sps:$4 sm:$0xff]  }
 0x16b   :  { %7537 = vmatprep.subr.bf16.mxu0 %v9846_v21  ;;  %v9928_v21 = vld [vmem:[#allocation2 + $0x1560] ss:$8 sps:$4 sm:$0xff]  }
 0x16d   :  { %6882 = vmatpush1.bf16.msra.mxu1 %v9841_v22  ;;  %v9933_v22 = vld [vmem:[#allocation2 + $0x574] ss:$8 sps:$4 sm:$0xff]  }
 0x16e   :  { %7538 = vmatpush1.bf16.msra.mxu0 %v9844_v23  ;;  %6883 = vmatprep.subr.bf16.mxu1 %v9849_v52  ;;  %v9936_v23 = vld [vmem:[#allocation2 + $0x1574] ss:$8 sps:$4 sm:$0xff]   ;;  %v9931_v52 = vld [vmem:[#allocation2 + $0x570] ss:$8 sps:$4 sm:$0xff]  }
 0x16f   :  { %7539 = vmatprep.subr.bf16.mxu0 %v9852_v26  ;;  %v9934_v26 = vld [vmem:[#allocation2 + $0x1570] ss:$8 sps:$4 sm:$0xff]  }
 0x171   :  { %6884 = vmatpush1.bf16.msra.mxu1 %v9847_v56  ;;  %v9939_v56 = vld [vmem:[#allocation2 + $0x584] ss:$8 sps:$4 sm:$0xff]  }
 0x172   :  { %7540 = vmatpush1.bf16.msra.mxu0 %v9850_v27  ;;  %6885 = vmatprep.subr.bf16.mxu1 %v9855_v28  ;;  %v9942_v27 = vld [vmem:[#allocation2 + $0x1584] ss:$8 sps:$4 sm:$0xff]   ;;  %v9937_v28 = vld [vmem:[#allocation2 + $0x580] ss:$8 sps:$4 sm:$0xff]  }
 0x173   :  { %7541 = vmatprep.subr.bf16.mxu0 %v9858_v29  ;;  %v9940_v29 = vld [vmem:[#allocation2 + $0x1580] ss:$8 sps:$4 sm:$0xff]  }
 0x175   :  { %6886 = vmatpush1.bf16.msra.mxu1 %v9853_v30  ;;  %v9945_v30 = vld [vmem:[#allocation2 + $0x594] ss:$8 sps:$4 sm:$0xff]  }
 0x176   :  { %7542 = vmatpush1.bf16.msra.mxu0 %v9856_v31  ;;  %6887 = vmatprep.subr.bf16.mxu1 %v9861_v32  ;;  %v9948_v31 = vld [vmem:[#allocation2 + $0x1594] ss:$8 sps:$4 sm:$0xff]   ;;  %v9943_v32 = vld [vmem:[#allocation2 + $0x590] ss:$8 sps:$4 sm:$0xff]  }
 0x177   :  { %7543 = vmatprep.subr.bf16.mxu0 %v9864_v33  ;;  %v9946_v33 = vld [vmem:[#allocation2 + $0x1590] ss:$8 sps:$4 sm:$0xff]  }
 0x179   :  { %6888 = vmatpush1.bf16.msra.mxu1 %v9859_v34  ;;  %v9951_v34 = vld [vmem:[#allocation2 + $0x5a4] ss:$8 sps:$4 sm:$0xff]  }
 0x17a   :  { %7544 = vmatpush1.bf16.msra.mxu0 %v9862_v35  ;;  %6889 = vmatprep.subr.bf16.mxu1 %v9867_v16  ;;  %v9954_v35 = vld [vmem:[#allocation2 + $0x15a4] ss:$8 sps:$4 sm:$0xff]   ;;  %v9949_v16 = vld [vmem:[#allocation2 + $0x5a0] ss:$8 sps:$4 sm:$0xff]  }
 0x17b   :  { %7545 = vmatprep.subr.bf16.mxu0 %v9870_v17  ;;  %v9952_v17 = vld [vmem:[#allocation2 + $0x15a0] ss:$8 sps:$4 sm:$0xff]  }
 0x17d   :  { %6890 = vmatpush1.bf16.msra.mxu1 %v9865_v43  ;;  %v9957_v43 = vld [vmem:[#allocation2 + $0x5b4] ss:$8 sps:$4 sm:$0xff]  }
 0x17e   :  { %7546 = vmatpush1.bf16.msra.mxu0 %v9868_v44  ;;  %6891 = vmatprep.subr.bf16.mxu1 %v9873_v45  ;;  %v9960_v44 = vld [vmem:[#allocation2 + $0x15b4] ss:$8 sps:$4 sm:$0xff]   ;;  %v9955_v45 = vld [vmem:[#allocation2 + $0x5b0] ss:$8 sps:$4 sm:$0xff]  }
 0x17f   :  { %7547 = vmatprep.subr.bf16.mxu0 %v9876_v46  ;;  %v9958_v46 = vld [vmem:[#allocation2 + $0x15b0] ss:$8 sps:$4 sm:$0xff]  }
 0x181   :  { %6892 = vmatpush1.bf16.msra.mxu1 %v9871_v24  ;;  %v9963_v24 = vld [vmem:[#allocation2 + $0x5c4] ss:$8 sps:$4 sm:$0xff]  }
 0x182   :  { %7548 = vmatpush1.bf16.msra.mxu0 %v9874_v25  ;;  %6893 = vmatprep.subr.bf16.mxu1 %v9879_v47  ;;  %v9966_v25 = vld [vmem:[#allocation2 + $0x15c4] ss:$8 sps:$4 sm:$0xff]   ;;  %v9961_v47 = vld [vmem:[#allocation2 + $0x5c0] ss:$8 sps:$4 sm:$0xff]  }
 0x183   :  { %7549 = vmatprep.subr.bf16.mxu0 %v9882_v48  ;;  %v9964_v48 = vld [vmem:[#allocation2 + $0x15c0] ss:$8 sps:$4 sm:$0xff]  }
 0x185   :  { %6894 = vmatpush1.bf16.msra.mxu1 %v9877_v36  ;;  %v9969_v36 = vld [vmem:[#allocation2 + $0x5d4] ss:$8 sps:$4 sm:$0xff]  }
 0x186   :  { %7550 = vmatpush1.bf16.msra.mxu0 %v9880_v50  ;;  %6895 = vmatprep.subr.bf16.mxu1 %v9885_v37  ;;  %v9972_v50 = vld [vmem:[#allocation2 + $0x15d4] ss:$8 sps:$4 sm:$0xff]   ;;  %v9967_v37 = vld [vmem:[#allocation2 + $0x5d0] ss:$8 sps:$4 sm:$0xff]  }
 0x187   :  { %7551 = vmatprep.subr.bf16.mxu0 %v9888_v51  ;;  %v9970_v51 = vld [vmem:[#allocation2 + $0x15d0] ss:$8 sps:$4 sm:$0xff]  }
 0x189   :  { %6896 = vmatpush1.bf16.msra.mxu1 %v9883_v53  ;;  %v9975_v53 = vld [vmem:[#allocation2 + $0x5e4] ss:$8 sps:$4 sm:$0xff]  }
 0x18a   :  { %7552 = vmatpush1.bf16.msra.mxu0 %v9886_v54  ;;  %6906 = vmatprep.subr.bf16.mxu1 %v9891_v58  ;;  %v9978_v54 = vld [vmem:[#allocation2 + $0x15e4] ss:$8 sps:$4 sm:$0xff]  }
 0x18b   :  { %7562 = vmatprep.subr.bf16.mxu0 %v9894_v59  ;;  %v10971_v58 = vld [vmem:[%s11533_s0 + $0x8] sm:$0xff] }
 0x18c   :  { %6898 = vmatmul.mubr.bf16.vlgmr.msra.gmra.mrb[0].mxu1 %v11285_v38  ;;  %v1174_v59 = vcombine.high %v10971_v58, %v10971_v58  ;;  %v10053_v58 = vld [vmem:[#allocation2 + $0x6b4] ss:$8 sps:$4 sm:$0xff]  }
 0x18d   :  { %7554 = vmatmul.mubr.bf16.vlgmr.msra.gmra.mrb[0].mxu0 %v11289_v39  ;;  %6907 = vmatpush1.bf16.msra.mxu1 %v9889_v60  ;;  %v10972_v60 = vld [vmem:[%s11533_s0 + $0x28] sm:$0xff] }
 0x18e   :  { %7563 = vmatpush1.bf16.msra.mxu0 %v9892_v61  ;;  %6908 = vmatprep.subr.bf16.mxu1 %v9897_v62  ;;  %v1370_v61 = vcombine.high %v10972_v60, %v10972_v60  ;;  %v9973_v62 = vld [vmem:[#allocation2 + $0x5e0] ss:$8 sps:$4 sm:$0xff]   ;;  %v10051_v60 = vld [vmem:[#allocation2 + $0x6b0] ss:$8 sps:$4 sm:$0xff]  }
 0x18f   :  { %7564 = vmatprep.subr.bf16.mxu0 %v9900_v63  ;;  %6938 = vmatprep.mubr.bf16.mxu1 %v1221_v0  ;;  %v9976_v63 = vld [vmem:[#allocation2 + $0x15e0] ss:$8 sps:$4 sm:$0xff]   ;;  %v9981_v0 = vld [vmem:[#allocation2 + $0x5f4] ss:$8 sps:$4 sm:$0xff]  }
 0x190   :  { %7594 = vmatprep.mubr.bf16.mxu0 %v1417_v1  ;;  %v9984_v1 = vld [vmem:[#allocation2 + $0x15f4] ss:$8 sps:$4 sm:$0xff]  }
 0x191   :  { %6909 = vmatpush1.bf16.msra.mxu1 %v9895_v40  ;;  %v11304_v40 = vrot.slane %v1174_v59, %v11191_v49  ;;  %v10056_v59 = vld [vmem:[#allocation2 + $0x16b4] ss:$8 sps:$4 sm:$0xff]  }
 0x192   :  { %7565 = vmatpush1.bf16.msra.mxu0 %v9898_v41  ;;  %6910 = vmatprep.subr.bf16.mxu1 %v9903_v2  ;;  %v11307_v41 = vrot.slane %v1370_v61, %v11191_v49  ;;  %v9979_v2 = vld [vmem:[#allocation2 + $0x5f0] ss:$8 sps:$4 sm:$0xff]  }
 0x193   :  { %7566 = vmatprep.subr.bf16.mxu0 %v9906_v3  ;;  %v9982_v3 = vld [vmem:[#allocation2 + $0x15f0] ss:$8 sps:$4 sm:$0xff]  }
 0x194   :  { %v10054_v61 = vld [vmem:[#allocation2 + $0x16b0] ss:$8 sps:$4 sm:$0xff]  }
 0x195   :  { %6911 = vmatpush1.bf16.msra.mxu1 %v9901_v55  ;;  %v9987_v55 = vld [vmem:[#allocation2 + $0x604] ss:$8 sps:$4 sm:$0xff]  }
 0x196   :  { %7567 = vmatpush1.bf16.msra.mxu0 %v9904_v4  ;;  %6912 = vmatprep.subr.bf16.mxu1 %v9909_v57  ;;  %v9990_v4 = vld [vmem:[#allocation2 + $0x1604] ss:$8 sps:$4 sm:$0xff]   ;;  %v1190_v57 = vcombine.high %v11304_v40, %v11304_v40 }
 0x197   :  { %7568 = vmatprep.subr.bf16.mxu0 %v9912_v5  ;;  %v1386_v5 = vcombine.high %v11307_v41, %v11307_v41 }
 0x199   :  { %6913 = vmatpush1.bf16.msra.mxu1 %v9907_v6  ;;  %v1219_v6 = vcombine.high %v11285_v38, %v11285_v38  ;;  %v9991_v38 = vld [vmem:[#allocation2 + $0x610] ss:$8 sps:$4 sm:$0xff]  }
 0x19a   :  { %7569 = vmatpush1.bf16.msra.mxu0 %v9910_v7  ;;  %6914 = vmatprep.subr.bf16.mxu1 %v9915_v8  ;;  %v1415_v7 = vcombine.high %v11289_v39, %v11289_v39  ;;  %v9985_v8 = vld [vmem:[#allocation2 + $0x600] ss:$8 sps:$4 sm:$0xff]   ;;  %v9994_v39 = vld [vmem:[#allocation2 + $0x1610] ss:$8 sps:$4 sm:$0xff]  }
 0x19b   :  { %7570 = vmatprep.subr.bf16.mxu0 %v9918_v9  ;;  %v9988_v9 = vld [vmem:[#allocation2 + $0x1600] ss:$8 sps:$4 sm:$0xff]  }
 0x19d   :  { %6915 = vmatpush1.bf16.msra.mxu1 %v9913_v10  ;;  %v9993_v10 = vld [vmem:[#allocation2 + $0x614] ss:$8 sps:$4 sm:$0xff]  }
 0x19e   :  { %7571 = vmatpush1.bf16.msra.mxu0 %v9916_v11  ;;  %6916 = vmatprep.subr.bf16.mxu1 %v9921_v12  ;;  %v9996_v11 = vld [vmem:[#allocation2 + $0x1614] ss:$8 sps:$4 sm:$0xff]   ;;  %v11318_v12 = vrot.slane %v1190_v57, %v11191_v49  ;;  %v10071_v57 = vld [vmem:[#allocation2 + $0x6e4] ss:$8 sps:$4 sm:$0xff]  }
 0x19f   :  { %7572 = vmatprep.subr.bf16.mxu0 %v9924_v13  ;;  %v11321_v13 = vrot.slane %v1386_v5, %v11191_v49  ;;  %v10074_v5 = vld [vmem:[#allocation2 + $0x16e4] ss:$8 sps:$4 sm:$0xff]  }
 0x1a1   :  { %6917 = vmatpush1.bf16.msra.mxu1 %v9919_v14  ;;  %v9999_v14 = vld [vmem:[#allocation2 + $0x624] ss:$8 sps:$4 sm:$0xff]  }
 0x1a2   :  { %7573 = vmatpush1.bf16.msra.mxu0 %v9922_v15  ;;  %6918 = vmatprep.subr.bf16.mxu1 %v9927_v18  ;;  %v10002_v15 = vld [vmem:[#allocation2 + $0x1624] ss:$8 sps:$4 sm:$0xff]   ;;  %v9997_v18 = vld [vmem:[#allocation2 + $0x620] ss:$8 sps:$4 sm:$0xff]  }
 0x1a3   :  { %7574 = vmatprep.subr.bf16.mxu0 %v9930_v19  ;;  %v10000_v19 = vld [vmem:[#allocation2 + $0x1620] ss:$8 sps:$4 sm:$0xff]  }
 0x1a5   :  { %6919 = vmatpush1.bf16.msra.mxu1 %v9925_v20  ;;  %v10005_v20 = vld [vmem:[#allocation2 + $0x634] ss:$8 sps:$4 sm:$0xff]  }
 0x1a6   :  { %7575 = vmatpush1.bf16.msra.mxu0 %v9928_v21  ;;  %6920 = vmatprep.subr.bf16.mxu1 %v9933_v22  ;;  %v10008_v21 = vld [vmem:[#allocation2 + $0x1634] ss:$8 sps:$4 sm:$0xff]   ;;  %v10003_v22 = vld [vmem:[#allocation2 + $0x630] ss:$8 sps:$4 sm:$0xff]  }
 0x1a7   :  { %7576 = vmatprep.subr.bf16.mxu0 %v9936_v23  ;;  %v10006_v23 = vld [vmem:[#allocation2 + $0x1630] ss:$8 sps:$4 sm:$0xff]  }
 0x1a9   :  { %6921 = vmatpush1.bf16.msra.mxu1 %v9931_v52  ;;  %v10011_v52 = vld [vmem:[#allocation2 + $0x644] ss:$8 sps:$4 sm:$0xff]  }
 0x1aa   :  { %7577 = vmatpush1.bf16.msra.mxu0 %v9934_v26  ;;  %6922 = vmatprep.subr.bf16.mxu1 %v9939_v56  ;;  %v10014_v26 = vld [vmem:[#allocation2 + $0x1644] ss:$8 sps:$4 sm:$0xff]   ;;  %v10009_v56 = vld [vmem:[#allocation2 + $0x640] ss:$8 sps:$4 sm:$0xff]  }
 0x1ab   :  { %7578 = vmatprep.subr.bf16.mxu0 %v9942_v27  ;;  %v10012_v27 = vld [vmem:[#allocation2 + $0x1640] ss:$8 sps:$4 sm:$0xff]  }
 0x1ad   :  { %6923 = vmatpush1.bf16.msra.mxu1 %v9937_v28  ;;  %v10017_v28 = vld [vmem:[#allocation2 + $0x654] ss:$8 sps:$4 sm:$0xff]  }
 0x1ae   :  { %7579 = vmatpush1.bf16.msra.mxu0 %v9940_v29  ;;  %6924 = vmatprep.subr.bf16.mxu1 %v9945_v30  ;;  %v10020_v29 = vld [vmem:[#allocation2 + $0x1654] ss:$8 sps:$4 sm:$0xff]   ;;  %v10015_v30 = vld [vmem:[#allocation2 + $0x650] ss:$8 sps:$4 sm:$0xff]  }
 0x1af   :  { %7580 = vmatprep.subr.bf16.mxu0 %v9948_v31  ;;  %v10018_v31 = vld [vmem:[#allocation2 + $0x1650] ss:$8 sps:$4 sm:$0xff]  }
 0x1b1   :  { %6925 = vmatpush1.bf16.msra.mxu1 %v9943_v32  ;;  %v10023_v32 = vld [vmem:[#allocation2 + $0x664] ss:$8 sps:$4 sm:$0xff]  }
 0x1b2   :  { %7581 = vmatpush1.bf16.msra.mxu0 %v9946_v33  ;;  %6926 = vmatprep.subr.bf16.mxu1 %v9951_v34  ;;  %v10026_v33 = vld [vmem:[#allocation2 + $0x1664] ss:$8 sps:$4 sm:$0xff]   ;;  %v10021_v34 = vld [vmem:[#allocation2 + $0x660] ss:$8 sps:$4 sm:$0xff]  }
 0x1b3   :  { %7582 = vmatprep.subr.bf16.mxu0 %v9954_v35  ;;  %v10024_v35 = vld [vmem:[#allocation2 + $0x1660] ss:$8 sps:$4 sm:$0xff]  }
 0x1b5   :  { %6927 = vmatpush1.bf16.msra.mxu1 %v9949_v16  ;;  %v10029_v16 = vld [vmem:[#allocation2 + $0x674] ss:$8 sps:$4 sm:$0xff]  }
 0x1b6   :  { %7583 = vmatpush1.bf16.msra.mxu0 %v9952_v17  ;;  %6928 = vmatprep.subr.bf16.mxu1 %v9957_v43  ;;  %v10032_v17 = vld [vmem:[#allocation2 + $0x1674] ss:$8 sps:$4 sm:$0xff]   ;;  %v10027_v43 = vld [vmem:[#allocation2 + $0x670] ss:$8 sps:$4 sm:$0xff]  }
 0x1b7   :  { %7584 = vmatprep.subr.bf16.mxu0 %v9960_v44  ;;  %v10030_v44 = vld [vmem:[#allocation2 + $0x1670] ss:$8 sps:$4 sm:$0xff]  }
 0x1b9   :  { %6929 = vmatpush1.bf16.msra.mxu1 %v9955_v45  ;;  %v10035_v45 = vld [vmem:[#allocation2 + $0x684] ss:$8 sps:$4 sm:$0xff]  }
 0x1ba   :  { %7585 = vmatpush1.bf16.msra.mxu0 %v9958_v46  ;;  %6930 = vmatprep.subr.bf16.mxu1 %v9963_v24  ;;  %v10038_v46 = vld [vmem:[#allocation2 + $0x1684] ss:$8 sps:$4 sm:$0xff]   ;;  %v10033_v24 = vld [vmem:[#allocation2 + $0x680] ss:$8 sps:$4 sm:$0xff]  }
 0x1bb   :  { %7586 = vmatprep.subr.bf16.mxu0 %v9966_v25  ;;  %v10036_v25 = vld [vmem:[#allocation2 + $0x1680] ss:$8 sps:$4 sm:$0xff]  }
 0x1bd   :  { %6931 = vmatpush1.bf16.msra.mxu1 %v9961_v47  ;;  %v10041_v47 = vld [vmem:[#allocation2 + $0x694] ss:$8 sps:$4 sm:$0xff]  }
 0x1be   :  { %7587 = vmatpush1.bf16.msra.mxu0 %v9964_v48  ;;  %6932 = vmatprep.subr.bf16.mxu1 %v9969_v36  ;;  %v10044_v48 = vld [vmem:[#allocation2 + $0x1694] ss:$8 sps:$4 sm:$0xff]   ;;  %v10039_v36 = vld [vmem:[#allocation2 + $0x690] ss:$8 sps:$4 sm:$0xff]  }
 0x1bf   :  { %7588 = vmatprep.subr.bf16.mxu0 %v9972_v50  ;;  %v10042_v50 = vld [vmem:[#allocation2 + $0x1690] ss:$8 sps:$4 sm:$0xff]  }
 0x1c1   :  { %6933 = vmatpush1.bf16.msra.mxu1 %v9967_v37  ;;  %v10047_v37 = vld [vmem:[#allocation2 + $0x6a4] ss:$8 sps:$4 sm:$0xff]  }
 0x1c2   :  { %7589 = vmatpush1.bf16.msra.mxu0 %v9970_v51  ;;  %6934 = vmatprep.subr.bf16.mxu1 %v9975_v53  ;;  %v10050_v51 = vld [vmem:[#allocation2 + $0x16a4] ss:$8 sps:$4 sm:$0xff]   ;;  %v10045_v53 = vld [vmem:[#allocation2 + $0x6a0] ss:$8 sps:$4 sm:$0xff]  }
 0x1c3   :  { %7590 = vmatprep.subr.bf16.mxu0 %v9978_v54  ;;  %v10048_v54 = vld [vmem:[#allocation2 + $0x16a0] ss:$8 sps:$4 sm:$0xff]  }
 0x1c5   :  { %6935 = vmatpush1.bf16.msra.mxu1 %v9973_v62  ;;  %v10059_v62 = vld [vmem:[#allocation2 + $0x6c4] ss:$8 sps:$4 sm:$0xff]  }
 0x1c6   :  { %7591 = vmatpush1.bf16.msra.mxu0 %v9976_v63  ;;  %6936 = vmatprep.subr.bf16.mxu1 %v9981_v0  ;;  %v10062_v63 = vld [vmem:[#allocation2 + $0x16c4] ss:$8 sps:$4 sm:$0xff]   ;;  %v10057_v0 = vld [vmem:[#allocation2 + $0x6c0] ss:$8 sps:$4 sm:$0xff]  }
 0x1c7   :  { %7592 = vmatprep.subr.bf16.mxu0 %v9984_v1  ;;  %v10060_v1 = vld [vmem:[#allocation2 + $0x16c0] ss:$8 sps:$4 sm:$0xff]  }
 0x1c9   :  { %6937 = vmatpush1.bf16.msra.mxu1 %v9979_v2  ;;  %v10065_v2 = vld [vmem:[#allocation2 + $0x6d4] ss:$8 sps:$4 sm:$0xff]  }
 0x1ca   :  { %7593 = vmatpush1.bf16.msra.mxu0 %v9982_v3  ;;  %6947 = vmatprep.subr.bf16.mxu1 %v9987_v55  ;;  %v10068_v3 = vld [vmem:[#allocation2 + $0x16d4] ss:$8 sps:$4 sm:$0xff]   ;;  %v10063_v55 = vld [vmem:[#allocation2 + $0x6d0] ss:$8 sps:$4 sm:$0xff]  }
 0x1cb   :  { %7603 = vmatprep.subr.bf16.mxu0 %v9990_v4  ;;  %v10066_v4 = vld [vmem:[#allocation2 + $0x16d0] ss:$8 sps:$4 sm:$0xff]  }
 0x1cc   :  { %6939 = vmatmul.mubr.bf16.vlgmr.msra.gmra.mrb[0].mxu1 %v1219_v6  ;;  %v10069_v6 = vld [vmem:[#allocation2 + $0x6e0] ss:$8 sps:$4 sm:$0xff]  }
 0x1cd   :  { %7595 = vmatmul.mubr.bf16.vlgmr.msra.gmra.mrb[0].mxu0 %v1415_v7  ;;  %6948 = vmatpush1.bf16.msra.mxu1 %v9985_v8  ;;  %v10072_v7 = vld [vmem:[#allocation2 + $0x16e0] ss:$8 sps:$4 sm:$0xff]   ;;  %v10077_v8 = vld [vmem:[#allocation2 + $0x6f4] ss:$8 sps:$4 sm:$0xff]  }
 0x1ce   :  { %7604 = vmatpush1.bf16.msra.mxu0 %v9988_v9  ;;  %6949 = vmatprep.subr.bf16.mxu1 %v9993_v10  ;;  %v10080_v9 = vld [vmem:[#allocation2 + $0x16f4] ss:$8 sps:$4 sm:$0xff]   ;;  %v10075_v10 = vld [vmem:[#allocation2 + $0x6f0] ss:$8 sps:$4 sm:$0xff]  }
 0x1cf   :  { %7605 = vmatprep.subr.bf16.mxu0 %v9996_v11  ;;  %6979 = vmatprep.mubr.bf16.mxu1 %v11318_v12  ;;  %v10078_v11 = vld [vmem:[#allocation2 + $0x16f0] ss:$8 sps:$4 sm:$0xff]  }
 0x1d0   :  { %7635 = vmatprep.mubr.bf16.mxu0 %v11321_v13 }
 0x1d1   :  { %6950 = vmatpush1.bf16.msra.mxu1 %v9991_v38  ;;  %v10084_v38 = vld [vmem:[#allocation2 + $0x704] ss:$8 sps:$4 sm:$0xff]  }
 0x1d2   :  { %7606 = vmatpush1.bf16.msra.mxu0 %v9994_v39  ;;  %6951 = vmatprep.subr.bf16.mxu1 %v9999_v14  ;;  %v10088_v39 = vld [vmem:[#allocation2 + $0x1704] ss:$8 sps:$4 sm:$0xff]   ;;  %v11327_v14 = vrot.slane %v11304_v40, %v11191_v49  ;;  %v10089_v40 = vld [vmem:[#allocation2 + $0x710] ss:$8 sps:$4 sm:$0xff]  }
 0x1d3   :  { %7607 = vmatprep.subr.bf16.mxu0 %v10002_v15  ;;  %v11331_v15 = vrot.slane %v11307_v41, %v11191_v49  ;;  %v10092_v41 = vld [vmem:[#allocation2 + $0x1710] ss:$8 sps:$4 sm:$0xff]  }
 0x1d5   :  { %6952 = vmatpush1.bf16.msra.mxu1 %v9997_v18  ;;  %v10082_v18 = vld [vmem:[#allocation2 + $0x700] ss:$8 sps:$4 sm:$0xff]  }
 0x1d6   :  { %7608 = vmatpush1.bf16.msra.mxu0 %v10000_v19  ;;  %6953 = vmatprep.subr.bf16.mxu1 %v10005_v20  ;;  %v10086_v19 = vld [vmem:[#allocation2 + $0x1700] ss:$8 sps:$4 sm:$0xff]   ;;  %v10091_v20 = vld [vmem:[#allocation2 + $0x714] ss:$8 sps:$4 sm:$0xff]  }
 0x1d7   :  { %7609 = vmatprep.subr.bf16.mxu0 %v10008_v21  ;;  %v10094_v21 = vld [vmem:[#allocation2 + $0x1714] ss:$8 sps:$4 sm:$0xff]  }
 0x1d9   :  { %6954 = vmatpush1.bf16.msra.mxu1 %v10003_v22  ;;  %v1222_v22 = vcombine.high %v11318_v12, %v11318_v12  ;;  %v10095_v12 = vld [vmem:[#allocation2 + $0x720] ss:$8 sps:$4 sm:$0xff]  }
 0x1da   :  { %7610 = vmatpush1.bf16.msra.mxu0 %v10006_v23  ;;  %6955 = vmatprep.subr.bf16.mxu1 %v10011_v52  ;;  %v1418_v23 = vcombine.high %v11321_v13, %v11321_v13  ;;  %v10097_v52 = vld [vmem:[#allocation2 + $0x724] ss:$8 sps:$4 sm:$0xff]   ;;  %v10103_v13 = vld [vmem:[#allocation2 + $0x734] ss:$8 sps:$4 sm:$0xff]  }
 0x1db   :  { %7611 = vmatprep.subr.bf16.mxu0 %v10014_v26  ;;  %v10100_v26 = vld [vmem:[#allocation2 + $0x1724] ss:$8 sps:$4 sm:$0xff]  }
 0x1dd   :  { %6956 = vmatpush1.bf16.msra.mxu1 %v10009_v56  ;;  %v10098_v56 = vld [vmem:[#allocation2 + $0x1720] ss:$8 sps:$4 sm:$0xff]  }
 0x1de   :  { %7612 = vmatpush1.bf16.msra.mxu0 %v10012_v27  ;;  %6957 = vmatprep.subr.bf16.mxu1 %v10017_v28  ;;  %v10106_v27 = vld [vmem:[#allocation2 + $0x1734] ss:$8 sps:$4 sm:$0xff]   ;;  %v10101_v28 = vld [vmem:[#allocation2 + $0x730] ss:$8 sps:$4 sm:$0xff]  }
 0x1df   :  { %7613 = vmatprep.subr.bf16.mxu0 %v10020_v29  ;;  %v10104_v29 = vld [vmem:[#allocation2 + $0x1730] ss:$8 sps:$4 sm:$0xff]  }
 0x1e1   :  { %6958 = vmatpush1.bf16.msra.mxu1 %v10015_v30  ;;  %v10109_v30 = vld [vmem:[#allocation2 + $0x744] ss:$8 sps:$4 sm:$0xff]  }
 0x1e2   :  { %7614 = vmatpush1.bf16.msra.mxu0 %v10018_v31  ;;  %6959 = vmatprep.subr.bf16.mxu1 %v10023_v32  ;;  %v10112_v31 = vld [vmem:[#allocation2 + $0x1744] ss:$8 sps:$4 sm:$0xff]   ;;  %v10107_v32 = vld [vmem:[#allocation2 + $0x740] ss:$8 sps:$4 sm:$0xff]  }
 0x1e3   :  { %7615 = vmatprep.subr.bf16.mxu0 %v10026_v33  ;;  %v10110_v33 = vld [vmem:[#allocation2 + $0x1740] ss:$8 sps:$4 sm:$0xff]  }
 0x1e5   :  { %6960 = vmatpush1.bf16.msra.mxu1 %v10021_v34  ;;  %v10115_v34 = vld [vmem:[#allocation2 + $0x754] ss:$8 sps:$4 sm:$0xff]  }
 0x1e6   :  { %7616 = vmatpush1.bf16.msra.mxu0 %v10024_v35  ;;  %6961 = vmatprep.subr.bf16.mxu1 %v10029_v16  ;;  %v10118_v35 = vld [vmem:[#allocation2 + $0x1754] ss:$8 sps:$4 sm:$0xff]   ;;  %v10113_v16 = vld [vmem:[#allocation2 + $0x750] ss:$8 sps:$4 sm:$0xff]  }
 0x1e7   :  { %7617 = vmatprep.subr.bf16.mxu0 %v10032_v17  ;;  %v10116_v17 = vld [vmem:[#allocation2 + $0x1750] ss:$8 sps:$4 sm:$0xff]  }
 0x1e9   :  { %6962 = vmatpush1.bf16.msra.mxu1 %v10027_v43  ;;  %v10121_v43 = vld [vmem:[#allocation2 + $0x764] ss:$8 sps:$4 sm:$0xff]  }
 0x1ea   :  { %7618 = vmatpush1.bf16.msra.mxu0 %v10030_v44  ;;  %6963 = vmatprep.subr.bf16.mxu1 %v10035_v45  ;;  %v10124_v44 = vld [vmem:[#allocation2 + $0x1764] ss:$8 sps:$4 sm:$0xff]   ;;  %v10119_v45 = vld [vmem:[#allocation2 + $0x760] ss:$8 sps:$4 sm:$0xff]  }
 0x1eb   :  { %7619 = vmatprep.subr.bf16.mxu0 %v10038_v46  ;;  %v10122_v46 = vld [vmem:[#allocation2 + $0x1760] ss:$8 sps:$4 sm:$0xff]  }
 0x1ed   :  { %6964 = vmatpush1.bf16.msra.mxu1 %v10033_v24  ;;  %v10127_v24 = vld [vmem:[#allocation2 + $0x774] ss:$8 sps:$4 sm:$0xff]  }
 0x1ee   :  { %7620 = vmatpush1.bf16.msra.mxu0 %v10036_v25  ;;  %6965 = vmatprep.subr.bf16.mxu1 %v10041_v47  ;;  %v10130_v25 = vld [vmem:[#allocation2 + $0x1774] ss:$8 sps:$4 sm:$0xff]   ;;  %v10125_v47 = vld [vmem:[#allocation2 + $0x770] ss:$8 sps:$4 sm:$0xff]  }
 0x1ef   :  { %7621 = vmatprep.subr.bf16.mxu0 %v10044_v48  ;;  %v10128_v48 = vld [vmem:[#allocation2 + $0x1770] ss:$8 sps:$4 sm:$0xff]  }
 0x1f1   :  { %6966 = vmatpush1.bf16.msra.mxu1 %v10039_v36  ;;  %v10133_v36 = vld [vmem:[#allocation2 + $0x784] ss:$8 sps:$4 sm:$0xff]  }
 0x1f2   :  { %7622 = vmatpush1.bf16.msra.mxu0 %v10042_v50  ;;  %6967 = vmatprep.subr.bf16.mxu1 %v10047_v37  ;;  %v10136_v50 = vld [vmem:[#allocation2 + $0x1784] ss:$8 sps:$4 sm:$0xff]   ;;  %v10131_v37 = vld [vmem:[#allocation2 + $0x780] ss:$8 sps:$4 sm:$0xff]  }
 0x1f3   :  { %7623 = vmatprep.subr.bf16.mxu0 %v10050_v51  ;;  %v10134_v51 = vld [vmem:[#allocation2 + $0x1780] ss:$8 sps:$4 sm:$0xff]  }
 0x1f5   :  { %6968 = vmatpush1.bf16.msra.mxu1 %v10045_v53  ;;  %v10139_v53 = vld [vmem:[#allocation2 + $0x794] ss:$8 sps:$4 sm:$0xff]  }
 0x1f6   :  { %7624 = vmatpush1.bf16.msra.mxu0 %v10048_v54  ;;  %6969 = vmatprep.subr.bf16.mxu1 %v10053_v58  ;;  %v10142_v54 = vld [vmem:[#allocation2 + $0x1794] ss:$8 sps:$4 sm:$0xff]   ;;  %v10137_v58 = vld [vmem:[#allocation2 + $0x790] ss:$8 sps:$4 sm:$0xff]  }
 0x1f7   :  { %7625 = vmatprep.subr.bf16.mxu0 %v10056_v59  ;;  %v10140_v59 = vld [vmem:[#allocation2 + $0x1790] ss:$8 sps:$4 sm:$0xff]  }
 0x1f9   :  { %6970 = vmatpush1.bf16.msra.mxu1 %v10051_v60  ;;  %v10145_v60 = vld [vmem:[#allocation2 + $0x7a4] ss:$8 sps:$4 sm:$0xff]  }
 0x1fa   :  { %7626 = vmatpush1.bf16.msra.mxu0 %v10054_v61  ;;  %6971 = vmatprep.subr.bf16.mxu1 %v10059_v62  ;;  %v10148_v61 = vld [vmem:[#allocation2 + $0x17a4] ss:$8 sps:$4 sm:$0xff]   ;;  %v10143_v62 = vld [vmem:[#allocation2 + $0x7a0] ss:$8 sps:$4 sm:$0xff]  }
 0x1fb   :  { %7627 = vmatprep.subr.bf16.mxu0 %v10062_v63  ;;  %v10146_v63 = vld [vmem:[#allocation2 + $0x17a0] ss:$8 sps:$4 sm:$0xff]  }
 0x1fd   :  { %6972 = vmatpush1.bf16.msra.mxu1 %v10057_v0  ;;  %v10151_v0 = vld [vmem:[#allocation2 + $0x7b4] ss:$8 sps:$4 sm:$0xff]  }
 0x1fe   :  { %7628 = vmatpush1.bf16.msra.mxu0 %v10060_v1  ;;  %6973 = vmatprep.subr.bf16.mxu1 %v10065_v2  ;;  %v10154_v1 = vld [vmem:[#allocation2 + $0x17b4] ss:$8 sps:$4 sm:$0xff]   ;;  %v10149_v2 = vld [vmem:[#allocation2 + $0x7b0] ss:$8 sps:$4 sm:$0xff]  }
 0x1ff   :  { %7629 = vmatprep.subr.bf16.mxu0 %v10068_v3  ;;  %v10152_v3 = vld [vmem:[#allocation2 + $0x17b0] ss:$8 sps:$4 sm:$0xff]  }
 0x201   :  { %6974 = vmatpush1.bf16.msra.mxu1 %v10063_v55  ;;  %v10157_v55 = vld [vmem:[#allocation2 + $0x7c4] ss:$8 sps:$4 sm:$0xff]  }
 0x202   :  { %7630 = vmatpush1.bf16.msra.mxu0 %v10066_v4  ;;  %6975 = vmatprep.subr.bf16.mxu1 %v10071_v57  ;;  %v10160_v4 = vld [vmem:[#allocation2 + $0x17c4] ss:$8 sps:$4 sm:$0xff]   ;;  %v10155_v57 = vld [vmem:[#allocation2 + $0x7c0] ss:$8 sps:$4 sm:$0xff]  }
 0x203   :  { %7631 = vmatprep.subr.bf16.mxu0 %v10074_v5  ;;  %v10158_v5 = vld [vmem:[#allocation2 + $0x17c0] ss:$8 sps:$4 sm:$0xff]  }
 0x205   :  { %6976 = vmatpush1.bf16.msra.mxu1 %v10069_v6  ;;  %v10163_v6 = vld [vmem:[#allocation2 + $0x7d4] ss:$8 sps:$4 sm:$0xff]  }
 0x206   :  { %7632 = vmatpush1.bf16.msra.mxu0 %v10072_v7  ;;  %6977 = vmatprep.subr.bf16.mxu1 %v10077_v8  ;;  %v10166_v7 = vld [vmem:[#allocation2 + $0x17d4] ss:$8 sps:$4 sm:$0xff]   ;;  %v10161_v8 = vld [vmem:[#allocation2 + $0x7d0] ss:$8 sps:$4 sm:$0xff]  }
 0x207   :  { %7633 = vmatprep.subr.bf16.mxu0 %v10080_v9  ;;  %v10164_v9 = vld [vmem:[#allocation2 + $0x17d0] ss:$8 sps:$4 sm:$0xff]  }
 0x209   :  { %6978 = vmatpush1.bf16.msra.mxu1 %v10075_v10  ;;  %v10169_v10 = vld [vmem:[#allocation2 + $0x7e4] ss:$8 sps:$4 sm:$0xff]  }
 0x20a   :  { %7634 = vmatpush1.bf16.msra.mxu0 %v10078_v11  ;;  %6988 = vmatprep.subr.bf16.mxu1 %v10084_v38  ;;  %v10172_v11 = vld [vmem:[#allocation2 + $0x17e4] ss:$8 sps:$4 sm:$0xff]   ;;  %v11342_v38 = vld [vmem:[%s11533_s0 + $0x10] sm:$0xff] }
 0x20b   :  { %7644 = vmatprep.subr.bf16.mxu0 %v10088_v39  ;;  %v11347_v39 = vld [vmem:[%s11533_s0 + $0x30] sm:$0xff] }
 0x20c   :  { %6980 = vmatmul.mubr.bf16.vlgmr.msra.gmra.mrb[0].mxu1 %v11327_v14 }
 0x20d   :  { %7636 = vmatmul.mubr.bf16.vlgmr.msra.gmra.mrb[0].mxu0 %v11331_v15  ;;  %6989 = vmatpush1.bf16.msra.mxu1 %v10082_v18  ;;  %v10167_v18 = vld [vmem:[#allocation2 + $0x7e0] ss:$8 sps:$4 sm:$0xff]  }
 0x20e   :  { %7645 = vmatpush1.bf16.msra.mxu0 %v10086_v19  ;;  %6990 = vmatprep.subr.bf16.mxu1 %v10091_v20  ;;  %v10170_v19 = vld [vmem:[#allocation2 + $0x17e0] ss:$8 sps:$4 sm:$0xff]   ;;  %v10175_v20 = vld [vmem:[#allocation2 + $0x7f4] ss:$8 sps:$4 sm:$0xff]  }
 0x20f   :  { %7646 = vmatprep.subr.bf16.mxu0 %v10094_v21  ;;  %7020 = vmatprep.mubr.bf16.mxu1 %v1222_v22  ;;  %v10178_v21 = vld [vmem:[#allocation2 + $0x17f4] ss:$8 sps:$4 sm:$0xff]   ;;  %v11351_v22 = vrot.slane %v11342_v38, %v11191_v49 }
 0x210   :  { %7676 = vmatprep.mubr.bf16.mxu0 %v1418_v23  ;;  %v11355_v23 = vrot.slane %v11347_v39, %v11191_v49 }
 0x211   :  { %6991 = vmatpush1.bf16.msra.mxu1 %v10089_v40  ;;  %v10173_v40 = vld [vmem:[#allocation2 + $0x7f0] ss:$8 sps:$4 sm:$0xff]  }
 0x212   :  { %7647 = vmatpush1.bf16.msra.mxu0 %v10092_v41  ;;  %6992 = vmatprep.subr.bf16.mxu1 %v10097_v52  ;;  %v10176_v41 = vld [vmem:[#allocation2 + $0x17f0] ss:$8 sps:$4 sm:$0xff]   ;;  %v10181_v52 = vld [vmem:[#allocation2 + $0x804] ss:$8 sps:$4 sm:$0xff]  }
 0x213   :  { %7648 = vmatprep.subr.bf16.mxu0 %v10100_v26  ;;  %v10184_v26 = vld [vmem:[#allocation2 + $0x1804] ss:$8 sps:$4 sm:$0xff]  }
 0x215   :  { %6993 = vmatpush1.bf16.msra.mxu1 %v10095_v12  ;;  %v1238_v12 = vcombine.high %v11351_v22, %v11351_v22 }
 0x216   :  { %7649 = vmatpush1.bf16.msra.mxu0 %v10098_v56  ;;  %6994 = vmatprep.subr.bf16.mxu1 %v10103_v13  ;;  %v1434_v56 = vcombine.high %v11355_v23, %v11355_v23  ;;  %v1220_v13 = vcombine.high %v11327_v14, %v11327_v14  ;;  %v10185_v14 = vld [vmem:[#allocation2 + $0x810] ss:$8 sps:$4 sm:$0xff]  }
 0x217   :  { %7650 = vmatprep.subr.bf16.mxu0 %v10106_v27  ;;  %v1416_v27 = vcombine.high %v11331_v15, %v11331_v15  ;;  %v10188_v15 = vld [vmem:[#allocation2 + $0x1810] ss:$8 sps:$4 sm:$0xff]  }
 0x219   :  { %6995 = vmatpush1.bf16.msra.mxu1 %v10101_v28  ;;  %v10179_v28 = vld [vmem:[#allocation2 + $0x800] ss:$8 sps:$4 sm:$0xff]  }
 0x21a   :  { %7651 = vmatpush1.bf16.msra.mxu0 %v10104_v29  ;;  %6996 = vmatprep.subr.bf16.mxu1 %v10109_v30  ;;  %v10182_v29 = vld [vmem:[#allocation2 + $0x1800] ss:$8 sps:$4 sm:$0xff]   ;;  %v10187_v30 = vld [vmem:[#allocation2 + $0x814] ss:$8 sps:$4 sm:$0xff]  }
 0x21b   :  { %7652 = vmatprep.subr.bf16.mxu0 %v10112_v31  ;;  %v10190_v31 = vld [vmem:[#allocation2 + $0x1814] ss:$8 sps:$4 sm:$0xff]  }
 0x21d   :  { %6997 = vmatpush1.bf16.msra.mxu1 %v10107_v32  ;;  %v11366_v32 = vrot.slane %v1238_v12, %v11191_v49  ;;  %v10257_v12 = vld [vmem:[#allocation2 + $0x8d0] ss:$8 sps:$4 sm:$0xff]  }
 0x21e   :  { %7653 = vmatpush1.bf16.msra.mxu0 %v10110_v33  ;;  %6998 = vmatprep.subr.bf16.mxu1 %v10115_v34  ;;  %v11369_v33 = vrot.slane %v1434_v56, %v11191_v49  ;;  %v10193_v34 = vld [vmem:[#allocation2 + $0x824] ss:$8 sps:$4 sm:$0xff]   ;;  %v10260_v56 = vld [vmem:[#allocation2 + $0x18d0] ss:$8 sps:$4 sm:$0xff]  }
 0x21f   :  { %7654 = vmatprep.subr.bf16.mxu0 %v10118_v35  ;;  %v10196_v35 = vld [vmem:[#allocation2 + $0x1824] ss:$8 sps:$4 sm:$0xff]  }
 0x221   :  { %6999 = vmatpush1.bf16.msra.mxu1 %v10113_v16  ;;  %v10191_v16 = vld [vmem:[#allocation2 + $0x820] ss:$8 sps:$4 sm:$0xff]  }
 0x222   :  { %7655 = vmatpush1.bf16.msra.mxu0 %v10116_v17  ;;  %7000 = vmatprep.subr.bf16.mxu1 %v10121_v43  ;;  %v10194_v17 = vld [vmem:[#allocation2 + $0x1820] ss:$8 sps:$4 sm:$0xff]   ;;  %v10199_v43 = vld [vmem:[#allocation2 + $0x834] ss:$8 sps:$4 sm:$0xff]  }
 0x223   :  { %7656 = vmatprep.subr.bf16.mxu0 %v10124_v44  ;;  %v10202_v44 = vld [vmem:[#allocation2 + $0x1834] ss:$8 sps:$4 sm:$0xff]  }
 0x225   :  { %7001 = vmatpush1.bf16.msra.mxu1 %v10119_v45  ;;  %v10197_v45 = vld [vmem:[#allocation2 + $0x830] ss:$8 sps:$4 sm:$0xff]  }
 0x226   :  { %7657 = vmatpush1.bf16.msra.mxu0 %v10122_v46  ;;  %7002 = vmatprep.subr.bf16.mxu1 %v10127_v24  ;;  %v10200_v46 = vld [vmem:[#allocation2 + $0x1830] ss:$8 sps:$4 sm:$0xff]   ;;  %v10205_v24 = vld [vmem:[#allocation2 + $0x844] ss:$8 sps:$4 sm:$0xff]  }
 0x227   :  { %7658 = vmatprep.subr.bf16.mxu0 %v10130_v25  ;;  %v10208_v25 = vld [vmem:[#allocation2 + $0x1844] ss:$8 sps:$4 sm:$0xff]  }
 0x229   :  { %7003 = vmatpush1.bf16.msra.mxu1 %v10125_v47  ;;  %v10203_v47 = vld [vmem:[#allocation2 + $0x840] ss:$8 sps:$4 sm:$0xff]  }
 0x22a   :  { %7659 = vmatpush1.bf16.msra.mxu0 %v10128_v48  ;;  %7004 = vmatprep.subr.bf16.mxu1 %v10133_v36  ;;  %v10206_v48 = vld [vmem:[#allocation2 + $0x1840] ss:$8 sps:$4 sm:$0xff]   ;;  %v10211_v36 = vld [vmem:[#allocation2 + $0x854] ss:$8 sps:$4 sm:$0xff]  }
 0x22b   :  { %7660 = vmatprep.subr.bf16.mxu0 %v10136_v50  ;;  %v10214_v50 = vld [vmem:[#allocation2 + $0x1854] ss:$8 sps:$4 sm:$0xff]  }
 0x22d   :  { %7005 = vmatpush1.bf16.msra.mxu1 %v10131_v37  ;;  %v10209_v37 = vld [vmem:[#allocation2 + $0x850] ss:$8 sps:$4 sm:$0xff]  }
 0x22e   :  { %7661 = vmatpush1.bf16.msra.mxu0 %v10134_v51  ;;  %7006 = vmatprep.subr.bf16.mxu1 %v10139_v53  ;;  %v10212_v51 = vld [vmem:[#allocation2 + $0x1850] ss:$8 sps:$4 sm:$0xff]   ;;  %v10217_v53 = vld [vmem:[#allocation2 + $0x864] ss:$8 sps:$4 sm:$0xff]  }
 0x22f   :  { %7662 = vmatprep.subr.bf16.mxu0 %v10142_v54  ;;  %v10220_v54 = vld [vmem:[#allocation2 + $0x1864] ss:$8 sps:$4 sm:$0xff]  }
 0x231   :  { %7007 = vmatpush1.bf16.msra.mxu1 %v10137_v58  ;;  %v10215_v58 = vld [vmem:[#allocation2 + $0x860] ss:$8 sps:$4 sm:$0xff]  }
 0x232   :  { %7663 = vmatpush1.bf16.msra.mxu0 %v10140_v59  ;;  %7008 = vmatprep.subr.bf16.mxu1 %v10145_v60  ;;  %v10218_v59 = vld [vmem:[#allocation2 + $0x1860] ss:$8 sps:$4 sm:$0xff]   ;;  %v10223_v60 = vld [vmem:[#allocation2 + $0x874] ss:$8 sps:$4 sm:$0xff]  }
 0x233   :  { %7664 = vmatprep.subr.bf16.mxu0 %v10148_v61  ;;  %v10226_v61 = vld [vmem:[#allocation2 + $0x1874] ss:$8 sps:$4 sm:$0xff]  }
 0x235   :  { %7009 = vmatpush1.bf16.msra.mxu1 %v10143_v62  ;;  %v10221_v62 = vld [vmem:[#allocation2 + $0x870] ss:$8 sps:$4 sm:$0xff]  }
 0x236   :  { %7665 = vmatpush1.bf16.msra.mxu0 %v10146_v63  ;;  %7010 = vmatprep.subr.bf16.mxu1 %v10151_v0  ;;  %v10224_v63 = vld [vmem:[#allocation2 + $0x1870] ss:$8 sps:$4 sm:$0xff]   ;;  %v10229_v0 = vld [vmem:[#allocation2 + $0x884] ss:$8 sps:$4 sm:$0xff]  }
 0x237   :  { %7666 = vmatprep.subr.bf16.mxu0 %v10154_v1  ;;  %v10232_v1 = vld [vmem:[#allocation2 + $0x1884] ss:$8 sps:$4 sm:$0xff]  }
 0x239   :  { %7011 = vmatpush1.bf16.msra.mxu1 %v10149_v2  ;;  %v10227_v2 = vld [vmem:[#allocation2 + $0x880] ss:$8 sps:$4 sm:$0xff]  }
 0x23a   :  { %7667 = vmatpush1.bf16.msra.mxu0 %v10152_v3  ;;  %7012 = vmatprep.subr.bf16.mxu1 %v10157_v55  ;;  %v10230_v3 = vld [vmem:[#allocation2 + $0x1880] ss:$8 sps:$4 sm:$0xff]   ;;  %v10235_v55 = vld [vmem:[#allocation2 + $0x894] ss:$8 sps:$4 sm:$0xff]  }
 0x23b   :  { %7668 = vmatprep.subr.bf16.mxu0 %v10160_v4  ;;  %v10238_v4 = vld [vmem:[#allocation2 + $0x1894] ss:$8 sps:$4 sm:$0xff]  }
 0x23d   :  { %7013 = vmatpush1.bf16.msra.mxu1 %v10155_v57  ;;  %v10233_v57 = vld [vmem:[#allocation2 + $0x890] ss:$8 sps:$4 sm:$0xff]  }
 0x23e   :  { %7669 = vmatpush1.bf16.msra.mxu0 %v10158_v5  ;;  %7014 = vmatprep.subr.bf16.mxu1 %v10163_v6  ;;  %v10236_v5 = vld [vmem:[#allocation2 + $0x1890] ss:$8 sps:$4 sm:$0xff]   ;;  %v10241_v6 = vld [vmem:[#allocation2 + $0x8a4] ss:$8 sps:$4 sm:$0xff]  }
 0x23f   :  { %7670 = vmatprep.subr.bf16.mxu0 %v10166_v7  ;;  %v10244_v7 = vld [vmem:[#allocation2 + $0x18a4] ss:$8 sps:$4 sm:$0xff]  }
 0x241   :  { %7015 = vmatpush1.bf16.msra.mxu1 %v10161_v8  ;;  %v10239_v8 = vld [vmem:[#allocation2 + $0x8a0] ss:$8 sps:$4 sm:$0xff]  }
 0x242   :  { %7671 = vmatpush1.bf16.msra.mxu0 %v10164_v9  ;;  %7016 = vmatprep.subr.bf16.mxu1 %v10169_v10  ;;  %v10242_v9 = vld [vmem:[#allocation2 + $0x18a0] ss:$8 sps:$4 sm:$0xff]   ;;  %v10247_v10 = vld [vmem:[#allocation2 + $0x8b4] ss:$8 sps:$4 sm:$0xff]  }
 0x243   :  { %7672 = vmatprep.subr.bf16.mxu0 %v10172_v11  ;;  %v10250_v11 = vld [vmem:[#allocation2 + $0x18b4] ss:$8 sps:$4 sm:$0xff]  }
 0x245   :  { %7017 = vmatpush1.bf16.msra.mxu1 %v10167_v18  ;;  %v10245_v18 = vld [vmem:[#allocation2 + $0x8b0] ss:$8 sps:$4 sm:$0xff]  }
 0x246   :  { %7673 = vmatpush1.bf16.msra.mxu0 %v10170_v19  ;;  %7018 = vmatprep.subr.bf16.mxu1 %v10175_v20  ;;  %v10248_v19 = vld [vmem:[#allocation2 + $0x18b0] ss:$8 sps:$4 sm:$0xff]   ;;  %v10253_v20 = vld [vmem:[#allocation2 + $0x8c4] ss:$8 sps:$4 sm:$0xff]  }
 0x247   :  { %7674 = vmatprep.subr.bf16.mxu0 %v10178_v21  ;;  %v10256_v21 = vld [vmem:[#allocation2 + $0x18c4] ss:$8 sps:$4 sm:$0xff]  }
 0x249   :  { %7019 = vmatpush1.bf16.msra.mxu1 %v10173_v40  ;;  %v10251_v40 = vld [vmem:[#allocation2 + $0x8c0] ss:$8 sps:$4 sm:$0xff]  }
 0x24a   :  { %7675 = vmatpush1.bf16.msra.mxu0 %v10176_v41  ;;  %7029 = vmatprep.subr.bf16.mxu1 %v10181_v52  ;;  %v10254_v41 = vld [vmem:[#allocation2 + $0x18c0] ss:$8 sps:$4 sm:$0xff]   ;;  %v10259_v52 = vld [vmem:[#allocation2 + $0x8d4] ss:$8 sps:$4 sm:$0xff]  }
 0x24b   :  { %7685 = vmatprep.subr.bf16.mxu0 %v10184_v26  ;;  %v10262_v26 = vld [vmem:[#allocation2 + $0x18d4] ss:$8 sps:$4 sm:$0xff]  }
 0x24c   :  { %7021 = vmatmul.mubr.bf16.vlgmr.msra.gmra.mrb[0].mxu1 %v1220_v13  ;;  %v10265_v13 = vld [vmem:[#allocation2 + $0x8e4] ss:$8 sps:$4 sm:$0xff]  }
 0x24d   :  { %7677 = vmatmul.mubr.bf16.vlgmr.msra.gmra.mrb[0].mxu0 %v1416_v27  ;;  %7030 = vmatpush1.bf16.msra.mxu1 %v10179_v28  ;;  %v10268_v27 = vld [vmem:[#allocation2 + $0x18e4] ss:$8 sps:$4 sm:$0xff]   ;;  %v10263_v28 = vld [vmem:[#allocation2 + $0x8e0] ss:$8 sps:$4 sm:$0xff]  }
 0x24e   :  { %7686 = vmatpush1.bf16.msra.mxu0 %v10182_v29  ;;  %7031 = vmatprep.subr.bf16.mxu1 %v10187_v30  ;;  %v10266_v29 = vld [vmem:[#allocation2 + $0x18e0] ss:$8 sps:$4 sm:$0xff]   ;;  %v10271_v30 = vld [vmem:[#allocation2 + $0x8f4] ss:$8 sps:$4 sm:$0xff]  }
 0x24f   :  { %7687 = vmatprep.subr.bf16.mxu0 %v10190_v31  ;;  %7061 = vmatprep.mubr.bf16.mxu1 %v11366_v32  ;;  %v10274_v31 = vld [vmem:[#allocation2 + $0x18f4] ss:$8 sps:$4 sm:$0xff]  }
 0x250   :  { %7717 = vmatprep.mubr.bf16.mxu0 %v11369_v33 }
 0x251   :  { %7032 = vmatpush1.bf16.msra.mxu1 %v10185_v14  ;;  %v10269_v14 = vld [vmem:[#allocation2 + $0x8f0] ss:$8 sps:$4 sm:$0xff]  }
 0x252   :  { %7688 = vmatpush1.bf16.msra.mxu0 %v10188_v15  ;;  %7033 = vmatprep.subr.bf16.mxu1 %v10193_v34  ;;  %v10272_v15 = vld [vmem:[#allocation2 + $0x18f0] ss:$8 sps:$4 sm:$0xff]   ;;  %v10277_v34 = vld [vmem:[#allocation2 + $0x904] ss:$8 sps:$4 sm:$0xff]  }
 0x253   :  { %7689 = vmatprep.subr.bf16.mxu0 %v10196_v35  ;;  %v10280_v35 = vld [vmem:[#allocation2 + $0x1904] ss:$8 sps:$4 sm:$0xff]  }
 0x255   :  { %7034 = vmatpush1.bf16.msra.mxu1 %v10191_v16  ;;  %v11375_v16 = vrot.slane %v11351_v22, %v11191_v49  ;;  %v10281_v22 = vld [vmem:[#allocation2 + $0x910] ss:$8 sps:$4 sm:$0xff]  }
 0x256   :  { %7690 = vmatpush1.bf16.msra.mxu0 %v10194_v17  ;;  %7035 = vmatprep.subr.bf16.mxu1 %v10199_v43  ;;  %v11379_v17 = vrot.slane %v11355_v23, %v11191_v49  ;;  %v10275_v43 = vld [vmem:[#allocation2 + $0x900] ss:$8 sps:$4 sm:$0xff]   ;;  %v10284_v23 = vld [vmem:[#allocation2 + $0x1910] ss:$8 sps:$4 sm:$0xff]  }
 0x257   :  { %7691 = vmatprep.subr.bf16.mxu0 %v10202_v44  ;;  %v10278_v44 = vld [vmem:[#allocation2 + $0x1900] ss:$8 sps:$4 sm:$0xff]  }
 0x259   :  { %7036 = vmatpush1.bf16.msra.mxu1 %v10197_v45  ;;  %v10283_v45 = vld [vmem:[#allocation2 + $0x914] ss:$8 sps:$4 sm:$0xff]  }
 0x25a   :  { %7692 = vmatpush1.bf16.msra.mxu0 %v10200_v46  ;;  %7037 = vmatprep.subr.bf16.mxu1 %v10205_v24  ;;  %v10286_v46 = vld [vmem:[#allocation2 + $0x1914] ss:$8 sps:$4 sm:$0xff]   ;;  %v1270_v24 = vcombine.high %v11366_v32, %v11366_v32  ;;  %v10287_v32 = vld [vmem:[#allocation2 + $0x920] ss:$8 sps:$4 sm:$0xff]  }
 0x25b   :  { %7693 = vmatprep.subr.bf16.mxu0 %v10208_v25  ;;  %v1466_v25 = vcombine.high %v11369_v33, %v11369_v33  ;;  %v10295_v33 = vld [vmem:[#allocation2 + $0x934] ss:$8 sps:$4 sm:$0xff]  }
 0x25d   :  { %7038 = vmatpush1.bf16.msra.mxu1 %v10203_v47  ;;  %v10289_v47 = vld [vmem:[#allocation2 + $0x924] ss:$8 sps:$4 sm:$0xff]  }
 0x25e   :  { %7694 = vmatpush1.bf16.msra.mxu0 %v10206_v48  ;;  %7039 = vmatprep.subr.bf16.mxu1 %v10211_v36  ;;  %v10292_v48 = vld [vmem:[#allocation2 + $0x1924] ss:$8 sps:$4 sm:$0xff]   ;;  %v10290_v36 = vld [vmem:[#allocation2 + $0x1920] ss:$8 sps:$4 sm:$0xff]  }
 0x25f   :  { %7695 = vmatprep.subr.bf16.mxu0 %v10214_v50  ;;  %v10298_v50 = vld [vmem:[#allocation2 + $0x1934] ss:$8 sps:$4 sm:$0xff]  }
 0x261   :  { %7040 = vmatpush1.bf16.msra.mxu1 %v10209_v37  ;;  %v10293_v37 = vld [vmem:[#allocation2 + $0x930] ss:$8 sps:$4 sm:$0xff]  }
 0x262   :  { %7696 = vmatpush1.bf16.msra.mxu0 %v10212_v51  ;;  %7041 = vmatprep.subr.bf16.mxu1 %v10217_v53  ;;  %v10296_v51 = vld [vmem:[#allocation2 + $0x1930] ss:$8 sps:$4 sm:$0xff]   ;;  %v10301_v53 = vld [vmem:[#allocation2 + $0x944] ss:$8 sps:$4 sm:$0xff]  }
 0x263   :  { %7697 = vmatprep.subr.bf16.mxu0 %v10220_v54  ;;  %v10304_v54 = vld [vmem:[#allocation2 + $0x1944] ss:$8 sps:$4 sm:$0xff]  }
 0x265   :  { %7042 = vmatpush1.bf16.msra.mxu1 %v10215_v58  ;;  %v10299_v58 = vld [vmem:[#allocation2 + $0x940] ss:$8 sps:$4 sm:$0xff]  }
 0x266   :  { %7698 = vmatpush1.bf16.msra.mxu0 %v10218_v59  ;;  %7043 = vmatprep.subr.bf16.mxu1 %v10223_v60  ;;  %v10302_v59 = vld [vmem:[#allocation2 + $0x1940] ss:$8 sps:$4 sm:$0xff]   ;;  %v10307_v60 = vld [vmem:[#allocation2 + $0x954] ss:$8 sps:$4 sm:$0xff]  }
 0x267   :  { %7699 = vmatprep.subr.bf16.mxu0 %v10226_v61  ;;  %v10310_v61 = vld [vmem:[#allocation2 + $0x1954] ss:$8 sps:$4 sm:$0xff]  }
 0x269   :  { %7044 = vmatpush1.bf16.msra.mxu1 %v10221_v62  ;;  %v10305_v62 = vld [vmem:[#allocation2 + $0x950] ss:$8 sps:$4 sm:$0xff]  }
 0x26a   :  { %7700 = vmatpush1.bf16.msra.mxu0 %v10224_v63  ;;  %7045 = vmatprep.subr.bf16.mxu1 %v10229_v0  ;;  %v10308_v63 = vld [vmem:[#allocation2 + $0x1950] ss:$8 sps:$4 sm:$0xff]   ;;  %v10313_v0 = vld [vmem:[#allocation2 + $0x964] ss:$8 sps:$4 sm:$0xff]  }
 0x26b   :  { %7701 = vmatprep.subr.bf16.mxu0 %v10232_v1  ;;  %v10316_v1 = vld [vmem:[#allocation2 + $0x1964] ss:$8 sps:$4 sm:$0xff]  }
 0x26d   :  { %7046 = vmatpush1.bf16.msra.mxu1 %v10227_v2  ;;  %v10311_v2 = vld [vmem:[#allocation2 + $0x960] ss:$8 sps:$4 sm:$0xff]  }
 0x26e   :  { %7702 = vmatpush1.bf16.msra.mxu0 %v10230_v3  ;;  %7047 = vmatprep.subr.bf16.mxu1 %v10235_v55  ;;  %v10314_v3 = vld [vmem:[#allocation2 + $0x1960] ss:$8 sps:$4 sm:$0xff]   ;;  %v10319_v55 = vld [vmem:[#allocation2 + $0x974] ss:$8 sps:$4 sm:$0xff]  }
 0x26f   :  { %7703 = vmatprep.subr.bf16.mxu0 %v10238_v4  ;;  %v10322_v4 = vld [vmem:[#allocation2 + $0x1974] ss:$8 sps:$4 sm:$0xff]  }
 0x271   :  { %7048 = vmatpush1.bf16.msra.mxu1 %v10233_v57  ;;  %v10317_v57 = vld [vmem:[#allocation2 + $0x970] ss:$8 sps:$4 sm:$0xff]  }
 0x272   :  { %7704 = vmatpush1.bf16.msra.mxu0 %v10236_v5  ;;  %7049 = vmatprep.subr.bf16.mxu1 %v10241_v6  ;;  %v10320_v5 = vld [vmem:[#allocation2 + $0x1970] ss:$8 sps:$4 sm:$0xff]   ;;  %v10325_v6 = vld [vmem:[#allocation2 + $0x984] ss:$8 sps:$4 sm:$0xff]  }
 0x273   :  { %7705 = vmatprep.subr.bf16.mxu0 %v10244_v7  ;;  %v10328_v7 = vld [vmem:[#allocation2 + $0x1984] ss:$8 sps:$4 sm:$0xff]  }
 0x275   :  { %7050 = vmatpush1.bf16.msra.mxu1 %v10239_v8  ;;  %v10323_v8 = vld [vmem:[#allocation2 + $0x980] ss:$8 sps:$4 sm:$0xff]  }
 0x276   :  { %7706 = vmatpush1.bf16.msra.mxu0 %v10242_v9  ;;  %7051 = vmatprep.subr.bf16.mxu1 %v10247_v10  ;;  %v10326_v9 = vld [vmem:[#allocation2 + $0x1980] ss:$8 sps:$4 sm:$0xff]   ;;  %v10331_v10 = vld [vmem:[#allocation2 + $0x994] ss:$8 sps:$4 sm:$0xff]  }
 0x277   :  { %7707 = vmatprep.subr.bf16.mxu0 %v10250_v11  ;;  %v10334_v11 = vld [vmem:[#allocation2 + $0x1994] ss:$8 sps:$4 sm:$0xff]  }
 0x279   :  { %7052 = vmatpush1.bf16.msra.mxu1 %v10245_v18  ;;  %v10329_v18 = vld [vmem:[#allocation2 + $0x990] ss:$8 sps:$4 sm:$0xff]  }
 0x27a   :  { %7708 = vmatpush1.bf16.msra.mxu0 %v10248_v19  ;;  %7053 = vmatprep.subr.bf16.mxu1 %v10253_v20  ;;  %v10332_v19 = vld [vmem:[#allocation2 + $0x1990] ss:$8 sps:$4 sm:$0xff]   ;;  %v10337_v20 = vld [vmem:[#allocation2 + $0x9a4] ss:$8 sps:$4 sm:$0xff]  }
 0x27b   :  { %7709 = vmatprep.subr.bf16.mxu0 %v10256_v21  ;;  %v10340_v21 = vld [vmem:[#allocation2 + $0x19a4] ss:$8 sps:$4 sm:$0xff]  }
 0x27d   :  { %7054 = vmatpush1.bf16.msra.mxu1 %v10251_v40  ;;  %v10335_v40 = vld [vmem:[#allocation2 + $0x9a0] ss:$8 sps:$4 sm:$0xff]  }
 0x27e   :  { %7710 = vmatpush1.bf16.msra.mxu0 %v10254_v41  ;;  %7055 = vmatprep.subr.bf16.mxu1 %v10259_v52  ;;  %v10338_v41 = vld [vmem:[#allocation2 + $0x19a0] ss:$8 sps:$4 sm:$0xff]   ;;  %v10343_v52 = vld [vmem:[#allocation2 + $0x9b4] ss:$8 sps:$4 sm:$0xff]  }
 0x27f   :  { %7711 = vmatprep.subr.bf16.mxu0 %v10262_v26  ;;  %v10346_v26 = vld [vmem:[#allocation2 + $0x19b4] ss:$8 sps:$4 sm:$0xff]  }
 0x281   :  { %7056 = vmatpush1.bf16.msra.mxu1 %v10257_v12  ;;  %v10341_v12 = vld [vmem:[#allocation2 + $0x9b0] ss:$8 sps:$4 sm:$0xff]  }
 0x282   :  { %7712 = vmatpush1.bf16.msra.mxu0 %v10260_v56  ;;  %7057 = vmatprep.subr.bf16.mxu1 %v10265_v13  ;;  %v10344_v56 = vld [vmem:[#allocation2 + $0x19b0] ss:$8 sps:$4 sm:$0xff]   ;;  %v10349_v13 = vld [vmem:[#allocation2 + $0x9c4] ss:$8 sps:$4 sm:$0xff]  }
 0x283   :  { %7713 = vmatprep.subr.bf16.mxu0 %v10268_v27  ;;  %v10352_v27 = vld [vmem:[#allocation2 + $0x19c4] ss:$8 sps:$4 sm:$0xff]  }
 0x285   :  { %7058 = vmatpush1.bf16.msra.mxu1 %v10263_v28  ;;  %v10347_v28 = vld [vmem:[#allocation2 + $0x9c0] ss:$8 sps:$4 sm:$0xff]  }
 0x286   :  { %7714 = vmatpush1.bf16.msra.mxu0 %v10266_v29  ;;  %7059 = vmatprep.subr.bf16.mxu1 %v10271_v30  ;;  %v10350_v29 = vld [vmem:[#allocation2 + $0x19c0] ss:$8 sps:$4 sm:$0xff]   ;;  %v10355_v30 = vld [vmem:[#allocation2 + $0x9d4] ss:$8 sps:$4 sm:$0xff]  }
 0x287   :  { %7715 = vmatprep.subr.bf16.mxu0 %v10274_v31  ;;  %v10358_v31 = vld [vmem:[#allocation2 + $0x19d4] ss:$8 sps:$4 sm:$0xff]  }
 0x289   :  { %7060 = vmatpush1.bf16.msra.mxu1 %v10269_v14  ;;  %v10353_v14 = vld [vmem:[#allocation2 + $0x9d0] ss:$8 sps:$4 sm:$0xff]  }
 0x28a   :  { %7716 = vmatpush1.bf16.msra.mxu0 %v10272_v15  ;;  %7070 = vmatprep.subr.bf16.mxu1 %v10277_v34  ;;  %v10356_v15 = vld [vmem:[#allocation2 + $0x19d0] ss:$8 sps:$4 sm:$0xff]   ;;  %v10361_v34 = vld [vmem:[#allocation2 + $0x9e4] ss:$8 sps:$4 sm:$0xff]  }
 0x28b   :  { %7726 = vmatprep.subr.bf16.mxu0 %v10280_v35  ;;  %v10364_v35 = vld [vmem:[#allocation2 + $0x19e4] ss:$8 sps:$4 sm:$0xff]  }
 0x28c   :  { %7062 = vmatmul.mubr.bf16.vlgmr.msra.gmra.mrb[0].mxu1 %v11375_v16 }
 0x28d   :  { %7718 = vmatmul.mubr.bf16.vlgmr.msra.gmra.mrb[0].mxu0 %v11379_v17  ;;  %7071 = vmatpush1.bf16.msra.mxu1 %v10275_v43  ;;  %v1223_v43 = vcombine.high %v11342_v38, %v11342_v38  ;;  %v10365_v38 = vld [vmem:[#allocation2 + $0x9f0] ss:$8 sps:$4 sm:$0xff]  }
 0x28e   :  { %7727 = vmatpush1.bf16.msra.mxu0 %v10278_v44  ;;  %7072 = vmatprep.subr.bf16.mxu1 %v10283_v45  ;;  %v1419_v44 = vcombine.high %v11347_v39, %v11347_v39  ;;  %v10359_v45 = vld [vmem:[#allocation2 + $0x9e0] ss:$8 sps:$4 sm:$0xff]   ;;  %v10373_v39 = vld [vmem:[#allocation2 + $0xa04] ss:$8 sps:$4 sm:$0xff]  }
 0x28f   :  { %7728 = vmatprep.subr.bf16.mxu0 %v10286_v46  ;;  %7102 = vmatprep.mubr.bf16.mxu1 %v1270_v24  ;;  %v10362_v46 = vld [vmem:[#allocation2 + $0x19e0] ss:$8 sps:$4 sm:$0xff]   ;;  %v10367_v24 = vld [vmem:[#allocation2 + $0x9f4] ss:$8 sps:$4 sm:$0xff]  }
 0x290   :  { %7758 = vmatprep.mubr.bf16.mxu0 %v1466_v25  ;;  %v10370_v25 = vld [vmem:[#allocation2 + $0x19f4] ss:$8 sps:$4 sm:$0xff]  }
 0x291   :  { %7073 = vmatpush1.bf16.msra.mxu1 %v10281_v22  ;;  %v11392_v22 = vrot.slane %v1223_v43, %v11191_v49  ;;  %v10437_v43 = vld [vmem:[#allocation2 + $0xab0] ss:$8 sps:$4 sm:$0xff]  }
 0x292   :  { %7729 = vmatpush1.bf16.msra.mxu0 %v10284_v23  ;;  %7074 = vmatprep.subr.bf16.mxu1 %v10289_v47  ;;  %v11395_v23 = vrot.slane %v1419_v44, %v11191_v49  ;;  %v10368_v47 = vld [vmem:[#allocation2 + $0x19f0] ss:$8 sps:$4 sm:$0xff]  }
 0x293   :  { %7730 = vmatprep.subr.bf16.mxu0 %v10292_v48  ;;  %v10376_v48 = vld [vmem:[#allocation2 + $0x1a04] ss:$8 sps:$4 sm:$0xff]   ;;  %v10440_v44 = vld [vmem:[#allocation2 + $0x1ab0] ss:$8 sps:$4 sm:$0xff]  }
 0x295   :  { %7075 = vmatpush1.bf16.msra.mxu1 %v10287_v32  ;;  %v1239_v32 = vcombine.high %v11392_v22, %v11392_v22 }
 0x296   :  { %7731 = vmatpush1.bf16.msra.mxu0 %v10290_v36  ;;  %7076 = vmatprep.subr.bf16.mxu1 %v10295_v33  ;;  %v1435_v36 = vcombine.high %v11395_v23, %v11395_v23  ;;  %v1268_v33 = vcombine.high %v11375_v16, %v11375_v16  ;;  %v10377_v16 = vld [vmem:[#allocation2 + $0xa10] ss:$8 sps:$4 sm:$0xff]  }
 0x297   :  { %7732 = vmatprep.subr.bf16.mxu0 %v10298_v50  ;;  %v1464_v50 = vcombine.high %v11379_v17, %v11379_v17  ;;  %v10380_v17 = vld [vmem:[#allocation2 + $0x1a10] ss:$8 sps:$4 sm:$0xff]  }
 0x299   :  { %7077 = vmatpush1.bf16.msra.mxu1 %v10293_v37  ;;  %v10371_v37 = vld [vmem:[#allocation2 + $0xa00] ss:$8 sps:$4 sm:$0xff]  }
 0x29a   :  { %7733 = vmatpush1.bf16.msra.mxu0 %v10296_v51  ;;  %7078 = vmatprep.subr.bf16.mxu1 %v10301_v53  ;;  %v10374_v51 = vld [vmem:[#allocation2 + $0x1a00] ss:$8 sps:$4 sm:$0xff]   ;;  %v10379_v53 = vld [vmem:[#allocation2 + $0xa14] ss:$8 sps:$4 sm:$0xff]  }
 0x29b   :  { %7734 = vmatprep.subr.bf16.mxu0 %v10304_v54  ;;  %v10382_v54 = vld [vmem:[#allocation2 + $0x1a14] ss:$8 sps:$4 sm:$0xff]  }
 0x29d   :  { %7079 = vmatpush1.bf16.msra.mxu1 %v10299_v58  ;;  %v11406_v58 = vrot.slane %v1239_v32, %v11191_v49  ;;  %v10457_v32 = vld [vmem:[#allocation2 + $0xae4] ss:$8 sps:$4 sm:$0xff]  }
 0x29e   :  { %7735 = vmatpush1.bf16.msra.mxu0 %v10302_v59  ;;  %7080 = vmatprep.subr.bf16.mxu1 %v10307_v60  ;;  %v11409_v59 = vrot.slane %v1435_v36, %v11191_v49  ;;  %v10385_v60 = vld [vmem:[#allocation2 + $0xa24] ss:$8 sps:$4 sm:$0xff]  }
 0x29f   :  { %7736 = vmatprep.subr.bf16.mxu0 %v10310_v61  ;;  %v10388_v61 = vld [vmem:[#allocation2 + $0x1a24] ss:$8 sps:$4 sm:$0xff]  }
 0x2a0   :  { %v10460_v36 = vld [vmem:[#allocation2 + $0x1ae4] ss:$8 sps:$4 sm:$0xff]  }
 0x2a1   :  { %7081 = vmatpush1.bf16.msra.mxu1 %v10305_v62  ;;  %v10383_v62 = vld [vmem:[#allocation2 + $0xa20] ss:$8 sps:$4 sm:$0xff]  }
 0x2a2   :  { %7737 = vmatpush1.bf16.msra.mxu0 %v10308_v63  ;;  %7082 = vmatprep.subr.bf16.mxu1 %v10313_v0  ;;  %v10386_v63 = vld [vmem:[#allocation2 + $0x1a20] ss:$8 sps:$4 sm:$0xff]   ;;  %v10391_v0 = vld [vmem:[#allocation2 + $0xa34] ss:$8 sps:$4 sm:$0xff]  }
 0x2a3   :  { %7738 = vmatprep.subr.bf16.mxu0 %v10316_v1  ;;  %v10394_v1 = vld [vmem:[#allocation2 + $0x1a34] ss:$8 sps:$4 sm:$0xff]  }
 0x2a5   :  { %7083 = vmatpush1.bf16.msra.mxu1 %v10311_v2  ;;  %v10389_v2 = vld [vmem:[#allocation2 + $0xa30] ss:$8 sps:$4 sm:$0xff]  }
 0x2a6   :  { %7739 = vmatpush1.bf16.msra.mxu0 %v10314_v3  ;;  %7084 = vmatprep.subr.bf16.mxu1 %v10319_v55  ;;  %v10392_v3 = vld [vmem:[#allocation2 + $0x1a30] ss:$8 sps:$4 sm:$0xff]   ;;  %v10397_v55 = vld [vmem:[#allocation2 + $0xa44] ss:$8 sps:$4 sm:$0xff]  }
 0x2a7   :  { %7740 = vmatprep.subr.bf16.mxu0 %v10322_v4  ;;  %v10400_v4 = vld [vmem:[#allocation2 + $0x1a44] ss:$8 sps:$4 sm:$0xff]  }
 0x2a9   :  { %7085 = vmatpush1.bf16.msra.mxu1 %v10317_v57  ;;  %v10395_v57 = vld [vmem:[#allocation2 + $0xa40] ss:$8 sps:$4 sm:$0xff]  }
 0x2aa   :  { %7741 = vmatpush1.bf16.msra.mxu0 %v10320_v5  ;;  %7086 = vmatprep.subr.bf16.mxu1 %v10325_v6  ;;  %v10398_v5 = vld [vmem:[#allocation2 + $0x1a40] ss:$8 sps:$4 sm:$0xff]   ;;  %v10403_v6 = vld [vmem:[#allocation2 + $0xa54] ss:$8 sps:$4 sm:$0xff]  }
 0x2ab   :  { %7742 = vmatprep.subr.bf16.mxu0 %v10328_v7  ;;  %v10406_v7 = vld [vmem:[#allocation2 + $0x1a54] ss:$8 sps:$4 sm:$0xff]  }
 0x2ad   :  { %7087 = vmatpush1.bf16.msra.mxu1 %v10323_v8  ;;  %v10401_v8 = vld [vmem:[#allocation2 + $0xa50] ss:$8 sps:$4 sm:$0xff]  }
 0x2ae   :  { %7743 = vmatpush1.bf16.msra.mxu0 %v10326_v9  ;;  %7088 = vmatprep.subr.bf16.mxu1 %v10331_v10  ;;  %v10404_v9 = vld [vmem:[#allocation2 + $0x1a50] ss:$8 sps:$4 sm:$0xff]   ;;  %v10409_v10 = vld [vmem:[#allocation2 + $0xa64] ss:$8 sps:$4 sm:$0xff]  }
 0x2af   :  { %7744 = vmatprep.subr.bf16.mxu0 %v10334_v11  ;;  %v10412_v11 = vld [vmem:[#allocation2 + $0x1a64] ss:$8 sps:$4 sm:$0xff]  }
 0x2b1   :  { %7089 = vmatpush1.bf16.msra.mxu1 %v10329_v18  ;;  %v10407_v18 = vld [vmem:[#allocation2 + $0xa60] ss:$8 sps:$4 sm:$0xff]  }
 0x2b2   :  { %7745 = vmatpush1.bf16.msra.mxu0 %v10332_v19  ;;  %7090 = vmatprep.subr.bf16.mxu1 %v10337_v20  ;;  %v10410_v19 = vld [vmem:[#allocation2 + $0x1a60] ss:$8 sps:$4 sm:$0xff]   ;;  %v10415_v20 = vld [vmem:[#allocation2 + $0xa74] ss:$8 sps:$4 sm:$0xff]  }
 0x2b3   :  { %7746 = vmatprep.subr.bf16.mxu0 %v10340_v21  ;;  %v10418_v21 = vld [vmem:[#allocation2 + $0x1a74] ss:$8 sps:$4 sm:$0xff]  }
 0x2b5   :  { %7091 = vmatpush1.bf16.msra.mxu1 %v10335_v40  ;;  %v10413_v40 = vld [vmem:[#allocation2 + $0xa70] ss:$8 sps:$4 sm:$0xff]  }
 0x2b6   :  { %7747 = vmatpush1.bf16.msra.mxu0 %v10338_v41  ;;  %7092 = vmatprep.subr.bf16.mxu1 %v10343_v52  ;;  %v10416_v41 = vld [vmem:[#allocation2 + $0x1a70] ss:$8 sps:$4 sm:$0xff]   ;;  %v10421_v52 = vld [vmem:[#allocation2 + $0xa84] ss:$8 sps:$4 sm:$0xff]  }
 0x2b7   :  { %7748 = vmatprep.subr.bf16.mxu0 %v10346_v26  ;;  %v10424_v26 = vld [vmem:[#allocation2 + $0x1a84] ss:$8 sps:$4 sm:$0xff]  }
 0x2b9   :  { %7093 = vmatpush1.bf16.msra.mxu1 %v10341_v12  ;;  %v10419_v12 = vld [vmem:[#allocation2 + $0xa80] ss:$8 sps:$4 sm:$0xff]  }
 0x2ba   :  { %7749 = vmatpush1.bf16.msra.mxu0 %v10344_v56  ;;  %7094 = vmatprep.subr.bf16.mxu1 %v10349_v13  ;;  %v10422_v56 = vld [vmem:[#allocation2 + $0x1a80] ss:$8 sps:$4 sm:$0xff]   ;;  %v10427_v13 = vld [vmem:[#allocation2 + $0xa94] ss:$8 sps:$4 sm:$0xff]  }
 0x2bb   :  { %7750 = vmatprep.subr.bf16.mxu0 %v10352_v27  ;;  %v10430_v27 = vld [vmem:[#allocation2 + $0x1a94] ss:$8 sps:$4 sm:$0xff]  }
 0x2bd   :  { %7095 = vmatpush1.bf16.msra.mxu1 %v10347_v28  ;;  %v10425_v28 = vld [vmem:[#allocation2 + $0xa90] ss:$8 sps:$4 sm:$0xff]  }
 0x2be   :  { %7751 = vmatpush1.bf16.msra.mxu0 %v10350_v29  ;;  %7096 = vmatprep.subr.bf16.mxu1 %v10355_v30  ;;  %v10428_v29 = vld [vmem:[#allocation2 + $0x1a90] ss:$8 sps:$4 sm:$0xff]   ;;  %v10433_v30 = vld [vmem:[#allocation2 + $0xaa4] ss:$8 sps:$4 sm:$0xff]  }
 0x2bf   :  { %7752 = vmatprep.subr.bf16.mxu0 %v10358_v31  ;;  %v10436_v31 = vld [vmem:[#allocation2 + $0x1aa4] ss:$8 sps:$4 sm:$0xff]  }
 0x2c1   :  { %7097 = vmatpush1.bf16.msra.mxu1 %v10353_v14  ;;  %v10431_v14 = vld [vmem:[#allocation2 + $0xaa0] ss:$8 sps:$4 sm:$0xff]  }
 0x2c2   :  { %7753 = vmatpush1.bf16.msra.mxu0 %v10356_v15  ;;  %7098 = vmatprep.subr.bf16.mxu1 %v10361_v34  ;;  %v10434_v15 = vld [vmem:[#allocation2 + $0x1aa0] ss:$8 sps:$4 sm:$0xff]   ;;  %v10439_v34 = vld [vmem:[#allocation2 + $0xab4] ss:$8 sps:$4 sm:$0xff]  }
 0x2c3   :  { %7754 = vmatprep.subr.bf16.mxu0 %v10364_v35  ;;  %v10442_v35 = vld [vmem:[#allocation2 + $0x1ab4] ss:$8 sps:$4 sm:$0xff]  }
 0x2c5   :  { %7099 = vmatpush1.bf16.msra.mxu1 %v10359_v45  ;;  %v10445_v45 = vld [vmem:[#allocation2 + $0xac4] ss:$8 sps:$4 sm:$0xff]  }
 0x2c6   :  { %7755 = vmatpush1.bf16.msra.mxu0 %v10362_v46  ;;  %7100 = vmatprep.subr.bf16.mxu1 %v10367_v24  ;;  %v10448_v46 = vld [vmem:[#allocation2 + $0x1ac4] ss:$8 sps:$4 sm:$0xff]   ;;  %v10443_v24 = vld [vmem:[#allocation2 + $0xac0] ss:$8 sps:$4 sm:$0xff]  }
 0x2c7   :  { %7756 = vmatprep.subr.bf16.mxu0 %v10370_v25  ;;  %v10446_v25 = vld [vmem:[#allocation2 + $0x1ac0] ss:$8 sps:$4 sm:$0xff]  }
 0x2c9   :  { %7101 = vmatpush1.bf16.msra.mxu1 %v10365_v38  ;;  %v10451_v38 = vld [vmem:[#allocation2 + $0xad4] ss:$8 sps:$4 sm:$0xff]  }
 0x2ca   :  { %7757 = vmatpush1.bf16.msra.mxu0 %v10368_v47  ;;  %7111 = vmatprep.subr.bf16.mxu1 %v10373_v39  ;;  %v10454_v47 = vld [vmem:[#allocation2 + $0x1ad4] ss:$8 sps:$4 sm:$0xff]   ;;  %v10449_v39 = vld [vmem:[#allocation2 + $0xad0] ss:$8 sps:$4 sm:$0xff]  }
 0x2cb   :  { %7767 = vmatprep.subr.bf16.mxu0 %v10376_v48  ;;  %v10452_v48 = vld [vmem:[#allocation2 + $0x1ad0] ss:$8 sps:$4 sm:$0xff]  }
 0x2cc   :  { %7103 = vmatmul.mubr.bf16.vlgmr.msra.gmra.mrb[0].mxu1 %v1268_v33  ;;  %v10455_v33 = vld [vmem:[#allocation2 + $0xae0] ss:$8 sps:$4 sm:$0xff]  }
 0x2cd   :  { %7759 = vmatmul.mubr.bf16.vlgmr.msra.gmra.mrb[0].mxu0 %v1464_v50  ;;  %7112 = vmatpush1.bf16.msra.mxu1 %v10371_v37  ;;  %v10458_v50 = vld [vmem:[#allocation2 + $0x1ae0] ss:$8 sps:$4 sm:$0xff]   ;;  %v10463_v37 = vld [vmem:[#allocation2 + $0xaf4] ss:$8 sps:$4 sm:$0xff]  }
 0x2ce   :  { %7768 = vmatpush1.bf16.msra.mxu0 %v10374_v51  ;;  %7113 = vmatprep.subr.bf16.mxu1 %v10379_v53  ;;  %v10466_v51 = vld [vmem:[#allocation2 + $0x1af4] ss:$8 sps:$4 sm:$0xff]   ;;  %v10461_v53 = vld [vmem:[#allocation2 + $0xaf0] ss:$8 sps:$4 sm:$0xff]  }
 0x2cf   :  { %7769 = vmatprep.subr.bf16.mxu0 %v10382_v54  ;;  %7143 = vmatprep.mubr.bf16.mxu1 %v11406_v58  ;;  %v10464_v54 = vld [vmem:[#allocation2 + $0x1af0] ss:$8 sps:$4 sm:$0xff]  }
 0x2d0   :  { %7799 = vmatprep.mubr.bf16.mxu0 %v11409_v59 }
 0x2d1   :  { %7114 = vmatpush1.bf16.msra.mxu1 %v10377_v16  ;;  %v10470_v16 = vld [vmem:[#allocation2 + $0xb04] ss:$8 sps:$4 sm:$0xff]  }
 0x2d2   :  { %7770 = vmatpush1.bf16.msra.mxu0 %v10380_v17  ;;  %7115 = vmatprep.subr.bf16.mxu1 %v10385_v60  ;;  %v10474_v17 = vld [vmem:[#allocation2 + $0x1b04] ss:$8 sps:$4 sm:$0xff]   ;;  %v11415_v60 = vrot.slane %v11392_v22, %v11191_v49  ;;  %v10475_v22 = vld [vmem:[#allocation2 + $0xb10] ss:$8 sps:$4 sm:$0xff]  }
 0x2d3   :  { %7771 = vmatprep.subr.bf16.mxu0 %v10388_v61  ;;  %v11419_v61 = vrot.slane %v11395_v23, %v11191_v49  ;;  %v10478_v23 = vld [vmem:[#allocation2 + $0x1b10] ss:$8 sps:$4 sm:$0xff]  }
 0x2d5   :  { %7116 = vmatpush1.bf16.msra.mxu1 %v10383_v62  ;;  %v10468_v62 = vld [vmem:[#allocation2 + $0xb00] ss:$8 sps:$4 sm:$0xff]  }
 0x2d6   :  { %7772 = vmatpush1.bf16.msra.mxu0 %v10386_v63  ;;  %7117 = vmatprep.subr.bf16.mxu1 %v10391_v0  ;;  %v10472_v63 = vld [vmem:[#allocation2 + $0x1b00] ss:$8 sps:$4 sm:$0xff]   ;;  %v10477_v0 = vld [vmem:[#allocation2 + $0xb14] ss:$8 sps:$4 sm:$0xff]  }
 0x2d7   :  { %7773 = vmatprep.subr.bf16.mxu0 %v10394_v1  ;;  %v10480_v1 = vld [vmem:[#allocation2 + $0x1b14] ss:$8 sps:$4 sm:$0xff]  }
 0x2d9   :  { %7118 = vmatpush1.bf16.msra.mxu1 %v10389_v2  ;;  %v1271_v2 = vcombine.high %v11406_v58, %v11406_v58  ;;  %v10481_v58 = vld [vmem:[#allocation2 + $0xb20] ss:$8 sps:$4 sm:$0xff]  }
 0x2da   :  { %7774 = vmatpush1.bf16.msra.mxu0 %v10392_v3  ;;  %7119 = vmatprep.subr.bf16.mxu1 %v10397_v55  ;;  %v1467_v3 = vcombine.high %v11409_v59, %v11409_v59  ;;  %v10483_v55 = vld [vmem:[#allocation2 + $0xb24] ss:$8 sps:$4 sm:$0xff]   ;;  %v10489_v59 = vld [vmem:[#allocation2 + $0xb34] ss:$8 sps:$4 sm:$0xff]  }
 0x2db   :  { %7775 = vmatprep.subr.bf16.mxu0 %v10400_v4  ;;  %v10486_v4 = vld [vmem:[#allocation2 + $0x1b24] ss:$8 sps:$4 sm:$0xff]  }
 0x2dd   :  { %7120 = vmatpush1.bf16.msra.mxu1 %v10395_v57  ;;  %v10484_v57 = vld [vmem:[#allocation2 + $0x1b20] ss:$8 sps:$4 sm:$0xff]  }
 0x2de   :  { %7776 = vmatpush1.bf16.msra.mxu0 %v10398_v5  ;;  %7121 = vmatprep.subr.bf16.mxu1 %v10403_v6  ;;  %v10492_v5 = vld [vmem:[#allocation2 + $0x1b34] ss:$8 sps:$4 sm:$0xff]   ;;  %v10487_v6 = vld [vmem:[#allocation2 + $0xb30] ss:$8 sps:$4 sm:$0xff]  }
 0x2df   :  { %7777 = vmatprep.subr.bf16.mxu0 %v10406_v7  ;;  %v10490_v7 = vld [vmem:[#allocation2 + $0x1b30] ss:$8 sps:$4 sm:$0xff]  }
 0x2e1   :  { %7122 = vmatpush1.bf16.msra.mxu1 %v10401_v8  ;;  %v10495_v8 = vld [vmem:[#allocation2 + $0xb44] ss:$8 sps:$4 sm:$0xff]  }
 0x2e2   :  { %7778 = vmatpush1.bf16.msra.mxu0 %v10404_v9  ;;  %7123 = vmatprep.subr.bf16.mxu1 %v10409_v10  ;;  %v10498_v9 = vld [vmem:[#allocation2 + $0x1b44] ss:$8 sps:$4 sm:$0xff]   ;;  %v10493_v10 = vld [vmem:[#allocation2 + $0xb40] ss:$8 sps:$4 sm:$0xff]  }
 0x2e3   :  { %7779 = vmatprep.subr.bf16.mxu0 %v10412_v11  ;;  %v10496_v11 = vld [vmem:[#allocation2 + $0x1b40] ss:$8 sps:$4 sm:$0xff]  }
 0x2e5   :  { %7124 = vmatpush1.bf16.msra.mxu1 %v10407_v18  ;;  %v10501_v18 = vld [vmem:[#allocation2 + $0xb54] ss:$8 sps:$4 sm:$0xff]  }
 0x2e6   :  { %7780 = vmatpush1.bf16.msra.mxu0 %v10410_v19  ;;  %7125 = vmatprep.subr.bf16.mxu1 %v10415_v20  ;;  %v10504_v19 = vld [vmem:[#allocation2 + $0x1b54] ss:$8 sps:$4 sm:$0xff]   ;;  %v10499_v20 = vld [vmem:[#allocation2 + $0xb50] ss:$8 sps:$4 sm:$0xff]  }
 0x2e7   :  { %7781 = vmatprep.subr.bf16.mxu0 %v10418_v21  ;;  %v10502_v21 = vld [vmem:[#allocation2 + $0x1b50] ss:$8 sps:$4 sm:$0xff]  }
 0x2e9   :  { %7126 = vmatpush1.bf16.msra.mxu1 %v10413_v40  ;;  %v10507_v40 = vld [vmem:[#allocation2 + $0xb64] ss:$8 sps:$4 sm:$0xff]  }
 0x2ea   :  { %7782 = vmatpush1.bf16.msra.mxu0 %v10416_v41  ;;  %7127 = vmatprep.subr.bf16.mxu1 %v10421_v52  ;;  %v10510_v41 = vld [vmem:[#allocation2 + $0x1b64] ss:$8 sps:$4 sm:$0xff]   ;;  %v10505_v52 = vld [vmem:[#allocation2 + $0xb60] ss:$8 sps:$4 sm:$0xff]  }
 0x2eb   :  { %7783 = vmatprep.subr.bf16.mxu0 %v10424_v26  ;;  %v10508_v26 = vld [vmem:[#allocation2 + $0x1b60] ss:$8 sps:$4 sm:$0xff]  }
 0x2ed   :  { %7128 = vmatpush1.bf16.msra.mxu1 %v10419_v12  ;;  %v10513_v12 = vld [vmem:[#allocation2 + $0xb74] ss:$8 sps:$4 sm:$0xff]  }
 0x2ee   :  { %7784 = vmatpush1.bf16.msra.mxu0 %v10422_v56  ;;  %7129 = vmatprep.subr.bf16.mxu1 %v10427_v13  ;;  %v10516_v56 = vld [vmem:[#allocation2 + $0x1b74] ss:$8 sps:$4 sm:$0xff]   ;;  %v10511_v13 = vld [vmem:[#allocation2 + $0xb70] ss:$8 sps:$4 sm:$0xff]  }
 0x2ef   :  { %7785 = vmatprep.subr.bf16.mxu0 %v10430_v27  ;;  %v10514_v27 = vld [vmem:[#allocation2 + $0x1b70] ss:$8 sps:$4 sm:$0xff]  }
 0x2f1   :  { %7130 = vmatpush1.bf16.msra.mxu1 %v10425_v28  ;;  %v10519_v28 = vld [vmem:[#allocation2 + $0xb84] ss:$8 sps:$4 sm:$0xff]  }
 0x2f2   :  { %7786 = vmatpush1.bf16.msra.mxu0 %v10428_v29  ;;  %7131 = vmatprep.subr.bf16.mxu1 %v10433_v30  ;;  %v10522_v29 = vld [vmem:[#allocation2 + $0x1b84] ss:$8 sps:$4 sm:$0xff]   ;;  %v10517_v30 = vld [vmem:[#allocation2 + $0xb80] ss:$8 sps:$4 sm:$0xff]  }
 0x2f3   :  { %7787 = vmatprep.subr.bf16.mxu0 %v10436_v31  ;;  %v10520_v31 = vld [vmem:[#allocation2 + $0x1b80] ss:$8 sps:$4 sm:$0xff]  }
 0x2f5   :  { %7132 = vmatpush1.bf16.msra.mxu1 %v10431_v14  ;;  %v10525_v14 = vld [vmem:[#allocation2 + $0xb94] ss:$8 sps:$4 sm:$0xff]  }
 0x2f6   :  { %7788 = vmatpush1.bf16.msra.mxu0 %v10434_v15  ;;  %7133 = vmatprep.subr.bf16.mxu1 %v10439_v34  ;;  %v10528_v15 = vld [vmem:[#allocation2 + $0x1b94] ss:$8 sps:$4 sm:$0xff]   ;;  %v10523_v34 = vld [vmem:[#allocation2 + $0xb90] ss:$8 sps:$4 sm:$0xff]  }
 0x2f7   :  { %7789 = vmatprep.subr.bf16.mxu0 %v10442_v35  ;;  %v10526_v35 = vld [vmem:[#allocation2 + $0x1b90] ss:$8 sps:$4 sm:$0xff]  }
 0x2f9   :  { %7134 = vmatpush1.bf16.msra.mxu1 %v10437_v43  ;;  %v10531_v43 = vld [vmem:[#allocation2 + $0xba4] ss:$8 sps:$4 sm:$0xff]  }
 0x2fa   :  { %7790 = vmatpush1.bf16.msra.mxu0 %v10440_v44  ;;  %7135 = vmatprep.subr.bf16.mxu1 %v10445_v45  ;;  %v10534_v44 = vld [vmem:[#allocation2 + $0x1ba4] ss:$8 sps:$4 sm:$0xff]   ;;  %v10529_v45 = vld [vmem:[#allocation2 + $0xba0] ss:$8 sps:$4 sm:$0xff]  }
 0x2fb   :  { %7791 = vmatprep.subr.bf16.mxu0 %v10448_v46  ;;  %v10532_v46 = vld [vmem:[#allocation2 + $0x1ba0] ss:$8 sps:$4 sm:$0xff]  }
 0x2fd   :  { %7136 = vmatpush1.bf16.msra.mxu1 %v10443_v24  ;;  %v10537_v24 = vld [vmem:[#allocation2 + $0xbb4] ss:$8 sps:$4 sm:$0xff]  }
 0x2fe   :  { %7792 = vmatpush1.bf16.msra.mxu0 %v10446_v25  ;;  %7137 = vmatprep.subr.bf16.mxu1 %v10451_v38  ;;  %v10540_v25 = vld [vmem:[#allocation2 + $0x1bb4] ss:$8 sps:$4 sm:$0xff]   ;;  %v10535_v38 = vld [vmem:[#allocation2 + $0xbb0] ss:$8 sps:$4 sm:$0xff]  }
 0x2ff   :  { %7793 = vmatprep.subr.bf16.mxu0 %v10454_v47  ;;  %v10538_v47 = vld [vmem:[#allocation2 + $0x1bb0] ss:$8 sps:$4 sm:$0xff]  }
 0x301   :  { %7138 = vmatpush1.bf16.msra.mxu1 %v10449_v39  ;;  %v10543_v39 = vld [vmem:[#allocation2 + $0xbc4] ss:$8 sps:$4 sm:$0xff]  }
 0x302   :  { %7794 = vmatpush1.bf16.msra.mxu0 %v10452_v48  ;;  %7139 = vmatprep.subr.bf16.mxu1 %v10457_v32  ;;  %v10546_v48 = vld [vmem:[#allocation2 + $0x1bc4] ss:$8 sps:$4 sm:$0xff]   ;;  %v10541_v32 = vld [vmem:[#allocation2 + $0xbc0] ss:$8 sps:$4 sm:$0xff]  }
 0x303   :  { %7795 = vmatprep.subr.bf16.mxu0 %v10460_v36  ;;  %v10544_v36 = vld [vmem:[#allocation2 + $0x1bc0] ss:$8 sps:$4 sm:$0xff]  }
 0x305   :  { %7140 = vmatpush1.bf16.msra.mxu1 %v10455_v33  ;;  %v10549_v33 = vld [vmem:[#allocation2 + $0xbd4] ss:$8 sps:$4 sm:$0xff]  }
 0x306   :  { %7796 = vmatpush1.bf16.msra.mxu0 %v10458_v50  ;;  %7141 = vmatprep.subr.bf16.mxu1 %v10463_v37  ;;  %v10552_v50 = vld [vmem:[#allocation2 + $0x1bd4] ss:$8 sps:$4 sm:$0xff]   ;;  %v10547_v37 = vld [vmem:[#allocation2 + $0xbd0] ss:$8 sps:$4 sm:$0xff]  }
 0x307   :  { %7797 = vmatprep.subr.bf16.mxu0 %v10466_v51  ;;  %v10550_v51 = vld [vmem:[#allocation2 + $0x1bd0] ss:$8 sps:$4 sm:$0xff]  }
 0x309   :  { %7142 = vmatpush1.bf16.msra.mxu1 %v10461_v53  ;;  %v10555_v53 = vld [vmem:[#allocation2 + $0xbe4] ss:$8 sps:$4 sm:$0xff]  }
 0x30a   :  { %7798 = vmatpush1.bf16.msra.mxu0 %v10464_v54  ;;  %7152 = vmatprep.subr.bf16.mxu1 %v10470_v16  ;;  %v10558_v54 = vld [vmem:[#allocation2 + $0x1be4] ss:$8 sps:$4 sm:$0xff]   ;;  %v11430_v16 = vld [vmem:[%s11533_s0 + $0x18] sm:$0xff] }
 0x30b   :  { %7808 = vmatprep.subr.bf16.mxu0 %v10474_v17  ;;  %v11435_v17 = vld [vmem:[%s11533_s0 + $0x38] sm:$0xff]  ;;  %s11102_s0 = smov [#allocation10]  }
 0x30c   :  { %7144 = vmatmul.mubr.bf16.vlgmr.msra.gmra.mrb[0].mxu1 %v11415_v60  ;;  %s8199_s10 = sshll.u32 %s11102_s0, 4  ;;  %s8200_s10 = int_to_ptr.vmem [resolvable:$true] %s8199_s10 }
 0x30d   :  { %7800 = vmatmul.mubr.bf16.vlgmr.msra.gmra.mrb[0].mxu0 %v11419_v61  ;;  %7153 = vmatpush1.bf16.msra.mxu1 %v10468_v62  ;;  %v10553_v62 = vld [vmem:[#allocation2 + $0xbe0] ss:$8 sps:$4 sm:$0xff]   ;;  %s11063_s11 = scalar_lea.vmem %s8200_s10, 32  ;;  %p11068_p5 = scmp.lt.s32.totalorder %s8200_s10, %s8200_s10 }
 0x30e   :  { %7809 = vmatpush1.bf16.msra.mxu0 %v10472_v63  ;;  %7154 = vmatprep.subr.bf16.mxu1 %v10477_v0  ;;  %v10556_v63 = vld [vmem:[#allocation2 + $0x1be0] ss:$8 sps:$4 sm:$0xff]   ;;  %v10561_v0 = vld [vmem:[#allocation2 + $0xbf4] ss:$8 sps:$4 sm:$0xff]   ;;  %p11064_p4 = scmp.ne.s32.totalorder %s8200_s10, %s11063_s11  ;;  %p11069_p6 = scmp.lt.s32.totalorder %s11063_s11, %s11063_s11 }
 0x30f   :  { %7810 = vmatprep.subr.bf16.mxu0 %v10480_v1  ;;  %7184 = vmatprep.mubr.bf16.mxu1 %v1271_v2  ;;  %v10564_v1 = vld [vmem:[#allocation2 + $0x1bf4] ss:$8 sps:$4 sm:$0xff]   ;;  %v11439_v2 = vrot.slane %v11430_v16, %v11191_v49 }
 0x310   :  { %7840 = vmatprep.mubr.bf16.mxu0 %v1467_v3  ;;  %v11443_v3 = vrot.slane %v11435_v17, %v11191_v49  ;;  %p11070_p7 = por %p11069_p6, %p11068_p5 }
 0x311   :  { %7155 = vmatpush1.bf16.msra.mxu1 %v10475_v22  ;;  %v10559_v22 = vld [vmem:[#allocation2 + $0xbf0] ss:$8 sps:$4 sm:$0xff]  }
 0x312   :  { %7811 = vmatpush1.bf16.msra.mxu0 %v10478_v23  ;;  %7156 = vmatprep.subr.bf16.mxu1 %v10483_v55  ;;  %v10562_v23 = vld [vmem:[#allocation2 + $0x1bf0] ss:$8 sps:$4 sm:$0xff]   ;;  %v10567_v55 = vld [vmem:[#allocation2 + $0xc04] ss:$8 sps:$4 sm:$0xff]   ;;  %p11071_p8 = pnand %p11070_p7, %p11064_p4 }
 0x313   :  { %7812 = vmatprep.subr.bf16.mxu0 %v10486_v4  ;;  %v10570_v4 = vld [vmem:[#allocation2 + $0x1c04] ss:$8 sps:$4 sm:$0xff]  }
 0x315   :  { %7157 = vmatpush1.bf16.msra.mxu1 %v10481_v58  ;;  %v1287_v58 = vcombine.high %v11439_v2, %v11439_v2 }
 0x316   :  { %7813 = vmatpush1.bf16.msra.mxu0 %v10484_v57  ;;  %7158 = vmatprep.subr.bf16.mxu1 %v10489_v59  ;;  %v1483_v57 = vcombine.high %v11443_v3, %v11443_v3  ;;  %v1269_v59 = vcombine.high %v11415_v60, %v11415_v60  ;;  %v10571_v60 = vld [vmem:[#allocation2 + $0xc10] ss:$8 sps:$4 sm:$0xff]  }
 0x317   :  { %7814 = vmatprep.subr.bf16.mxu0 %v10492_v5  ;;  %v1465_v5 = vcombine.high %v11419_v61, %v11419_v61  ;;  %v10574_v61 = vld [vmem:[#allocation2 + $0x1c10] ss:$8 sps:$4 sm:$0xff]  }
 0x319   :  { %7159 = vmatpush1.bf16.msra.mxu1 %v10487_v6  ;;  %v10565_v6 = vld [vmem:[#allocation2 + $0xc00] ss:$8 sps:$4 sm:$0xff]  }
 0x31a   :  { %7815 = vmatpush1.bf16.msra.mxu0 %v10490_v7  ;;  %7160 = vmatprep.subr.bf16.mxu1 %v10495_v8  ;;  %v10568_v7 = vld [vmem:[#allocation2 + $0x1c00] ss:$8 sps:$4 sm:$0xff]   ;;  %v10573_v8 = vld [vmem:[#allocation2 + $0xc14] ss:$8 sps:$4 sm:$0xff]  }
 0x31b   :  { %7816 = vmatprep.subr.bf16.mxu0 %v10498_v9  ;;  %v10576_v9 = vld [vmem:[#allocation2 + $0x1c14] ss:$8 sps:$4 sm:$0xff]  }
 0x31d   :  { %7161 = vmatpush1.bf16.msra.mxu1 %v10493_v10  ;;  %v11454_v10 = vrot.slane %v1287_v58, %v11191_v49  ;;  %v10643_v58 = vld [vmem:[#allocation2 + $0xcd0] ss:$8 sps:$4 sm:$0xff]  }
 0x31e   :  { %7817 = vmatpush1.bf16.msra.mxu0 %v10496_v11  ;;  %7162 = vmatprep.subr.bf16.mxu1 %v10501_v18  ;;  %v11457_v11 = vrot.slane %v1483_v57, %v11191_v49  ;;  %v10579_v18 = vld [vmem:[#allocation2 + $0xc24] ss:$8 sps:$4 sm:$0xff]   ;;  %v10646_v57 = vld [vmem:[#allocation2 + $0x1cd0] ss:$8 sps:$4 sm:$0xff]  }
 0x31f   :  { %7818 = vmatprep.subr.bf16.mxu0 %v10504_v19  ;;  %v10582_v19 = vld [vmem:[#allocation2 + $0x1c24] ss:$8 sps:$4 sm:$0xff]  }
 0x321   :  { %7163 = vmatpush1.bf16.msra.mxu1 %v10499_v20  ;;  %v10577_v20 = vld [vmem:[#allocation2 + $0xc20] ss:$8 sps:$4 sm:$0xff]  }
 0x322   :  { %7819 = vmatpush1.bf16.msra.mxu0 %v10502_v21  ;;  %7164 = vmatprep.subr.bf16.mxu1 %v10507_v40  ;;  %v10580_v21 = vld [vmem:[#allocation2 + $0x1c20] ss:$8 sps:$4 sm:$0xff]   ;;  %v10585_v40 = vld [vmem:[#allocation2 + $0xc34] ss:$8 sps:$4 sm:$0xff]  }
 0x323   :  { %7820 = vmatprep.subr.bf16.mxu0 %v10510_v41  ;;  %v10588_v41 = vld [vmem:[#allocation2 + $0x1c34] ss:$8 sps:$4 sm:$0xff]  }
 0x325   :  { %7165 = vmatpush1.bf16.msra.mxu1 %v10505_v52  ;;  %v10583_v52 = vld [vmem:[#allocation2 + $0xc30] ss:$8 sps:$4 sm:$0xff]  }
 0x326   :  { %7821 = vmatpush1.bf16.msra.mxu0 %v10508_v26  ;;  %7166 = vmatprep.subr.bf16.mxu1 %v10513_v12  ;;  %v10586_v26 = vld [vmem:[#allocation2 + $0x1c30] ss:$8 sps:$4 sm:$0xff]   ;;  %v10591_v12 = vld [vmem:[#allocation2 + $0xc44] ss:$8 sps:$4 sm:$0xff]  }
 0x327   :  { %7822 = vmatprep.subr.bf16.mxu0 %v10516_v56  ;;  %v10594_v56 = vld [vmem:[#allocation2 + $0x1c44] ss:$8 sps:$4 sm:$0xff]  }
 0x329   :  { %7167 = vmatpush1.bf16.msra.mxu1 %v10511_v13  ;;  %v10589_v13 = vld [vmem:[#allocation2 + $0xc40] ss:$8 sps:$4 sm:$0xff]  }
 0x32a   :  { %7823 = vmatpush1.bf16.msra.mxu0 %v10514_v27  ;;  %7168 = vmatprep.subr.bf16.mxu1 %v10519_v28  ;;  %v10592_v27 = vld [vmem:[#allocation2 + $0x1c40] ss:$8 sps:$4 sm:$0xff]   ;;  %v10597_v28 = vld [vmem:[#allocation2 + $0xc54] ss:$8 sps:$4 sm:$0xff]  }
 0x32b   :  { %7824 = vmatprep.subr.bf16.mxu0 %v10522_v29  ;;  %v10600_v29 = vld [vmem:[#allocation2 + $0x1c54] ss:$8 sps:$4 sm:$0xff]  }
 0x32d   :  { %7169 = vmatpush1.bf16.msra.mxu1 %v10517_v30  ;;  %v10595_v30 = vld [vmem:[#allocation2 + $0xc50] ss:$8 sps:$4 sm:$0xff]  }
 0x32e   :  { %7825 = vmatpush1.bf16.msra.mxu0 %v10520_v31  ;;  %7170 = vmatprep.subr.bf16.mxu1 %v10525_v14  ;;  %v10598_v31 = vld [vmem:[#allocation2 + $0x1c50] ss:$8 sps:$4 sm:$0xff]   ;;  %v10603_v14 = vld [vmem:[#allocation2 + $0xc64] ss:$8 sps:$4 sm:$0xff]  }
 0x32f   :  { %7826 = vmatprep.subr.bf16.mxu0 %v10528_v15  ;;  %v10606_v15 = vld [vmem:[#allocation2 + $0x1c64] ss:$8 sps:$4 sm:$0xff]  }
 0x331   :  { %7171 = vmatpush1.bf16.msra.mxu1 %v10523_v34  ;;  %v10601_v34 = vld [vmem:[#allocation2 + $0xc60] ss:$8 sps:$4 sm:$0xff]  }
 0x332   :  { %7827 = vmatpush1.bf16.msra.mxu0 %v10526_v35  ;;  %7172 = vmatprep.subr.bf16.mxu1 %v10531_v43  ;;  %v10604_v35 = vld [vmem:[#allocation2 + $0x1c60] ss:$8 sps:$4 sm:$0xff]   ;;  %v10609_v43 = vld [vmem:[#allocation2 + $0xc74] ss:$8 sps:$4 sm:$0xff]  }
 0x333   :  { %7828 = vmatprep.subr.bf16.mxu0 %v10534_v44  ;;  %v10612_v44 = vld [vmem:[#allocation2 + $0x1c74] ss:$8 sps:$4 sm:$0xff]  }
 0x335   :  { %7173 = vmatpush1.bf16.msra.mxu1 %v10529_v45  ;;  %v10607_v45 = vld [vmem:[#allocation2 + $0xc70] ss:$8 sps:$4 sm:$0xff]  }
 0x336   :  { %7829 = vmatpush1.bf16.msra.mxu0 %v10532_v46  ;;  %7174 = vmatprep.subr.bf16.mxu1 %v10537_v24  ;;  %v10610_v46 = vld [vmem:[#allocation2 + $0x1c70] ss:$8 sps:$4 sm:$0xff]   ;;  %v10615_v24 = vld [vmem:[#allocation2 + $0xc84] ss:$8 sps:$4 sm:$0xff]  }
 0x337   :  { %7830 = vmatprep.subr.bf16.mxu0 %v10540_v25  ;;  %v10618_v25 = vld [vmem:[#allocation2 + $0x1c84] ss:$8 sps:$4 sm:$0xff]  }
 0x339   :  { %7175 = vmatpush1.bf16.msra.mxu1 %v10535_v38  ;;  %v10613_v38 = vld [vmem:[#allocation2 + $0xc80] ss:$8 sps:$4 sm:$0xff]  }
 0x33a   :  { %7831 = vmatpush1.bf16.msra.mxu0 %v10538_v47  ;;  %7176 = vmatprep.subr.bf16.mxu1 %v10543_v39  ;;  %v10616_v47 = vld [vmem:[#allocation2 + $0x1c80] ss:$8 sps:$4 sm:$0xff]   ;;  %v10621_v39 = vld [vmem:[#allocation2 + $0xc94] ss:$8 sps:$4 sm:$0xff]  }
 0x33b   :  { %7832 = vmatprep.subr.bf16.mxu0 %v10546_v48  ;;  %v10624_v48 = vld [vmem:[#allocation2 + $0x1c94] ss:$8 sps:$4 sm:$0xff]  }
 0x33d   :  { %7177 = vmatpush1.bf16.msra.mxu1 %v10541_v32  ;;  %v10619_v32 = vld [vmem:[#allocation2 + $0xc90] ss:$8 sps:$4 sm:$0xff]  }
 0x33e   :  { %7833 = vmatpush1.bf16.msra.mxu0 %v10544_v36  ;;  %7178 = vmatprep.subr.bf16.mxu1 %v10549_v33  ;;  %v10622_v36 = vld [vmem:[#allocation2 + $0x1c90] ss:$8 sps:$4 sm:$0xff]   ;;  %v10627_v33 = vld [vmem:[#allocation2 + $0xca4] ss:$8 sps:$4 sm:$0xff]  }
 0x33f   :  { %7834 = vmatprep.subr.bf16.mxu0 %v10552_v50  ;;  %v10630_v50 = vld [vmem:[#allocation2 + $0x1ca4] ss:$8 sps:$4 sm:$0xff]  }
 0x341   :  { %7179 = vmatpush1.bf16.msra.mxu1 %v10547_v37  ;;  %v10625_v37 = vld [vmem:[#allocation2 + $0xca0] ss:$8 sps:$4 sm:$0xff]  }
 0x342   :  { %7835 = vmatpush1.bf16.msra.mxu0 %v10550_v51  ;;  %7180 = vmatprep.subr.bf16.mxu1 %v10555_v53  ;;  %v10628_v51 = vld [vmem:[#allocation2 + $0x1ca0] ss:$8 sps:$4 sm:$0xff]   ;;  %v10633_v53 = vld [vmem:[#allocation2 + $0xcb4] ss:$8 sps:$4 sm:$0xff]  }
 0x343   :  { %7836 = vmatprep.subr.bf16.mxu0 %v10558_v54  ;;  %v10636_v54 = vld [vmem:[#allocation2 + $0x1cb4] ss:$8 sps:$4 sm:$0xff]  }
 0x345   :  { %7181 = vmatpush1.bf16.msra.mxu1 %v10553_v62  ;;  %v10631_v62 = vld [vmem:[#allocation2 + $0xcb0] ss:$8 sps:$4 sm:$0xff]  }
 0x346   :  { %7837 = vmatpush1.bf16.msra.mxu0 %v10556_v63  ;;  %7182 = vmatprep.subr.bf16.mxu1 %v10561_v0  ;;  %v10634_v63 = vld [vmem:[#allocation2 + $0x1cb0] ss:$8 sps:$4 sm:$0xff]   ;;  %v10639_v0 = vld [vmem:[#allocation2 + $0xcc4] ss:$8 sps:$4 sm:$0xff]  }
 0x347   :  { %7838 = vmatprep.subr.bf16.mxu0 %v10564_v1  ;;  %v10642_v1 = vld [vmem:[#allocation2 + $0x1cc4] ss:$8 sps:$4 sm:$0xff]  }
 0x349   :  { %7183 = vmatpush1.bf16.msra.mxu1 %v10559_v22  ;;  %v10637_v22 = vld [vmem:[#allocation2 + $0xcc0] ss:$8 sps:$4 sm:$0xff]  }
 0x34a   :  { %7839 = vmatpush1.bf16.msra.mxu0 %v10562_v23  ;;  %7193 = vmatprep.subr.bf16.mxu1 %v10567_v55  ;;  %v10640_v23 = vld [vmem:[#allocation2 + $0x1cc0] ss:$8 sps:$4 sm:$0xff]   ;;  %v10645_v55 = vld [vmem:[#allocation2 + $0xcd4] ss:$8 sps:$4 sm:$0xff]  }
 0x34b   :  { %7849 = vmatprep.subr.bf16.mxu0 %v10570_v4  ;;  %v10648_v4 = vld [vmem:[#allocation2 + $0x1cd4] ss:$8 sps:$4 sm:$0xff]  }
 0x34c   :  { %7185 = vmatmul.mubr.bf16.vlgmr.msra.gmra.mrb[0].mxu1 %v1269_v59  ;;  %v10651_v59 = vld [vmem:[#allocation2 + $0xce4] ss:$8 sps:$4 sm:$0xff]  }
 0x34d   :  { %7841 = vmatmul.mubr.bf16.vlgmr.msra.gmra.mrb[0].mxu0 %v1465_v5  ;;  %7194 = vmatpush1.bf16.msra.mxu1 %v10565_v6  ;;  %v10654_v5 = vld [vmem:[#allocation2 + $0x1ce4] ss:$8 sps:$4 sm:$0xff]   ;;  %v10649_v6 = vld [vmem:[#allocation2 + $0xce0] ss:$8 sps:$4 sm:$0xff]  }
 0x34e   :  { %7850 = vmatpush1.bf16.msra.mxu0 %v10568_v7  ;;  %7195 = vmatprep.subr.bf16.mxu1 %v10573_v8  ;;  %v10652_v7 = vld [vmem:[#allocation2 + $0x1ce0] ss:$8 sps:$4 sm:$0xff]   ;;  %v10657_v8 = vld [vmem:[#allocation2 + $0xcf4] ss:$8 sps:$4 sm:$0xff]  }
 0x34f   :  { %7851 = vmatprep.subr.bf16.mxu0 %v10576_v9  ;;  %7225 = vmatprep.mubr.bf16.mxu1 %v11454_v10  ;;  %v10660_v9 = vld [vmem:[#allocation2 + $0x1cf4] ss:$8 sps:$4 sm:$0xff]  }
 0x350   :  { %7881 = vmatprep.mubr.bf16.mxu0 %v11457_v11 }
 0x351   :  { %7196 = vmatpush1.bf16.msra.mxu1 %v10571_v60  ;;  %v10655_v60 = vld [vmem:[#allocation2 + $0xcf0] ss:$8 sps:$4 sm:$0xff]  }
 0x352   :  { %7852 = vmatpush1.bf16.msra.mxu0 %v10574_v61  ;;  %7197 = vmatprep.subr.bf16.mxu1 %v10579_v18  ;;  %v10658_v61 = vld [vmem:[#allocation2 + $0x1cf0] ss:$8 sps:$4 sm:$0xff]   ;;  %v10663_v18 = vld [vmem:[#allocation2 + $0xd04] ss:$8 sps:$4 sm:$0xff]  }
 0x353   :  { %7853 = vmatprep.subr.bf16.mxu0 %v10582_v19  ;;  %v10666_v19 = vld [vmem:[#allocation2 + $0x1d04] ss:$8 sps:$4 sm:$0xff]  }
 0x355   :  { %7198 = vmatpush1.bf16.msra.mxu1 %v10577_v20  ;;  %v11463_v20 = vrot.slane %v11439_v2, %v11191_v49  ;;  %v10667_v2 = vld [vmem:[#allocation2 + $0xd10] ss:$8 sps:$4 sm:$0xff]  }
 0x356   :  { %7854 = vmatpush1.bf16.msra.mxu0 %v10580_v21  ;;  %7199 = vmatprep.subr.bf16.mxu1 %v10585_v40  ;;  %v11467_v21 = vrot.slane %v11443_v3, %v11191_v49  ;;  %v10661_v40 = vld [vmem:[#allocation2 + $0xd00] ss:$8 sps:$4 sm:$0xff]   ;;  %v10670_v3 = vld [vmem:[#allocation2 + $0x1d10] ss:$8 sps:$4 sm:$0xff]  }
 0x357   :  { %7855 = vmatprep.subr.bf16.mxu0 %v10588_v41  ;;  %v10664_v41 = vld [vmem:[#allocation2 + $0x1d00] ss:$8 sps:$4 sm:$0xff]  }
 0x359   :  { %7200 = vmatpush1.bf16.msra.mxu1 %v10583_v52  ;;  %v10669_v52 = vld [vmem:[#allocation2 + $0xd14] ss:$8 sps:$4 sm:$0xff]  }
 0x35a   :  { %7856 = vmatpush1.bf16.msra.mxu0 %v10586_v26  ;;  %7201 = vmatprep.subr.bf16.mxu1 %v10591_v12  ;;  %v10672_v26 = vld [vmem:[#allocation2 + $0x1d14] ss:$8 sps:$4 sm:$0xff]   ;;  %v1319_v12 = vcombine.high %v11454_v10, %v11454_v10  ;;  %v10673_v10 = vld [vmem:[#allocation2 + $0xd20] ss:$8 sps:$4 sm:$0xff]  }
 0x35b   :  { %7857 = vmatprep.subr.bf16.mxu0 %v10594_v56  ;;  %v1515_v56 = vcombine.high %v11457_v11, %v11457_v11  ;;  %v10681_v11 = vld [vmem:[#allocation2 + $0xd34] ss:$8 sps:$4 sm:$0xff]  }
 0x35d   :  { %7202 = vmatpush1.bf16.msra.mxu1 %v10589_v13  ;;  %v10675_v13 = vld [vmem:[#allocation2 + $0xd24] ss:$8 sps:$4 sm:$0xff]  }
 0x35e   :  { %7858 = vmatpush1.bf16.msra.mxu0 %v10592_v27  ;;  %7203 = vmatprep.subr.bf16.mxu1 %v10597_v28  ;;  %v10678_v27 = vld [vmem:[#allocation2 + $0x1d24] ss:$8 sps:$4 sm:$0xff]   ;;  %v10676_v28 = vld [vmem:[#allocation2 + $0x1d20] ss:$8 sps:$4 sm:$0xff]  }
 0x35f   :  { %7859 = vmatprep.subr.bf16.mxu0 %v10600_v29  ;;  %v10684_v29 = vld [vmem:[#allocation2 + $0x1d34] ss:$8 sps:$4 sm:$0xff]  }
 0x361   :  { %7204 = vmatpush1.bf16.msra.mxu1 %v10595_v30  ;;  %v10679_v30 = vld [vmem:[#allocation2 + $0xd30] ss:$8 sps:$4 sm:$0xff]  }
 0x362   :  { %7860 = vmatpush1.bf16.msra.mxu0 %v10598_v31  ;;  %7205 = vmatprep.subr.bf16.mxu1 %v10603_v14  ;;  %v10682_v31 = vld [vmem:[#allocation2 + $0x1d30] ss:$8 sps:$4 sm:$0xff]   ;;  %v10687_v14 = vld [vmem:[#allocation2 + $0xd44] ss:$8 sps:$4 sm:$0xff]  }
 0x363   :  { %7861 = vmatprep.subr.bf16.mxu0 %v10606_v15  ;;  %v10690_v15 = vld [vmem:[#allocation2 + $0x1d44] ss:$8 sps:$4 sm:$0xff]  }
 0x365   :  { %7206 = vmatpush1.bf16.msra.mxu1 %v10601_v34  ;;  %v10685_v34 = vld [vmem:[#allocation2 + $0xd40] ss:$8 sps:$4 sm:$0xff]  }
 0x366   :  { %7862 = vmatpush1.bf16.msra.mxu0 %v10604_v35  ;;  %7207 = vmatprep.subr.bf16.mxu1 %v10609_v43  ;;  %v10688_v35 = vld [vmem:[#allocation2 + $0x1d40] ss:$8 sps:$4 sm:$0xff]   ;;  %v10693_v43 = vld [vmem:[#allocation2 + $0xd54] ss:$8 sps:$4 sm:$0xff]  }
 0x367   :  { %7863 = vmatprep.subr.bf16.mxu0 %v10612_v44  ;;  %v10696_v44 = vld [vmem:[#allocation2 + $0x1d54] ss:$8 sps:$4 sm:$0xff]  }
 0x369   :  { %7208 = vmatpush1.bf16.msra.mxu1 %v10607_v45  ;;  %v10691_v45 = vld [vmem:[#allocation2 + $0xd50] ss:$8 sps:$4 sm:$0xff]  }
 0x36a   :  { %7864 = vmatpush1.bf16.msra.mxu0 %v10610_v46  ;;  %7209 = vmatprep.subr.bf16.mxu1 %v10615_v24  ;;  %v10694_v46 = vld [vmem:[#allocation2 + $0x1d50] ss:$8 sps:$4 sm:$0xff]   ;;  %v10699_v24 = vld [vmem:[#allocation2 + $0xd64] ss:$8 sps:$4 sm:$0xff]  }
 0x36b   :  { %7865 = vmatprep.subr.bf16.mxu0 %v10618_v25  ;;  %v10702_v25 = vld [vmem:[#allocation2 + $0x1d64] ss:$8 sps:$4 sm:$0xff]  }
 0x36d   :  { %7210 = vmatpush1.bf16.msra.mxu1 %v10613_v38  ;;  %v10697_v38 = vld [vmem:[#allocation2 + $0xd60] ss:$8 sps:$4 sm:$0xff]  }
 0x36e   :  { %7866 = vmatpush1.bf16.msra.mxu0 %v10616_v47  ;;  %7211 = vmatprep.subr.bf16.mxu1 %v10621_v39  ;;  %v10700_v47 = vld [vmem:[#allocation2 + $0x1d60] ss:$8 sps:$4 sm:$0xff]   ;;  %v10705_v39 = vld [vmem:[#allocation2 + $0xd74] ss:$8 sps:$4 sm:$0xff]  }
 0x36f   :  { %7867 = vmatprep.subr.bf16.mxu0 %v10624_v48  ;;  %v10708_v48 = vld [vmem:[#allocation2 + $0x1d74] ss:$8 sps:$4 sm:$0xff]  }
 0x371   :  { %7212 = vmatpush1.bf16.msra.mxu1 %v10619_v32  ;;  %v10703_v32 = vld [vmem:[#allocation2 + $0xd70] ss:$8 sps:$4 sm:$0xff]  }
 0x372   :  { %7868 = vmatpush1.bf16.msra.mxu0 %v10622_v36  ;;  %7213 = vmatprep.subr.bf16.mxu1 %v10627_v33  ;;  %v10706_v36 = vld [vmem:[#allocation2 + $0x1d70] ss:$8 sps:$4 sm:$0xff]   ;;  %v10711_v33 = vld [vmem:[#allocation2 + $0xd84] ss:$8 sps:$4 sm:$0xff]  }
 0x373   :  { %7869 = vmatprep.subr.bf16.mxu0 %v10630_v50  ;;  %v10714_v50 = vld [vmem:[#allocation2 + $0x1d84] ss:$8 sps:$4 sm:$0xff]  }
 0x375   :  { %7214 = vmatpush1.bf16.msra.mxu1 %v10625_v37  ;;  %v10709_v37 = vld [vmem:[#allocation2 + $0xd80] ss:$8 sps:$4 sm:$0xff]  }
 0x376   :  { %7870 = vmatpush1.bf16.msra.mxu0 %v10628_v51  ;;  %7215 = vmatprep.subr.bf16.mxu1 %v10633_v53  ;;  %v10712_v51 = vld [vmem:[#allocation2 + $0x1d80] ss:$8 sps:$4 sm:$0xff]   ;;  %v10717_v53 = vld [vmem:[#allocation2 + $0xd94] ss:$8 sps:$4 sm:$0xff]  }
 0x377   :  { %7871 = vmatprep.subr.bf16.mxu0 %v10636_v54  ;;  %v10720_v54 = vld [vmem:[#allocation2 + $0x1d94] ss:$8 sps:$4 sm:$0xff]  }
 0x379   :  { %7216 = vmatpush1.bf16.msra.mxu1 %v10631_v62  ;;  %v10715_v62 = vld [vmem:[#allocation2 + $0xd90] ss:$8 sps:$4 sm:$0xff]  }
 0x37a   :  { %7872 = vmatpush1.bf16.msra.mxu0 %v10634_v63  ;;  %7217 = vmatprep.subr.bf16.mxu1 %v10639_v0  ;;  %v10718_v63 = vld [vmem:[#allocation2 + $0x1d90] ss:$8 sps:$4 sm:$0xff]   ;;  %v10723_v0 = vld [vmem:[#allocation2 + $0xda4] ss:$8 sps:$4 sm:$0xff]  }
 0x37b   :  { %7873 = vmatprep.subr.bf16.mxu0 %v10642_v1  ;;  %v10726_v1 = vld [vmem:[#allocation2 + $0x1da4] ss:$8 sps:$4 sm:$0xff]  }
 0x37d   :  { %7218 = vmatpush1.bf16.msra.mxu1 %v10637_v22  ;;  %v10721_v22 = vld [vmem:[#allocation2 + $0xda0] ss:$8 sps:$4 sm:$0xff]  }
 0x37e   :  { %7874 = vmatpush1.bf16.msra.mxu0 %v10640_v23  ;;  %7219 = vmatprep.subr.bf16.mxu1 %v10645_v55  ;;  %v10724_v23 = vld [vmem:[#allocation2 + $0x1da0] ss:$8 sps:$4 sm:$0xff]   ;;  %v10729_v55 = vld [vmem:[#allocation2 + $0xdb4] ss:$8 sps:$4 sm:$0xff]  }
 0x37f   :  { %7875 = vmatprep.subr.bf16.mxu0 %v10648_v4  ;;  %v10732_v4 = vld [vmem:[#allocation2 + $0x1db4] ss:$8 sps:$4 sm:$0xff]  }
 0x381   :  { %7220 = vmatpush1.bf16.msra.mxu1 %v10643_v58  ;;  %v10727_v58 = vld [vmem:[#allocation2 + $0xdb0] ss:$8 sps:$4 sm:$0xff]  }
 0x382   :  { %7876 = vmatpush1.bf16.msra.mxu0 %v10646_v57  ;;  %7221 = vmatprep.subr.bf16.mxu1 %v10651_v59  ;;  %v10730_v57 = vld [vmem:[#allocation2 + $0x1db0] ss:$8 sps:$4 sm:$0xff]   ;;  %v10735_v59 = vld [vmem:[#allocation2 + $0xdc4] ss:$8 sps:$4 sm:$0xff]  }
 0x383   :  { %7877 = vmatprep.subr.bf16.mxu0 %v10654_v5  ;;  %v10738_v5 = vld [vmem:[#allocation2 + $0x1dc4] ss:$8 sps:$4 sm:$0xff]  }
 0x385   :  { %7222 = vmatpush1.bf16.msra.mxu1 %v10649_v6  ;;  %v10733_v6 = vld [vmem:[#allocation2 + $0xdc0] ss:$8 sps:$4 sm:$0xff]  }
 0x386   :  { %7878 = vmatpush1.bf16.msra.mxu0 %v10652_v7  ;;  %7223 = vmatprep.subr.bf16.mxu1 %v10657_v8  ;;  %v10736_v7 = vld [vmem:[#allocation2 + $0x1dc0] ss:$8 sps:$4 sm:$0xff]   ;;  %v10741_v8 = vld [vmem:[#allocation2 + $0xdd4] ss:$8 sps:$4 sm:$0xff]  }
 0x387   :  { %7879 = vmatprep.subr.bf16.mxu0 %v10660_v9  ;;  %v10744_v9 = vld [vmem:[#allocation2 + $0x1dd4] ss:$8 sps:$4 sm:$0xff]  }
 0x389   :  { %7224 = vmatpush1.bf16.msra.mxu1 %v10655_v60  ;;  %v10739_v60 = vld [vmem:[#allocation2 + $0xdd0] ss:$8 sps:$4 sm:$0xff]  }
 0x38a   :  { %7880 = vmatpush1.bf16.msra.mxu0 %v10658_v61  ;;  %7234 = vmatprep.subr.bf16.mxu1 %v10663_v18  ;;  %v10742_v61 = vld [vmem:[#allocation2 + $0x1dd0] ss:$8 sps:$4 sm:$0xff]   ;;  %v10747_v18 = vld [vmem:[#allocation2 + $0xde4] ss:$8 sps:$4 sm:$0xff]  }
 0x38b   :  { %7890 = vmatprep.subr.bf16.mxu0 %v10666_v19  ;;  %v10750_v19 = vld [vmem:[#allocation2 + $0x1de4] ss:$8 sps:$4 sm:$0xff]  }
 0x38c   :  { %7226 = vmatmul.mubr.bf16.vlgmr.msra.gmra.mrb[0].mxu1 %v11463_v20 }
 0x38d   :  { %7882 = vmatmul.mubr.bf16.vlgmr.msra.gmra.mrb[0].mxu0 %v11467_v21  ;;  %7235 = vmatpush1.bf16.msra.mxu1 %v10661_v40  ;;  %v1272_v40 = vcombine.high %v11430_v16, %v11430_v16  ;;  %v10751_v16 = vld [vmem:[#allocation2 + $0xdf0] ss:$8 sps:$4 sm:$0xff]  }
 0x38e   :  { %7891 = vmatpush1.bf16.msra.mxu0 %v10664_v41  ;;  %7236 = vmatprep.subr.bf16.mxu1 %v10669_v52  ;;  %v1468_v41 = vcombine.high %v11435_v17, %v11435_v17  ;;  %v10745_v52 = vld [vmem:[#allocation2 + $0xde0] ss:$8 sps:$4 sm:$0xff]   ;;  %v10759_v17 = vld [vmem:[#allocation2 + $0xe04] ss:$8 sps:$4 sm:$0xff]  }
 0x38f   :  { %7892 = vmatprep.subr.bf16.mxu0 %v10672_v26  ;;  %7266 = vmatprep.mubr.bf16.mxu1 %v1319_v12  ;;  %v10748_v26 = vld [vmem:[#allocation2 + $0x1de0] ss:$8 sps:$4 sm:$0xff]   ;;  %v10753_v12 = vld [vmem:[#allocation2 + $0xdf4] ss:$8 sps:$4 sm:$0xff]  }
 0x390   :  { %7922 = vmatprep.mubr.bf16.mxu0 %v1515_v56  ;;  %v10756_v56 = vld [vmem:[#allocation2 + $0x1df4] ss:$8 sps:$4 sm:$0xff]  }
 0x391   :  { %7237 = vmatpush1.bf16.msra.mxu1 %v10667_v2  ;;  %v11480_v2 = vrot.slane %v1272_v40, %v11191_v49  ;;  %v10823_v40 = vld [vmem:[#allocation2 + $0xeb0] ss:$8 sps:$4 sm:$0xff]  }
 0x392   :  { %7893 = vmatpush1.bf16.msra.mxu0 %v10670_v3  ;;  %7238 = vmatprep.subr.bf16.mxu1 %v10675_v13  ;;  %v11483_v3 = vrot.slane %v1468_v41, %v11191_v49  ;;  %v10754_v13 = vld [vmem:[#allocation2 + $0x1df0] ss:$8 sps:$4 sm:$0xff]  }
 0x393   :  { %7894 = vmatprep.subr.bf16.mxu0 %v10678_v27  ;;  %v10762_v27 = vld [vmem:[#allocation2 + $0x1e04] ss:$8 sps:$4 sm:$0xff]   ;;  %v10826_v41 = vld [vmem:[#allocation2 + $0x1eb0] ss:$8 sps:$4 sm:$0xff]  }
 0x395   :  { %7239 = vmatpush1.bf16.msra.mxu1 %v10673_v10  ;;  %v1288_v10 = vcombine.high %v11480_v2, %v11480_v2 }
 0x396   :  { %7895 = vmatpush1.bf16.msra.mxu0 %v10676_v28  ;;  %7240 = vmatprep.subr.bf16.mxu1 %v10681_v11  ;;  %v1484_v28 = vcombine.high %v11483_v3, %v11483_v3  ;;  %v1317_v11 = vcombine.high %v11463_v20, %v11463_v20  ;;  %v10763_v20 = vld [vmem:[#allocation2 + $0xe10] ss:$8 sps:$4 sm:$0xff]  }
 0x397   :  { %7896 = vmatprep.subr.bf16.mxu0 %v10684_v29  ;;  %v1513_v29 = vcombine.high %v11467_v21, %v11467_v21  ;;  %v10766_v21 = vld [vmem:[#allocation2 + $0x1e10] ss:$8 sps:$4 sm:$0xff]  }
 0x399   :  { %7241 = vmatpush1.bf16.msra.mxu1 %v10679_v30  ;;  %v10757_v30 = vld [vmem:[#allocation2 + $0xe00] ss:$8 sps:$4 sm:$0xff]  }
 0x39a   :  { %7897 = vmatpush1.bf16.msra.mxu0 %v10682_v31  ;;  %7242 = vmatprep.subr.bf16.mxu1 %v10687_v14  ;;  %v10760_v31 = vld [vmem:[#allocation2 + $0x1e00] ss:$8 sps:$4 sm:$0xff]   ;;  %v10765_v14 = vld [vmem:[#allocation2 + $0xe14] ss:$8 sps:$4 sm:$0xff]  }
 0x39b   :  { %7898 = vmatprep.subr.bf16.mxu0 %v10690_v15  ;;  %v10768_v15 = vld [vmem:[#allocation2 + $0x1e14] ss:$8 sps:$4 sm:$0xff]  }
 0x39d   :  { %7243 = vmatpush1.bf16.msra.mxu1 %v10685_v34  ;;  %v11494_v34 = vrot.slane %v1288_v10, %v11191_v49  ;;  %v10843_v10 = vld [vmem:[#allocation2 + $0xee4] ss:$8 sps:$4 sm:$0xff]  }
 0x39e   :  { %7899 = vmatpush1.bf16.msra.mxu0 %v10688_v35  ;;  %7244 = vmatprep.subr.bf16.mxu1 %v10693_v43  ;;  %v11497_v35 = vrot.slane %v1484_v28, %v11191_v49  ;;  %v10771_v43 = vld [vmem:[#allocation2 + $0xe24] ss:$8 sps:$4 sm:$0xff]  }
 0x39f   :  { %7900 = vmatprep.subr.bf16.mxu0 %v10696_v44  ;;  %v10774_v44 = vld [vmem:[#allocation2 + $0x1e24] ss:$8 sps:$4 sm:$0xff]  }
 0x3a0   :  { %v10846_v28 = vld [vmem:[#allocation2 + $0x1ee4] ss:$8 sps:$4 sm:$0xff]  }
 0x3a1   :  { %7245 = vmatpush1.bf16.msra.mxu1 %v10691_v45  ;;  %v10769_v45 = vld [vmem:[#allocation2 + $0xe20] ss:$8 sps:$4 sm:$0xff]  }
 0x3a2   :  { %7901 = vmatpush1.bf16.msra.mxu0 %v10694_v46  ;;  %7246 = vmatprep.subr.bf16.mxu1 %v10699_v24  ;;  %v10772_v46 = vld [vmem:[#allocation2 + $0x1e20] ss:$8 sps:$4 sm:$0xff]   ;;  %v10777_v24 = vld [vmem:[#allocation2 + $0xe34] ss:$8 sps:$4 sm:$0xff]  }
 0x3a3   :  { %7902 = vmatprep.subr.bf16.mxu0 %v10702_v25  ;;  %v10780_v25 = vld [vmem:[#allocation2 + $0x1e34] ss:$8 sps:$4 sm:$0xff]  }
 0x3a5   :  { %7247 = vmatpush1.bf16.msra.mxu1 %v10697_v38  ;;  %v10775_v38 = vld [vmem:[#allocation2 + $0xe30] ss:$8 sps:$4 sm:$0xff]  }
 0x3a6   :  { %7903 = vmatpush1.bf16.msra.mxu0 %v10700_v47  ;;  %7248 = vmatprep.subr.bf16.mxu1 %v10705_v39  ;;  %v10778_v47 = vld [vmem:[#allocation2 + $0x1e30] ss:$8 sps:$4 sm:$0xff]   ;;  %v10783_v39 = vld [vmem:[#allocation2 + $0xe44] ss:$8 sps:$4 sm:$0xff]  }
 0x3a7   :  { %7904 = vmatprep.subr.bf16.mxu0 %v10708_v48  ;;  %v10786_v48 = vld [vmem:[#allocation2 + $0x1e44] ss:$8 sps:$4 sm:$0xff]  }
 0x3a9   :  { %7249 = vmatpush1.bf16.msra.mxu1 %v10703_v32  ;;  %v10781_v32 = vld [vmem:[#allocation2 + $0xe40] ss:$8 sps:$4 sm:$0xff]  }
 0x3aa   :  { %7905 = vmatpush1.bf16.msra.mxu0 %v10706_v36  ;;  %7250 = vmatprep.subr.bf16.mxu1 %v10711_v33  ;;  %v10784_v36 = vld [vmem:[#allocation2 + $0x1e40] ss:$8 sps:$4 sm:$0xff]   ;;  %v10789_v33 = vld [vmem:[#allocation2 + $0xe54] ss:$8 sps:$4 sm:$0xff]  }
 0x3ab   :  { %7906 = vmatprep.subr.bf16.mxu0 %v10714_v50  ;;  %v10792_v50 = vld [vmem:[#allocation2 + $0x1e54] ss:$8 sps:$4 sm:$0xff]  }
 0x3ad   :  { %7251 = vmatpush1.bf16.msra.mxu1 %v10709_v37  ;;  %v10787_v37 = vld [vmem:[#allocation2 + $0xe50] ss:$8 sps:$4 sm:$0xff]  }
 0x3ae   :  { %7907 = vmatpush1.bf16.msra.mxu0 %v10712_v51  ;;  %7252 = vmatprep.subr.bf16.mxu1 %v10717_v53  ;;  %v10790_v51 = vld [vmem:[#allocation2 + $0x1e50] ss:$8 sps:$4 sm:$0xff]   ;;  %v10795_v53 = vld [vmem:[#allocation2 + $0xe64] ss:$8 sps:$4 sm:$0xff]  }
 0x3af   :  { %7908 = vmatprep.subr.bf16.mxu0 %v10720_v54  ;;  %v10798_v54 = vld [vmem:[#allocation2 + $0x1e64] ss:$8 sps:$4 sm:$0xff]  }
 0x3b1   :  { %7253 = vmatpush1.bf16.msra.mxu1 %v10715_v62  ;;  %v10793_v62 = vld [vmem:[#allocation2 + $0xe60] ss:$8 sps:$4 sm:$0xff]  }
 0x3b2   :  { %7909 = vmatpush1.bf16.msra.mxu0 %v10718_v63  ;;  %7254 = vmatprep.subr.bf16.mxu1 %v10723_v0  ;;  %v10796_v63 = vld [vmem:[#allocation2 + $0x1e60] ss:$8 sps:$4 sm:$0xff]   ;;  %v10801_v0 = vld [vmem:[#allocation2 + $0xe74] ss:$8 sps:$4 sm:$0xff]  }
 0x3b3   :  { %7910 = vmatprep.subr.bf16.mxu0 %v10726_v1  ;;  %v10804_v1 = vld [vmem:[#allocation2 + $0x1e74] ss:$8 sps:$4 sm:$0xff]  }
 0x3b5   :  { %7255 = vmatpush1.bf16.msra.mxu1 %v10721_v22  ;;  %v10799_v22 = vld [vmem:[#allocation2 + $0xe70] ss:$8 sps:$4 sm:$0xff]  }
 0x3b6   :  { %7911 = vmatpush1.bf16.msra.mxu0 %v10724_v23  ;;  %7256 = vmatprep.subr.bf16.mxu1 %v10729_v55  ;;  %v10802_v23 = vld [vmem:[#allocation2 + $0x1e70] ss:$8 sps:$4 sm:$0xff]   ;;  %v10807_v55 = vld [vmem:[#allocation2 + $0xe84] ss:$8 sps:$4 sm:$0xff]  }
 0x3b7   :  { %7912 = vmatprep.subr.bf16.mxu0 %v10732_v4  ;;  %v10810_v4 = vld [vmem:[#allocation2 + $0x1e84] ss:$8 sps:$4 sm:$0xff]  }
 0x3b9   :  { %7257 = vmatpush1.bf16.msra.mxu1 %v10727_v58  ;;  %v10805_v58 = vld [vmem:[#allocation2 + $0xe80] ss:$8 sps:$4 sm:$0xff]  }
 0x3ba   :  { %7913 = vmatpush1.bf16.msra.mxu0 %v10730_v57  ;;  %7258 = vmatprep.subr.bf16.mxu1 %v10735_v59  ;;  %v10808_v57 = vld [vmem:[#allocation2 + $0x1e80] ss:$8 sps:$4 sm:$0xff]   ;;  %v10813_v59 = vld [vmem:[#allocation2 + $0xe94] ss:$8 sps:$4 sm:$0xff]  }
 0x3bb   :  { %7914 = vmatprep.subr.bf16.mxu0 %v10738_v5  ;;  %v10816_v5 = vld [vmem:[#allocation2 + $0x1e94] ss:$8 sps:$4 sm:$0xff]  }
 0x3bd   :  { %7259 = vmatpush1.bf16.msra.mxu1 %v10733_v6  ;;  %v10811_v6 = vld [vmem:[#allocation2 + $0xe90] ss:$8 sps:$4 sm:$0xff]  }
 0x3be   :  { %7915 = vmatpush1.bf16.msra.mxu0 %v10736_v7  ;;  %7260 = vmatprep.subr.bf16.mxu1 %v10741_v8  ;;  %v10814_v7 = vld [vmem:[#allocation2 + $0x1e90] ss:$8 sps:$4 sm:$0xff]   ;;  %v10819_v8 = vld [vmem:[#allocation2 + $0xea4] ss:$8 sps:$4 sm:$0xff]  }
 0x3bf   :  { %7916 = vmatprep.subr.bf16.mxu0 %v10744_v9  ;;  %v10822_v9 = vld [vmem:[#allocation2 + $0x1ea4] ss:$8 sps:$4 sm:$0xff]  }
 0x3c1   :  { %7261 = vmatpush1.bf16.msra.mxu1 %v10739_v60  ;;  %v10817_v60 = vld [vmem:[#allocation2 + $0xea0] ss:$8 sps:$4 sm:$0xff]  }
 0x3c2   :  { %7917 = vmatpush1.bf16.msra.mxu0 %v10742_v61  ;;  %7262 = vmatprep.subr.bf16.mxu1 %v10747_v18  ;;  %v10820_v61 = vld [vmem:[#allocation2 + $0x1ea0] ss:$8 sps:$4 sm:$0xff]   ;;  %v10825_v18 = vld [vmem:[#allocation2 + $0xeb4] ss:$8 sps:$4 sm:$0xff]  }
 0x3c3   :  { %7918 = vmatprep.subr.bf16.mxu0 %v10750_v19  ;;  %v10828_v19 = vld [vmem:[#allocation2 + $0x1eb4] ss:$8 sps:$4 sm:$0xff]  }
 0x3c5   :  { %7263 = vmatpush1.bf16.msra.mxu1 %v10745_v52  ;;  %v10831_v52 = vld [vmem:[#allocation2 + $0xec4] ss:$8 sps:$4 sm:$0xff]  }
 0x3c6   :  { %7919 = vmatpush1.bf16.msra.mxu0 %v10748_v26  ;;  %7264 = vmatprep.subr.bf16.mxu1 %v10753_v12  ;;  %v10834_v26 = vld [vmem:[#allocation2 + $0x1ec4] ss:$8 sps:$4 sm:$0xff]   ;;  %v10829_v12 = vld [vmem:[#allocation2 + $0xec0] ss:$8 sps:$4 sm:$0xff]  }
 0x3c7   :  { %7920 = vmatprep.subr.bf16.mxu0 %v10756_v56  ;;  %v10832_v56 = vld [vmem:[#allocation2 + $0x1ec0] ss:$8 sps:$4 sm:$0xff]  }
 0x3c9   :  { %7265 = vmatpush1.bf16.msra.mxu1 %v10751_v16  ;;  %v10837_v16 = vld [vmem:[#allocation2 + $0xed4] ss:$8 sps:$4 sm:$0xff]  }
 0x3ca   :  { %7921 = vmatpush1.bf16.msra.mxu0 %v10754_v13  ;;  %7275 = vmatprep.subr.bf16.mxu1 %v10759_v17  ;;  %v10840_v13 = vld [vmem:[#allocation2 + $0x1ed4] ss:$8 sps:$4 sm:$0xff]   ;;  %v10835_v17 = vld [vmem:[#allocation2 + $0xed0] ss:$8 sps:$4 sm:$0xff]  }
 0x3cb   :  { %7931 = vmatprep.subr.bf16.mxu0 %v10762_v27  ;;  %v10838_v27 = vld [vmem:[#allocation2 + $0x1ed0] ss:$8 sps:$4 sm:$0xff]  }
 0x3cc   :  { %7267 = vmatmul.mubr.bf16.vlgmr.msra.gmra.mrb[0].mxu1 %v1317_v11  ;;  %v10841_v11 = vld [vmem:[#allocation2 + $0xee0] ss:$8 sps:$4 sm:$0xff]  }
 0x3cd   :  { %7923 = vmatmul.mubr.bf16.vlgmr.msra.gmra.mrb[0].mxu0 %v1513_v29  ;;  %7276 = vmatpush1.bf16.msra.mxu1 %v10757_v30  ;;  %v10844_v29 = vld [vmem:[#allocation2 + $0x1ee0] ss:$8 sps:$4 sm:$0xff]   ;;  %v10849_v30 = vld [vmem:[#allocation2 + $0xef4] ss:$8 sps:$4 sm:$0xff]  }
 0x3ce   :  { %7932 = vmatpush1.bf16.msra.mxu0 %v10760_v31  ;;  %7277 = vmatprep.subr.bf16.mxu1 %v10765_v14  ;;  %v10852_v31 = vld [vmem:[#allocation2 + $0x1ef4] ss:$8 sps:$4 sm:$0xff]   ;;  %v10847_v14 = vld [vmem:[#allocation2 + $0xef0] ss:$8 sps:$4 sm:$0xff]  }
 0x3cf   :  { %7933 = vmatprep.subr.bf16.mxu0 %v10768_v15  ;;  %7307 = vmatprep.mubr.bf16.mxu1 %v11494_v34  ;;  %v10850_v15 = vld [vmem:[#allocation2 + $0x1ef0] ss:$8 sps:$4 sm:$0xff]  }
 0x3d0   :  { %7963 = vmatprep.mubr.bf16.mxu0 %v11497_v35 }
 0x3d1   :  { %7278 = vmatpush1.bf16.msra.mxu1 %v10763_v20  ;;  %v10856_v20 = vld [vmem:[#allocation2 + $0xf04] ss:$8 sps:$4 sm:$0xff]  }
 0x3d2   :  { %7934 = vmatpush1.bf16.msra.mxu0 %v10766_v21  ;;  %7279 = vmatprep.subr.bf16.mxu1 %v10771_v43  ;;  %v10860_v21 = vld [vmem:[#allocation2 + $0x1f04] ss:$8 sps:$4 sm:$0xff]   ;;  %v11503_v43 = vrot.slane %v11480_v2, %v11191_v49  ;;  %v10864_v2 = vld [vmem:[#allocation2 + $0x1f10] ss:$8 sps:$4 sm:$0xff]  }
 0x3d3   :  { %7935 = vmatprep.subr.bf16.mxu0 %v10774_v44  ;;  %v11507_v44 = vrot.slane %v11483_v3, %v11191_v49  ;;  %v10861_v49 = vld [vmem:[#allocation2 + $0xf10] ss:$8 sps:$4 sm:$0xff]   ;;  %v10869_v3 = vld [vmem:[#allocation2 + $0xf24] ss:$8 sps:$4 sm:$0xff]  }
 0x3d5   :  { %7280 = vmatpush1.bf16.msra.mxu1 %v10769_v45  ;;  %v10854_v45 = vld [vmem:[#allocation2 + $0xf00] ss:$8 sps:$4 sm:$0xff]  }
 0x3d6   :  { %7936 = vmatpush1.bf16.msra.mxu0 %v10772_v46  ;;  %7281 = vmatprep.subr.bf16.mxu1 %v10777_v24  ;;  %v10858_v46 = vld [vmem:[#allocation2 + $0x1f00] ss:$8 sps:$4 sm:$0xff]   ;;  %v10863_v24 = vld [vmem:[#allocation2 + $0xf14] ss:$8 sps:$4 sm:$0xff]  }
 0x3d7   :  { %7937 = vmatprep.subr.bf16.mxu0 %v10780_v25  ;;  %v10866_v25 = vld [vmem:[#allocation2 + $0x1f14] ss:$8 sps:$4 sm:$0xff]  }
 0x3d9   :  { %7282 = vmatpush1.bf16.msra.mxu1 %v10775_v38  ;;  %v1320_v38 = vcombine.high %v11494_v34, %v11494_v34  ;;  %v10867_v34 = vld [vmem:[#allocation2 + $0xf20] ss:$8 sps:$4 sm:$0xff]  }
 0x3da   :  { %7938 = vmatpush1.bf16.msra.mxu0 %v10778_v47  ;;  %7283 = vmatprep.subr.bf16.mxu1 %v10783_v39  ;;  %v1516_v47 = vcombine.high %v11497_v35, %v11497_v35  ;;  %v10872_v39 = vld [vmem:[#allocation2 + $0x1f24] ss:$8 sps:$4 sm:$0xff]   ;;  %v10875_v35 = vld [vmem:[#allocation2 + $0xf34] ss:$8 sps:$4 sm:$0xff]  }
 0x3db   :  { %7939 = vmatprep.subr.bf16.mxu0 %v10786_v48  ;;  %v10870_v48 = vld [vmem:[#allocation2 + $0x1f20] ss:$8 sps:$4 sm:$0xff]  }
 0x3dd   :  { %7284 = vmatpush1.bf16.msra.mxu1 %v10781_v32  ;;  %v10878_v32 = vld [vmem:[#allocation2 + $0x1f34] ss:$8 sps:$4 sm:$0xff]  }
 0x3de   :  { %7940 = vmatpush1.bf16.msra.mxu0 %v10784_v36  ;;  %7285 = vmatprep.subr.bf16.mxu1 %v10789_v33  ;;  %v10873_v36 = vld [vmem:[#allocation2 + $0xf30] ss:$8 sps:$4 sm:$0xff]  }
 0x3df   :  { %7941 = vmatprep.subr.bf16.mxu0 %v10792_v50  ;;  %v10876_v33 = vld [vmem:[#allocation2 + $0x1f30] ss:$8 sps:$4 sm:$0xff]   ;;  %v10881_v50 = vld [vmem:[#allocation2 + $0xf44] ss:$8 sps:$4 sm:$0xff]  }
 0x3e1   :  { %7286 = vmatpush1.bf16.msra.mxu1 %v10787_v37  ;;  %v10884_v37 = vld [vmem:[#allocation2 + $0x1f44] ss:$8 sps:$4 sm:$0xff]  }
 0x3e2   :  { %7942 = vmatpush1.bf16.msra.mxu0 %v10790_v51  ;;  %7287 = vmatprep.subr.bf16.mxu1 %v10795_v53  ;;  %v10879_v51 = vld [vmem:[#allocation2 + $0xf40] ss:$8 sps:$4 sm:$0xff]  }
 0x3e3   :  { %7943 = vmatprep.subr.bf16.mxu0 %v10798_v54  ;;  %v10882_v53 = vld [vmem:[#allocation2 + $0x1f40] ss:$8 sps:$4 sm:$0xff]   ;;  %v10887_v54 = vld [vmem:[#allocation2 + $0xf54] ss:$8 sps:$4 sm:$0xff]  }
 0x3e5   :  { %7288 = vmatpush1.bf16.msra.mxu1 %v10793_v62  ;;  %v10890_v62 = vld [vmem:[#allocation2 + $0x1f54] ss:$8 sps:$4 sm:$0xff]  }
 0x3e6   :  { %7944 = vmatpush1.bf16.msra.mxu0 %v10796_v63  ;;  %7289 = vmatprep.subr.bf16.mxu1 %v10801_v0  ;;  %v10885_v63 = vld [vmem:[#allocation2 + $0xf50] ss:$8 sps:$4 sm:$0xff]  }
 0x3e7   :  { %7945 = vmatprep.subr.bf16.mxu0 %v10804_v1  ;;  %v10888_v0 = vld [vmem:[#allocation2 + $0x1f50] ss:$8 sps:$4 sm:$0xff]   ;;  %v10893_v1 = vld [vmem:[#allocation2 + $0xf64] ss:$8 sps:$4 sm:$0xff]  }
 0x3e9   :  { %7290 = vmatpush1.bf16.msra.mxu1 %v10799_v22  ;;  %v10896_v22 = vld [vmem:[#allocation2 + $0x1f64] ss:$8 sps:$4 sm:$0xff]  }
 0x3ea   :  { %7946 = vmatpush1.bf16.msra.mxu0 %v10802_v23  ;;  %7291 = vmatprep.subr.bf16.mxu1 %v10807_v55  ;;  %v10891_v23 = vld [vmem:[#allocation2 + $0xf60] ss:$8 sps:$4 sm:$0xff]  }
 0x3eb   :  { %7947 = vmatprep.subr.bf16.mxu0 %v10810_v4  ;;  %v10894_v55 = vld [vmem:[#allocation2 + $0x1f60] ss:$8 sps:$4 sm:$0xff]   ;;  %v10899_v4 = vld [vmem:[#allocation2 + $0xf74] ss:$8 sps:$4 sm:$0xff]  }
 0x3ed   :  { %7292 = vmatpush1.bf16.msra.mxu1 %v10805_v58  ;;  %v10902_v58 = vld [vmem:[#allocation2 + $0x1f74] ss:$8 sps:$4 sm:$0xff]  }
 0x3ee   :  { %7948 = vmatpush1.bf16.msra.mxu0 %v10808_v57  ;;  %7293 = vmatprep.subr.bf16.mxu1 %v10813_v59  ;;  %v10897_v57 = vld [vmem:[#allocation2 + $0xf70] ss:$8 sps:$4 sm:$0xff]  }
 0x3ef   :  { %7949 = vmatprep.subr.bf16.mxu0 %v10816_v5  ;;  %v10900_v59 = vld [vmem:[#allocation2 + $0x1f70] ss:$8 sps:$4 sm:$0xff]   ;;  %v10905_v5 = vld [vmem:[#allocation2 + $0xf84] ss:$8 sps:$4 sm:$0xff]  }
 0x3f1   :  { %7294 = vmatpush1.bf16.msra.mxu1 %v10811_v6  ;;  %v10908_v6 = vld [vmem:[#allocation2 + $0x1f84] ss:$8 sps:$4 sm:$0xff]  }
 0x3f2   :  { %7950 = vmatpush1.bf16.msra.mxu0 %v10814_v7  ;;  %7295 = vmatprep.subr.bf16.mxu1 %v10819_v8  ;;  %v10903_v7 = vld [vmem:[#allocation2 + $0xf80] ss:$8 sps:$4 sm:$0xff]  }
 0x3f3   :  { %7951 = vmatprep.subr.bf16.mxu0 %v10822_v9  ;;  %v10906_v8 = vld [vmem:[#allocation2 + $0x1f80] ss:$8 sps:$4 sm:$0xff]   ;;  %v10911_v9 = vld [vmem:[#allocation2 + $0xf94] ss:$8 sps:$4 sm:$0xff]  }
 0x3f5   :  { %7296 = vmatpush1.bf16.msra.mxu1 %v10817_v60  ;;  %v10914_v60 = vld [vmem:[#allocation2 + $0x1f94] ss:$8 sps:$4 sm:$0xff]  }
 0x3f6   :  { %7952 = vmatpush1.bf16.msra.mxu0 %v10820_v61  ;;  %7297 = vmatprep.subr.bf16.mxu1 %v10825_v18  ;;  %v10909_v61 = vld [vmem:[#allocation2 + $0xf90] ss:$8 sps:$4 sm:$0xff]  }
 0x3f7   :  { %7953 = vmatprep.subr.bf16.mxu0 %v10828_v19  ;;  %v10912_v18 = vld [vmem:[#allocation2 + $0x1f90] ss:$8 sps:$4 sm:$0xff]   ;;  %v10917_v19 = vld [vmem:[#allocation2 + $0xfa4] ss:$8 sps:$4 sm:$0xff]  }
 0x3f9   :  { %7298 = vmatpush1.bf16.msra.mxu1 %v10823_v40  ;;  %v10920_v40 = vld [vmem:[#allocation2 + $0x1fa4] ss:$8 sps:$4 sm:$0xff]  }
 0x3fa   :  { %7954 = vmatpush1.bf16.msra.mxu0 %v10826_v41  ;;  %7299 = vmatprep.subr.bf16.mxu1 %v10831_v52  ;;  %v10915_v41 = vld [vmem:[#allocation2 + $0xfa0] ss:$8 sps:$4 sm:$0xff]  }
 0x3fb   :  { %7955 = vmatprep.subr.bf16.mxu0 %v10834_v26  ;;  %v10918_v52 = vld [vmem:[#allocation2 + $0x1fa0] ss:$8 sps:$4 sm:$0xff]   ;;  %v10923_v26 = vld [vmem:[#allocation2 + $0xfb4] ss:$8 sps:$4 sm:$0xff]  }
 0x3fd   :  { %7300 = vmatpush1.bf16.msra.mxu1 %v10829_v12  ;;  %v10926_v12 = vld [vmem:[#allocation2 + $0x1fb4] ss:$8 sps:$4 sm:$0xff]  }
 0x3fe   :  { %7956 = vmatpush1.bf16.msra.mxu0 %v10832_v56  ;;  %7301 = vmatprep.subr.bf16.mxu1 %v10837_v16  ;;  %v10921_v56 = vld [vmem:[#allocation2 + $0xfb0] ss:$8 sps:$4 sm:$0xff]  }
 0x3ff   :  { %7957 = vmatprep.subr.bf16.mxu0 %v10840_v13  ;;  %v10924_v16 = vld [vmem:[#allocation2 + $0x1fb0] ss:$8 sps:$4 sm:$0xff]   ;;  %v10929_v13 = vld [vmem:[#allocation2 + $0xfc4] ss:$8 sps:$4 sm:$0xff]  }
 0x401   :  { %7302 = vmatpush1.bf16.msra.mxu1 %v10835_v17  ;;  %v10932_v17 = vld [vmem:[#allocation2 + $0x1fc4] ss:$8 sps:$4 sm:$0xff]  }
 0x402   :  { %7958 = vmatpush1.bf16.msra.mxu0 %v10838_v27  ;;  %7303 = vmatprep.subr.bf16.mxu1 %v10843_v10  ;;  %v10927_v27 = vld [vmem:[#allocation2 + $0xfc0] ss:$8 sps:$4 sm:$0xff]  }
 0x403   :  { %7959 = vmatprep.subr.bf16.mxu0 %v10846_v28  ;;  %v10930_v10 = vld [vmem:[#allocation2 + $0x1fc0] ss:$8 sps:$4 sm:$0xff]   ;;  %v10935_v28 = vld [vmem:[#allocation2 + $0xfd4] ss:$8 sps:$4 sm:$0xff]  }
 0x405   :  { %7304 = vmatpush1.bf16.msra.mxu1 %v10841_v11  ;;  %v10938_v11 = vld [vmem:[#allocation2 + $0x1fd4] ss:$8 sps:$4 sm:$0xff]  }
 0x406   :  { %7960 = vmatpush1.bf16.msra.mxu0 %v10844_v29  ;;  %7305 = vmatprep.subr.bf16.mxu1 %v10849_v30  ;;  %v10933_v29 = vld [vmem:[#allocation2 + $0xfd0] ss:$8 sps:$4 sm:$0xff]  }
 0x407   :  { %7961 = vmatprep.subr.bf16.mxu0 %v10852_v31  ;;  %v10936_v30 = vld [vmem:[#allocation2 + $0x1fd0] ss:$8 sps:$4 sm:$0xff]   ;;  %v10941_v31 = vld [vmem:[#allocation2 + $0xfe4] ss:$8 sps:$4 sm:$0xff]  }
 0x409   :  { %7306 = vmatpush1.bf16.msra.mxu1 %v10847_v14  ;;  %v10944_v14 = vld [vmem:[#allocation2 + $0x1fe4] ss:$8 sps:$4 sm:$0xff]  }
 0x40a   :  { %7962 = vmatpush1.bf16.msra.mxu0 %v10850_v15  ;;  %7316 = vmatprep.subr.bf16.mxu1 %v10856_v20  ;;  %v10939_v15 = vld [vmem:[#allocation2 + $0xfe0] ss:$8 sps:$4 sm:$0xff]  }
 0x40b   :  { %7972 = vmatprep.subr.bf16.mxu0 %v10860_v21  ;;  %v10942_v20 = vld [vmem:[#allocation2 + $0x1fe0] ss:$8 sps:$4 sm:$0xff]   ;;  %v10947_v21 = vld [vmem:[#allocation2 + $0xff4] ss:$8 sps:$4 sm:$0xff]  }
 0x40c   :  { %7308 = vmatmul.mubr.bf16.vlgmr.msra.gmra.mrb[0].mxu1 %v11503_v43 }
 0x40d   :  { %7964 = vmatmul.mubr.bf16.vlgmr.msra.gmra.mrb[0].mxu0 %v11507_v44  ;;  %7317 = vmatpush1.bf16.msra.mxu1 %v10854_v45  ;;  %v10950_v45 = vld [vmem:[#allocation2 + $0x1ff4] ss:$8 sps:$4 sm:$0xff]  }
 0x40e   :  { %7973 = vmatpush1.bf16.msra.mxu0 %v10858_v46  ;;  %7318 = vmatprep.subr.bf16.mxu1 %v10863_v24  ;;  %v10945_v46 = vld [vmem:[#allocation2 + $0xff0] ss:$8 sps:$4 sm:$0xff]  }
 0x40f   :  { %7974 = vmatprep.subr.bf16.mxu0 %v10866_v25  ;;  %7348 = vmatprep.mubr.bf16.mxu1 %v1320_v38  ;;  %v10948_v24 = vld [vmem:[#allocation2 + $0x1ff0] ss:$8 sps:$4 sm:$0xff]   ;;  %v10951_v25 = vld [vmem:[#allocation7 + $0x40] sm:$0xff]   ;;  %v1318_v38 = vcombine.high %v11503_v43, %v11503_v43 }
 0x410   :  { %8004 = vmatprep.mubr.bf16.mxu0 %v1516_v47  ;;  %v1514_v47 = vcombine.high %v11507_v44, %v11507_v44  ;;  %v10958_v43 = vld [vmem:[#allocation7 + $0x18] sm:$0xff]   ;;  %v10959_v44 = vld [vmem:[#allocation7 + $0x60] sm:$0xff]  }
 0x411   :  { %7319 = vmatpush1.bf16.msra.mxu1 %v10861_v49  ;;  %v10952_v49 = vld [vmem:[#allocation7] sm:$0xff]  }
 0x412   :  { %7975 = vmatpush1.bf16.msra.mxu0 %v10864_v2  ;;  %7320 = vmatprep.subr.bf16.mxu1 %v10869_v3  ;;  %v10953_v2 = vld [vmem:[#allocation7 + $0x48] sm:$0xff]  }
 0x413   :  { %7976 = vmatprep.subr.bf16.mxu0 %v10872_v39  ;;  %v10954_v3 = vld [vmem:[#allocation7 + $0x8] sm:$0xff]   ;;  %v10955_v39 = vld [vmem:[#allocation7 + $0x50] sm:$0xff]  }
 0x415   :  { %7321 = vmatpush1.bf16.msra.mxu1 %v10867_v34  ;;  %v10956_v34 = vld [vmem:[#allocation7 + $0x10] sm:$0xff]  }
 0x416   :  { %7977 = vmatpush1.bf16.msra.mxu0 %v10870_v48  ;;  %7322 = vmatprep.subr.bf16.mxu1 %v10875_v35  ;;  %v10957_v48 = vld [vmem:[#allocation7 + $0x58] sm:$0xff]   ;;  %v10960_v35 = vld [vmem:[#allocation7 + $0x20] sm:$0xff]  }
 0x417   :  { %7978 = vmatprep.subr.bf16.mxu0 %v10878_v32  ;;  %v10961_v32 = vld [vmem:[#allocation7 + $0x68] sm:$0xff]  }
 0x419   :  { %7323 = vmatpush1.bf16.msra.mxu1 %v10873_v36  ;;  %v10962_v36 = vld [vmem:[#allocation7 + $0x28] sm:$0xff]  }
 0x41a   :  { %7979 = vmatpush1.bf16.msra.mxu0 %v10876_v33  ;;  %7324 = vmatprep.subr.bf16.mxu1 %v10881_v50  ;;  %v10963_v33 = vld [vmem:[#allocation7 + $0x70] sm:$0xff]  }
 0x41b   :  { %7980 = vmatprep.subr.bf16.mxu0 %v10884_v37  ;;  %v10964_v50 = vld [vmem:[#allocation7 + $0x30] sm:$0xff]   ;;  %v10965_v37 = vld [vmem:[#allocation7 + $0x78] sm:$0xff]  }
 0x41d   :  { %7325 = vmatpush1.bf16.msra.mxu1 %v10879_v51  ;;  %v10966_v51 = vld [vmem:[#allocation7 + $0x38] sm:$0xff]  }
 0x41e   :  { %7981 = vmatpush1.bf16.msra.mxu0 %v10882_v53  ;;  %7326 = vmatprep.subr.bf16.mxu1 %v10887_v54  ;;  %v1109_v53 = vsub.s32 0, %v11188_v42  ;;  %v1105_v54 = vld [vmem:[#allocation5] sm:$0x3] }
 0x41f   :  { %7982 = vmatprep.subr.bf16.mxu0 %v10890_v62  ;;  %v1113_v62 = vsub.s32 1, %v11188_v42 }
 0x421   :  { %7327 = vmatpush1.bf16.msra.mxu1 %v10885_v63  ;;  %v1110_v63 = vrot.slane %v1105_v54, %v1109_v53 }
 0x422   :  { %7983 = vmatpush1.bf16.msra.mxu0 %v10888_v0  ;;  %7328 = vmatprep.subr.bf16.mxu1 %v10893_v1  ;;  %v1114_v0 = vrot.slane %v1105_v54, %v1113_v62 }
 0x423   :  { %7984 = vmatprep.subr.bf16.mxu0 %v10896_v22 }
 0x425   :  { %7329 = vmatpush1.bf16.msra.mxu1 %v10891_v23 }
 0x426   :  { %7985 = vmatpush1.bf16.msra.mxu0 %v10894_v55  ;;  %7330 = vmatprep.subr.bf16.mxu1 %v10899_v4 }
 0x427   :  { %7986 = vmatprep.subr.bf16.mxu0 %v10902_v58 }
 0x429   :  { %7331 = vmatpush1.bf16.msra.mxu1 %v10897_v57 }
 0x42a   :  { %7987 = vmatpush1.bf16.msra.mxu0 %v10900_v59  ;;  %7332 = vmatprep.subr.bf16.mxu1 %v10905_v5 }
 0x42b   :  { %7988 = vmatprep.subr.bf16.mxu0 %v10908_v6 }
 0x42d   :  { %7333 = vmatpush1.bf16.msra.mxu1 %v10903_v7 }
 0x42e   :  { %7989 = vmatpush1.bf16.msra.mxu0 %v10906_v8  ;;  %7334 = vmatprep.subr.bf16.mxu1 %v10911_v9 }
 0x42f   :  { %7990 = vmatprep.subr.bf16.mxu0 %v10914_v60 }
 0x431   :  { %7335 = vmatpush1.bf16.msra.mxu1 %v10909_v61 }
 0x432   :  { %7991 = vmatpush1.bf16.msra.mxu0 %v10912_v18  ;;  %7336 = vmatprep.subr.bf16.mxu1 %v10917_v19  ;;  %v9234_v19 = vld [vmem:[#allocation8] ss:$0 sm:$0xff] }
 0x433   :  { %7992 = vmatprep.subr.bf16.mxu0 %v10920_v40 }
 0x435   :  { %7337 = vmatpush1.bf16.msra.mxu1 %v10915_v41 }
 0x436   :  { %7993 = vmatpush1.bf16.msra.mxu0 %v10918_v52  ;;  %7338 = vmatprep.subr.bf16.mxu1 %v10923_v26 }
 0x437   :  { %7994 = vmatprep.subr.bf16.mxu0 %v10926_v12 }
 0x439   :  { %7339 = vmatpush1.bf16.msra.mxu1 %v10921_v56 }
 0x43a   :  { %7995 = vmatpush1.bf16.msra.mxu0 %v10924_v16  ;;  %7340 = vmatprep.subr.bf16.mxu1 %v10929_v13 }
 0x43b   :  { %7996 = vmatprep.subr.bf16.mxu0 %v10932_v17 }
 0x43d   :  { %7341 = vmatpush1.bf16.msra.mxu1 %v10927_v27 }
 0x43e   :  { %7997 = vmatpush1.bf16.msra.mxu0 %v10930_v10  ;;  %7342 = vmatprep.subr.bf16.mxu1 %v10935_v28 }
 0x43f   :  { %7998 = vmatprep.subr.bf16.mxu0 %v10938_v11 }
 0x441   :  { %7343 = vmatpush1.bf16.msra.mxu1 %v10933_v29 }
 0x442   :  { %7999 = vmatpush1.bf16.msra.mxu0 %v10936_v30  ;;  %7344 = vmatprep.subr.bf16.mxu1 %v10941_v31 }
 0x443   :  { %8000 = vmatprep.subr.bf16.mxu0 %v10944_v14 }
 0x445   :  { %7345 = vmatpush1.bf16.msra.mxu1 %v10939_v15 }
 0x446   :  { %8001 = vmatpush1.bf16.msra.mxu0 %v10942_v20  ;;  %7346 = vmatprep.subr.bf16.mxu1 %v10947_v21 }
 0x447   :  { %8002 = vmatprep.subr.bf16.mxu0 %v10950_v45 }
 0x449   :  { %7347 = vmatpush1.bf16.msra.mxu1 %v10945_v46 }
 0x44a   :  { %8003 = vmatpush1.bf16.msra.mxu0 %v10948_v24  ;;  %9251 = vmatprep.subr.bf16.mxu1 %v10951_v25 }
 0x44c   :  { %7349 = vmatmul.mubr.bf16.vlgmr.msra.gmra.mrb[0].mxu1 %v1318_v38 }
 0x44d   :  { %8005 = vmatmul.mubr.bf16.vlgmr.msra.gmra.mrb[0].mxu0 %v1514_v47  ;;  %9252 = vmatpush3.bf16.msra.mxu1 %v10952_v49 }
 0x44e   :  { %9253 = vmatprep.subr.bf16.mxu1 %v10953_v2 }
 0x451   :  { %9254 = vmatpush3.bf16.msra.mxu1 %v10954_v3 }
 0x452   :  { %9255 = vmatprep.subr.bf16.mxu1 %v10955_v39 }
 0x455   :  { %9256 = vmatpush3.bf16.msra.mxu1 %v10956_v34 }
 0x456   :  { %9257 = vmatprep.subr.bf16.mxu1 %v10957_v48 }
 0x459   :  { %9258 = vmatpush3.bf16.msra.mxu1 %v10958_v43 }
 0x45a   :  { %9259 = vmatprep.subr.bf16.mxu1 %v10959_v44 }
 0x45d   :  { %9260 = vmatpush3.bf16.msra.mxu1 %v10960_v35 }
 0x45e   :  { %9261 = vmatprep.subr.bf16.mxu1 %v10961_v32 }
 0x461   :  { %9262 = vmatpush3.bf16.msra.mxu1 %v10962_v36 }
 0x462   :  { %9263 = vmatprep.subr.bf16.mxu1 %v10963_v33 }
 0x465   :  { %9264 = vmatpush3.bf16.msra.mxu1 %v10964_v50 }
 0x466   :  { %9265 = vmatprep.subr.bf16.mxu1 %v10965_v37 }
 0x469   :  { %9266 = vmatpush3.bf16.msra.mxu1 %v10966_v51 }
 0x51f   :  { %v7350_v1 = vpop.f32.mrb[0].mxu1 }
 0x520   :  { %v8006_v22 = vpop.f32.mrb[0].mxu0  ;;  %v9273_v23 = vadd.f32 %v7350_v1, %v1110_v63  ;;  %v7352_v55 = vpop.f32.mrb[1].mxu1 }
 0x521   :  { %v8008_v4 = vpop.f32.mrb[1].mxu0  ;;  %v9275_v58 = vadd.f32 %v7352_v55, %v1114_v0  ;;  %v7354_v57 = vpop.f32.mrb[2].mxu1 }
 0x522   :  { %v8010_v59 = vpop.f32.mrb[2].mxu0  ;;  %v9274_v5 = vadd.f32 %v9273_v23, %v8006_v22  ;;  %v7355_v6 = vpop.f32.mrb[3].mxu1 }
 0x523   :  { %v8011_v7 = vpop.f32.mrb[3].mxu0  ;;  %v9276_v8 = vadd.f32 %v9275_v58, %v8008_v4 }
 0x524   :  { %10967 = vtanh.f32 %v9274_v5 }
 0x525   :  { %10969 = vtanh.f32 %v9276_v8 }
 0x52e   :  { %v10968_v9 = vpop.eup %10967 }
 0x52f   :  { %v10970_v60 = vpop.eup %10969  ;;  %v8015_v42 = vpack.c.bf16 %v10968_v9, %v10968_v9 }
 0x530   :  { %v8016_v61 = vpack.c.bf16 %v10970_v60, %v10970_v60 }
 0x532   :  { %8184 = vmatprep.mubr.bf16.mxu1 %v8016_v61 }
 0x533   :  { %8185 = vmatmul.mubr.bf16.vlgmr.msra.gmra.mrb[4].mxu1 %v8015_v42 }
 0x606   :  { %v9267_v18 = vpop.f32.mrb[4].mxu1 }
 0x607   :  { %v9268_v40 = vpop.f32.mrb[5].mxu1 }
 0x608   :  { %v9269_v41 = vadd.f32 %v9268_v40, %v9267_v18  ;;  %v9270_v52 = vpop.f32.mrb[6].mxu1 }
 0x609   :  { %v9271_v26 = vpop.f32.mrb[7].mxu1 }
 0x60a   :  { %v8187_v12 = vadd.f32 %v9269_v41, %v9234_v19 }
 0x60c   :  { %8192 = vst [vmem:[#allocation10] sm:$0x3] %v8187_v12 }
 0x60d   :  { %11074 = shalt.err (!%p11071_p8)
}
 0x60e   :  { %s11075_s14 = scalar_lea.hbm %s11538_s5, 32 }
 0x60f   :  { %p11076_p9 = scmp.ne.s32.totalorder %s11538_s5, %s11075_s14  ;;  %p11079_p10 = scmp.lt.u32.totalorder %s11075_s14, %s11538_s5 }
 0x611   :  { %p11081_p11 = pnand %p11079_p10, %p11076_p9 }
 0x613   :  { %11084 = shalt.err (!%p11081_p11)
}
 0x614   :  { %8202 = dma.vmem_to_hbm [thread:$0]  %s8200_s10, 32, %s11538_s5, [#allocation4]  }
 0x615   :  { %11091 = dma.done.wait [#allocation4], 32  }
 0x616   :  { %11092 = vsyncadd [#allocation4], 4294967264 }
 0x617   :  { %8206 = vsyncpa [#allocation3], 1 }
 0x618   :  { %8207 = vsyncpa [#allocation6], 1 }
 0x619   :  { %8208 = vsyncpa [#allocation9], 1 }
 0x61a   :  { %8209 = vsyncpa [#allocation4], 1 }

</bundles_post_ra>
